<compile_context>
chip_gen: v6e
topology: v6e:2x2x1
jax: 0.10.0
libtpu: 0.0.40
codegen_flags: <defaults>
</compile_context>

<pallas_src>
import functools

import jax
import jax.numpy as jnp
import numpy as np
from jax.experimental import pallas as pl
from jax.experimental.pallas import tpu as pltpu

_EPS = 1e-5
_VMEM_SPEC = pl.BlockSpec(memory_space=pltpu.MemorySpace.VMEM)


# ----------------------------------------------------------------------------
# Kernel 1: fused conv trunk (foot conv + res blocks + policy/value conv heads)
# ----------------------------------------------------------------------------
def _trunk_kernel(*refs, n, h, w, c, num_blocks):
    """Runs the whole conv part of the network with activations in VMEM.

    refs layout:
      [0]                      x        (N, H, W, C)  input, channels pre-padded to C
      [1 + 3*i : 4 + 3*i]      (wtaps (9,C,C), scale (1,C), bias (1,C)) per 3x3 conv
                               order: foot, (rb conv1, rb conv2)*, policy conv
      value 1x1 conv:          vw (C,1), vscale (1,1), vbias (1,1)
      outputs:                 pol_out (M, C), val_out (M, 1)    M = N*H*W
      scratch:                 xpad (N,H+2,W+2,C), act (N,H,W,C), ybuf (N,H,W,C)
    """
    m = n * h * w
    nconv = 2 + 2 * num_blocks
    x_ref = refs[0]
    conv_refs = [refs[1 + 3 * i: 4 + 3 * i] for i in range(nconv)]
    vw_ref, vs_ref, vb_ref = refs[1 + 3 * nconv: 4 + 3 * nconv]
    pol_out, val_out = refs[4 + 3 * nconv: 6 + 3 * nconv]
    xpad, act, ybuf = refs[6 + 3 * nconv:]

    # Zero the padded buffer once; only its interior is ever rewritten, so the
    # zero border provides the conv padding for every layer.
    xpad[...] = jnp.zeros(xpad.shape, xpad.dtype)

    def conv3x3_bn(src_ref, wt_ref, sc_ref, bi_ref, residual=None, relu=True):
        # src -> padded buffer interior
        xpad[:, 1:h + 1, 1:w + 1, :] = src_ref[...]
        acc = jnp.zeros((m, c), jnp.float32)
        # 3x3 conv as 9 shifted matmuls accumulated in f32 (MXU)
        for t in range(9):
            dy, dx = divmod(t, 3)
            patch = xpad[:, dy:dy + h, dx:dx + w, :].reshape(m, c)
            acc = acc + jnp.dot(patch, wt_ref[t],
                                preferred_element_type=jnp.float32)
        out = acc * sc_ref[...] + bi_ref[...]          # folded BatchNorm affine
        if residual is not None:
            out = out + residual
        if relu:
            out = jnp.maximum(out, 0.0)
        return out                                      # (M, C)

    # foot conv
    act[...] = conv3x3_bn(x_ref, *conv_refs[0]).reshape(n, h, w, c)

    # post-activation res blocks
    li = 1
    for _ in range(num_blocks):
        ybuf[...] = conv3x3_bn(act, *conv_refs[li]).reshape(n, h, w, c)
        li += 1
        resid = act[...].reshape(m, c)
        act[...] = conv3x3_bn(ybuf, *conv_refs[li],
                              residual=resid).reshape(n, h, w, c)
        li += 1

    # policy conv head (relu(bn(conv3x3)))
    pol_out[...] = conv3x3_bn(act, *conv_refs[li])

    # value conv head: relu(bn(conv1x1))
    actm = act[...].reshape(m, c)
    v = jnp.dot(actm, vw_ref[...], preferred_element_type=jnp.float32)
    val_out[...] = jnp.maximum(v * vs_ref[...] + vb_ref[...], 0.0)


def _trunk(x_nhwc, prep):
    n, h, w, c = x_nhwc.shape
    m = n * h * w
    conv_w, conv_s, conv_b = prep["conv_w"], prep["conv_s"], prep["conv_b"]
    nconv = len(conv_w)
    num_blocks = (nconv - 2) // 2

    inputs = [x_nhwc]
    for i in range(nconv):
        inputs += [conv_w[i], conv_s[i], conv_b[i]]
    inputs += [prep["vconv_w"], prep["vconv_s"], prep["vconv_b"]]

    kernel = functools.partial(_trunk_kernel, n=n, h=h, w=w, c=c,
                               num_blocks=num_blocks)
    return pl.pallas_call(
        kernel,
        out_shape=(jax.ShapeDtypeStruct((m, c), jnp.float32),   # policy conv act
                   jax.ShapeDtypeStruct((m, 1), jnp.float32)),  # value conv act
        in_specs=[_VMEM_SPEC] * len(inputs),
        out_specs=(_VMEM_SPEC, _VMEM_SPEC),
        scratch_shapes=[
            pltpu.VMEM((n, h + 2, w + 2, c), jnp.float32),  # padded buffer
            pltpu.VMEM((n, h, w, c), jnp.float32),          # current activation
            pltpu.VMEM((n, h, w, c), jnp.float32),          # res-block temp
        ],
    )(*inputs)


# ----------------------------------------------------------------------------
# Kernel 2: fused FC heads (policy FC, value fc1+relu, value fc2+tanh)
# ----------------------------------------------------------------------------
def _heads_kernel(polf_ref, valf_ref, wp_ref, bp_ref, w1_ref, b1_ref,
                  w2_ref, b2_ref, pol_out, val_out):
    # policy logits (lane-padded output, sliced to action_size outside)
    pol_out[...] = (jnp.dot(polf_ref[...], wp_ref[...],
                            preferred_element_type=jnp.float32) + bp_ref[...])
    # value head
    v = jnp.dot(valf_ref[...], w1_ref[...],
                preferred_element_type=jnp.float32) + b1_ref[...]
    v = jnp.maximum(v, 0.0)
    v = jnp.dot(v, w2_ref[...], preferred_element_type=jnp.float32) + b2_ref[...]
    val_out[...] = jnp.tanh(v)


def _heads(pol_flat, val_flat, prep):
    n = pol_flat.shape[0]
    a_pad = prep["wp"].shape[1]
    return pl.pallas_call(
        _heads_kernel,
        out_shape=(jax.ShapeDtypeStruct((n, a_pad), jnp.float32),
                   jax.ShapeDtypeStruct((n, 1), jnp.float32)),
        in_specs=[_VMEM_SPEC] * 8,
        out_specs=(_VMEM_SPEC, _VMEM_SPEC),
    )(pol_flat, val_flat, prep["wp"], prep["bp"], prep["w1"], prep["b1"],
      prep["w2"], prep["b2"])


# ----------------------------------------------------------------------------
# One-time parameter preparation (outside jit): fold BN, pre-transpose weights
# ----------------------------------------------------------------------------
def prepare_params(raw, *, size, planes):
    def fold(bn):
        scale = bn["gamma"] / jnp.sqrt(bn["var"] + _EPS)
        bias = bn["beta"] - bn["mean"] * scale
        return scale.reshape(1, -1), bias.reshape(1, -1)

    def conv3x3_taps(w_oihw):
        cout, cin = w_oihw.shape[0], w_oihw.shape[1]
        if cin < planes:  # foot conv: pad in-channels with zeros to a uniform C
            w_oihw = jnp.pad(w_oihw, ((0, 0), (0, planes - cin), (0, 0), (0, 0)))
        return jnp.transpose(w_oihw, (2, 3, 1, 0)).reshape(9, planes, cout)

    conv_w, conv_s, conv_b = [], [], []

    def add(w, bn):
        s, b = fold(bn)
        conv_w.append(conv3x3_taps(w))
        conv_s.append(s)
        conv_b.append(b)

    add(raw["foot_conv"], raw["foot_bn"])
    for blk in raw["body"]:
        add(blk["conv1"], blk["bn1"])
        add(blk["conv2"], blk["bn2"])
    add(raw["policy_conv"], raw["policy_bn"])

    vs, vb = fold(raw["value_bn"])
    vw = raw["value_conv"].reshape(1, planes).T                     # (C, 1)

    # policy FC: permute columns from torch's (C,H,W) flatten to NHWC (H,W,C)
    # order and zero-pad the output dim to 128 lanes.
    wpol = raw["policy_fc"]["w"]                                    # (A, C*S*S)
    a = wpol.shape[0]
    a_pad = ((a + 127) // 128) * 128
    wpol = wpol.reshape(a, planes, size, size)
    wpol = jnp.transpose(wpol, (0, 2, 3, 1)).reshape(a, size * size * planes)
    wp = jnp.pad(wpol, ((0, a_pad - a), (0, 0))).T                  # (S*S*C, a_pad)
    bp = jnp.pad(raw["policy_fc"]["b"], (0, a_pad - a)).reshape(1, a_pad)

    return {
        "conv_w": conv_w, "conv_s": conv_s, "conv_b": conv_b,
        "vconv_w": vw, "vconv_s": vs, "vconv_b": vb,
        "wp": wp, "bp": bp,
        "w1": raw["value_fc1"]["w"].T, "b1": raw["value_fc1"]["b"].reshape(1, -1),
        "w2": raw["value_fc2"]["w"].T, "b2": raw["value_fc2"]["b"].reshape(1, 1),
    }


# ----------------------------------------------------------------------------
# Network forward (Pallas path)
# ----------------------------------------------------------------------------
def forward_pallas(prep, x_nchw, *, action_size):
    n, cin, h, w = x_nchw.shape
    c = prep["conv_w"][0].shape[1]                      # planes (static shape)

    # NCHW -> NHWC; pad input channels to `planes` (matching zero-padded foot weights)
    x = jnp.transpose(x_nchw, (0, 2, 3, 1))
    x = jnp.pad(x, ((0, 0), (0, 0), (0, 0), (0, c - cin)))

    pol_m, val_m = _trunk(x, prep)                      # (N*H*W, C), (N*H*W, 1)

    pol_flat = pol_m.reshape(n, h * w * c)              # free: NHWC flatten
    val_flat = val_m.reshape(n, h * w)

    pol_pad, value = _heads(pol_flat, val_flat, prep)
    policy = pol_pad[:, :action_size]
    return value, policy


# ----------------------------------------------------------------------------
# Plain-JAX reference (for correctness check only)
# ----------------------------------------------------------------------------
def _conv_ref(x_nchw, w_oihw, padding):
    return jax.lax.conv_general_dilated(
        x_nchw, w_oihw, window_strides=(1, 1),
        padding=((padding, padding), (padding, padding)),
        dimension_numbers=("NCHW", "OIHW", "NCHW"),
        precision=jax.lax.Precision.HIGHEST)


def _bn_ref(x_nchw, bn):
    sc = (bn["gamma"] / jnp.sqrt(bn["var"] + _EPS))[None, :, None, None]
    bi = (bn["beta"] - bn["mean"] * bn["gamma"] / jnp.sqrt(bn["var"] + _EPS))[None, :, None, None]
    return x_nchw * sc + bi


def forward_ref(params, x):
    n = x.shape[0]
    hp = jax.lax.Precision.HIGHEST
    relu = lambda t: jnp.maximum(t, 0.0)
    x = relu(_bn_ref(_conv_ref(x, params["foot_conv"], 1), params["foot_bn"]))
    for blk in params["body"]:
        idn = x
        o = relu(_bn_ref(_conv_ref(x, blk["conv1"], 1), blk["bn1"]))
        o = _bn_ref(_conv_ref(o, blk["conv2"], 1), blk["bn2"]) + idn
        x = relu(o)
    pol = relu(_bn_ref(_conv_ref(x, params["policy_conv"], 1), params["policy_bn"]))
    pol = pol.reshape(n, -1)
    policy = jnp.dot(pol, params["policy_fc"]["w"].T, precision=hp) + params["policy_fc"]["b"]
    v = relu(_bn_ref(_conv_ref(x, params["value_conv"], 0), params["value_bn"]))
    v = v.reshape(n, -1)
    v = relu(jnp.dot(v, params["value_fc1"]["w"].T, precision=hp) + params["value_fc1"]["b"])
    v = jnp.tanh(jnp.dot(v, params["value_fc2"]["w"].T, precision=hp) + params["value_fc2"]["b"])
    return v, policy


# ----------------------------------------------------------------------------
# Deterministic parameter init (raw torch-layout params; arrays only, no ints)
# ----------------------------------------------------------------------------
class _KeyGen:
    def __init__(self, key):
        self._key = key

    def __call__(self):
        self._key, sub = jax.random.split(self._key)
        return sub


def _init_bn(kg, c):
    return {
        "gamma": 1.0 + 0.1 * jax.random.normal(kg(), (c,), jnp.float32),
        "beta": 0.05 * jax.random.normal(kg(), (c,), jnp.float32),
        "mean": 0.1 * jax.random.normal(kg(), (c,), jnp.float32),
        "var": 1.0 + 0.1 * jnp.abs(jax.random.normal(kg(), (c,), jnp.float32)),
    }


def _init_conv(kg, cout, cin, k):
    return 0.1 * jax.random.normal(kg(), (cout, cin, k, k), jnp.float32)


def _init_linear(kg, out_dim, in_dim):
    return {
        "w": 0.05 * jax.random.normal(kg(), (out_dim, in_dim), jnp.float32),
        "b": 0.05 * jax.random.normal(kg(), (out_dim,), jnp.float32),
    }


def init_params(key, *, size, planes, action_size, num_res_blocks):
    kg = _KeyGen(key)
    body = []
    for _ in range(num_res_blocks):
        body.append({
            "conv1": _init_conv(kg, planes, planes, 3),
            "bn1": _init_bn(kg, planes),
            "conv2": _init_conv(kg, planes, planes, 3),
            "bn2": _init_bn(kg, planes),
        })
    return {
        "foot_conv": _init_conv(kg, planes, 2, 3),
        "foot_bn": _init_bn(kg, planes),
        "body": body,
        "policy_conv": _init_conv(kg, planes, planes, 3),
        "policy_bn": _init_bn(kg, planes),
        "policy_fc": _init_linear(kg, action_size, planes * size * size),
        "value_conv": _init_conv(kg, 1, planes, 1),
        "value_bn": _init_bn(kg, 1),
        "value_fc1": _init_linear(kg, planes, size * size),
        "value_fc2": _init_linear(kg, 1, planes),
    }


# ----------------------------------------------------------------------------
if __name__ == "__main__":
    # config: size=8, num_conv_filters=32, action_size=65, conv_stride=1,
    #         num_res_blocks=2, use_full_pre_activation=False
    SIZE, PLANES, ACTION_SIZE, NUM_RES_BLOCKS, BATCH = 8, 32, 65, 2, 2

    root = jax.random.PRNGKey(0)
    kp, kx = jax.random.split(root)
    raw_params = init_params(kp, size=SIZE, planes=PLANES,
                             action_size=ACTION_SIZE,
                             num_res_blocks=NUM_RES_BLOCKS)
    x = jax.random.normal(kx, (BATCH, 2, SIZE, SIZE), jnp.float32)  # NCHW like torch

    # one-time weight-layout / BN-folding prep (outside jit)
    prep = prepare_params(raw_params, size=SIZE, planes=PLANES)

    fwd = jax.jit(forward_pallas, static_argnames=("action_size",))
    value, policy = fwd(prep, x, action_size=ACTION_SIZE)
    value = jax.block_until_ready(value)
    policy = jax.block_until_ready(policy)

    value_ref, policy_ref = forward_ref(raw_params, x)
    np.testing.assert_allclose(np.asarray(value), np.asarray(value_ref),
                               rtol=2e-2, atol=2e-2)
    np.testing.assert_allclose(np.asarray(policy), np.asarray(policy_ref),
                               rtol=2e-2, atol=2e-2)
    assert value.shape == (BATCH, 1) and policy.shape == (BATCH, ACTION_SIZE)

    print("KERNEL_OK")
</pallas_src>

<mosaic_0001>
module attributes {stable_mosaic.version = 11 : i64} {
  func.func @_trunk_kernel(%arg0: memref<2x8x8x32xf32, #tpu.memory_space<vmem>>, %arg1: memref<9x32x32xf32, #tpu.memory_space<vmem>>, %arg2: memref<1x32xf32, #tpu.memory_space<vmem>>, %arg3: memref<1x32xf32, #tpu.memory_space<vmem>>, %arg4: memref<9x32x32xf32, #tpu.memory_space<vmem>>, %arg5: memref<1x32xf32, #tpu.memory_space<vmem>>, %arg6: memref<1x32xf32, #tpu.memory_space<vmem>>, %arg7: memref<9x32x32xf32, #tpu.memory_space<vmem>>, %arg8: memref<1x32xf32, #tpu.memory_space<vmem>>, %arg9: memref<1x32xf32, #tpu.memory_space<vmem>>, %arg10: memref<9x32x32xf32, #tpu.memory_space<vmem>>, %arg11: memref<1x32xf32, #tpu.memory_space<vmem>>, %arg12: memref<1x32xf32, #tpu.memory_space<vmem>>, %arg13: memref<9x32x32xf32, #tpu.memory_space<vmem>>, %arg14: memref<1x32xf32, #tpu.memory_space<vmem>>, %arg15: memref<1x32xf32, #tpu.memory_space<vmem>>, %arg16: memref<9x32x32xf32, #tpu.memory_space<vmem>>, %arg17: memref<1x32xf32, #tpu.memory_space<vmem>>, %arg18: memref<1x32xf32, #tpu.memory_space<vmem>>, %arg19: memref<32x1xf32, #tpu.memory_space<vmem>>, %arg20: memref<1x1xf32, #tpu.memory_space<vmem>>, %arg21: memref<1x1xf32, #tpu.memory_space<vmem>>, %arg22: memref<128x32xf32, #tpu.memory_space<vmem>>, %arg23: memref<128x1xf32, #tpu.memory_space<vmem>>, %arg24: memref<2x10x10x32xf32, #tpu.memory_space<vmem>>, %arg25: memref<2x8x8x32xf32, #tpu.memory_space<vmem>>, %arg26: memref<2x8x8x32xf32, #tpu.memory_space<vmem>>) attributes {dimension_semantics = [], scalar_prefetch = 0 : i64, scratch_operands = 3 : i64, tpu.core_type = #tpu.core_type<tc>} {
    %cst = arith.constant 0.000000e+00 : f32
    %0 = vector.broadcast %cst : f32 to vector<2x10x10x32xf32>
    %c0 = arith.constant 0 : index
    %c0_0 = arith.constant 0 : index
    %c0_1 = arith.constant 0 : index
    %c0_2 = arith.constant 0 : index
    %1 = vector.load %arg24[%c0, %c0_0, %c0_1, %c0_2] : memref<2x10x10x32xf32, #tpu.memory_space<vmem>>, vector<2x10x10x32xf32>
    tpu.vector_store %arg24[%c0, %c0_0, %c0_1, %c0_2], %0 {strides = array<i32>} : memref<2x10x10x32xf32, #tpu.memory_space<vmem>>, vector<2x10x10x32xf32>,
    %c0_3 = arith.constant 0 : index
    %c0_4 = arith.constant 0 : index
    %c0_5 = arith.constant 0 : index
    %c0_6 = arith.constant 0 : index
    %2 = vector.load %arg0[%c0_3, %c0_4, %c0_5, %c0_6] : memref<2x8x8x32xf32, #tpu.memory_space<vmem>>, vector<2x8x8x32xf32>
    %c0_7 = arith.constant 0 : index
    %c1 = arith.constant 1 : index
    %c1_8 = arith.constant 1 : index
    %c0_9 = arith.constant 0 : index
    %3 = vector.load %arg24[%c0_7, %c1, %c1_8, %c0_9] : memref<2x10x10x32xf32, #tpu.memory_space<vmem>>, vector<2x8x8x32xf32>
    tpu.vector_store %arg24[%c0_7, %c1, %c1_8, %c0_9], %2 {strides = array<i32>} : memref<2x10x10x32xf32, #tpu.memory_space<vmem>>, vector<2x8x8x32xf32>,
    %cst_10 = arith.constant 0.000000e+00 : f32
    %4 = vector.broadcast %cst_10 : f32 to vector<128x32xf32>
    %c0_11 = arith.constant 0 : index
    %c0_12 = arith.constant 0 : index
    %c0_13 = arith.constant 0 : index
    %c0_14 = arith.constant 0 : index
    %5 = vector.load %arg24[%c0_11, %c0_12, %c0_13, %c0_14] : memref<2x10x10x32xf32, #tpu.memory_space<vmem>>, vector<2x8x8x32xf32>
    %6 = vector.shape_cast %5 : vector<2x8x8x32xf32> to vector<128x32xf32>
    %c0_15 = arith.constant 0 : index
    %c0_16 = arith.constant 0 : index
    %c0_17 = arith.constant 0 : index
    %7 = vector.load %arg1[%c0_15, %c0_16, %c0_17] : memref<9x32x32xf32, #tpu.memory_space<vmem>>, vector<1x32x32xf32>
    %8 = vector.shape_cast %7 : vector<1x32x32xf32> to vector<32x32xf32>
    %cst_18 = arith.constant dense<0.000000e+00> : vector<128x32xf32>
    %9 = tpu.matmul %6, %8, %cst_18 {dimension_numbers = #tpu.dot_dimension_numbers<[1], [0], [0], [1], [0, 0, 1, 1], [], []>} : vector<128x32xf32>, vector<32x32xf32>, vector<128x32xf32> -> vector<128x32xf32>
    %10 = arith.addf %4, %9 : vector<128x32xf32>
    %c0_19 = arith.constant 0 : index
    %c0_20 = arith.constant 0 : index
    %c1_21 = arith.constant 1 : index
    %c0_22 = arith.constant 0 : index
    %11 = vector.load %arg24[%c0_19, %c0_20, %c1_21, %c0_22] : memref<2x10x10x32xf32, #tpu.memory_space<vmem>>, vector<2x8x8x32xf32>
    %12 = vector.shape_cast %11 : vector<2x8x8x32xf32> to vector<128x32xf32>
    %c1_23 = arith.constant 1 : index
    %c0_24 = arith.constant 0 : index
    %c0_25 = arith.constant 0 : index
    %13 = vector.load %arg1[%c1_23, %c0_24, %c0_25] : memref<9x32x32xf32, #tpu.memory_space<vmem>>, vector<1x32x32xf32>
    %14 = vector.shape_cast %13 : vector<1x32x32xf32> to vector<32x32xf32>
    %cst_26 = arith.constant dense<0.000000e+00> : vector<128x32xf32>
    %15 = tpu.matmul %12, %14, %cst_26 {dimension_numbers = #tpu.dot_dimension_numbers<[1], [0], [0], [1], [0, 0, 1, 1], [], []>} : vector<128x32xf32>, vector<32x32xf32>, vector<128x32xf32> -> vector<128x32xf32>
    %16 = arith.addf %10, %15 : vector<128x32xf32>
    %c0_27 = arith.constant 0 : index
    %c0_28 = arith.constant 0 : index
    %c2 = arith.constant 2 : index
    %c0_29 = arith.constant 0 : index
    %17 = vector.load %arg24[%c0_27, %c0_28, %c2, %c0_29] : memref<2x10x10x32xf32, #tpu.memory_space<vmem>>, vector<2x8x8x32xf32>
    %18 = vector.shape_cast %17 : vector<2x8x8x32xf32> to vector<128x32xf32>
    %c2_30 = arith.constant 2 : index
    %c0_31 = arith.constant 0 : index
    %c0_32 = arith.constant 0 : index
    %19 = vector.load %arg1[%c2_30, %c0_31, %c0_32] : memref<9x32x32xf32, #tpu.memory_space<vmem>>, vector<1x32x32xf32>
    %20 = vector.shape_cast %19 : vector<1x32x32xf32> to vector<32x32xf32>
    %cst_33 = arith.constant dense<0.000000e+00> : vector<128x32xf32>
    %21 = tpu.matmul %18, %20, %cst_33 {dimension_numbers = #tpu.dot_dimension_numbers<[1], [0], [0], [1], [0, 0, 1, 1], [], []>} : vector<128x32xf32>, vector<32x32xf32>, vector<128x32xf32> -> vector<128x32xf32>
    %22 = arith.addf %16, %21 : vector<128x32xf32>
    %c0_34 = arith.constant 0 : index
    %c1_35 = arith.constant 1 : index
    %c0_36 = arith.constant 0 : index
    %c0_37 = arith.constant 0 : index
    %23 = vector.load %arg24[%c0_34, %c1_35, %c0_36, %c0_37] : memref<2x10x10x32xf32, #tpu.memory_space<vmem>>, vector<2x8x8x32xf32>
    %24 = vector.shape_cast %23 : vector<2x8x8x32xf32> to vector<128x32xf32>
    %c3 = arith.constant 3 : index
    %c0_38 = arith.constant 0 : index
    %c0_39 = arith.constant 0 : index
    %25 = vector.load %arg1[%c3, %c0_38, %c0_39] : memref<9x32x32xf32, #tpu.memory_space<vmem>>, vector<1x32x32xf32>
    %26 = vector.shape_cast %25 : vector<1x32x32xf32> to vector<32x32xf32>
    %cst_40 = arith.constant dense<0.000000e+00> : vector<128x32xf32>
    %27 = tpu.matmul %24, %26, %cst_40 {dimension_numbers = #tpu.dot_dimension_numbers<[1], [0], [0], [1], [0, 0, 1, 1], [], []>} : vector<128x32xf32>, vector<32x32xf32>, vector<128x32xf32> -> vector<128x32xf32>
    %28 = arith.addf %22, %27 : vector<128x32xf32>
    %c0_41 = arith.constant 0 : index
    %c1_42 = arith.constant 1 : index
    %c1_43 = arith.constant 1 : index
    %c0_44 = arith.constant 0 : index
    %29 = vector.load %arg24[%c0_41, %c1_42, %c1_43, %c0_44] : memref<2x10x10x32xf32, #tpu.memory_space<vmem>>, vector<2x8x8x32xf32>
    %30 = vector.shape_cast %29 : vector<2x8x8x32xf32> to vector<128x32xf32>
    %c4 = arith.constant 4 : index
    %c0_45 = arith.constant 0 : index
    %c0_46 = arith.constant 0 : index
    %31 = vector.load %arg1[%c4, %c0_45, %c0_46] : memref<9x32x32xf32, #tpu.memory_space<vmem>>, vector<1x32x32xf32>
    %32 = vector.shape_cast %31 : vector<1x32x32xf32> to vector<32x32xf32>
    %cst_47 = arith.constant dense<0.000000e+00> : vector<128x32xf32>
    %33 = tpu.matmul %30, %32, %cst_47 {dimension_numbers = #tpu.dot_dimension_numbers<[1], [0], [0], [1], [0, 0, 1, 1], [], []>} : vector<128x32xf32>, vector<32x32xf32>, vector<128x32xf32> -> vector<128x32xf32>
    %34 = arith.addf %28, %33 : vector<128x32xf32>
    %c0_48 = arith.constant 0 : index
    %c1_49 = arith.constant 1 : index
    %c2_50 = arith.constant 2 : index
    %c0_51 = arith.constant 0 : index
    %35 = vector.load %arg24[%c0_48, %c1_49, %c2_50, %c0_51] : memref<2x10x10x32xf32, #tpu.memory_space<vmem>>, vector<2x8x8x32xf32>
    %36 = vector.shape_cast %35 : vector<2x8x8x32xf32> to vector<128x32xf32>
    %c5 = arith.constant 5 : index
    %c0_52 = arith.constant 0 : index
    %c0_53 = arith.constant 0 : index
    %37 = vector.load %arg1[%c5, %c0_52, %c0_53] : memref<9x32x32xf32, #tpu.memory_space<vmem>>, vector<1x32x32xf32>
    %38 = vector.shape_cast %37 : vector<1x32x32xf32> to vector<32x32xf32>
    %cst_54 = arith.constant dense<0.000000e+00> : vector<128x32xf32>
    %39 = tpu.matmul %36, %38, %cst_54 {dimension_numbers = #tpu.dot_dimension_numbers<[1], [0], [0], [1], [0, 0, 1, 1], [], []>} : vector<128x32xf32>, vector<32x32xf32>, vector<128x32xf32> -> vector<128x32xf32>
    %40 = arith.addf %34, %39 : vector<128x32xf32>
    %c0_55 = arith.constant 0 : index
    %c2_56 = arith.constant 2 : index
    %c0_57 = arith.constant 0 : index
    %c0_58 = arith.constant 0 : index
    %41 = vector.load %arg24[%c0_55, %c2_56, %c0_57, %c0_58] : memref<2x10x10x32xf32, #tpu.memory_space<vmem>>, vector<2x8x8x32xf32>
    %42 = vector.shape_cast %41 : vector<2x8x8x32xf32> to vector<128x32xf32>
    %c6 = arith.constant 6 : index
    %c0_59 = arith.constant 0 : index
    %c0_60 = arith.constant 0 : index
    %43 = vector.load %arg1[%c6, %c0_59, %c0_60] : memref<9x32x32xf32, #tpu.memory_space<vmem>>, vector<1x32x32xf32>
    %44 = vector.shape_cast %43 : vector<1x32x32xf32> to vector<32x32xf32>
    %cst_61 = arith.constant dense<0.000000e+00> : vector<128x32xf32>
    %45 = tpu.matmul %42, %44, %cst_61 {dimension_numbers = #tpu.dot_dimension_numbers<[1], [0], [0], [1], [0, 0, 1, 1], [], []>} : vector<128x32xf32>, vector<32x32xf32>, vector<128x32xf32> -> vector<128x32xf32>
    %46 = arith.addf %40, %45 : vector<128x32xf32>
    %c0_62 = arith.constant 0 : index
    %c2_63 = arith.constant 2 : index
    %c1_64 = arith.constant 1 : index
    %c0_65 = arith.constant 0 : index
    %47 = vector.load %arg24[%c0_62, %c2_63, %c1_64, %c0_65] : memref<2x10x10x32xf32, #tpu.memory_space<vmem>>, vector<2x8x8x32xf32>
    %48 = vector.shape_cast %47 : vector<2x8x8x32xf32> to vector<128x32xf32>
    %c7 = arith.constant 7 : index
    %c0_66 = arith.constant 0 : index
    %c0_67 = arith.constant 0 : index
    %49 = vector.load %arg1[%c7, %c0_66, %c0_67] : memref<9x32x32xf32, #tpu.memory_space<vmem>>, vector<1x32x32xf32>
    %50 = vector.shape_cast %49 : vector<1x32x32xf32> to vector<32x32xf32>
    %cst_68 = arith.constant dense<0.000000e+00> : vector<128x32xf32>
    %51 = tpu.matmul %48, %50, %cst_68 {dimension_numbers = #tpu.dot_dimension_numbers<[1], [0], [0], [1], [0, 0, 1, 1], [], []>} : vector<128x32xf32>, vector<32x32xf32>, vector<128x32xf32> -> vector<128x32xf32>
    %52 = arith.addf %46, %51 : vector<128x32xf32>
    %c0_69 = arith.constant 0 : index
    %c2_70 = arith.constant 2 : index
    %c2_71 = arith.constant 2 : index
    %c0_72 = arith.constant 0 : index
    %53 = vector.load %arg24[%c0_69, %c2_70, %c2_71, %c0_72] : memref<2x10x10x32xf32, #tpu.memory_space<vmem>>, vector<2x8x8x32xf32>
    %54 = vector.shape_cast %53 : vector<2x8x8x32xf32> to vector<128x32xf32>
    %c8 = arith.constant 8 : index
    %c0_73 = arith.constant 0 : index
    %c0_74 = arith.constant 0 : index
    %55 = vector.load %arg1[%c8, %c0_73, %c0_74] : memref<9x32x32xf32, #tpu.memory_space<vmem>>, vector<1x32x32xf32>
    %56 = vector.shape_cast %55 : vector<1x32x32xf32> to vector<32x32xf32>
    %cst_75 = arith.constant dense<0.000000e+00> : vector<128x32xf32>
    %57 = tpu.matmul %54, %56, %cst_75 {dimension_numbers = #tpu.dot_dimension_numbers<[1], [0], [0], [1], [0, 0, 1, 1], [], []>} : vector<128x32xf32>, vector<32x32xf32>, vector<128x32xf32> -> vector<128x32xf32>
    %58 = arith.addf %52, %57 : vector<128x32xf32>
    %c0_76 = arith.constant 0 : index
    %c0_77 = arith.constant 0 : index
    %59 = vector.load %arg2[%c0_76, %c0_77] : memref<1x32xf32, #tpu.memory_space<vmem>>, vector<1x32xf32>
    %60 = vector.broadcast %59 : vector<1x32xf32> to vector<128x32xf32>
    %61 = arith.mulf %58, %60 : vector<128x32xf32>
    %c0_78 = arith.constant 0 : index
    %c0_79 = arith.constant 0 : index
    %62 = vector.load %arg3[%c0_78, %c0_79] : memref<1x32xf32, #tpu.memory_space<vmem>>, vector<1x32xf32>
    %63 = vector.broadcast %62 : vector<1x32xf32> to vector<128x32xf32>
    %64 = arith.addf %61, %63 : vector<128x32xf32>
    %cst_80 = arith.constant 0.000000e+00 : f32
    %65 = vector.broadcast %cst_80 : f32 to vector<128x32xf32>
    %66 = arith.maximumf %64, %65 : vector<128x32xf32>
    %67 = vector.shape_cast %66 : vector<128x32xf32> to vector<2x8x8x32xf32>
    %c0_81 = arith.constant 0 : index
    %c0_82 = arith.constant 0 : index
    %c0_83 = arith.constant 0 : index
    %c0_84 = arith.constant 0 : index
    %68 = vector.load %arg25[%c0_81, %c0_82, %c0_83, %c0_84] : memref<2x8x8x32xf32, #tpu.memory_space<vmem>>, vector<2x8x8x32xf32>
    tpu.vector_store %arg25[%c0_81, %c0_82, %c0_83, %c0_84], %67 {strides = array<i32>} : memref<2x8x8x32xf32, #tpu.memory_space<vmem>>, vector<2x8x8x32xf32>,
    %c0_85 = arith.constant 0 : index
    %c0_86 = arith.constant 0 : index
    %c0_87 = arith.constant 0 : index
    %c0_88 = arith.constant 0 : index
    %69 = vector.load %arg25[%c0_85, %c0_86, %c0_87, %c0_88] : memref<2x8x8x32xf32, #tpu.memory_space<vmem>>, vector<2x8x8x32xf32>
    %c0_89 = arith.constant 0 : index
    %c1_90 = arith.constant 1 : index
    %c1_91 = arith.constant 1 : index
    %c0_92 = arith.constant 0 : index
    %70 = vector.load %arg24[%c0_89, %c1_90, %c1_91, %c0_92] : memref<2x10x10x32xf32, #tpu.memory_space<vmem>>, vector<2x8x8x32xf32>
    tpu.vector_store %arg24[%c0_89, %c1_90, %c1_91, %c0_92], %69 {strides = array<i32>} : memref<2x10x10x32xf32, #tpu.memory_space<vmem>>, vector<2x8x8x32xf32>,
    %cst_93 = arith.constant 0.000000e+00 : f32
    %71 = vector.broadcast %cst_93 : f32 to vector<128x32xf32>
    %c0_94 = arith.constant 0 : index
    %c0_95 = arith.constant 0 : index
    %c0_96 = arith.constant 0 : index
    %c0_97 = arith.constant 0 : index
    %72 = vector.load %arg24[%c0_94, %c0_95, %c0_96, %c0_97] : memref<2x10x10x32xf32, #tpu.memory_space<vmem>>, vector<2x8x8x32xf32>
    %73 = vector.shape_cast %72 : vector<2x8x8x32xf32> to vector<128x32xf32>
    %c0_98 = arith.constant 0 : index
    %c0_99 = arith.constant 0 : index
    %c0_100 = arith.constant 0 : index
    %74 = vector.load %arg4[%c0_98, %c0_99, %c0_100] : memref<9x32x32xf32, #tpu.memory_space<vmem>>, vector<1x32x32xf32>
    %75 = vector.shape_cast %74 : vector<1x32x32xf32> to vector<32x32xf32>
    %cst_101 = arith.constant dense<0.000000e+00> : vector<128x32xf32>
    %76 = tpu.matmul %73, %75, %cst_101 {dimension_numbers = #tpu.dot_dimension_numbers<[1], [0], [0], [1], [0, 0, 1, 1], [], []>} : vector<128x32xf32>, vector<32x32xf32>, vector<128x32xf32> -> vector<128x32xf32>
    %77 = arith.addf %71, %76 : vector<128x32xf32>
    %c0_102 = arith.constant 0 : index
    %c0_103 = arith.constant 0 : index
    %c1_104 = arith.constant 1 : index
    %c0_105 = arith.constant 0 : index
    %78 = vector.load %arg24[%c0_102, %c0_103, %c1_104, %c0_105] : memref<2x10x10x32xf32, #tpu.memory_space<vmem>>, vector<2x8x8x32xf32>
    %79 = vector.shape_cast %78 : vector<2x8x8x32xf32> to vector<128x32xf32>
    %c1_106 = arith.constant 1 : index
    %c0_107 = arith.constant 0 : index
    %c0_108 = arith.constant 0 : index
    %80 = vector.load %arg4[%c1_106, %c0_107, %c0_108] : memref<9x32x32xf32, #tpu.memory_space<vmem>>, vector<1x32x32xf32>
    %81 = vector.shape_cast %80 : vector<1x32x32xf32> to vector<32x32xf32>
    %cst_109 = arith.constant dense<0.000000e+00> : vector<128x32xf32>
    %82 = tpu.matmul %79, %81, %cst_109 {dimension_numbers = #tpu.dot_dimension_numbers<[1], [0], [0], [1], [0, 0, 1, 1], [], []>} : vector<128x32xf32>, vector<32x32xf32>, vector<128x32xf32> -> vector<128x32xf32>
    %83 = arith.addf %77, %82 : vector<128x32xf32>
    %c0_110 = arith.constant 0 : index
    %c0_111 = arith.constant 0 : index
    %c2_112 = arith.constant 2 : index
    %c0_113 = arith.constant 0 : index
    %84 = vector.load %arg24[%c0_110, %c0_111, %c2_112, %c0_113] : memref<2x10x10x32xf32, #tpu.memory_space<vmem>>, vector<2x8x8x32xf32>
    %85 = vector.shape_cast %84 : vector<2x8x8x32xf32> to vector<128x32xf32>
    %c2_114 = arith.constant 2 : index
    %c0_115 = arith.constant 0 : index
    %c0_116 = arith.constant 0 : index
    %86 = vector.load %arg4[%c2_114, %c0_115, %c0_116] : memref<9x32x32xf32, #tpu.memory_space<vmem>>, vector<1x32x32xf32>
    %87 = vector.shape_cast %86 : vector<1x32x32xf32> to vector<32x32xf32>
    %cst_117 = arith.constant dense<0.000000e+00> : vector<128x32xf32>
    %88 = tpu.matmul %85, %87, %cst_117 {dimension_numbers = #tpu.dot_dimension_numbers<[1], [0], [0], [1], [0, 0, 1, 1], [], []>} : vector<128x32xf32>, vector<32x32xf32>, vector<128x32xf32> -> vector<128x32xf32>
    %89 = arith.addf %83, %88 : vector<128x32xf32>
    %c0_118 = arith.constant 0 : index
    %c1_119 = arith.constant 1 : index
    %c0_120 = arith.constant 0 : index
    %c0_121 = arith.constant 0 : index
    %90 = vector.load %arg24[%c0_118, %c1_119, %c0_120, %c0_121] : memref<2x10x10x32xf32, #tpu.memory_space<vmem>>, vector<2x8x8x32xf32>
    %91 = vector.shape_cast %90 : vector<2x8x8x32xf32> to vector<128x32xf32>
    %c3_122 = arith.constant 3 : index
    %c0_123 = arith.constant 0 : index
    %c0_124 = arith.constant 0 : index
    %92 = vector.load %arg4[%c3_122, %c0_123, %c0_124] : memref<9x32x32xf32, #tpu.memory_space<vmem>>, vector<1x32x32xf32>
    %93 = vector.shape_cast %92 : vector<1x32x32xf32> to vector<32x32xf32>
    %cst_125 = arith.constant dense<0.000000e+00> : vector<128x32xf32>
    %94 = tpu.matmul %91, %93, %cst_125 {dimension_numbers = #tpu.dot_dimension_numbers<[1], [0], [0], [1], [0, 0, 1, 1], [], []>} : vector<128x32xf32>, vector<32x32xf32>, vector<128x32xf32> -> vector<128x32xf32>
    %95 = arith.addf %89, %94 : vector<128x32xf32>
    %c0_126 = arith.constant 0 : index
    %c1_127 = arith.constant 1 : index
    %c1_128 = arith.constant 1 : index
    %c0_129 = arith.constant 0 : index
    %96 = vector.load %arg24[%c0_126, %c1_127, %c1_128, %c0_129] : memref<2x10x10x32xf32, #tpu.memory_space<vmem>>, vector<2x8x8x32xf32>
    %97 = vector.shape_cast %96 : vector<2x8x8x32xf32> to vector<128x32xf32>
    %c4_130 = arith.constant 4 : index
    %c0_131 = arith.constant 0 : index
    %c0_132 = arith.constant 0 : index
    %98 = vector.load %arg4[%c4_130, %c0_131, %c0_132] : memref<9x32x32xf32, #tpu.memory_space<vmem>>, vector<1x32x32xf32>
    %99 = vector.shape_cast %98 : vector<1x32x32xf32> to vector<32x32xf32>
    %cst_133 = arith.constant dense<0.000000e+00> : vector<128x32xf32>
    %100 = tpu.matmul %97, %99, %cst_133 {dimension_numbers = #tpu.dot_dimension_numbers<[1], [0], [0], [1], [0, 0, 1, 1], [], []>} : vector<128x32xf32>, vector<32x32xf32>, vector<128x32xf32> -> vector<128x32xf32>
    %101 = arith.addf %95, %100 : vector<128x32xf32>
    %c0_134 = arith.constant 0 : index
    %c1_135 = arith.constant 1 : index
    %c2_136 = arith.constant 2 : index
    %c0_137 = arith.constant 0 : index
    %102 = vector.load %arg24[%c0_134, %c1_135, %c2_136, %c0_137] : memref<2x10x10x32xf32, #tpu.memory_space<vmem>>, vector<2x8x8x32xf32>
    %103 = vector.shape_cast %102 : vector<2x8x8x32xf32> to vector<128x32xf32>
    %c5_138 = arith.constant 5 : index
    %c0_139 = arith.constant 0 : index
    %c0_140 = arith.constant 0 : index
    %104 = vector.load %arg4[%c5_138, %c0_139, %c0_140] : memref<9x32x32xf32, #tpu.memory_space<vmem>>, vector<1x32x32xf32>
    %105 = vector.shape_cast %104 : vector<1x32x32xf32> to vector<32x32xf32>
    %cst_141 = arith.constant dense<0.000000e+00> : vector<128x32xf32>
    %106 = tpu.matmul %103, %105, %cst_141 {dimension_numbers = #tpu.dot_dimension_numbers<[1], [0], [0], [1], [0, 0, 1, 1], [], []>} : vector<128x32xf32>, vector<32x32xf32>, vector<128x32xf32> -> vector<128x32xf32>
    %107 = arith.addf %101, %106 : vector<128x32xf32>
    %c0_142 = arith.constant 0 : index
    %c2_143 = arith.constant 2 : index
    %c0_144 = arith.constant 0 : index
    %c0_145 = arith.constant 0 : index
    %108 = vector.load %arg24[%c0_142, %c2_143, %c0_144, %c0_145] : memref<2x10x10x32xf32, #tpu.memory_space<vmem>>, vector<2x8x8x32xf32>
    %109 = vector.shape_cast %108 : vector<2x8x8x32xf32> to vector<128x32xf32>
    %c6_146 = arith.constant 6 : index
    %c0_147 = arith.constant 0 : index
    %c0_148 = arith.constant 0 : index
    %110 = vector.load %arg4[%c6_146, %c0_147, %c0_148] : memref<9x32x32xf32, #tpu.memory_space<vmem>>, vector<1x32x32xf32>
    %111 = vector.shape_cast %110 : vector<1x32x32xf32> to vector<32x32xf32>
    %cst_149 = arith.constant dense<0.000000e+00> : vector<128x32xf32>
    %112 = tpu.matmul %109, %111, %cst_149 {dimension_numbers = #tpu.dot_dimension_numbers<[1], [0], [0], [1], [0, 0, 1, 1], [], []>} : vector<128x32xf32>, vector<32x32xf32>, vector<128x32xf32> -> vector<128x32xf32>
    %113 = arith.addf %107, %112 : vector<128x32xf32>
    %c0_150 = arith.constant 0 : index
    %c2_151 = arith.constant 2 : index
    %c1_152 = arith.constant 1 : index
    %c0_153 = arith.constant 0 : index
    %114 = vector.load %arg24[%c0_150, %c2_151, %c1_152, %c0_153] : memref<2x10x10x32xf32, #tpu.memory_space<vmem>>, vector<2x8x8x32xf32>
    %115 = vector.shape_cast %114 : vector<2x8x8x32xf32> to vector<128x32xf32>
    %c7_154 = arith.constant 7 : index
    %c0_155 = arith.constant 0 : index
    %c0_156 = arith.constant 0 : index
    %116 = vector.load %arg4[%c7_154, %c0_155, %c0_156] : memref<9x32x32xf32, #tpu.memory_space<vmem>>, vector<1x32x32xf32>
    %117 = vector.shape_cast %116 : vector<1x32x32xf32> to vector<32x32xf32>
    %cst_157 = arith.constant dense<0.000000e+00> : vector<128x32xf32>
    %118 = tpu.matmul %115, %117, %cst_157 {dimension_numbers = #tpu.dot_dimension_numbers<[1], [0], [0], [1], [0, 0, 1, 1], [], []>} : vector<128x32xf32>, vector<32x32xf32>, vector<128x32xf32> -> vector<128x32xf32>
    %119 = arith.addf %113, %118 : vector<128x32xf32>
    %c0_158 = arith.constant 0 : index
    %c2_159 = arith.constant 2 : index
    %c2_160 = arith.constant 2 : index
    %c0_161 = arith.constant 0 : index
    %120 = vector.load %arg24[%c0_158, %c2_159, %c2_160, %c0_161] : memref<2x10x10x32xf32, #tpu.memory_space<vmem>>, vector<2x8x8x32xf32>
    %121 = vector.shape_cast %120 : vector<2x8x8x32xf32> to vector<128x32xf32>
    %c8_162 = arith.constant 8 : index
    %c0_163 = arith.constant 0 : index
    %c0_164 = arith.constant 0 : index
    %122 = vector.load %arg4[%c8_162, %c0_163, %c0_164] : memref<9x32x32xf32, #tpu.memory_space<vmem>>, vector<1x32x32xf32>
    %123 = vector.shape_cast %122 : vector<1x32x32xf32> to vector<32x32xf32>
    %cst_165 = arith.constant dense<0.000000e+00> : vector<128x32xf32>
    %124 = tpu.matmul %121, %123, %cst_165 {dimension_numbers = #tpu.dot_dimension_numbers<[1], [0], [0], [1], [0, 0, 1, 1], [], []>} : vector<128x32xf32>, vector<32x32xf32>, vector<128x32xf32> -> vector<128x32xf32>
    %125 = arith.addf %119, %124 : vector<128x32xf32>
    %c0_166 = arith.constant 0 : index
    %c0_167 = arith.constant 0 : index
    %126 = vector.load %arg5[%c0_166, %c0_167] : memref<1x32xf32, #tpu.memory_space<vmem>>, vector<1x32xf32>
    %127 = vector.broadcast %126 : vector<1x32xf32> to vector<128x32xf32>
    %128 = arith.mulf %125, %127 : vector<128x32xf32>
    %c0_168 = arith.constant 0 : index
    %c0_169 = arith.constant 0 : index
    %129 = vector.load %arg6[%c0_168, %c0_169] : memref<1x32xf32, #tpu.memory_space<vmem>>, vector<1x32xf32>
    %130 = vector.broadcast %129 : vector<1x32xf32> to vector<128x32xf32>
    %131 = arith.addf %128, %130 : vector<128x32xf32>
    %cst_170 = arith.constant 0.000000e+00 : f32
    %132 = vector.broadcast %cst_170 : f32 to vector<128x32xf32>
    %133 = arith.maximumf %131, %132 : vector<128x32xf32>
    %134 = vector.shape_cast %133 : vector<128x32xf32> to vector<2x8x8x32xf32>
    %c0_171 = arith.constant 0 : index
    %c0_172 = arith.constant 0 : index
    %c0_173 = arith.constant 0 : index
    %c0_174 = arith.constant 0 : index
    %135 = vector.load %arg26[%c0_171, %c0_172, %c0_173, %c0_174] : memref<2x8x8x32xf32, #tpu.memory_space<vmem>>, vector<2x8x8x32xf32>
    tpu.vector_store %arg26[%c0_171, %c0_172, %c0_173, %c0_174], %134 {strides = array<i32>} : memref<2x8x8x32xf32, #tpu.memory_space<vmem>>, vector<2x8x8x32xf32>,
    %c0_175 = arith.constant 0 : index
    %c0_176 = arith.constant 0 : index
    %c0_177 = arith.constant 0 : index
    %c0_178 = arith.constant 0 : index
    %136 = vector.load %arg25[%c0_175, %c0_176, %c0_177, %c0_178] : memref<2x8x8x32xf32, #tpu.memory_space<vmem>>, vector<2x8x8x32xf32>
    %137 = vector.shape_cast %136 : vector<2x8x8x32xf32> to vector<128x32xf32>
    %c0_179 = arith.constant 0 : index
    %c0_180 = arith.constant 0 : index
    %c0_181 = arith.constant 0 : index
    %c0_182 = arith.constant 0 : index
    %138 = vector.load %arg26[%c0_179, %c0_180, %c0_181, %c0_182] : memref<2x8x8x32xf32, #tpu.memory_space<vmem>>, vector<2x8x8x32xf32>
    %c0_183 = arith.constant 0 : index
    %c1_184 = arith.constant 1 : index
    %c1_185 = arith.constant 1 : index
    %c0_186 = arith.constant 0 : index
    %139 = vector.load %arg24[%c0_183, %c1_184, %c1_185, %c0_186] : memref<2x10x10x32xf32, #tpu.memory_space<vmem>>, vector<2x8x8x32xf32>
    tpu.vector_store %arg24[%c0_183, %c1_184, %c1_185, %c0_186], %138 {strides = array<i32>} : memref<2x10x10x32xf32, #tpu.memory_space<vmem>>, vector<2x8x8x32xf32>,
    %cst_187 = arith.constant 0.000000e+00 : f32
    %140 = vector.broadcast %cst_187 : f32 to vector<128x32xf32>
    %c0_188 = arith.constant 0 : index
    %c0_189 = arith.constant 0 : index
    %c0_190 = arith.constant 0 : index
    %c0_191 = arith.constant 0 : index
    %141 = vector.load %arg24[%c0_188, %c0_189, %c0_190, %c0_191] : memref<2x10x10x32xf32, #tpu.memory_space<vmem>>, vector<2x8x8x32xf32>
    %142 = vector.shape_cast %141 : vector<2x8x8x32xf32> to vector<128x32xf32>
    %c0_192 = arith.constant 0 : index
    %c0_193 = arith.constant 0 : index
    %c0_194 = arith.constant 0 : index
    %143 = vector.load %arg7[%c0_192, %c0_193, %c0_194] : memref<9x32x32xf32, #tpu.memory_space<vmem>>, vector<1x32x32xf32>
    %144 = vector.shape_cast %143 : vector<1x32x32xf32> to vector<32x32xf32>
    %cst_195 = arith.constant dense<0.000000e+00> : vector<128x32xf32>
    %145 = tpu.matmul %142, %144, %cst_195 {dimension_numbers = #tpu.dot_dimension_numbers<[1], [0], [0], [1], [0, 0, 1, 1], [], []>} : vector<128x32xf32>, vector<32x32xf32>, vector<128x32xf32> -> vector<128x32xf32>
    %146 = arith.addf %140, %145 : vector<128x32xf32>
    %c0_196 = arith.constant 0 : index
    %c0_197 = arith.constant 0 : index
    %c1_198 = arith.constant 1 : index
    %c0_199 = arith.constant 0 : index
    %147 = vector.load %arg24[%c0_196, %c0_197, %c1_198, %c0_199] : memref<2x10x10x32xf32, #tpu.memory_space<vmem>>, vector<2x8x8x32xf32>
    %148 = vector.shape_cast %147 : vector<2x8x8x32xf32> to vector<128x32xf32>
    %c1_200 = arith.constant 1 : index
    %c0_201 = arith.constant 0 : index
    %c0_202 = arith.constant 0 : index
    %149 = vector.load %arg7[%c1_200, %c0_201, %c0_202] : memref<9x32x32xf32, #tpu.memory_space<vmem>>, vector<1x32x32xf32>
    %150 = vector.shape_cast %149 : vector<1x32x32xf32> to vector<32x32xf32>
    %cst_203 = arith.constant dense<0.000000e+00> : vector<128x32xf32>
    %151 = tpu.matmul %148, %150, %cst_203 {dimension_numbers = #tpu.dot_dimension_numbers<[1], [0], [0], [1], [0, 0, 1, 1], [], []>} : vector<128x32xf32>, vector<32x32xf32>, vector<128x32xf32> -> vector<128x32xf32>
    %152 = arith.addf %146, %151 : vector<128x32xf32>
    %c0_204 = arith.constant 0 : index
    %c0_205 = arith.constant 0 : index
    %c2_206 = arith.constant 2 : index
    %c0_207 = arith.constant 0 : index
    %153 = vector.load %arg24[%c0_204, %c0_205, %c2_206, %c0_207] : memref<2x10x10x32xf32, #tpu.memory_space<vmem>>, vector<2x8x8x32xf32>
    %154 = vector.shape_cast %153 : vector<2x8x8x32xf32> to vector<128x32xf32>
    %c2_208 = arith.constant 2 : index
    %c0_209 = arith.constant 0 : index
    %c0_210 = arith.constant 0 : index
    %155 = vector.load %arg7[%c2_208, %c0_209, %c0_210] : memref<9x32x32xf32, #tpu.memory_space<vmem>>, vector<1x32x32xf32>
    %156 = vector.shape_cast %155 : vector<1x32x32xf32> to vector<32x32xf32>
    %cst_211 = arith.constant dense<0.000000e+00> : vector<128x32xf32>
    %157 = tpu.matmul %154, %156, %cst_211 {dimension_numbers = #tpu.dot_dimension_numbers<[1], [0], [0], [1], [0, 0, 1, 1], [], []>} : vector<128x32xf32>, vector<32x32xf32>, vector<128x32xf32> -> vector<128x32xf32>
    %158 = arith.addf %152, %157 : vector<128x32xf32>
    %c0_212 = arith.constant 0 : index
    %c1_213 = arith.constant 1 : index
    %c0_214 = arith.constant 0 : index
    %c0_215 = arith.constant 0 : index
    %159 = vector.load %arg24[%c0_212, %c1_213, %c0_214, %c0_215] : memref<2x10x10x32xf32, #tpu.memory_space<vmem>>, vector<2x8x8x32xf32>
    %160 = vector.shape_cast %159 : vector<2x8x8x32xf32> to vector<128x32xf32>
    %c3_216 = arith.constant 3 : index
    %c0_217 = arith.constant 0 : index
    %c0_218 = arith.constant 0 : index
    %161 = vector.load %arg7[%c3_216, %c0_217, %c0_218] : memref<9x32x32xf32, #tpu.memory_space<vmem>>, vector<1x32x32xf32>
    %162 = vector.shape_cast %161 : vector<1x32x32xf32> to vector<32x32xf32>
    %cst_219 = arith.constant dense<0.000000e+00> : vector<128x32xf32>
    %163 = tpu.matmul %160, %162, %cst_219 {dimension_numbers = #tpu.dot_dimension_numbers<[1], [0], [0], [1], [0, 0, 1, 1], [], []>} : vector<128x32xf32>, vector<32x32xf32>, vector<128x32xf32> -> vector<128x32xf32>
    %164 = arith.addf %158, %163 : vector<128x32xf32>
    %c0_220 = arith.constant 0 : index
    %c1_221 = arith.constant 1 : index
    %c1_222 = arith.constant 1 : index
    %c0_223 = arith.constant 0 : index
    %165 = vector.load %arg24[%c0_220, %c1_221, %c1_222, %c0_223] : memref<2x10x10x32xf32, #tpu.memory_space<vmem>>, vector<2x8x8x32xf32>
    %166 = vector.shape_cast %165 : vector<2x8x8x32xf32> to vector<128x32xf32>
    %c4_224 = arith.constant 4 : index
    %c0_225 = arith.constant 0 : index
    %c0_226 = arith.constant 0 : index
    %167 = vector.load %arg7[%c4_224, %c0_225, %c0_226] : memref<9x32x32xf32, #tpu.memory_space<vmem>>, vector<1x32x32xf32>
    %168 = vector.shape_cast %167 : vector<1x32x32xf32> to vector<32x32xf32>
    %cst_227 = arith.constant dense<0.000000e+00> : vector<128x32xf32>
    %169 = tpu.matmul %166, %168, %cst_227 {dimension_numbers = #tpu.dot_dimension_numbers<[1], [0], [0], [1], [0, 0, 1, 1], [], []>} : vector<128x32xf32>, vector<32x32xf32>, vector<128x32xf32> -> vector<128x32xf32>
    %170 = arith.addf %164, %169 : vector<128x32xf32>
    %c0_228 = arith.constant 0 : index
    %c1_229 = arith.constant 1 : index
    %c2_230 = arith.constant 2 : index
    %c0_231 = arith.constant 0 : index
    %171 = vector.load %arg24[%c0_228, %c1_229, %c2_230, %c0_231] : memref<2x10x10x32xf32, #tpu.memory_space<vmem>>, vector<2x8x8x32xf32>
    %172 = vector.shape_cast %171 : vector<2x8x8x32xf32> to vector<128x32xf32>
    %c5_232 = arith.constant 5 : index
    %c0_233 = arith.constant 0 : index
    %c0_234 = arith.constant 0 : index
    %173 = vector.load %arg7[%c5_232, %c0_233, %c0_234] : memref<9x32x32xf32, #tpu.memory_space<vmem>>, vector<1x32x32xf32>
    %174 = vector.shape_cast %173 : vector<1x32x32xf32> to vector<32x32xf32>
    %cst_235 = arith.constant dense<0.000000e+00> : vector<128x32xf32>
    %175 = tpu.matmul %172, %174, %cst_235 {dimension_numbers = #tpu.dot_dimension_numbers<[1], [0], [0], [1], [0, 0, 1, 1], [], []>} : vector<128x32xf32>, vector<32x32xf32>, vector<128x32xf32> -> vector<128x32xf32>
    %176 = arith.addf %170, %175 : vector<128x32xf32>
    %c0_236 = arith.constant 0 : index
    %c2_237 = arith.constant 2 : index
    %c0_238 = arith.constant 0 : index
    %c0_239 = arith.constant 0 : index
    %177 = vector.load %arg24[%c0_236, %c2_237, %c0_238, %c0_239] : memref<2x10x10x32xf32, #tpu.memory_space<vmem>>, vector<2x8x8x32xf32>
    %178 = vector.shape_cast %177 : vector<2x8x8x32xf32> to vector<128x32xf32>
    %c6_240 = arith.constant 6 : index
    %c0_241 = arith.constant 0 : index
    %c0_242 = arith.constant 0 : index
    %179 = vector.load %arg7[%c6_240, %c0_241, %c0_242] : memref<9x32x32xf32, #tpu.memory_space<vmem>>, vector<1x32x32xf32>
    %180 = vector.shape_cast %179 : vector<1x32x32xf32> to vector<32x32xf32>
    %cst_243 = arith.constant dense<0.000000e+00> : vector<128x32xf32>
    %181 = tpu.matmul %178, %180, %cst_243 {dimension_numbers = #tpu.dot_dimension_numbers<[1], [0], [0], [1], [0, 0, 1, 1], [], []>} : vector<128x32xf32>, vector<32x32xf32>, vector<128x32xf32> -> vector<128x32xf32>
    %182 = arith.addf %176, %181 : vector<128x32xf32>
    %c0_244 = arith.constant 0 : index
    %c2_245 = arith.constant 2 : index
    %c1_246 = arith.constant 1 : index
    %c0_247 = arith.constant 0 : index
    %183 = vector.load %arg24[%c0_244, %c2_245, %c1_246, %c0_247] : memref<2x10x10x32xf32, #tpu.memory_space<vmem>>, vector<2x8x8x32xf32>
    %184 = vector.shape_cast %183 : vector<2x8x8x32xf32> to vector<128x32xf32>
    %c7_248 = arith.constant 7 : index
    %c0_249 = arith.constant 0 : index
    %c0_250 = arith.constant 0 : index
    %185 = vector.load %arg7[%c7_248, %c0_249, %c0_250] : memref<9x32x32xf32, #tpu.memory_space<vmem>>, vector<1x32x32xf32>
    %186 = vector.shape_cast %185 : vector<1x32x32xf32> to vector<32x32xf32>
    %cst_251 = arith.constant dense<0.000000e+00> : vector<128x32xf32>
    %187 = tpu.matmul %184, %186, %cst_251 {dimension_numbers = #tpu.dot_dimension_numbers<[1], [0], [0], [1], [0, 0, 1, 1], [], []>} : vector<128x32xf32>, vector<32x32xf32>, vector<128x32xf32> -> vector<128x32xf32>
    %188 = arith.addf %182, %187 : vector<128x32xf32>
    %c0_252 = arith.constant 0 : index
    %c2_253 = arith.constant 2 : index
    %c2_254 = arith.constant 2 : index
    %c0_255 = arith.constant 0 : index
    %189 = vector.load %arg24[%c0_252, %c2_253, %c2_254, %c0_255] : memref<2x10x10x32xf32, #tpu.memory_space<vmem>>, vector<2x8x8x32xf32>
    %190 = vector.shape_cast %189 : vector<2x8x8x32xf32> to vector<128x32xf32>
    %c8_256 = arith.constant 8 : index
    %c0_257 = arith.constant 0 : index
    %c0_258 = arith.constant 0 : index
    %191 = vector.load %arg7[%c8_256, %c0_257, %c0_258] : memref<9x32x32xf32, #tpu.memory_space<vmem>>, vector<1x32x32xf32>
    %192 = vector.shape_cast %191 : vector<1x32x32xf32> to vector<32x32xf32>
    %cst_259 = arith.constant dense<0.000000e+00> : vector<128x32xf32>
    %193 = tpu.matmul %190, %192, %cst_259 {dimension_numbers = #tpu.dot_dimension_numbers<[1], [0], [0], [1], [0, 0, 1, 1], [], []>} : vector<128x32xf32>, vector<32x32xf32>, vector<128x32xf32> -> vector<128x32xf32>
    %194 = arith.addf %188, %193 : vector<128x32xf32>
    %c0_260 = arith.constant 0 : index
    %c0_261 = arith.constant 0 : index
    %195 = vector.load %arg8[%c0_260, %c0_261] : memref<1x32xf32, #tpu.memory_space<vmem>>, vector<1x32xf32>
    %196 = vector.broadcast %195 : vector<1x32xf32> to vector<128x32xf32>
    %197 = arith.mulf %194, %196 : vector<128x32xf32>
    %c0_262 = arith.constant 0 : index
    %c0_263 = arith.constant 0 : index
    %198 = vector.load %arg9[%c0_262, %c0_263] : memref<1x32xf32, #tpu.memory_space<vmem>>, vector<1x32xf32>
    %199 = vector.broadcast %198 : vector<1x32xf32> to vector<128x32xf32>
    %200 = arith.addf %197, %199 : vector<128x32xf32>
    %201 = arith.addf %200, %137 : vector<128x32xf32>
    %cst_264 = arith.constant 0.000000e+00 : f32
    %202 = vector.broadcast %cst_264 : f32 to vector<128x32xf32>
    %203 = arith.maximumf %201, %202 : vector<128x32xf32>
    %204 = vector.shape_cast %203 : vector<128x32xf32> to vector<2x8x8x32xf32>
    %c0_265 = arith.constant 0 : index
    %c0_266 = arith.constant 0 : index
    %c0_267 = arith.constant 0 : index
    %c0_268 = arith.constant 0 : index
    %205 = vector.load %arg25[%c0_265, %c0_266, %c0_267, %c0_268] : memref<2x8x8x32xf32, #tpu.memory_space<vmem>>, vector<2x8x8x32xf32>
    tpu.vector_store %arg25[%c0_265, %c0_266, %c0_267, %c0_268], %204 {strides = array<i32>} : memref<2x8x8x32xf32, #tpu.memory_space<vmem>>, vector<2x8x8x32xf32>,
    %c0_269 = arith.constant 0 : index
    %c0_270 = arith.constant 0 : index
    %c0_271 = arith.constant 0 : index
    %c0_272 = arith.constant 0 : index
    %206 = vector.load %arg25[%c0_269, %c0_270, %c0_271, %c0_272] : memref<2x8x8x32xf32, #tpu.memory_space<vmem>>, vector<2x8x8x32xf32>
    %c0_273 = arith.constant 0 : index
    %c1_274 = arith.constant 1 : index
    %c1_275 = arith.constant 1 : index
    %c0_276 = arith.constant 0 : index
    %207 = vector.load %arg24[%c0_273, %c1_274, %c1_275, %c0_276] : memref<2x10x10x32xf32, #tpu.memory_space<vmem>>, vector<2x8x8x32xf32>
    tpu.vector_store %arg24[%c0_273, %c1_274, %c1_275, %c0_276], %206 {strides = array<i32>} : memref<2x10x10x32xf32, #tpu.memory_space<vmem>>, vector<2x8x8x32xf32>,
    %cst_277 = arith.constant 0.000000e+00 : f32
    %208 = vector.broadcast %cst_277 : f32 to vector<128x32xf32>
    %c0_278 = arith.constant 0 : index
    %c0_279 = arith.constant 0 : index
    %c0_280 = arith.constant 0 : index
    %c0_281 = arith.constant 0 : index
    %209 = vector.load %arg24[%c0_278, %c0_279, %c0_280, %c0_281] : memref<2x10x10x32xf32, #tpu.memory_space<vmem>>, vector<2x8x8x32xf32>
    %210 = vector.shape_cast %209 : vector<2x8x8x32xf32> to vector<128x32xf32>
    %c0_282 = arith.constant 0 : index
    %c0_283 = arith.constant 0 : index
    %c0_284 = arith.constant 0 : index
    %211 = vector.load %arg10[%c0_282, %c0_283, %c0_284] : memref<9x32x32xf32, #tpu.memory_space<vmem>>, vector<1x32x32xf32>
    %212 = vector.shape_cast %211 : vector<1x32x32xf32> to vector<32x32xf32>
    %cst_285 = arith.constant dense<0.000000e+00> : vector<128x32xf32>
    %213 = tpu.matmul %210, %212, %cst_285 {dimension_numbers = #tpu.dot_dimension_numbers<[1], [0], [0], [1], [0, 0, 1, 1], [], []>} : vector<128x32xf32>, vector<32x32xf32>, vector<128x32xf32> -> vector<128x32xf32>
    %214 = arith.addf %208, %213 : vector<128x32xf32>
    %c0_286 = arith.constant 0 : index
    %c0_287 = arith.constant 0 : index
    %c1_288 = arith.constant 1 : index
    %c0_289 = arith.constant 0 : index
    %215 = vector.load %arg24[%c0_286, %c0_287, %c1_288, %c0_289] : memref<2x10x10x32xf32, #tpu.memory_space<vmem>>, vector<2x8x8x32xf32>
    %216 = vector.shape_cast %215 : vector<2x8x8x32xf32> to vector<128x32xf32>
    %c1_290 = arith.constant 1 : index
    %c0_291 = arith.constant 0 : index
    %c0_292 = arith.constant 0 : index
    %217 = vector.load %arg10[%c1_290, %c0_291, %c0_292] : memref<9x32x32xf32, #tpu.memory_space<vmem>>, vector<1x32x32xf32>
    %218 = vector.shape_cast %217 : vector<1x32x32xf32> to vector<32x32xf32>
    %cst_293 = arith.constant dense<0.000000e+00> : vector<128x32xf32>
    %219 = tpu.matmul %216, %218, %cst_293 {dimension_numbers = #tpu.dot_dimension_numbers<[1], [0], [0], [1], [0, 0, 1, 1], [], []>} : vector<128x32xf32>, vector<32x32xf32>, vector<128x32xf32> -> vector<128x32xf32>
    %220 = arith.addf %214, %219 : vector<128x32xf32>
    %c0_294 = arith.constant 0 : index
    %c0_295 = arith.constant 0 : index
    %c2_296 = arith.constant 2 : index
    %c0_297 = arith.constant 0 : index
    %221 = vector.load %arg24[%c0_294, %c0_295, %c2_296, %c0_297] : memref<2x10x10x32xf32, #tpu.memory_space<vmem>>, vector<2x8x8x32xf32>
    %222 = vector.shape_cast %221 : vector<2x8x8x32xf32> to vector<128x32xf32>
    %c2_298 = arith.constant 2 : index
    %c0_299 = arith.constant 0 : index
    %c0_300 = arith.constant 0 : index
    %223 = vector.load %arg10[%c2_298, %c0_299, %c0_300] : memref<9x32x32xf32, #tpu.memory_space<vmem>>, vector<1x32x32xf32>
    %224 = vector.shape_cast %223 : vector<1x32x32xf32> to vector<32x32xf32>
    %cst_301 = arith.constant dense<0.000000e+00> : vector<128x32xf32>
    %225 = tpu.matmul %222, %224, %cst_301 {dimension_numbers = #tpu.dot_dimension_numbers<[1], [0], [0], [1], [0, 0, 1, 1], [], []>} : vector<128x32xf32>, vector<32x32xf32>, vector<128x32xf32> -> vector<128x32xf32>
    %226 = arith.addf %220, %225 : vector<128x32xf32>
    %c0_302 = arith.constant 0 : index
    %c1_303 = arith.constant 1 : index
    %c0_304 = arith.constant 0 : index
    %c0_305 = arith.constant 0 : index
    %227 = vector.load %arg24[%c0_302, %c1_303, %c0_304, %c0_305] : memref<2x10x10x32xf32, #tpu.memory_space<vmem>>, vector<2x8x8x32xf32>
    %228 = vector.shape_cast %227 : vector<2x8x8x32xf32> to vector<128x32xf32>
    %c3_306 = arith.constant 3 : index
    %c0_307 = arith.constant 0 : index
    %c0_308 = arith.constant 0 : index
    %229 = vector.load %arg10[%c3_306, %c0_307, %c0_308] : memref<9x32x32xf32, #tpu.memory_space<vmem>>, vector<1x32x32xf32>
    %230 = vector.shape_cast %229 : vector<1x32x32xf32> to vector<32x32xf32>
    %cst_309 = arith.constant dense<0.000000e+00> : vector<128x32xf32>
    %231 = tpu.matmul %228, %230, %cst_309 {dimension_numbers = #tpu.dot_dimension_numbers<[1], [0], [0], [1], [0, 0, 1, 1], [], []>} : vector<128x32xf32>, vector<32x32xf32>, vector<128x32xf32> -> vector<128x32xf32>
    %232 = arith.addf %226, %231 : vector<128x32xf32>
    %c0_310 = arith.constant 0 : index
    %c1_311 = arith.constant 1 : index
    %c1_312 = arith.constant 1 : index
    %c0_313 = arith.constant 0 : index
    %233 = vector.load %arg24[%c0_310, %c1_311, %c1_312, %c0_313] : memref<2x10x10x32xf32, #tpu.memory_space<vmem>>, vector<2x8x8x32xf32>
    %234 = vector.shape_cast %233 : vector<2x8x8x32xf32> to vector<128x32xf32>
    %c4_314 = arith.constant 4 : index
    %c0_315 = arith.constant 0 : index
    %c0_316 = arith.constant 0 : index
    %235 = vector.load %arg10[%c4_314, %c0_315, %c0_316] : memref<9x32x32xf32, #tpu.memory_space<vmem>>, vector<1x32x32xf32>
    %236 = vector.shape_cast %235 : vector<1x32x32xf32> to vector<32x32xf32>
    %cst_317 = arith.constant dense<0.000000e+00> : vector<128x32xf32>
    %237 = tpu.matmul %234, %236, %cst_317 {dimension_numbers = #tpu.dot_dimension_numbers<[1], [0], [0], [1], [0, 0, 1, 1], [], []>} : vector<128x32xf32>, vector<32x32xf32>, vector<128x32xf32> -> vector<128x32xf32>
    %238 = arith.addf %232, %237 : vector<128x32xf32>
    %c0_318 = arith.constant 0 : index
    %c1_319 = arith.constant 1 : index
    %c2_320 = arith.constant 2 : index
    %c0_321 = arith.constant 0 : index
    %239 = vector.load %arg24[%c0_318, %c1_319, %c2_320, %c0_321] : memref<2x10x10x32xf32, #tpu.memory_space<vmem>>, vector<2x8x8x32xf32>
    %240 = vector.shape_cast %239 : vector<2x8x8x32xf32> to vector<128x32xf32>
    %c5_322 = arith.constant 5 : index
    %c0_323 = arith.constant 0 : index
    %c0_324 = arith.constant 0 : index
    %241 = vector.load %arg10[%c5_322, %c0_323, %c0_324] : memref<9x32x32xf32, #tpu.memory_space<vmem>>, vector<1x32x32xf32>
    %242 = vector.shape_cast %241 : vector<1x32x32xf32> to vector<32x32xf32>
    %cst_325 = arith.constant dense<0.000000e+00> : vector<128x32xf32>
    %243 = tpu.matmul %240, %242, %cst_325 {dimension_numbers = #tpu.dot_dimension_numbers<[1], [0], [0], [1], [0, 0, 1, 1], [], []>} : vector<128x32xf32>, vector<32x32xf32>, vector<128x32xf32> -> vector<128x32xf32>
    %244 = arith.addf %238, %243 : vector<128x32xf32>
    %c0_326 = arith.constant 0 : index
    %c2_327 = arith.constant 2 : index
    %c0_328 = arith.constant 0 : index
    %c0_329 = arith.constant 0 : index
    %245 = vector.load %arg24[%c0_326, %c2_327, %c0_328, %c0_329] : memref<2x10x10x32xf32, #tpu.memory_space<vmem>>, vector<2x8x8x32xf32>
    %246 = vector.shape_cast %245 : vector<2x8x8x32xf32> to vector<128x32xf32>
    %c6_330 = arith.constant 6 : index
    %c0_331 = arith.constant 0 : index
    %c0_332 = arith.constant 0 : index
    %247 = vector.load %arg10[%c6_330, %c0_331, %c0_332] : memref<9x32x32xf32, #tpu.memory_space<vmem>>, vector<1x32x32xf32>
    %248 = vector.shape_cast %247 : vector<1x32x32xf32> to vector<32x32xf32>
    %cst_333 = arith.constant dense<0.000000e+00> : vector<128x32xf32>
    %249 = tpu.matmul %246, %248, %cst_333 {dimension_numbers = #tpu.dot_dimension_numbers<[1], [0], [0], [1], [0, 0, 1, 1], [], []>} : vector<128x32xf32>, vector<32x32xf32>, vector<128x32xf32> -> vector<128x32xf32>
    %250 = arith.addf %244, %249 : vector<128x32xf32>
    %c0_334 = arith.constant 0 : index
    %c2_335 = arith.constant 2 : index
    %c1_336 = arith.constant 1 : index
    %c0_337 = arith.constant 0 : index
    %251 = vector.load %arg24[%c0_334, %c2_335, %c1_336, %c0_337] : memref<2x10x10x32xf32, #tpu.memory_space<vmem>>, vector<2x8x8x32xf32>
    %252 = vector.shape_cast %251 : vector<2x8x8x32xf32> to vector<128x32xf32>
    %c7_338 = arith.constant 7 : index
    %c0_339 = arith.constant 0 : index
    %c0_340 = arith.constant 0 : index
    %253 = vector.load %arg10[%c7_338, %c0_339, %c0_340] : memref<9x32x32xf32, #tpu.memory_space<vmem>>, vector<1x32x32xf32>
    %254 = vector.shape_cast %253 : vector<1x32x32xf32> to vector<32x32xf32>
    %cst_341 = arith.constant dense<0.000000e+00> : vector<128x32xf32>
    %255 = tpu.matmul %252, %254, %cst_341 {dimension_numbers = #tpu.dot_dimension_numbers<[1], [0], [0], [1], [0, 0, 1, 1], [], []>} : vector<128x32xf32>, vector<32x32xf32>, vector<128x32xf32> -> vector<128x32xf32>
    %256 = arith.addf %250, %255 : vector<128x32xf32>
    %c0_342 = arith.constant 0 : index
    %c2_343 = arith.constant 2 : index
    %c2_344 = arith.constant 2 : index
    %c0_345 = arith.constant 0 : index
    %257 = vector.load %arg24[%c0_342, %c2_343, %c2_344, %c0_345] : memref<2x10x10x32xf32, #tpu.memory_space<vmem>>, vector<2x8x8x32xf32>
    %258 = vector.shape_cast %257 : vector<2x8x8x32xf32> to vector<128x32xf32>
    %c8_346 = arith.constant 8 : index
    %c0_347 = arith.constant 0 : index
    %c0_348 = arith.constant 0 : index
    %259 = vector.load %arg10[%c8_346, %c0_347, %c0_348] : memref<9x32x32xf32, #tpu.memory_space<vmem>>, vector<1x32x32xf32>
    %260 = vector.shape_cast %259 : vector<1x32x32xf32> to vector<32x32xf32>
    %cst_349 = arith.constant dense<0.000000e+00> : vector<128x32xf32>
    %261 = tpu.matmul %258, %260, %cst_349 {dimension_numbers = #tpu.dot_dimension_numbers<[1], [0], [0], [1], [0, 0, 1, 1], [], []>} : vector<128x32xf32>, vector<32x32xf32>, vector<128x32xf32> -> vector<128x32xf32>
    %262 = arith.addf %256, %261 : vector<128x32xf32>
    %c0_350 = arith.constant 0 : index
    %c0_351 = arith.constant 0 : index
    %263 = vector.load %arg11[%c0_350, %c0_351] : memref<1x32xf32, #tpu.memory_space<vmem>>, vector<1x32xf32>
    %264 = vector.broadcast %263 : vector<1x32xf32> to vector<128x32xf32>
    %265 = arith.mulf %262, %264 : vector<128x32xf32>
    %c0_352 = arith.constant 0 : index
    %c0_353 = arith.constant 0 : index
    %266 = vector.load %arg12[%c0_352, %c0_353] : memref<1x32xf32, #tpu.memory_space<vmem>>, vector<1x32xf32>
    %267 = vector.broadcast %266 : vector<1x32xf32> to vector<128x32xf32>
    %268 = arith.addf %265, %267 : vector<128x32xf32>
    %cst_354 = arith.constant 0.000000e+00 : f32
    %269 = vector.broadcast %cst_354 : f32 to vector<128x32xf32>
    %270 = arith.maximumf %268, %269 : vector<128x32xf32>
    %271 = vector.shape_cast %270 : vector<128x32xf32> to vector<2x8x8x32xf32>
    %c0_355 = arith.constant 0 : index
    %c0_356 = arith.constant 0 : index
    %c0_357 = arith.constant 0 : index
    %c0_358 = arith.constant 0 : index
    %272 = vector.load %arg26[%c0_355, %c0_356, %c0_357, %c0_358] : memref<2x8x8x32xf32, #tpu.memory_space<vmem>>, vector<2x8x8x32xf32>
    tpu.vector_store %arg26[%c0_355, %c0_356, %c0_357, %c0_358], %271 {strides = array<i32>} : memref<2x8x8x32xf32, #tpu.memory_space<vmem>>, vector<2x8x8x32xf32>,
    %c0_359 = arith.constant 0 : index
    %c0_360 = arith.constant 0 : index
    %c0_361 = arith.constant 0 : index
    %c0_362 = arith.constant 0 : index
    %273 = vector.load %arg25[%c0_359, %c0_360, %c0_361, %c0_362] : memref<2x8x8x32xf32, #tpu.memory_space<vmem>>, vector<2x8x8x32xf32>
    %274 = vector.shape_cast %273 : vector<2x8x8x32xf32> to vector<128x32xf32>
    %c0_363 = arith.constant 0 : index
    %c0_364 = arith.constant 0 : index
    %c0_365 = arith.constant 0 : index
    %c0_366 = arith.constant 0 : index
    %275 = vector.load %arg26[%c0_363, %c0_364, %c0_365, %c0_366] : memref<2x8x8x32xf32, #tpu.memory_space<vmem>>, vector<2x8x8x32xf32>
    %c0_367 = arith.constant 0 : index
    %c1_368 = arith.constant 1 : index
    %c1_369 = arith.constant 1 : index
    %c0_370 = arith.constant 0 : index
    %276 = vector.load %arg24[%c0_367, %c1_368, %c1_369, %c0_370] : memref<2x10x10x32xf32, #tpu.memory_space<vmem>>, vector<2x8x8x32xf32>
    tpu.vector_store %arg24[%c0_367, %c1_368, %c1_369, %c0_370], %275 {strides = array<i32>} : memref<2x10x10x32xf32, #tpu.memory_space<vmem>>, vector<2x8x8x32xf32>,
    %cst_371 = arith.constant 0.000000e+00 : f32
    %277 = vector.broadcast %cst_371 : f32 to vector<128x32xf32>
    %c0_372 = arith.constant 0 : index
    %c0_373 = arith.constant 0 : index
    %c0_374 = arith.constant 0 : index
    %c0_375 = arith.constant 0 : index
    %278 = vector.load %arg24[%c0_372, %c0_373, %c0_374, %c0_375] : memref<2x10x10x32xf32, #tpu.memory_space<vmem>>, vector<2x8x8x32xf32>
    %279 = vector.shape_cast %278 : vector<2x8x8x32xf32> to vector<128x32xf32>
    %c0_376 = arith.constant 0 : index
    %c0_377 = arith.constant 0 : index
    %c0_378 = arith.constant 0 : index
    %280 = vector.load %arg13[%c0_376, %c0_377, %c0_378] : memref<9x32x32xf32, #tpu.memory_space<vmem>>, vector<1x32x32xf32>
    %281 = vector.shape_cast %280 : vector<1x32x32xf32> to vector<32x32xf32>
    %cst_379 = arith.constant dense<0.000000e+00> : vector<128x32xf32>
    %282 = tpu.matmul %279, %281, %cst_379 {dimension_numbers = #tpu.dot_dimension_numbers<[1], [0], [0], [1], [0, 0, 1, 1], [], []>} : vector<128x32xf32>, vector<32x32xf32>, vector<128x32xf32> -> vector<128x32xf32>
    %283 = arith.addf %277, %282 : vector<128x32xf32>
    %c0_380 = arith.constant 0 : index
    %c0_381 = arith.constant 0 : index
    %c1_382 = arith.constant 1 : index
    %c0_383 = arith.constant 0 : index
    %284 = vector.load %arg24[%c0_380, %c0_381, %c1_382, %c0_383] : memref<2x10x10x32xf32, #tpu.memory_space<vmem>>, vector<2x8x8x32xf32>
    %285 = vector.shape_cast %284 : vector<2x8x8x32xf32> to vector<128x32xf32>
    %c1_384 = arith.constant 1 : index
    %c0_385 = arith.constant 0 : index
    %c0_386 = arith.constant 0 : index
    %286 = vector.load %arg13[%c1_384, %c0_385, %c0_386] : memref<9x32x32xf32, #tpu.memory_space<vmem>>, vector<1x32x32xf32>
    %287 = vector.shape_cast %286 : vector<1x32x32xf32> to vector<32x32xf32>
    %cst_387 = arith.constant dense<0.000000e+00> : vector<128x32xf32>
    %288 = tpu.matmul %285, %287, %cst_387 {dimension_numbers = #tpu.dot_dimension_numbers<[1], [0], [0], [1], [0, 0, 1, 1], [], []>} : vector<128x32xf32>, vector<32x32xf32>, vector<128x32xf32> -> vector<128x32xf32>
    %289 = arith.addf %283, %288 : vector<128x32xf32>
    %c0_388 = arith.constant 0 : index
    %c0_389 = arith.constant 0 : index
    %c2_390 = arith.constant 2 : index
    %c0_391 = arith.constant 0 : index
    %290 = vector.load %arg24[%c0_388, %c0_389, %c2_390, %c0_391] : memref<2x10x10x32xf32, #tpu.memory_space<vmem>>, vector<2x8x8x32xf32>
    %291 = vector.shape_cast %290 : vector<2x8x8x32xf32> to vector<128x32xf32>
    %c2_392 = arith.constant 2 : index
    %c0_393 = arith.constant 0 : index
    %c0_394 = arith.constant 0 : index
    %292 = vector.load %arg13[%c2_392, %c0_393, %c0_394] : memref<9x32x32xf32, #tpu.memory_space<vmem>>, vector<1x32x32xf32>
    %293 = vector.shape_cast %292 : vector<1x32x32xf32> to vector<32x32xf32>
    %cst_395 = arith.constant dense<0.000000e+00> : vector<128x32xf32>
    %294 = tpu.matmul %291, %293, %cst_395 {dimension_numbers = #tpu.dot_dimension_numbers<[1], [0], [0], [1], [0, 0, 1, 1], [], []>} : vector<128x32xf32>, vector<32x32xf32>, vector<128x32xf32> -> vector<128x32xf32>
    %295 = arith.addf %289, %294 : vector<128x32xf32>
    %c0_396 = arith.constant 0 : index
    %c1_397 = arith.constant 1 : index
    %c0_398 = arith.constant 0 : index
    %c0_399 = arith.constant 0 : index
    %296 = vector.load %arg24[%c0_396, %c1_397, %c0_398, %c0_399] : memref<2x10x10x32xf32, #tpu.memory_space<vmem>>, vector<2x8x8x32xf32>
    %297 = vector.shape_cast %296 : vector<2x8x8x32xf32> to vector<128x32xf32>
    %c3_400 = arith.constant 3 : index
    %c0_401 = arith.constant 0 : index
    %c0_402 = arith.constant 0 : index
    %298 = vector.load %arg13[%c3_400, %c0_401, %c0_402] : memref<9x32x32xf32, #tpu.memory_space<vmem>>, vector<1x32x32xf32>
    %299 = vector.shape_cast %298 : vector<1x32x32xf32> to vector<32x32xf32>
    %cst_403 = arith.constant dense<0.000000e+00> : vector<128x32xf32>
    %300 = tpu.matmul %297, %299, %cst_403 {dimension_numbers = #tpu.dot_dimension_numbers<[1], [0], [0], [1], [0, 0, 1, 1], [], []>} : vector<128x32xf32>, vector<32x32xf32>, vector<128x32xf32> -> vector<128x32xf32>
    %301 = arith.addf %295, %300 : vector<128x32xf32>
    %c0_404 = arith.constant 0 : index
    %c1_405 = arith.constant 1 : index
    %c1_406 = arith.constant 1 : index
    %c0_407 = arith.constant 0 : index
    %302 = vector.load %arg24[%c0_404, %c1_405, %c1_406, %c0_407] : memref<2x10x10x32xf32, #tpu.memory_space<vmem>>, vector<2x8x8x32xf32>
    %303 = vector.shape_cast %302 : vector<2x8x8x32xf32> to vector<128x32xf32>
    %c4_408 = arith.constant 4 : index
    %c0_409 = arith.constant 0 : index
    %c0_410 = arith.constant 0 : index
    %304 = vector.load %arg13[%c4_408, %c0_409, %c0_410] : memref<9x32x32xf32, #tpu.memory_space<vmem>>, vector<1x32x32xf32>
    %305 = vector.shape_cast %304 : vector<1x32x32xf32> to vector<32x32xf32>
    %cst_411 = arith.constant dense<0.000000e+00> : vector<128x32xf32>
    %306 = tpu.matmul %303, %305, %cst_411 {dimension_numbers = #tpu.dot_dimension_numbers<[1], [0], [0], [1], [0, 0, 1, 1], [], []>} : vector<128x32xf32>, vector<32x32xf32>, vector<128x32xf32> -> vector<128x32xf32>
    %307 = arith.addf %301, %306 : vector<128x32xf32>
    %c0_412 = arith.constant 0 : index
    %c1_413 = arith.constant 1 : index
    %c2_414 = arith.constant 2 : index
    %c0_415 = arith.constant 0 : index
    %308 = vector.load %arg24[%c0_412, %c1_413, %c2_414, %c0_415] : memref<2x10x10x32xf32, #tpu.memory_space<vmem>>, vector<2x8x8x32xf32>
    %309 = vector.shape_cast %308 : vector<2x8x8x32xf32> to vector<128x32xf32>
    %c5_416 = arith.constant 5 : index
    %c0_417 = arith.constant 0 : index
    %c0_418 = arith.constant 0 : index
    %310 = vector.load %arg13[%c5_416, %c0_417, %c0_418] : memref<9x32x32xf32, #tpu.memory_space<vmem>>, vector<1x32x32xf32>
    %311 = vector.shape_cast %310 : vector<1x32x32xf32> to vector<32x32xf32>
    %cst_419 = arith.constant dense<0.000000e+00> : vector<128x32xf32>
    %312 = tpu.matmul %309, %311, %cst_419 {dimension_numbers = #tpu.dot_dimension_numbers<[1], [0], [0], [1], [0, 0, 1, 1], [], []>} : vector<128x32xf32>, vector<32x32xf32>, vector<128x32xf32> -> vector<128x32xf32>
    %313 = arith.addf %307, %312 : vector<128x32xf32>
    %c0_420 = arith.constant 0 : index
    %c2_421 = arith.constant 2 : index
    %c0_422 = arith.constant 0 : index
    %c0_423 = arith.constant 0 : index
    %314 = vector.load %arg24[%c0_420, %c2_421, %c0_422, %c0_423] : memref<2x10x10x32xf32, #tpu.memory_space<vmem>>, vector<2x8x8x32xf32>
    %315 = vector.shape_cast %314 : vector<2x8x8x32xf32> to vector<128x32xf32>
    %c6_424 = arith.constant 6 : index
    %c0_425 = arith.constant 0 : index
    %c0_426 = arith.constant 0 : index
    %316 = vector.load %arg13[%c6_424, %c0_425, %c0_426] : memref<9x32x32xf32, #tpu.memory_space<vmem>>, vector<1x32x32xf32>
    %317 = vector.shape_cast %316 : vector<1x32x32xf32> to vector<32x32xf32>
    %cst_427 = arith.constant dense<0.000000e+00> : vector<128x32xf32>
    %318 = tpu.matmul %315, %317, %cst_427 {dimension_numbers = #tpu.dot_dimension_numbers<[1], [0], [0], [1], [0, 0, 1, 1], [], []>} : vector<128x32xf32>, vector<32x32xf32>, vector<128x32xf32> -> vector<128x32xf32>
    %319 = arith.addf %313, %318 : vector<128x32xf32>
    %c0_428 = arith.constant 0 : index
    %c2_429 = arith.constant 2 : index
    %c1_430 = arith.constant 1 : index
    %c0_431 = arith.constant 0 : index
    %320 = vector.load %arg24[%c0_428, %c2_429, %c1_430, %c0_431] : memref<2x10x10x32xf32, #tpu.memory_space<vmem>>, vector<2x8x8x32xf32>
    %321 = vector.shape_cast %320 : vector<2x8x8x32xf32> to vector<128x32xf32>
    %c7_432 = arith.constant 7 : index
    %c0_433 = arith.constant 0 : index
    %c0_434 = arith.constant 0 : index
    %322 = vector.load %arg13[%c7_432, %c0_433, %c0_434] : memref<9x32x32xf32, #tpu.memory_space<vmem>>, vector<1x32x32xf32>
    %323 = vector.shape_cast %322 : vector<1x32x32xf32> to vector<32x32xf32>
    %cst_435 = arith.constant dense<0.000000e+00> : vector<128x32xf32>
    %324 = tpu.matmul %321, %323, %cst_435 {dimension_numbers = #tpu.dot_dimension_numbers<[1], [0], [0], [1], [0, 0, 1, 1], [], []>} : vector<128x32xf32>, vector<32x32xf32>, vector<128x32xf32> -> vector<128x32xf32>
    %325 = arith.addf %319, %324 : vector<128x32xf32>
    %c0_436 = arith.constant 0 : index
    %c2_437 = arith.constant 2 : index
    %c2_438 = arith.constant 2 : index
    %c0_439 = arith.constant 0 : index
    %326 = vector.load %arg24[%c0_436, %c2_437, %c2_438, %c0_439] : memref<2x10x10x32xf32, #tpu.memory_space<vmem>>, vector<2x8x8x32xf32>
    %327 = vector.shape_cast %326 : vector<2x8x8x32xf32> to vector<128x32xf32>
    %c8_440 = arith.constant 8 : index
    %c0_441 = arith.constant 0 : index
    %c0_442 = arith.constant 0 : index
    %328 = vector.load %arg13[%c8_440, %c0_441, %c0_442] : memref<9x32x32xf32, #tpu.memory_space<vmem>>, vector<1x32x32xf32>
    %329 = vector.shape_cast %328 : vector<1x32x32xf32> to vector<32x32xf32>
    %cst_443 = arith.constant dense<0.000000e+00> : vector<128x32xf32>
    %330 = tpu.matmul %327, %329, %cst_443 {dimension_numbers = #tpu.dot_dimension_numbers<[1], [0], [0], [1], [0, 0, 1, 1], [], []>} : vector<128x32xf32>, vector<32x32xf32>, vector<128x32xf32> -> vector<128x32xf32>
    %331 = arith.addf %325, %330 : vector<128x32xf32>
    %c0_444 = arith.constant 0 : index
    %c0_445 = arith.constant 0 : index
    %332 = vector.load %arg14[%c0_444, %c0_445] : memref<1x32xf32, #tpu.memory_space<vmem>>, vector<1x32xf32>
    %333 = vector.broadcast %332 : vector<1x32xf32> to vector<128x32xf32>
    %334 = arith.mulf %331, %333 : vector<128x32xf32>
    %c0_446 = arith.constant 0 : index
    %c0_447 = arith.constant 0 : index
    %335 = vector.load %arg15[%c0_446, %c0_447] : memref<1x32xf32, #tpu.memory_space<vmem>>, vector<1x32xf32>
    %336 = vector.broadcast %335 : vector<1x32xf32> to vector<128x32xf32>
    %337 = arith.addf %334, %336 : vector<128x32xf32>
    %338 = arith.addf %337, %274 : vector<128x32xf32>
    %cst_448 = arith.constant 0.000000e+00 : f32
    %339 = vector.broadcast %cst_448 : f32 to vector<128x32xf32>
    %340 = arith.maximumf %338, %339 : vector<128x32xf32>
    %341 = vector.shape_cast %340 : vector<128x32xf32> to vector<2x8x8x32xf32>
    %c0_449 = arith.constant 0 : index
    %c0_450 = arith.constant 0 : index
    %c0_451 = arith.constant 0 : index
    %c0_452 = arith.constant 0 : index
    %342 = vector.load %arg25[%c0_449, %c0_450, %c0_451, %c0_452] : memref<2x8x8x32xf32, #tpu.memory_space<vmem>>, vector<2x8x8x32xf32>
    tpu.vector_store %arg25[%c0_449, %c0_450, %c0_451, %c0_452], %341 {strides = array<i32>} : memref<2x8x8x32xf32, #tpu.memory_space<vmem>>, vector<2x8x8x32xf32>,
    %c0_453 = arith.constant 0 : index
    %c0_454 = arith.constant 0 : index
    %c0_455 = arith.constant 0 : index
    %c0_456 = arith.constant 0 : index
    %343 = vector.load %arg25[%c0_453, %c0_454, %c0_455, %c0_456] : memref<2x8x8x32xf32, #tpu.memory_space<vmem>>, vector<2x8x8x32xf32>
    %c0_457 = arith.constant 0 : index
    %c1_458 = arith.constant 1 : index
    %c1_459 = arith.constant 1 : index
    %c0_460 = arith.constant 0 : index
    %344 = vector.load %arg24[%c0_457, %c1_458, %c1_459, %c0_460] : memref<2x10x10x32xf32, #tpu.memory_space<vmem>>, vector<2x8x8x32xf32>
    tpu.vector_store %arg24[%c0_457, %c1_458, %c1_459, %c0_460], %343 {strides = array<i32>} : memref<2x10x10x32xf32, #tpu.memory_space<vmem>>, vector<2x8x8x32xf32>,
    %cst_461 = arith.constant 0.000000e+00 : f32
    %345 = vector.broadcast %cst_461 : f32 to vector<128x32xf32>
    %c0_462 = arith.constant 0 : index
    %c0_463 = arith.constant 0 : index
    %c0_464 = arith.constant 0 : index
    %c0_465 = arith.constant 0 : index
    %346 = vector.load %arg24[%c0_462, %c0_463, %c0_464, %c0_465] : memref<2x10x10x32xf32, #tpu.memory_space<vmem>>, vector<2x8x8x32xf32>
    %347 = vector.shape_cast %346 : vector<2x8x8x32xf32> to vector<128x32xf32>
    %c0_466 = arith.constant 0 : index
    %c0_467 = arith.constant 0 : index
    %c0_468 = arith.constant 0 : index
    %348 = vector.load %arg16[%c0_466, %c0_467, %c0_468] : memref<9x32x32xf32, #tpu.memory_space<vmem>>, vector<1x32x32xf32>
    %349 = vector.shape_cast %348 : vector<1x32x32xf32> to vector<32x32xf32>
    %cst_469 = arith.constant dense<0.000000e+00> : vector<128x32xf32>
    %350 = tpu.matmul %347, %349, %cst_469 {dimension_numbers = #tpu.dot_dimension_numbers<[1], [0], [0], [1], [0, 0, 1, 1], [], []>} : vector<128x32xf32>, vector<32x32xf32>, vector<128x32xf32> -> vector<128x32xf32>
    %351 = arith.addf %345, %350 : vector<128x32xf32>
    %c0_470 = arith.constant 0 : index
    %c0_471 = arith.constant 0 : index
    %c1_472 = arith.constant 1 : index
    %c0_473 = arith.constant 0 : index
    %352 = vector.load %arg24[%c0_470, %c0_471, %c1_472, %c0_473] : memref<2x10x10x32xf32, #tpu.memory_space<vmem>>, vector<2x8x8x32xf32>
    %353 = vector.shape_cast %352 : vector<2x8x8x32xf32> to vector<128x32xf32>
    %c1_474 = arith.constant 1 : index
    %c0_475 = arith.constant 0 : index
    %c0_476 = arith.constant 0 : index
    %354 = vector.load %arg16[%c1_474, %c0_475, %c0_476] : memref<9x32x32xf32, #tpu.memory_space<vmem>>, vector<1x32x32xf32>
    %355 = vector.shape_cast %354 : vector<1x32x32xf32> to vector<32x32xf32>
    %cst_477 = arith.constant dense<0.000000e+00> : vector<128x32xf32>
    %356 = tpu.matmul %353, %355, %cst_477 {dimension_numbers = #tpu.dot_dimension_numbers<[1], [0], [0], [1], [0, 0, 1, 1], [], []>} : vector<128x32xf32>, vector<32x32xf32>, vector<128x32xf32> -> vector<128x32xf32>
    %357 = arith.addf %351, %356 : vector<128x32xf32>
    %c0_478 = arith.constant 0 : index
    %c0_479 = arith.constant 0 : index
    %c2_480 = arith.constant 2 : index
    %c0_481 = arith.constant 0 : index
    %358 = vector.load %arg24[%c0_478, %c0_479, %c2_480, %c0_481] : memref<2x10x10x32xf32, #tpu.memory_space<vmem>>, vector<2x8x8x32xf32>
    %359 = vector.shape_cast %358 : vector<2x8x8x32xf32> to vector<128x32xf32>
    %c2_482 = arith.constant 2 : index
    %c0_483 = arith.constant 0 : index
    %c0_484 = arith.constant 0 : index
    %360 = vector.load %arg16[%c2_482, %c0_483, %c0_484] : memref<9x32x32xf32, #tpu.memory_space<vmem>>, vector<1x32x32xf32>
    %361 = vector.shape_cast %360 : vector<1x32x32xf32> to vector<32x32xf32>
    %cst_485 = arith.constant dense<0.000000e+00> : vector<128x32xf32>
    %362 = tpu.matmul %359, %361, %cst_485 {dimension_numbers = #tpu.dot_dimension_numbers<[1], [0], [0], [1], [0, 0, 1, 1], [], []>} : vector<128x32xf32>, vector<32x32xf32>, vector<128x32xf32> -> vector<128x32xf32>
    %363 = arith.addf %357, %362 : vector<128x32xf32>
    %c0_486 = arith.constant 0 : index
    %c1_487 = arith.constant 1 : index
    %c0_488 = arith.constant 0 : index
    %c0_489 = arith.constant 0 : index
    %364 = vector.load %arg24[%c0_486, %c1_487, %c0_488, %c0_489] : memref<2x10x10x32xf32, #tpu.memory_space<vmem>>, vector<2x8x8x32xf32>
    %365 = vector.shape_cast %364 : vector<2x8x8x32xf32> to vector<128x32xf32>
    %c3_490 = arith.constant 3 : index
    %c0_491 = arith.constant 0 : index
    %c0_492 = arith.constant 0 : index
    %366 = vector.load %arg16[%c3_490, %c0_491, %c0_492] : memref<9x32x32xf32, #tpu.memory_space<vmem>>, vector<1x32x32xf32>
    %367 = vector.shape_cast %366 : vector<1x32x32xf32> to vector<32x32xf32>
    %cst_493 = arith.constant dense<0.000000e+00> : vector<128x32xf32>
    %368 = tpu.matmul %365, %367, %cst_493 {dimension_numbers = #tpu.dot_dimension_numbers<[1], [0], [0], [1], [0, 0, 1, 1], [], []>} : vector<128x32xf32>, vector<32x32xf32>, vector<128x32xf32> -> vector<128x32xf32>
    %369 = arith.addf %363, %368 : vector<128x32xf32>
    %c0_494 = arith.constant 0 : index
    %c1_495 = arith.constant 1 : index
    %c1_496 = arith.constant 1 : index
    %c0_497 = arith.constant 0 : index
    %370 = vector.load %arg24[%c0_494, %c1_495, %c1_496, %c0_497] : memref<2x10x10x32xf32, #tpu.memory_space<vmem>>, vector<2x8x8x32xf32>
    %371 = vector.shape_cast %370 : vector<2x8x8x32xf32> to vector<128x32xf32>
    %c4_498 = arith.constant 4 : index
    %c0_499 = arith.constant 0 : index
    %c0_500 = arith.constant 0 : index
    %372 = vector.load %arg16[%c4_498, %c0_499, %c0_500] : memref<9x32x32xf32, #tpu.memory_space<vmem>>, vector<1x32x32xf32>
    %373 = vector.shape_cast %372 : vector<1x32x32xf32> to vector<32x32xf32>
    %cst_501 = arith.constant dense<0.000000e+00> : vector<128x32xf32>
    %374 = tpu.matmul %371, %373, %cst_501 {dimension_numbers = #tpu.dot_dimension_numbers<[1], [0], [0], [1], [0, 0, 1, 1], [], []>} : vector<128x32xf32>, vector<32x32xf32>, vector<128x32xf32> -> vector<128x32xf32>
    %375 = arith.addf %369, %374 : vector<128x32xf32>
    %c0_502 = arith.constant 0 : index
    %c1_503 = arith.constant 1 : index
    %c2_504 = arith.constant 2 : index
    %c0_505 = arith.constant 0 : index
    %376 = vector.load %arg24[%c0_502, %c1_503, %c2_504, %c0_505] : memref<2x10x10x32xf32, #tpu.memory_space<vmem>>, vector<2x8x8x32xf32>
    %377 = vector.shape_cast %376 : vector<2x8x8x32xf32> to vector<128x32xf32>
    %c5_506 = arith.constant 5 : index
    %c0_507 = arith.constant 0 : index
    %c0_508 = arith.constant 0 : index
    %378 = vector.load %arg16[%c5_506, %c0_507, %c0_508] : memref<9x32x32xf32, #tpu.memory_space<vmem>>, vector<1x32x32xf32>
    %379 = vector.shape_cast %378 : vector<1x32x32xf32> to vector<32x32xf32>
    %cst_509 = arith.constant dense<0.000000e+00> : vector<128x32xf32>
    %380 = tpu.matmul %377, %379, %cst_509 {dimension_numbers = #tpu.dot_dimension_numbers<[1], [0], [0], [1], [0, 0, 1, 1], [], []>} : vector<128x32xf32>, vector<32x32xf32>, vector<128x32xf32> -> vector<128x32xf32>
    %381 = arith.addf %375, %380 : vector<128x32xf32>
    %c0_510 = arith.constant 0 : index
    %c2_511 = arith.constant 2 : index
    %c0_512 = arith.constant 0 : index
    %c0_513 = arith.constant 0 : index
    %382 = vector.load %arg24[%c0_510, %c2_511, %c0_512, %c0_513] : memref<2x10x10x32xf32, #tpu.memory_space<vmem>>, vector<2x8x8x32xf32>
    %383 = vector.shape_cast %382 : vector<2x8x8x32xf32> to vector<128x32xf32>
    %c6_514 = arith.constant 6 : index
    %c0_515 = arith.constant 0 : index
    %c0_516 = arith.constant 0 : index
    %384 = vector.load %arg16[%c6_514, %c0_515, %c0_516] : memref<9x32x32xf32, #tpu.memory_space<vmem>>, vector<1x32x32xf32>
    %385 = vector.shape_cast %384 : vector<1x32x32xf32> to vector<32x32xf32>
    %cst_517 = arith.constant dense<0.000000e+00> : vector<128x32xf32>
    %386 = tpu.matmul %383, %385, %cst_517 {dimension_numbers = #tpu.dot_dimension_numbers<[1], [0], [0], [1], [0, 0, 1, 1], [], []>} : vector<128x32xf32>, vector<32x32xf32>, vector<128x32xf32> -> vector<128x32xf32>
    %387 = arith.addf %381, %386 : vector<128x32xf32>
    %c0_518 = arith.constant 0 : index
    %c2_519 = arith.constant 2 : index
    %c1_520 = arith.constant 1 : index
    %c0_521 = arith.constant 0 : index
    %388 = vector.load %arg24[%c0_518, %c2_519, %c1_520, %c0_521] : memref<2x10x10x32xf32, #tpu.memory_space<vmem>>, vector<2x8x8x32xf32>
    %389 = vector.shape_cast %388 : vector<2x8x8x32xf32> to vector<128x32xf32>
    %c7_522 = arith.constant 7 : index
    %c0_523 = arith.constant 0 : index
    %c0_524 = arith.constant 0 : index
    %390 = vector.load %arg16[%c7_522, %c0_523, %c0_524] : memref<9x32x32xf32, #tpu.memory_space<vmem>>, vector<1x32x32xf32>
    %391 = vector.shape_cast %390 : vector<1x32x32xf32> to vector<32x32xf32>
    %cst_525 = arith.constant dense<0.000000e+00> : vector<128x32xf32>
    %392 = tpu.matmul %389, %391, %cst_525 {dimension_numbers = #tpu.dot_dimension_numbers<[1], [0], [0], [1], [0, 0, 1, 1], [], []>} : vector<128x32xf32>, vector<32x32xf32>, vector<128x32xf32> -> vector<128x32xf32>
    %393 = arith.addf %387, %392 : vector<128x32xf32>
    %c0_526 = arith.constant 0 : index
    %c2_527 = arith.constant 2 : index
    %c2_528 = arith.constant 2 : index
    %c0_529 = arith.constant 0 : index
    %394 = vector.load %arg24[%c0_526, %c2_527, %c2_528, %c0_529] : memref<2x10x10x32xf32, #tpu.memory_space<vmem>>, vector<2x8x8x32xf32>
    %395 = vector.shape_cast %394 : vector<2x8x8x32xf32> to vector<128x32xf32>
    %c8_530 = arith.constant 8 : index
    %c0_531 = arith.constant 0 : index
    %c0_532 = arith.constant 0 : index
    %396 = vector.load %arg16[%c8_530, %c0_531, %c0_532] : memref<9x32x32xf32, #tpu.memory_space<vmem>>, vector<1x32x32xf32>
    %397 = vector.shape_cast %396 : vector<1x32x32xf32> to vector<32x32xf32>
    %cst_533 = arith.constant dense<0.000000e+00> : vector<128x32xf32>
    %398 = tpu.matmul %395, %397, %cst_533 {dimension_numbers = #tpu.dot_dimension_numbers<[1], [0], [0], [1], [0, 0, 1, 1], [], []>} : vector<128x32xf32>, vector<32x32xf32>, vector<128x32xf32> -> vector<128x32xf32>
    %399 = arith.addf %393, %398 : vector<128x32xf32>
    %c0_534 = arith.constant 0 : index
    %c0_535 = arith.constant 0 : index
    %400 = vector.load %arg17[%c0_534, %c0_535] : memref<1x32xf32, #tpu.memory_space<vmem>>, vector<1x32xf32>
    %401 = vector.broadcast %400 : vector<1x32xf32> to vector<128x32xf32>
    %402 = arith.mulf %399, %401 : vector<128x32xf32>
    %c0_536 = arith.constant 0 : index
    %c0_537 = arith.constant 0 : index
    %403 = vector.load %arg18[%c0_536, %c0_537] : memref<1x32xf32, #tpu.memory_space<vmem>>, vector<1x32xf32>
    %404 = vector.broadcast %403 : vector<1x32xf32> to vector<128x32xf32>
    %405 = arith.addf %402, %404 : vector<128x32xf32>
    %cst_538 = arith.constant 0.000000e+00 : f32
    %406 = vector.broadcast %cst_538 : f32 to vector<128x32xf32>
    %407 = arith.maximumf %405, %406 : vector<128x32xf32>
    %c0_539 = arith.constant 0 : index
    %c0_540 = arith.constant 0 : index
    %408 = vector.load %arg22[%c0_539, %c0_540] : memref<128x32xf32, #tpu.memory_space<vmem>>, vector<128x32xf32>
    tpu.vector_store %arg22[%c0_539, %c0_540], %407 {strides = array<i32>} : memref<128x32xf32, #tpu.memory_space<vmem>>, vector<128x32xf32>,
    %c0_541 = arith.constant 0 : index
    %c0_542 = arith.constant 0 : index
    %c0_543 = arith.constant 0 : index
    %c0_544 = arith.constant 0 : index
    %409 = vector.load %arg25[%c0_541, %c0_542, %c0_543, %c0_544] : memref<2x8x8x32xf32, #tpu.memory_space<vmem>>, vector<2x8x8x32xf32>
    %410 = vector.shape_cast %409 : vector<2x8x8x32xf32> to vector<128x32xf32>
    %c0_545 = arith.constant 0 : index
    %c0_546 = arith.constant 0 : index
    %411 = vector.load %arg19[%c0_545, %c0_546] : memref<32x1xf32, #tpu.memory_space<vmem>>, vector<32x1xf32>
    %cst_547 = arith.constant dense<0.000000e+00> : vector<128x1xf32>
    %412 = tpu.matmul %410, %411, %cst_547 {dimension_numbers = #tpu.dot_dimension_numbers<[1], [0], [0], [1], [0, 0, 1, 1], [], []>} : vector<128x32xf32>, vector<32x1xf32>, vector<128x1xf32> -> vector<128x1xf32>
    %c0_548 = arith.constant 0 : index
    %c0_549 = arith.constant 0 : index
    %413 = vector.load %arg20[%c0_548, %c0_549] : memref<1x1xf32, #tpu.memory_space<vmem>>, vector<1x1xf32>
    %414 = vector.broadcast %413 : vector<1x1xf32> to vector<128x1xf32>
    %415 = arith.mulf %412, %414 : vector<128x1xf32>
    %c0_550 = arith.constant 0 : index
    %c0_551 = arith.constant 0 : index
    %416 = vector.load %arg21[%c0_550, %c0_551] : memref<1x1xf32, #tpu.memory_space<vmem>>, vector<1x1xf32>
    %417 = vector.broadcast %416 : vector<1x1xf32> to vector<128x1xf32>
    %418 = arith.addf %415, %417 : vector<128x1xf32>
    %cst_552 = arith.constant 0.000000e+00 : f32
    %419 = vector.broadcast %cst_552 : f32 to vector<128x1xf32>
    %420 = arith.maximumf %418, %419 : vector<128x1xf32>
    %c0_553 = arith.constant 0 : index
    %c0_554 = arith.constant 0 : index
    %421 = vector.load %arg23[%c0_553, %c0_554] : memref<128x1xf32, #tpu.memory_space<vmem>>, vector<128x1xf32>
    tpu.vector_store %arg23[%c0_553, %c0_554], %420 {strides = array<i32>} : memref<128x1xf32, #tpu.memory_space<vmem>>, vector<128x1xf32>,
    return
  }
}

module attributes {stable_mosaic.version = 11 : i64} {
  func.func @_heads_kernel(%arg0: memref<2x2048xf32, #tpu.memory_space<vmem>>, %arg1: memref<2x64xf32, #tpu.memory_space<vmem>>, %arg2: memref<2048x128xf32, #tpu.memory_space<vmem>>, %arg3: memref<1x128xf32, #tpu.memory_space<vmem>>, %arg4: memref<64x32xf32, #tpu.memory_space<vmem>>, %arg5: memref<1x32xf32, #tpu.memory_space<vmem>>, %arg6: memref<32x1xf32, #tpu.memory_space<vmem>>, %arg7: memref<1x1xf32, #tpu.memory_space<vmem>>, %arg8: memref<2x128xf32, #tpu.memory_space<vmem>>, %arg9: memref<2x1xf32, #tpu.memory_space<vmem>>) attributes {dimension_semantics = [], scalar_prefetch = 0 : i64, scratch_operands = 0 : i64, tpu.core_type = #tpu.core_type<tc>} {
    %c0 = arith.constant 0 : index
    %c0_0 = arith.constant 0 : index
    %0 = vector.load %arg0[%c0, %c0_0] : memref<2x2048xf32, #tpu.memory_space<vmem>>, vector<2x2048xf32>
    %c0_1 = arith.constant 0 : index
    %c0_2 = arith.constant 0 : index
    %1 = vector.load %arg2[%c0_1, %c0_2] : memref<2048x128xf32, #tpu.memory_space<vmem>>, vector<2048x128xf32>
    %cst = arith.constant dense<0.000000e+00> : vector<2x128xf32>
    %2 = tpu.matmul %0, %1, %cst {dimension_numbers = #tpu.dot_dimension_numbers<[1], [0], [0], [1], [0, 0, 1, 1], [], []>} : vector<2x2048xf32>, vector<2048x128xf32>, vector<2x128xf32> -> vector<2x128xf32>
    %c0_3 = arith.constant 0 : index
    %c0_4 = arith.constant 0 : index
    %3 = vector.load %arg3[%c0_3, %c0_4] : memref<1x128xf32, #tpu.memory_space<vmem>>, vector<1x128xf32>
    %4 = vector.broadcast %3 : vector<1x128xf32> to vector<2x128xf32>
    %5 = arith.addf %2, %4 : vector<2x128xf32>
    %c0_5 = arith.constant 0 : index
    %c0_6 = arith.constant 0 : index
    %6 = vector.load %arg8[%c0_5, %c0_6] : memref<2x128xf32, #tpu.memory_space<vmem>>, vector<2x128xf32>
    tpu.vector_store %arg8[%c0_5, %c0_6], %5 {strides = array<i32>} : memref<2x128xf32, #tpu.memory_space<vmem>>, vector<2x128xf32>,
    %c0_7 = arith.constant 0 : index
    %c0_8 = arith.constant 0 : index
    %7 = vector.load %arg1[%c0_7, %c0_8] : memref<2x64xf32, #tpu.memory_space<vmem>>, vector<2x64xf32>
    %c0_9 = arith.constant 0 : index
    %c0_10 = arith.constant 0 : index
    %8 = vector.load %arg4[%c0_9, %c0_10] : memref<64x32xf32, #tpu.memory_space<vmem>>, vector<64x32xf32>
    %cst_11 = arith.constant dense<0.000000e+00> : vector<2x32xf32>
    %9 = tpu.matmul %7, %8, %cst_11 {dimension_numbers = #tpu.dot_dimension_numbers<[1], [0], [0], [1], [0, 0, 1, 1], [], []>} : vector<2x64xf32>, vector<64x32xf32>, vector<2x32xf32> -> vector<2x32xf32>
    %c0_12 = arith.constant 0 : index
    %c0_13 = arith.constant 0 : index
    %10 = vector.load %arg5[%c0_12, %c0_13] : memref<1x32xf32, #tpu.memory_space<vmem>>, vector<1x32xf32>
    %11 = vector.broadcast %10 : vector<1x32xf32> to vector<2x32xf32>
    %12 = arith.addf %9, %11 : vector<2x32xf32>
    %cst_14 = arith.constant 0.000000e+00 : f32
    %13 = vector.broadcast %cst_14 : f32 to vector<2x32xf32>
    %14 = arith.maximumf %12, %13 : vector<2x32xf32>
    %c0_15 = arith.constant 0 : index
    %c0_16 = arith.constant 0 : index
    %15 = vector.load %arg6[%c0_15, %c0_16] : memref<32x1xf32, #tpu.memory_space<vmem>>, vector<32x1xf32>
    %cst_17 = arith.constant dense<0.000000e+00> : vector<2x1xf32>
    %16 = tpu.matmul %14, %15, %cst_17 {dimension_numbers = #tpu.dot_dimension_numbers<[1], [0], [0], [1], [0, 0, 1, 1], [], []>} : vector<2x32xf32>, vector<32x1xf32>, vector<2x1xf32> -> vector<2x1xf32>
    %c0_18 = arith.constant 0 : index
    %c0_19 = arith.constant 0 : index
    %17 = vector.load %arg7[%c0_18, %c0_19] : memref<1x1xf32, #tpu.memory_space<vmem>>, vector<1x1xf32>
    %18 = vector.broadcast %17 : vector<1x1xf32> to vector<2x1xf32>
    %19 = arith.addf %16, %18 : vector<2x1xf32>
    %20 = math.tanh %19 : vector<2x1xf32>
    %c0_20 = arith.constant 0 : index
    %c0_21 = arith.constant 0 : index
    %21 = vector.load %arg9[%c0_20, %c0_21] : memref<2x1xf32, #tpu.memory_space<vmem>>, vector<2x1xf32>
    tpu.vector_store %arg9[%c0_20, %c0_21], %20 {strides = array<i32>} : memref<2x1xf32, #tpu.memory_space<vmem>>, vector<2x1xf32>,
    return
  }
}

</mosaic_0001>

<bundles_post_ra>
// kernel: forward_pallas.3
= control target key start
LH: loop header
LB: loop body
LE: loop exit
PB: predicated region body
PF: predicated region fallthrough
CT: control target
= control target key end

     0   :  { %s2406_s0 = inlined_call_operand.vmem [shape: f32[2,2048], index: 0, kind: input, shape index: {}]   ;;  %s2407_s1 = inlined_call_operand.vmem [shape: f32[2,64], index: 1, kind: input, shape index: {}]   ;;  %s2408_s2 = inlined_call_operand.vmem [shape: f32[2048,128], index: 2, kind: input, shape index: {}]   ;;  %s2409_s3 = inlined_call_operand.vmem [shape: f32[1,128], index: 3, kind: input, shape index: {}]   ;;  %s2410_s4 = inlined_call_operand.vmem [shape: f32[64,32], index: 4, kind: input, shape index: {}]   ;;  %s2411_s5 = inlined_call_operand.vmem [shape: f32[1,32], index: 5, kind: input, shape index: {}]   ;;  %s2412_s6 = inlined_call_operand.vmem [shape: f32[32,1], index: 6, kind: input, shape index: {}]   ;;  %s2413_s7 = inlined_call_operand.<no memory space> [shape: f32[1,1], index: 7, kind: input, shape index: {}]   ;;  %s2414_s8 = inlined_call_operand.hbm [shape: f32[2,128], index: 8, kind: output, shape index: {0}]   ;;  %s2415_s9 = inlined_call_operand.vmem [shape: f32[2,1], index: 9, kind: output, shape index: {1}]  }
   0x1   :  { %v15_v0 = vstv %s2413_s7 }
   0x2   :  { %16 = vst [vmem:[#allocation2] sm:$0x1] %v15_v0 }
   0x3   :  { %v69_v1 = vld [vmem:[%s2408_s2 + $0xf8] sm:$0xff]  ;;  %v68_v3 = vld [vmem:[%s2408_s2 + $0xf0] sm:$0xff]  ;;  %v67_v7 = vld [vmem:[%s2408_s2 + $0xe8] sm:$0xff]  ;;  %v1508_v28 = vmov 1983009808   ;;  %v309_v30 = vlaneseq }
   0x4   :  { %v53_v2 = vld [vmem:[%s2408_s2 + $0x78] sm:$0xff]  ;;  %1152 = vmatprep.subr.mxu0 %v69_v1  ;;  %v52_v5 = vld [vmem:[%s2408_s2 + $0x70] sm:$0xff]  ;;  %v51_v9 = vld [vmem:[%s2408_s2 + $0x68] sm:$0xff]  ;;  %v307_v29 = vunpack.c.l.s4 %v1508_v28 }
   0x5   :  { %v101_v4 = vld [vmem:[%s2408_s2 + $0x1f8] sm:$0xff]  ;;  %1153 = vmatpush3.msra.mxu0 %v53_v2  ;;  %v100_v8 = vld [vmem:[%s2408_s2 + $0x1f0] sm:$0xff]  ;;  %v99_v11 = vld [vmem:[%s2408_s2 + $0x1e8] sm:$0xff]  ;;  %v310_v40 = vshrl.u32 %v309_v30, 7 }
   0x6   :  { %v85_v6 = vld [vmem:[%s2408_s2 + $0x178] sm:$0xff]  ;;  %1187 = vmatprep.subr.mxu1 %v101_v4  ;;  %1154 = vmatprep.subr.mxu0 %v68_v3  ;;  %v84_v10 = vld [vmem:[%s2408_s2 + $0x170] sm:$0xff]  ;;  %v66_v12 = vld [vmem:[%s2408_s2 + $0xe0] sm:$0xff]  ;;  %v308_v39 = vunpack.c.0.s8 %v307_v29 }
   0x7   :  { %1188 = vmatpush3.msra.mxu1 %v85_v6  ;;  %1155 = vmatpush3.msra.mxu0 %v52_v5  ;;  %v83_v13 = vld [vmem:[%s2408_s2 + $0x168] sm:$0xff]  ;;  %v50_v14 = vld [vmem:[%s2408_s2 + $0x60] sm:$0xff]  ;;  %v65_v16 = vld [vmem:[%s2408_s2 + $0xd8] sm:$0xff] }
   0x8   :  { %1189 = vmatprep.subr.mxu1 %v100_v8  ;;  %1156 = vmatprep.subr.mxu0 %v67_v7  ;;  %v98_v15 = vld [vmem:[%s2408_s2 + $0x1e0] sm:$0xff]  ;;  %v49_v18 = vld [vmem:[%s2408_s2 + $0x58] sm:$0xff]  ;;  %v64_v20 = vld [vmem:[%s2408_s2 + $0xd0] sm:$0xff]  ;;  %v1694_v49 = vsub.s32 %v308_v39, %v310_v40 }
   0x9   :  { %1190 = vmatpush3.msra.mxu1 %v84_v10  ;;  %1157 = vmatpush3.msra.mxu0 %v51_v9  ;;  %v82_v17 = vld [vmem:[%s2408_s2 + $0x160] sm:$0xff]  ;;  %v97_v19 = vld [vmem:[%s2408_s2 + $0x1d8] sm:$0xff]  ;;  %v48_v22 = vld [vmem:[%s2408_s2 + $0x50] sm:$0xff] }
   0xa   :  { %1191 = vmatprep.subr.mxu1 %v99_v11  ;;  %1158 = vmatprep.subr.mxu0 %v66_v12  ;;  %v81_v21 = vld [vmem:[%s2408_s2 + $0x158] sm:$0xff]  ;;  %v96_v23 = vld [vmem:[%s2408_s2 + $0x1d0] sm:$0xff]  ;;  %v63_v24 = vld [vmem:[%s2408_s2 + $0xc8] sm:$0xff] }
   0xb   :  { %1192 = vmatpush3.msra.mxu1 %v83_v13  ;;  %1159 = vmatpush3.msra.mxu0 %v50_v14  ;;  %v80_v25 = vld [vmem:[%s2408_s2 + $0x150] sm:$0xff]  ;;  %v47_v26 = vld [vmem:[%s2408_s2 + $0x48] sm:$0xff]  ;;  %v62_v31 = vld [vmem:[%s2408_s2 + $0xc0] sm:$0xff] }
   0xc   :  { %1193 = vmatprep.subr.mxu1 %v98_v15  ;;  %1160 = vmatprep.subr.mxu0 %v65_v16  ;;  %v95_v27 = vld [vmem:[%s2408_s2 + $0x1c8] sm:$0xff]  ;;  %v46_v33 = vld [vmem:[%s2408_s2 + $0x40] sm:$0xff]  ;;  %v61_v35 = vld [vmem:[%s2408_s2 + $0xb8] sm:$0xff] }
   0xd   :  { %1194 = vmatpush3.msra.mxu1 %v82_v17  ;;  %1161 = vmatpush3.msra.mxu0 %v49_v18  ;;  %v79_v32 = vld [vmem:[%s2408_s2 + $0x148] sm:$0xff]  ;;  %v94_v34 = vld [vmem:[%s2408_s2 + $0x1c0] sm:$0xff]  ;;  %v45_v37 = vld [vmem:[%s2408_s2 + $0x38] sm:$0xff] }
   0xe   :  { %1195 = vmatprep.subr.mxu1 %v97_v19  ;;  %1162 = vmatprep.subr.mxu0 %v64_v20  ;;  %v78_v36 = vld [vmem:[%s2408_s2 + $0x140] sm:$0xff]  ;;  %v93_v38 = vld [vmem:[%s2408_s2 + $0x1b8] sm:$0xff]  ;;  %v60_v41 = vld [vmem:[%s2408_s2 + $0xb0] sm:$0xff] }
   0xf   :  { %1196 = vmatpush3.msra.mxu1 %v81_v21  ;;  %1163 = vmatpush3.msra.mxu0 %v48_v22  ;;  %v77_v42 = vld [vmem:[%s2408_s2 + $0x138] sm:$0xff]  ;;  %v44_v43 = vld [vmem:[%s2408_s2 + $0x30] sm:$0xff]  ;;  %v59_v45 = vld [vmem:[%s2408_s2 + $0xa8] sm:$0xff] }
  0x10   :  { %1197 = vmatprep.subr.mxu1 %v96_v23  ;;  %1164 = vmatprep.subr.mxu0 %v63_v24  ;;  %v92_v44 = vld [vmem:[%s2408_s2 + $0x1b0] sm:$0xff]  ;;  %v43_v47 = vld [vmem:[%s2408_s2 + $0x28] sm:$0xff]  ;;  %v58_v50 = vld [vmem:[%s2408_s2 + $0xa0] sm:$0xff] }
  0x11   :  { %1198 = vmatpush3.msra.mxu1 %v80_v25  ;;  %1165 = vmatpush3.msra.mxu0 %v47_v26  ;;  %v76_v46 = vld [vmem:[%s2408_s2 + $0x130] sm:$0xff]  ;;  %v91_v48 = vld [vmem:[%s2408_s2 + $0x1a8] sm:$0xff]  ;;  %v34_v52 = vld [vmem:[%s2406_s0] sm:$0xff] }
  0x12   :  { %1199 = vmatprep.subr.mxu1 %v95_v27  ;;  %1166 = vmatprep.subr.mxu0 %v62_v31  ;;  %v75_v51 = vld [vmem:[%s2408_s2 + $0x128] sm:$0xff]  ;;  %v42_v53 = vld [vmem:[%s2408_s2 + $0x20] sm:$0xff]  ;;  %v57_v55 = vld [vmem:[%s2408_s2 + $0x98] sm:$0xff]  ;;  %v312_v59 = vrot.slane %v34_v52, %v1694_v49  ;;  %v305_v60 = vcombine.high %v34_v52, %v34_v52 }
  0x13   :  { %1200 = vmatpush3.msra.mxu1 %v79_v32  ;;  %1167 = vmatpush3.msra.mxu0 %v46_v33  ;;  %v90_v54 = vld [vmem:[%s2408_s2 + $0x1a0] sm:$0xff]  ;;  %v41_v57 = vld [vmem:[%s2408_s2 + $0x18] sm:$0xff]  ;;  %v56_v61 = vld [vmem:[%s2408_s2 + $0x90] sm:$0xff] }
  0x14   :  { %1201 = vmatprep.subr.mxu1 %v94_v34  ;;  %1168 = vmatprep.subr.mxu0 %v61_v35  ;;  %v74_v56 = vld [vmem:[%s2408_s2 + $0x120] sm:$0xff]  ;;  %v89_v58 = vld [vmem:[%s2408_s2 + $0x198] sm:$0xff]  ;;  %v40_v63 = vld [vmem:[%s2408_s2 + $0x10] sm:$0xff]  ;;  %v320_v5 = vcombine.high %v312_v59, %v312_v59  ;;  %v319_v6 = vrot.slane %v305_v60, %v1694_v49 }
  0x15   :  { %1202 = vmatpush3.msra.mxu1 %v78_v36  ;;  %1169 = vmatpush3.msra.mxu0 %v45_v37  ;;  %v73_v62 = vld [vmem:[%s2408_s2 + $0x118] sm:$0xff]  ;;  %v88_v0 = vld [vmem:[%s2408_s2 + $0x190] sm:$0xff]  ;;  %v55_v1 = vld [vmem:[%s2408_s2 + $0x88] sm:$0xff] }
  0x16   :  { %1203 = vmatprep.subr.mxu1 %v93_v38  ;;  %1170 = vmatprep.subr.mxu0 %v60_v41  ;;  %v72_v2 = vld [vmem:[%s2408_s2 + $0x110] sm:$0xff]  ;;  %v39_v3 = vld [vmem:[%s2408_s2 + $0x8] sm:$0xff]  ;;  %v54_v7 = vld [vmem:[%s2408_s2 + $0x80] sm:$0xff]  ;;  %v321_v13 = vcombine.high %v319_v6, %v319_v6 }
  0x17   :  { %1204 = vmatpush3.msra.mxu1 %v77_v42  ;;  %1171 = vmatpush3.msra.mxu0 %v44_v43  ;;  %v87_v4 = vld [vmem:[%s2408_s2 + $0x188] sm:$0xff]  ;;  %v38_v8 = vld [vmem:[%s2408_s2] sm:$0xff]  ;;  %v133_v11 = vld [vmem:[%s2408_s2 + $0x2f8] sm:$0xff] }
  0x18   :  { %1205 = vmatprep.subr.mxu1 %v92_v44  ;;  %1172 = vmatprep.subr.mxu0 %v59_v45  ;;  %v71_v9 = vld [vmem:[%s2408_s2 + $0x108] sm:$0xff]  ;;  %v86_v10 = vld [vmem:[%s2408_s2 + $0x180] sm:$0xff]  ;;  %v117_v14 = vld [vmem:[%s2408_s2 + $0x278] sm:$0xff] }
  0x19   :  { %1206 = vmatpush3.msra.mxu1 %v76_v46  ;;  %1173 = vmatpush3.msra.mxu0 %v43_v47  ;;  %v70_v12 = vld [vmem:[%s2408_s2 + $0x100] sm:$0xff]  ;;  %v132_v15 = vld [vmem:[%s2408_s2 + $0x2f0] sm:$0xff]  ;;  %v165_v16 = vld [vmem:[%s2408_s2 + $0x3f8] sm:$0xff] }
  0x1a   :  { %1207 = vmatprep.subr.mxu1 %v91_v48  ;;  %1174 = vmatprep.subr.mxu0 %v58_v50  ;;  %v116_v17 = vld [vmem:[%s2408_s2 + $0x270] sm:$0xff]  ;;  %v149_v18 = vld [vmem:[%s2408_s2 + $0x378] sm:$0xff]  ;;  %v131_v19 = vld [vmem:[%s2408_s2 + $0x2e8] sm:$0xff] }
  0x1b   :  { %1208 = vmatpush3.msra.mxu1 %v75_v51  ;;  %1175 = vmatpush3.msra.mxu0 %v42_v53  ;;  %v164_v20 = vld [vmem:[%s2408_s2 + $0x3f0] sm:$0xff]  ;;  %v115_v21 = vld [vmem:[%s2408_s2 + $0x268] sm:$0xff]  ;;  %v130_v23 = vld [vmem:[%s2408_s2 + $0x2e0] sm:$0xff] }
  0x1c   :  { %1209 = vmatprep.subr.mxu1 %v90_v54  ;;  %1176 = vmatprep.subr.mxu0 %v57_v55  ;;  %v148_v22 = vld [vmem:[%s2408_s2 + $0x370] sm:$0xff]  ;;  %v163_v24 = vld [vmem:[%s2408_s2 + $0x3e8] sm:$0xff]  ;;  %v114_v25 = vld [vmem:[%s2408_s2 + $0x260] sm:$0xff] }
  0x1d   :  { %1210 = vmatpush3.msra.mxu1 %v74_v56  ;;  %1177 = vmatpush3.msra.mxu0 %v41_v57  ;;  %v147_v26 = vld [vmem:[%s2408_s2 + $0x368] sm:$0xff]  ;;  %v129_v27 = vld [vmem:[%s2408_s2 + $0x2d8] sm:$0xff]  ;;  %v162_v28 = vld [vmem:[%s2408_s2 + $0x3e0] sm:$0xff] }
  0x1e   :  { %1211 = vmatprep.subr.mxu1 %v89_v58  ;;  %1178 = vmatprep.subr.mxu0 %v56_v61  ;;  %v113_v29 = vld [vmem:[%s2408_s2 + $0x258] sm:$0xff]  ;;  %v146_v30 = vld [vmem:[%s2408_s2 + $0x360] sm:$0xff]  ;;  %v128_v31 = vld [vmem:[%s2408_s2 + $0x2d0] sm:$0xff] }
  0x1f   :  { %1212 = vmatpush3.msra.mxu1 %v73_v62  ;;  %1179 = vmatpush3.msra.mxu0 %v40_v63  ;;  %v161_v32 = vld [vmem:[%s2408_s2 + $0x3d8] sm:$0xff]  ;;  %v112_v33 = vld [vmem:[%s2408_s2 + $0x250] sm:$0xff]  ;;  %v127_v35 = vld [vmem:[%s2408_s2 + $0x2c8] sm:$0xff] }
  0x20   :  { %1213 = vmatprep.subr.mxu1 %v88_v0  ;;  %1180 = vmatprep.subr.mxu0 %v55_v1  ;;  %v145_v34 = vld [vmem:[%s2408_s2 + $0x358] sm:$0xff]  ;;  %v160_v36 = vld [vmem:[%s2408_s2 + $0x3d0] sm:$0xff]  ;;  %v111_v37 = vld [vmem:[%s2408_s2 + $0x248] sm:$0xff] }
  0x21   :  { %1214 = vmatpush3.msra.mxu1 %v72_v2  ;;  %1181 = vmatpush3.msra.mxu0 %v39_v3  ;;  %v144_v38 = vld [vmem:[%s2408_s2 + $0x350] sm:$0xff]  ;;  %v126_v39 = vld [vmem:[%s2408_s2 + $0x2c0] sm:$0xff]  ;;  %v159_v40 = vld [vmem:[%s2408_s2 + $0x3c8] sm:$0xff] }
  0x22   :  { %1215 = vmatprep.subr.mxu1 %v87_v4  ;;  %1182 = vmatprep.subr.mxu0 %v54_v7  ;;  %v110_v41 = vld [vmem:[%s2408_s2 + $0x240] sm:$0xff]  ;;  %v143_v42 = vld [vmem:[%s2408_s2 + $0x348] sm:$0xff]  ;;  %v125_v43 = vld [vmem:[%s2408_s2 + $0x2b8] sm:$0xff] }
  0x23   :  { %453 = vmatprep.mubr.f32.mxu0 %v320_v5  ;;  %1183 = vmatpush3.msra.mxu0 %v38_v8  ;;  %v158_v44 = vld [vmem:[%s2408_s2 + $0x3c0] sm:$0xff]  ;;  %v109_v45 = vld [vmem:[%s2408_s2 + $0x238] sm:$0xff]  ;;  %v124_v47 = vld [vmem:[%s2408_s2 + $0x2b0] sm:$0xff] }
  0x24   :  { %1216 = vmatpush3.msra.mxu1 %v71_v9  ;;  %454 = vmatmul.mubr.f32.vlgmr.msra.gmra.mxu0 %v312_v59  ;;  %v142_v46 = vld [vmem:[%s2408_s2 + $0x340] sm:$0xff]  ;;  %v157_v48 = vld [vmem:[%s2408_s2 + $0x3b8] sm:$0xff]  ;;  %v108_v50 = vld [vmem:[%s2408_s2 + $0x230] sm:$0xff] }
  0x25   :  { %1217 = vmatprep.subr.mxu1 %v86_v10  ;;  %1222 = vmatprep.subr.mxu0 %v133_v11  ;;  %v141_v51 = vld [vmem:[%s2408_s2 + $0x338] sm:$0xff]  ;;  %v123_v52 = vld [vmem:[%s2408_s2 + $0x2a8] sm:$0xff]  ;;  %v156_v53 = vld [vmem:[%s2408_s2 + $0x3b0] sm:$0xff] }
  0x26   :  { %1218 = vmatpush3.msra.mxu1 %v70_v12  ;;  %523 = vmatprep.mubr.f32.mxu1 %v321_v13  ;;  %v107_v54 = vld [vmem:[%s2408_s2 + $0x228] sm:$0xff]  ;;  %v140_v55 = vld [vmem:[%s2408_s2 + $0x330] sm:$0xff]  ;;  %v122_v56 = vld [vmem:[%s2408_s2 + $0x2a0] sm:$0xff] }
  0x27   :  { %1223 = vmatpush3.msra.mxu0 %v117_v14  ;;  %524 = vmatmul.mubr.f32.vlgmr.msra.gmra.mxu1 %v319_v6  ;;  %v155_v57 = vld [vmem:[%s2408_s2 + $0x3a8] sm:$0xff]  ;;  %v106_v58 = vld [vmem:[%s2408_s2 + $0x220] sm:$0xff]  ;;  %v121_v61 = vld [vmem:[%s2408_s2 + $0x298] sm:$0xff] }
  0x28   :  { %1224 = vmatprep.subr.mxu0 %v132_v15  ;;  %1257 = vmatprep.subr.mxu1 %v165_v16  ;;  %v35_v59 = vld [vmem:[%s2406_s0 + $0x8] sm:$0xff]  ;;  %v154_v62 = vld [vmem:[%s2408_s2 + $0x3a0] sm:$0xff]  ;;  %v105_v63 = vld [vmem:[%s2408_s2 + $0x218] sm:$0xff] }
  0x29   :  { %1225 = vmatpush3.msra.mxu0 %v116_v17  ;;  %1258 = vmatpush3.msra.mxu1 %v149_v18  ;;  %v139_v60 = vld [vmem:[%s2408_s2 + $0x328] sm:$0xff]  ;;  %v138_v0 = vld [vmem:[%s2408_s2 + $0x320] sm:$0xff]  ;;  %v120_v1 = vld [vmem:[%s2408_s2 + $0x290] sm:$0xff]  ;;  %v322_v2 = vcombine.high %v35_v59, %v35_v59  ;;  %v329_v5 = vrot.slane %v35_v59, %v1694_v49 }
  0x2a   :  { %1226 = vmatprep.subr.mxu0 %v131_v19  ;;  %1259 = vmatprep.subr.mxu1 %v164_v20  ;;  %v153_v3 = vld [vmem:[%s2408_s2 + $0x398] sm:$0xff]  ;;  %v104_v4 = vld [vmem:[%s2408_s2 + $0x210] sm:$0xff]  ;;  %v119_v7 = vld [vmem:[%s2408_s2 + $0x288] sm:$0xff] }
  0x2b   :  { %1227 = vmatpush3.msra.mxu0 %v115_v21  ;;  %1260 = vmatpush3.msra.mxu1 %v148_v22  ;;  %v137_v6 = vld [vmem:[%s2408_s2 + $0x318] sm:$0xff]  ;;  %v152_v8 = vld [vmem:[%s2408_s2 + $0x390] sm:$0xff]  ;;  %v103_v9 = vld [vmem:[%s2408_s2 + $0x208] sm:$0xff]  ;;  %v336_v12 = vrot.slane %v322_v2, %v1694_v49  ;;  %v337_v15 = vcombine.high %v329_v5, %v329_v5 }
  0x2c   :  { %1228 = vmatprep.subr.mxu0 %v130_v23  ;;  %1261 = vmatprep.subr.mxu1 %v163_v24  ;;  %v136_v10 = vld [vmem:[%s2408_s2 + $0x310] sm:$0xff]  ;;  %v118_v11 = vld [vmem:[%s2408_s2 + $0x280] sm:$0xff]  ;;  %v151_v13 = vld [vmem:[%s2408_s2 + $0x388] sm:$0xff] }
  0x2d   :  { %1229 = vmatpush3.msra.mxu0 %v114_v25  ;;  %1262 = vmatpush3.msra.mxu1 %v147_v26  ;;  %v102_v14 = vld [vmem:[%s2408_s2 + $0x200] sm:$0xff]  ;;  %v135_v16 = vld [vmem:[%s2408_s2 + $0x308] sm:$0xff]  ;;  %v197_v18 = vld [vmem:[%s2408_s2 + $0x4f8] sm:$0xff]  ;;  %v338_v20 = vcombine.high %v336_v12, %v336_v12 }
  0x2e   :  { %1230 = vmatprep.subr.mxu0 %v129_v27  ;;  %1263 = vmatprep.subr.mxu1 %v162_v28  ;;  %v150_v17 = vld [vmem:[%s2408_s2 + $0x380] sm:$0xff]  ;;  %v181_v21 = vld [vmem:[%s2408_s2 + $0x478] sm:$0xff]  ;;  %v196_v22 = vld [vmem:[%s2408_s2 + $0x4f0] sm:$0xff] }
  0x2f   :  { %1231 = vmatpush3.msra.mxu0 %v113_v29  ;;  %1264 = vmatpush3.msra.mxu1 %v146_v30  ;;  %v134_v19 = vld [vmem:[%s2408_s2 + $0x300] sm:$0xff]  ;;  %v229_v23 = vld [vmem:[%s2408_s2 + $0x5f8] sm:$0xff]  ;;  %v180_v24 = vld [vmem:[%s2408_s2 + $0x470] sm:$0xff] }
  0x30   :  { %1232 = vmatprep.subr.mxu0 %v128_v31  ;;  %1265 = vmatprep.subr.mxu1 %v161_v32  ;;  %v213_v25 = vld [vmem:[%s2408_s2 + $0x578] sm:$0xff]  ;;  %v195_v26 = vld [vmem:[%s2408_s2 + $0x4e8] sm:$0xff]  ;;  %v228_v27 = vld [vmem:[%s2408_s2 + $0x5f0] sm:$0xff] }
  0x31   :  { %1233 = vmatpush3.msra.mxu0 %v112_v33  ;;  %1266 = vmatpush3.msra.mxu1 %v145_v34  ;;  %v179_v28 = vld [vmem:[%s2408_s2 + $0x468] sm:$0xff]  ;;  %v212_v29 = vld [vmem:[%s2408_s2 + $0x570] sm:$0xff]  ;;  %v194_v30 = vld [vmem:[%s2408_s2 + $0x4e0] sm:$0xff] }
  0x32   :  { %1234 = vmatprep.subr.mxu0 %v127_v35  ;;  %1267 = vmatprep.subr.mxu1 %v160_v36  ;;  %v227_v31 = vld [vmem:[%s2408_s2 + $0x5e8] sm:$0xff]  ;;  %v178_v32 = vld [vmem:[%s2408_s2 + $0x460] sm:$0xff]  ;;  %v193_v34 = vld [vmem:[%s2408_s2 + $0x4d8] sm:$0xff] }
  0x33   :  { %1235 = vmatpush3.msra.mxu0 %v111_v37  ;;  %1268 = vmatpush3.msra.mxu1 %v144_v38  ;;  %v211_v33 = vld [vmem:[%s2408_s2 + $0x568] sm:$0xff]  ;;  %v226_v35 = vld [vmem:[%s2408_s2 + $0x5e0] sm:$0xff]  ;;  %v177_v36 = vld [vmem:[%s2408_s2 + $0x458] sm:$0xff] }
  0x34   :  { %1236 = vmatprep.subr.mxu0 %v126_v39  ;;  %1269 = vmatprep.subr.mxu1 %v159_v40  ;;  %v210_v37 = vld [vmem:[%s2408_s2 + $0x560] sm:$0xff]  ;;  %v192_v38 = vld [vmem:[%s2408_s2 + $0x4d0] sm:$0xff]  ;;  %v225_v39 = vld [vmem:[%s2408_s2 + $0x5d8] sm:$0xff] }
  0x35   :  { %1237 = vmatpush3.msra.mxu0 %v110_v41  ;;  %1270 = vmatpush3.msra.mxu1 %v143_v42  ;;  %v176_v40 = vld [vmem:[%s2408_s2 + $0x450] sm:$0xff]  ;;  %v209_v41 = vld [vmem:[%s2408_s2 + $0x558] sm:$0xff]  ;;  %v191_v42 = vld [vmem:[%s2408_s2 + $0x4c8] sm:$0xff] }
  0x36   :  { %1238 = vmatprep.subr.mxu0 %v125_v43  ;;  %1271 = vmatprep.subr.mxu1 %v158_v44  ;;  %v224_v43 = vld [vmem:[%s2408_s2 + $0x5d0] sm:$0xff]  ;;  %v175_v44 = vld [vmem:[%s2408_s2 + $0x448] sm:$0xff] }
  0x37   :  { %1239 = vmatpush3.msra.mxu0 %v109_v45  ;;  %1272 = vmatpush3.msra.mxu1 %v142_v46  ;;  %v208_v45 = vld [vmem:[%s2408_s2 + $0x550] sm:$0xff]  ;;  %v190_v46 = vld [vmem:[%s2408_s2 + $0x4c0] sm:$0xff]  ;;  %v187_v59 = vld [vmem:[%s2408_s2 + $0x4a8] sm:$0xff] }
  0x38   :  { %1240 = vmatprep.subr.mxu0 %v124_v47  ;;  %1273 = vmatprep.subr.mxu1 %v157_v48  ;;  %v223_v47 = vld [vmem:[%s2408_s2 + $0x5c8] sm:$0xff]  ;;  %v174_v48 = vld [vmem:[%s2408_s2 + $0x440] sm:$0xff]  ;;  %v36_v2 = vld [vmem:[%s2406_s0 + $0x10] sm:$0xff] }
  0x39   :  { %1241 = vmatpush3.msra.mxu0 %v108_v50  ;;  %1274 = vmatpush3.msra.mxu1 %v141_v51  ;;  %v207_v50 = vld [vmem:[%s2408_s2 + $0x548] sm:$0xff]  ;;  %v189_v51 = vld [vmem:[%s2408_s2 + $0x4b8] sm:$0xff] }
  0x3a   :  { %1242 = vmatprep.subr.mxu0 %v123_v52  ;;  %1275 = vmatprep.subr.mxu1 %v156_v53  ;;  %v222_v52 = vld [vmem:[%s2408_s2 + $0x5c0] sm:$0xff]  ;;  %v173_v53 = vld [vmem:[%s2408_s2 + $0x438] sm:$0xff] }
  0x3b   :  { %1243 = vmatpush3.msra.mxu0 %v107_v54  ;;  %1276 = vmatpush3.msra.mxu1 %v140_v55  ;;  %v206_v54 = vld [vmem:[%s2408_s2 + $0x540] sm:$0xff]  ;;  %v188_v55 = vld [vmem:[%s2408_s2 + $0x4b0] sm:$0xff] }
  0x3c   :  { %1244 = vmatprep.subr.mxu0 %v122_v56  ;;  %1277 = vmatprep.subr.mxu1 %v155_v57  ;;  %v221_v56 = vld [vmem:[%s2408_s2 + $0x5b8] sm:$0xff]  ;;  %v172_v57 = vld [vmem:[%s2408_s2 + $0x430] sm:$0xff] }
  0x3d   :  { %1245 = vmatpush3.msra.mxu0 %v106_v58  ;;  %1278 = vmatpush3.msra.mxu1 %v139_v60  ;;  %v205_v58 = vld [vmem:[%s2408_s2 + $0x538] sm:$0xff]  ;;  %v220_v60 = vld [vmem:[%s2408_s2 + $0x5b0] sm:$0xff] }
  0x3e   :  { %1246 = vmatprep.subr.mxu0 %v121_v61  ;;  %1279 = vmatprep.subr.mxu1 %v154_v62  ;;  %v171_v61 = vld [vmem:[%s2408_s2 + $0x428] sm:$0xff]  ;;  %v204_v62 = vld [vmem:[%s2408_s2 + $0x530] sm:$0xff] }
  0x3f   :  { %1247 = vmatpush3.msra.mxu0 %v105_v63  ;;  %1280 = vmatpush3.msra.mxu1 %v138_v0  ;;  %v186_v63 = vld [vmem:[%s2408_s2 + $0x4a0] sm:$0xff]  ;;  %v219_v0 = vld [vmem:[%s2408_s2 + $0x5a8] sm:$0xff] }
  0x40   :  { %1248 = vmatprep.subr.mxu0 %v120_v1  ;;  %1281 = vmatprep.subr.mxu1 %v153_v3  ;;  %v170_v1 = vld [vmem:[%s2408_s2 + $0x420] sm:$0xff]  ;;  %v203_v3 = vld [vmem:[%s2408_s2 + $0x528] sm:$0xff] }
  0x41   :  { %1249 = vmatpush3.msra.mxu0 %v104_v4  ;;  %1282 = vmatpush3.msra.mxu1 %v137_v6  ;;  %v185_v4 = vld [vmem:[%s2408_s2 + $0x498] sm:$0xff] }
  0x42   :  { %1250 = vmatprep.subr.mxu0 %v119_v7  ;;  %1283 = vmatprep.subr.mxu1 %v152_v8 }
  0x43   :  { %1251 = vmatpush3.msra.mxu0 %v103_v9  ;;  %1284 = vmatpush3.msra.mxu1 %v136_v10 }
  0x44   :  { %1252 = vmatprep.subr.mxu0 %v118_v11  ;;  %1285 = vmatprep.subr.mxu1 %v151_v13 }
  0x45   :  { %1253 = vmatpush3.msra.mxu0 %v102_v14  ;;  %593 = vmatprep.mubr.f32.mxu0 %v337_v15 }
  0x46   :  { %1286 = vmatpush3.msra.mxu1 %v135_v16  ;;  %594 = vmatmul.mubr.f32.vlgmr.msra.gmra.mxu0 %v329_v5 }
  0x47   :  { %1287 = vmatprep.subr.mxu1 %v150_v17  ;;  %1292 = vmatprep.subr.mxu0 %v197_v18 }
  0x48   :  { %1288 = vmatpush3.msra.mxu1 %v134_v19  ;;  %663 = vmatprep.mubr.f32.mxu1 %v338_v20 }
  0x49   :  { %1293 = vmatpush3.msra.mxu0 %v181_v21  ;;  %664 = vmatmul.mubr.f32.vlgmr.msra.gmra.mxu1 %v336_v12 }
  0x4a   :  { %1294 = vmatprep.subr.mxu0 %v196_v22  ;;  %1327 = vmatprep.subr.mxu1 %v229_v23 }
  0x4b   :  { %1295 = vmatpush3.msra.mxu0 %v180_v24  ;;  %1328 = vmatpush3.msra.mxu1 %v213_v25 }
  0x4c   :  { %1296 = vmatprep.subr.mxu0 %v195_v26  ;;  %1329 = vmatprep.subr.mxu1 %v228_v27 }
  0x4d   :  { %1297 = vmatpush3.msra.mxu0 %v179_v28  ;;  %1330 = vmatpush3.msra.mxu1 %v212_v29 }
  0x4e   :  { %1298 = vmatprep.subr.mxu0 %v194_v30  ;;  %1331 = vmatprep.subr.mxu1 %v227_v31 }
  0x4f   :  { %1299 = vmatpush3.msra.mxu0 %v178_v32  ;;  %1332 = vmatpush3.msra.mxu1 %v211_v33 }
  0x50   :  { %1300 = vmatprep.subr.mxu0 %v193_v34  ;;  %1333 = vmatprep.subr.mxu1 %v226_v35 }
  0x51   :  { %1301 = vmatpush3.msra.mxu0 %v177_v36  ;;  %1334 = vmatpush3.msra.mxu1 %v210_v37 }
  0x52   :  { %1302 = vmatprep.subr.mxu0 %v192_v38  ;;  %1335 = vmatprep.subr.mxu1 %v225_v39 }
  0x53   :  { %1303 = vmatpush3.msra.mxu0 %v176_v40  ;;  %1336 = vmatpush3.msra.mxu1 %v209_v41 }
  0x54   :  { %1304 = vmatprep.subr.mxu0 %v191_v42  ;;  %1337 = vmatprep.subr.mxu1 %v224_v43 }
  0x55   :  { %1305 = vmatpush3.msra.mxu0 %v175_v44  ;;  %1338 = vmatpush3.msra.mxu1 %v208_v45 }
  0x56   :  { %1306 = vmatprep.subr.mxu0 %v190_v46  ;;  %1339 = vmatprep.subr.mxu1 %v223_v47 }
  0x57   :  { %1307 = vmatpush3.msra.mxu0 %v174_v48  ;;  %1340 = vmatpush3.msra.mxu1 %v207_v50 }
  0x58   :  { %1308 = vmatprep.subr.mxu0 %v189_v51  ;;  %1341 = vmatprep.subr.mxu1 %v222_v52 }
  0x59   :  { %1309 = vmatpush3.msra.mxu0 %v173_v53  ;;  %1342 = vmatpush3.msra.mxu1 %v206_v54 }
  0x5a   :  { %1310 = vmatprep.subr.mxu0 %v188_v55  ;;  %1343 = vmatprep.subr.mxu1 %v221_v56 }
  0x5b   :  { %1311 = vmatpush3.msra.mxu0 %v172_v57  ;;  %1344 = vmatpush3.msra.mxu1 %v205_v58 }
  0x5c   :  { %1312 = vmatprep.subr.mxu0 %v187_v59  ;;  %1345 = vmatprep.subr.mxu1 %v220_v60 }
  0x5d   :  { %1313 = vmatpush3.msra.mxu0 %v171_v61 }
  0x5e   :  { %17 = vsyncpa [#allocation4], 0  ;;  %1346 = vmatpush3.msra.mxu1 %v204_v62  ;;  %1314 = vmatprep.subr.mxu0 %v186_v63  ;;  %v218_v5 = vld [vmem:[%s2408_s2 + $0x5a0] sm:$0xff]  ;;  %v169_v6 = vld [vmem:[%s2408_s2 + $0x418] sm:$0xff]  ;;  %v339_v9 = vcombine.high %v36_v2, %v36_v2  ;;  %v346_v12 = vrot.slane %v36_v2, %v1694_v49  ;;  %vm1510_vm0 = vmmov 0   ;;  %vm966_vm1 = vcmask 523264  }
  0x5f   :  { %1347 = vmatprep.subr.mxu1 %v219_v0  ;;  %1315 = vmatpush3.msra.mxu0 %v170_v1  ;;  %v202_v7 = vld [vmem:[%s2408_s2 + $0x520] sm:$0xff]  ;;  %v184_v8 = vld [vmem:[%s2408_s2 + $0x490] sm:$0xff]  ;;  %v217_v10 = vld [vmem:[%s2408_s2 + $0x598] sm:$0xff]  ;;  %vm1052_vm2 = vcmask 261120   ;;  %s1511_s24 = smov [#allocation3]  }
  0x60   :  { %1348 = vmatpush3.msra.mxu1 %v203_v3  ;;  %1316 = vmatprep.subr.mxu0 %v185_v4  ;;  %v168_v11 = vld [vmem:[%s2408_s2 + $0x410] sm:$0xff]  ;;  %v201_v13 = vld [vmem:[%s2408_s2 + $0x518] sm:$0xff]  ;;  %v183_v14 = vld [vmem:[%s2408_s2 + $0x488] sm:$0xff]  ;;  %v353_v19 = vrot.slane %v339_v9, %v1694_v49  ;;  %v354_v22 = vcombine.high %v346_v12, %v346_v12  ;;  %s1135_s25 = sshll.u32 %s1511_s24, 4  ;;  %s1136_s25 = int_to_ptr.vmem [resolvable:$true] %s1135_s25 }
  0x61   :  { %1349 = vmatprep.subr.mxu1 %v218_v5  ;;  %1317 = vmatpush3.msra.mxu0 %v169_v6  ;;  %v216_v15 = vld [vmem:[%s2408_s2 + $0x590] sm:$0xff]  ;;  %v167_v16 = vld [vmem:[%s2408_s2 + $0x408] sm:$0xff]  ;;  %v182_v18 = vld [vmem:[%s2408_s2 + $0x480] sm:$0xff]  ;;  %p1491_p1 = scmp.lt.s32.totalorder %s1136_s25, %s1136_s25 }
  0x62   :  { %1350 = vmatpush3.msra.mxu1 %v202_v7  ;;  %1318 = vmatprep.subr.mxu0 %v184_v8  ;;  %v200_v17 = vld [vmem:[%s2408_s2 + $0x510] sm:$0xff]  ;;  %v215_v20 = vld [vmem:[%s2408_s2 + $0x588] sm:$0xff]  ;;  %v166_v21 = vld [vmem:[%s2408_s2 + $0x400] sm:$0xff]  ;;  %v355_v27 = vcombine.high %v353_v19, %v353_v19 }
  0x63   :  { %1351 = vmatprep.subr.mxu1 %v217_v10  ;;  %1319 = vmatpush3.msra.mxu0 %v168_v11  ;;  %v199_v23 = vld [vmem:[%s2408_s2 + $0x508] sm:$0xff]  ;;  %v214_v24 = vld [vmem:[%s2408_s2 + $0x580] sm:$0xff]  ;;  %v261_v25 = vld [vmem:[%s2408_s2 + $0x6f8] sm:$0xff] }
  0x64   :  { %1352 = vmatpush3.msra.mxu1 %v201_v13  ;;  %1320 = vmatprep.subr.mxu0 %v183_v14  ;;  %v198_v26 = vld [vmem:[%s2408_s2 + $0x500] sm:$0xff]  ;;  %v245_v28 = vld [vmem:[%s2408_s2 + $0x678] sm:$0xff]  ;;  %v260_v29 = vld [vmem:[%s2408_s2 + $0x6f0] sm:$0xff] }
  0x65   :  { %1353 = vmatprep.subr.mxu1 %v216_v15  ;;  %1321 = vmatpush3.msra.mxu0 %v167_v16  ;;  %v293_v30 = vld [vmem:[%s2408_s2 + $0x7f8] sm:$0xff]  ;;  %v244_v31 = vld [vmem:[%s2408_s2 + $0x670] sm:$0xff]  ;;  %v259_v33 = vld [vmem:[%s2408_s2 + $0x6e8] sm:$0xff] }
  0x66   :  { %1354 = vmatpush3.msra.mxu1 %v200_v17  ;;  %1322 = vmatprep.subr.mxu0 %v182_v18  ;;  %v277_v32 = vld [vmem:[%s2408_s2 + $0x778] sm:$0xff]  ;;  %v292_v34 = vld [vmem:[%s2408_s2 + $0x7f0] sm:$0xff]  ;;  %v243_v35 = vld [vmem:[%s2408_s2 + $0x668] sm:$0xff] }
  0x67   :  { %1355 = vmatprep.subr.mxu1 %v215_v20  ;;  %1323 = vmatpush3.msra.mxu0 %v166_v21  ;;  %v276_v36 = vld [vmem:[%s2408_s2 + $0x770] sm:$0xff]  ;;  %v258_v37 = vld [vmem:[%s2408_s2 + $0x6e0] sm:$0xff]  ;;  %v291_v38 = vld [vmem:[%s2408_s2 + $0x7e8] sm:$0xff] }
  0x68   :  { %733 = vmatprep.mubr.f32.mxu0 %v354_v22  ;;  %1356 = vmatpush3.msra.mxu1 %v199_v23  ;;  %v242_v39 = vld [vmem:[%s2408_s2 + $0x660] sm:$0xff]  ;;  %v275_v40 = vld [vmem:[%s2408_s2 + $0x768] sm:$0xff]  ;;  %v257_v41 = vld [vmem:[%s2408_s2 + $0x6d8] sm:$0xff] }
  0x69   :  { %734 = vmatmul.mubr.f32.vlgmr.msra.gmra.mxu0 %v346_v12  ;;  %1357 = vmatprep.subr.mxu1 %v214_v24  ;;  %v290_v42 = vld [vmem:[%s2408_s2 + $0x7e0] sm:$0xff]  ;;  %v241_v43 = vld [vmem:[%s2408_s2 + $0x658] sm:$0xff]  ;;  %v256_v45 = vld [vmem:[%s2408_s2 + $0x6d0] sm:$0xff] }
  0x6a   :  { %1362 = vmatprep.subr.mxu0 %v261_v25  ;;  %1358 = vmatpush3.msra.mxu1 %v198_v26  ;;  %v274_v44 = vld [vmem:[%s2408_s2 + $0x760] sm:$0xff]  ;;  %v289_v46 = vld [vmem:[%s2408_s2 + $0x7d8] sm:$0xff]  ;;  %v240_v47 = vld [vmem:[%s2408_s2 + $0x650] sm:$0xff] }
  0x6b   :  { %803 = vmatprep.mubr.f32.mxu1 %v355_v27  ;;  %1363 = vmatpush3.msra.mxu0 %v245_v28  ;;  %v273_v48 = vld [vmem:[%s2408_s2 + $0x758] sm:$0xff]  ;;  %v255_v50 = vld [vmem:[%s2408_s2 + $0x6c8] sm:$0xff]  ;;  %v288_v51 = vld [vmem:[%s2408_s2 + $0x7d0] sm:$0xff] }
  0x6c   :  { %804 = vmatmul.mubr.f32.vlgmr.msra.gmra.mxu1 %v353_v19  ;;  %1364 = vmatprep.subr.mxu0 %v260_v29  ;;  %v239_v52 = vld [vmem:[%s2408_s2 + $0x648] sm:$0xff]  ;;  %v272_v53 = vld [vmem:[%s2408_s2 + $0x750] sm:$0xff]  ;;  %v254_v54 = vld [vmem:[%s2408_s2 + $0x6c0] sm:$0xff] }
  0x6d   :  { %1397 = vmatprep.subr.mxu1 %v293_v30  ;;  %1365 = vmatpush3.msra.mxu0 %v244_v31  ;;  %v287_v55 = vld [vmem:[%s2408_s2 + $0x7c8] sm:$0xff]  ;;  %v238_v56 = vld [vmem:[%s2408_s2 + $0x640] sm:$0xff]  ;;  %v253_v58 = vld [vmem:[%s2408_s2 + $0x6b8] sm:$0xff] }
  0x6e   :  { %1398 = vmatpush3.msra.mxu1 %v277_v32  ;;  %1366 = vmatprep.subr.mxu0 %v259_v33  ;;  %v271_v57 = vld [vmem:[%s2408_s2 + $0x748] sm:$0xff]  ;;  %v286_v59 = vld [vmem:[%s2408_s2 + $0x7c0] sm:$0xff]  ;;  %v237_v60 = vld [vmem:[%s2408_s2 + $0x638] sm:$0xff] }
  0x6f   :  { %1399 = vmatprep.subr.mxu1 %v292_v34  ;;  %1367 = vmatpush3.msra.mxu0 %v243_v35  ;;  %v270_v61 = vld [vmem:[%s2408_s2 + $0x740] sm:$0xff]  ;;  %v252_v62 = vld [vmem:[%s2408_s2 + $0x6b0] sm:$0xff]  ;;  %v285_v63 = vld [vmem:[%s2408_s2 + $0x7b8] sm:$0xff]  ;;  %v1509_v34 = vmov 0.0  }
  0x70   :  { %1400 = vmatpush3.msra.mxu1 %v276_v36  ;;  %1368 = vmatprep.subr.mxu0 %v258_v37  ;;  %v236_v0 = vld [vmem:[%s2408_s2 + $0x630] sm:$0xff]  ;;  %v269_v1 = vld [vmem:[%s2408_s2 + $0x738] sm:$0xff]  ;;  %v251_v2 = vld [vmem:[%s2408_s2 + $0x6a8] sm:$0xff] }
  0x71   :  { %1401 = vmatprep.subr.mxu1 %v291_v38  ;;  %1369 = vmatpush3.msra.mxu0 %v242_v39  ;;  %v284_v3 = vld [vmem:[%s2408_s2 + $0x7b0] sm:$0xff]  ;;  %v235_v4 = vld [vmem:[%s2408_s2 + $0x628] sm:$0xff]  ;;  %v250_v6 = vld [vmem:[%s2408_s2 + $0x6a0] sm:$0xff] }
  0x72   :  { %1402 = vmatpush3.msra.mxu1 %v275_v40  ;;  %1370 = vmatprep.subr.mxu0 %v257_v41  ;;  %v268_v5 = vld [vmem:[%s2408_s2 + $0x730] sm:$0xff]  ;;  %v283_v7 = vld [vmem:[%s2408_s2 + $0x7a8] sm:$0xff]  ;;  %v234_v8 = vld [vmem:[%s2408_s2 + $0x620] sm:$0xff] }
  0x73   :  { %1403 = vmatprep.subr.mxu1 %v290_v42  ;;  %1371 = vmatpush3.msra.mxu0 %v241_v43  ;;  %v37_v9 = vld [vmem:[%s2406_s0 + $0x18] sm:$0xff]  ;;  %v267_v10 = vld [vmem:[%s2408_s2 + $0x728] sm:$0xff]  ;;  %v282_v12 = vld [vmem:[%s2408_s2 + $0x7a0] sm:$0xff] }
  0x74   :  { %1404 = vmatpush3.msra.mxu1 %v274_v44  ;;  %1372 = vmatprep.subr.mxu0 %v256_v45  ;;  %v249_v11 = vld [vmem:[%s2408_s2 + $0x698] sm:$0xff]  ;;  %v266_v14 = vld [vmem:[%s2408_s2 + $0x720] sm:$0xff]  ;;  %v248_v15 = vld [vmem:[%s2408_s2 + $0x690] sm:$0xff]  ;;  %v356_v16 = vcombine.high %v37_v9, %v37_v9  ;;  %v363_v19 = vrot.slane %v37_v9, %v1694_v49 }
  0x75   :  { %1405 = vmatprep.subr.mxu1 %v289_v46  ;;  %1373 = vmatpush3.msra.mxu0 %v240_v47  ;;  %v233_v13 = vld [vmem:[%s2408_s2 + $0x618] sm:$0xff]  ;;  %v232_v18 = vld [vmem:[%s2408_s2 + $0x610] sm:$0xff]  ;;  %v247_v21 = vld [vmem:[%s2408_s2 + $0x688] sm:$0xff] }
  0x76   :  { %1406 = vmatpush3.msra.mxu1 %v273_v48  ;;  %1374 = vmatprep.subr.mxu0 %v255_v50  ;;  %v281_v17 = vld [vmem:[%s2408_s2 + $0x798] sm:$0xff]  ;;  %v280_v22 = vld [vmem:[%s2408_s2 + $0x790] sm:$0xff]  ;;  %v231_v23 = vld [vmem:[%s2408_s2 + $0x608] sm:$0xff]  ;;  %v370_v26 = vrot.slane %v356_v16, %v1694_v49  ;;  %v371_v29 = vcombine.high %v363_v19, %v363_v19 }
  0x77   :  { %1407 = vmatprep.subr.mxu1 %v288_v51  ;;  %1375 = vmatpush3.msra.mxu0 %v239_v52  ;;  %v265_v20 = vld [vmem:[%s2408_s2 + $0x718] sm:$0xff]  ;;  %v264_v24 = vld [vmem:[%s2408_s2 + $0x710] sm:$0xff]  ;;  %v246_v25 = vld [vmem:[%s2408_s2 + $0x680] sm:$0xff] }
  0x78   :  { %1408 = vmatpush3.msra.mxu1 %v272_v53  ;;  %1376 = vmatprep.subr.mxu0 %v254_v54  ;;  %v279_v27 = vld [vmem:[%s2408_s2 + $0x788] sm:$0xff]  ;;  %v230_v28 = vld [vmem:[%s2408_s2 + $0x600] sm:$0xff]  ;;  %v372_v32 = vcombine.high %v370_v26, %v370_v26  ;;  %v958_v33 = vld [vmem:[%s2410_s4 + $0x38] sm:$0xff] }
  0x79   :  { %1409 = vmatprep.subr.mxu1 %v287_v55  ;;  %1377 = vmatpush3.msra.mxu0 %v238_v56  ;;  %v263_v30 = vld [vmem:[%s2408_s2 + $0x708] sm:$0xff]  ;;  %v278_v49 = vld [vmem:[%s2408_s2 + $0x780] sm:$0xff]  ;;  %v957_v35 = vld [vmem:[%s2410_s4 + $0x30] sm:$0xff] }
  0x7a   :  { %1410 = vmatpush3.msra.mxu1 %v271_v57  ;;  %1378 = vmatprep.subr.mxu0 %v253_v58  ;;  %v262_v31 = vld [vmem:[%s2408_s2 + $0x700] sm:$0xff]  ;;  %v956_v36 = vld [vmem:[%s2410_s4 + $0x28] sm:$0xff]  ;;  %v954_v38 = vld [vmem:[%s2410_s4 + $0x18] sm:$0xff]  ;;  %s1486_s2 = scalar_lea.vmem %s1136_s25, 32 }
  0x7b   :  { %1411 = vmatprep.subr.mxu1 %v286_v59  ;;  %1379 = vmatpush3.msra.mxu0 %v237_v60  ;;  %v955_v37 = vld [vmem:[%s2410_s4 + $0x20] sm:$0xff]  ;;  %v953_v39 = vld [vmem:[%s2410_s4 + $0x10] sm:$0xff]  ;;  %v952_v40 = vld [vmem:[%s2410_s4 + $0x8] sm:$0xff]  ;;  %p1487_p0 = scmp.ne.s32.totalorder %s1136_s25, %s1486_s2  ;;  %p1492_p2 = scmp.lt.s32.totalorder %s1486_s2, %s1486_s2 }
  0x7c   :  { %1412 = vmatpush3.msra.mxu1 %v270_v61  ;;  %1380 = vmatprep.subr.mxu0 %v252_v62  ;;  %v951_v41 = vld [vmem:[%s2410_s4] sm:$0xff]  ;;  %v1044_v43 = vld [vmem:[%s2412_s6 + $0x18] sm:$0xff]  ;;  %v1043_v44 = vld [vmem:[%s2412_s6 + $0x10] sm:$0xff] }
  0x7d   :  { %1413 = vmatprep.subr.mxu1 %v285_v63  ;;  %1381 = vmatpush3.msra.mxu0 %v236_v0  ;;  %v950_v42 = vld [vmem:[%s2407_s1] sm:$0x3]  ;;  %v1042_v45 = vld [vmem:[%s2412_s6 + $0x8] sm:$0xff]  ;;  %p1493_p3 = por %p1492_p2, %p1491_p1 }
  0x7e   :  { %1414 = vmatpush3.msra.mxu1 %v269_v1  ;;  %1382 = vmatprep.subr.mxu0 %v251_v2  ;;  %v1041_v46 = vld [vmem:[%s2412_s6] sm:$0xff] }
  0x7f   :  { %1415 = vmatprep.subr.mxu1 %v284_v3  ;;  %1383 = vmatpush3.msra.mxu0 %v235_v4  ;;  %v1147_v53 = vld [vmem:[%s2409_s3] ss:$0 sm:$0xff]  ;;  %p1494_p4 = pnand %p1493_p3, %p1487_p0 }
  0x80   :  { %1416 = vmatpush3.msra.mxu1 %v268_v5  ;;  %1384 = vmatprep.subr.mxu0 %v250_v6 }
  0x81   :  { %1417 = vmatprep.subr.mxu1 %v283_v7  ;;  %1385 = vmatpush3.msra.mxu0 %v234_v8 }
  0x82   :  { %1418 = vmatpush3.msra.mxu1 %v267_v10  ;;  %1386 = vmatprep.subr.mxu0 %v249_v11 }
  0x83   :  { %1419 = vmatprep.subr.mxu1 %v282_v12  ;;  %1387 = vmatpush3.msra.mxu0 %v233_v13 }
  0x84   :  { %1420 = vmatpush3.msra.mxu1 %v266_v14  ;;  %1388 = vmatprep.subr.mxu0 %v248_v15 }
  0x85   :  { %1421 = vmatprep.subr.mxu1 %v281_v17  ;;  %1389 = vmatpush3.msra.mxu0 %v232_v18  ;;  %v1148_v17 = vld [vmem:[%s2411_s5] ss:$0 sm:$0xff] }
  0x86   :  { %1422 = vmatpush3.msra.mxu1 %v265_v20  ;;  %1390 = vmatprep.subr.mxu0 %v247_v21 }
  0x87   :  { %1423 = vmatprep.subr.mxu1 %v280_v22  ;;  %1391 = vmatpush3.msra.mxu0 %v231_v23 }
  0x88   :  { %1424 = vmatpush3.msra.mxu1 %v264_v24  ;;  %1392 = vmatprep.subr.mxu0 %v246_v25 }
  0x89   :  { %1425 = vmatprep.subr.mxu1 %v279_v27  ;;  %1393 = vmatpush3.msra.mxu0 %v230_v28 }
  0x8a   :  { %873 = vmatprep.mubr.f32.mxu0 %v371_v29  ;;  %1426 = vmatpush3.msra.mxu1 %v263_v30 }
  0x8b   :  { %874 = vmatmul.mubr.f32.vlgmr.msra.gmra.mxu0 %v363_v19  ;;  %1427 = vmatprep.subr.mxu1 %v278_v49 }
  0x8c   :  { %1446 = vmatprep.subr.mxu0 %v1509_v34  ;;  %1428 = vmatpush3.msra.mxu1 %v262_v31 }
  0x8d   :  { %943 = vmatprep.mubr.f32.mxu1 %v372_v32  ;;  %1447 = vmatpush3.msra.mxu0 %v958_v33 }
  0x8e   :  { %944 = vmatmul.mubr.f32.vlgmr.msra.gmra.mxu1 %v370_v26  ;;  %1448 = vmatprep.subr.mxu0 %v1509_v34 }
  0x8f   :  { %1449 = vmatpush3.msra.mxu0 %v957_v35  ;;  %1462 = vmatprep.mubr.msk.f32.mxu0 %vm1510_vm0, %v1509_v34 }
  0x90   :  { %1450 = vmatprep.subr.mxu0 %v1509_v34  ;;  %1465 = vmatprep.subr.mxu1 %v1509_v34 }
  0x91   :  { %1451 = vmatpush3.msra.mxu0 %v956_v36  ;;  %1473 = vmatprep.mubr.msk.f32.mxu1 %vm1510_vm0, %v1509_v34 }
  0x92   :  { %1452 = vmatprep.subr.mxu0 %v1509_v34  ;;  %1466 = vmatpush3.msra.mxu1 %v1044_v43 }
  0x93   :  { %1453 = vmatpush3.msra.mxu0 %v955_v37  ;;  %1467 = vmatprep.subr.mxu1 %v1509_v34 }
  0x94   :  { %1454 = vmatprep.subr.mxu0 %v1509_v34  ;;  %1468 = vmatpush3.msra.mxu1 %v1043_v44 }
  0x95   :  { %1455 = vmatpush3.msra.mxu0 %v954_v38  ;;  %1469 = vmatprep.subr.mxu1 %v1509_v34 }
  0x96   :  { %1456 = vmatprep.subr.mxu0 %v1509_v34  ;;  %1470 = vmatpush3.msra.mxu1 %v1042_v45 }
  0x97   :  { %1457 = vmatpush3.msra.mxu0 %v953_v39  ;;  %1471 = vmatprep.subr.mxu1 %v1509_v34 }
  0x98   :  { %1458 = vmatprep.subr.mxu0 %v1509_v34  ;;  %1472 = vmatpush3.msra.mxu1 %v1041_v46 }
  0x99   :  { %1459 = vmatpush3.msra.mxu0 %v952_v40 }
  0x9a   :  { %1460 = vmatprep.subr.mxu0 %v1509_v34 }
  0x9b   :  { %1461 = vmatpush3.msra.mxu0 %v951_v41 }
  0x9c   :  { %1463 = vmatmul.mubr.msk.f32.vlgmr.msra.gmra.mxu0 %vm966_vm1, %v950_v42 }
  0xe4   :  { %v1184_v47 = vpop.f32.mrf.mxu0 }
  0xe6   :  { %v1185_v48 = vpop.f32.mrf.mxu0 }
  0xe7   :  { %v1219_v50 = vpop.f32.mrf.mxu1  ;;  %v1186_v52 = vadd.f32 %v1185_v48, %v1184_v47 }
  0xe9   :  { %v1220_v54 = vpop.f32.mrf.mxu1  ;;  %v456_v57 = vadd.f32 %v1186_v52, %v1147_v53 }
  0xea   :  { %v1221_v58 = vadd.f32 %v1220_v54, %v1219_v50 }
  0xec   :  { %v526_v62 = vadd.f32 %v1221_v58, %v456_v57 }
 0x106   :  { %v1254_v51 = vpop.f32.mrf.mxu0 }
 0x108   :  { %v1255_v55 = vpop.f32.mrf.mxu0 }
 0x109   :  { %v1289_v56 = vpop.f32.mrf.mxu1  ;;  %v1256_v60 = vadd.f32 %v1255_v55, %v1254_v51 }
 0x10b   :  { %v1290_v61 = vpop.f32.mrf.mxu1  ;;  %v596_v1 = vadd.f32 %v1256_v60, %v526_v62 }
 0x10c   :  { %v1291_v2 = vadd.f32 %v1290_v61, %v1289_v56 }
 0x10e   :  { %v666_v5 = vadd.f32 %v1291_v2, %v596_v1 }
 0x129   :  { %v1324_v59 = vpop.f32.mrf.mxu0 }
 0x12b   :  { %v1325_v63 = vpop.f32.mrf.mxu0 }
 0x12c   :  { %v1359_v0 = vpop.f32.mrf.mxu1  ;;  %v1326_v3 = vadd.f32 %v1325_v63, %v1324_v59 }
 0x12e   :  { %v1360_v4 = vpop.f32.mrf.mxu1  ;;  %v736_v6 = vadd.f32 %v1326_v3, %v666_v5 }
 0x12f   :  { %v1361_v7 = vadd.f32 %v1360_v4, %v1359_v0 }
 0x131   :  { %v806_v10 = vadd.f32 %v1361_v7, %v736_v6 }
 0x14b   :  { %v1394_v8 = vpop.f32.mrf.mxu0 }
 0x14d   :  { %v1395_v9 = vpop.f32.mrf.mxu0 }
 0x14e   :  { %v1396_v11 = vadd.f32 %v1395_v9, %v1394_v8  ;;  %v1429_v12 = vpop.f32.mrf.mxu1 }
 0x150   :  { %v876_v13 = vadd.f32 %v1396_v11, %v806_v10  ;;  %v1430_v14 = vpop.f32.mrf.mxu1 }
 0x151   :  { %v1431_v15 = vadd.f32 %v1430_v14, %v1429_v12 }
 0x153   :  { %v946_v16 = vadd.f32 %v1431_v15, %v876_v13 }
 0x155   :  { %949 = vst [vmem:[#allocation3] sm:$0x3] %v946_v16 }
 0x15c   :  { %v1036_v18 = vpop.f32.mrf.mxu0 }
 0x15d   :  { %v1037_v19 = vadd.f32 %v1148_v17, %v1036_v18 }
 0x15e   :  { %v1464_v20 = vpop.f32.mrf.mxu0 }
 0x15f   :  { %v1040_v21 = vmax.f32 %v1037_v19, 0.0 }
 0x161   :  { %1474 = vmatmul.mubr.msk.f32.vlgmr.msra.gmra.mxu1 %vm1052_vm2, %v1040_v21 }
 0x162   :  { %1497 = shalt.err (!%p1494_p4)
}
 0x163   :  { %1138 = dma.vmem_to_hbm [thread:$0]  %s1136_s25, 32, %s2414_s8, [#allocation4]   ;;  %v1150_v22 = vld [vmem:[#allocation2] ss:$0 sm:$0xff]  ;;  %vm1127_vm3 = vcmask 1024  }
 0x221   :  { %v1122_v23 = vpop.f32.mrf.mxu1 }
 0x222   :  { %v1123_v24 = vadd.f32 %v1150_v22, %v1122_v23 }
 0x223   :  { %v1475_v25 = vpop.f32.mrf.mxu1 }
 0x224   :  { %1484 = vtanh.f32 %v1123_v24 }
 0x231   :  { %v1485_v26 = vpop.eup %1484 }
 0x232   :  { %1128 = vst.msk [vmem:[%s2415_s9] sm:$0x3] %vm1127_vm3, %v1485_v26 }
 0x233   :  { %1506 = dma.done.wait [#allocation4], 32  }
 0x234   :  { %1507 = vsyncadd [#allocation4], 4294967264 }
 0x235   :  { %1146 = vsyncpa [#allocation4], 1 }

// kernel: forward_pallas.2
= control target key start
LH: loop header
LB: loop body
LE: loop exit
PB: predicated region body
PF: predicated region fallthrough
CT: control target
= control target key end

     0   :  { %s22354_s0 = inlined_call_operand.vmem [shape: f32[2,8,8,32], index: 0, kind: input, shape index: {}]   ;;  %s22355_s1 = inlined_call_operand.vmem [shape: f32[9,32,32], index: 1, kind: input, shape index: {}]   ;;  %s22356_s2 = inlined_call_operand.vmem [shape: f32[1,32], index: 2, kind: input, shape index: {}]   ;;  %s22357_s3 = inlined_call_operand.vmem [shape: f32[1,32], index: 3, kind: input, shape index: {}]   ;;  %s22358_s4 = inlined_call_operand.hbm [shape: f32[9,32,32], index: 4, kind: input, shape index: {}]   ;;  %s22359_s5 = inlined_call_operand.vmem [shape: f32[1,32], index: 5, kind: input, shape index: {}]   ;;  %s22360_s6 = inlined_call_operand.vmem [shape: f32[1,32], index: 6, kind: input, shape index: {}]   ;;  %s22361_s7 = inlined_call_operand.hbm [shape: f32[9,32,32], index: 7, kind: input, shape index: {}]   ;;  %s22362_s8 = inlined_call_operand.vmem [shape: f32[1,32], index: 8, kind: input, shape index: {}]   ;;  %s22363_s9 = inlined_call_operand.vmem [shape: f32[1,32], index: 9, kind: input, shape index: {}]   ;;  %s22364_s10 = inlined_call_operand.hbm [shape: f32[9,32,32], index: 10, kind: input, shape index: {}]   ;;  %s22365_s11 = inlined_call_operand.vmem [shape: f32[1,32], index: 11, kind: input, shape index: {}]   ;;  %s22366_s12 = inlined_call_operand.vmem [shape: f32[1,32], index: 12, kind: input, shape index: {}]   ;;  %s22367_s13 = inlined_call_operand.hbm [shape: f32[9,32,32], index: 13, kind: input, shape index: {}]   ;;  %s22368_s14 = inlined_call_operand.vmem [shape: f32[1,32], index: 14, kind: input, shape index: {}]   ;;  %s22369_s15 = inlined_call_operand.vmem [shape: f32[1,32], index: 15, kind: input, shape index: {}]   ;;  %s22370_s16 = inlined_call_operand.hbm [shape: f32[9,32,32], index: 16, kind: input, shape index: {}]   ;;  %s22371_s17 = inlined_call_operand.vmem [shape: f32[1,32], index: 17, kind: input, shape index: {}]   ;;  %s22372_s18 = inlined_call_operand.vmem [shape: f32[1,32], index: 18, kind: input, shape index: {}]   ;;  %s22373_s19 = inlined_call_operand.vmem [shape: f32[32,1], index: 19, kind: input, shape index: {}]   ;;  %s22374_s20 = inlined_call_operand.<no memory space> [shape: f32[1,1], index: 20, kind: input, shape index: {}]   ;;  %s22375_s22 = inlined_call_operand.vmem [shape: f32[128,32], index: 22, kind: output, shape index: {0}]   ;;  %s22376_s23 = inlined_call_operand.vmem [shape: f32[128,1], index: 23, kind: output, shape index: {1}]   ;;  %s22377_s21 = inlined_call_operand.<no memory space> [shape: f32[1,1], index: 21, kind: input, shape index: {}]  }
   0x1   :  { %22390 = sst [smem:[#allocation58_spill]] %s22354_s0  ;;  %v29_v0 = vstv %s22374_s20  ;;  %v31_v1 = vstv %s22377_s21 }
   0x2   :  { %22391 = sst [smem:[#allocation59_spill]] %s22355_s1  ;;  %30 = vst [vmem:[#allocation5] sm:$0x1] %v29_v0  ;;  %32 = vst [vmem:[#allocation6] sm:$0x1] %v31_v1 }
   0x3   :  { %22392 = sst [smem:[#allocation60_spill]] %s22356_s2 }
   0x4   :  { %22393 = sst [smem:[#allocation61_spill]] %s22357_s3 }
   0x5   :  { %22394 = sst [smem:[#allocation62_spill]] %s22358_s4 }
   0x6   :  { %22395 = sst [smem:[#allocation63_spill]] %s22359_s5 }
   0x7   :  { %22396 = sst [smem:[#allocation64_spill]] %s22360_s6 }
   0x8   :  { %22397 = sst [smem:[#allocation65_spill]] %s22361_s7 }
   0x9   :  { %33 = vsyncpa [#allocation8], 0 }
   0xa   :  { %34 = vsyncpa [#allocation10], 0 }
   0xb   :  { %35 = vsyncpa [#allocation13], 0  ;;  %s17346_s5 = smov [#allocation9]   ;;  %s17347_s26 = smov [#allocation12]  }
   0xc   :  { %s65_s1 = sshll.u32 %s17346_s5, 4  ;;  %s97_s2 = sshll.u32 %s17347_s26, 4  ;;  %s66_s1 = int_to_ptr.vmem [resolvable:$true] %s65_s1  ;;  %s98_s2 = int_to_ptr.vmem [resolvable:$true] %s97_s2 }
   0xd   :  { %s17248_s6 = scalar_lea.vmem %s66_s1, 4608  ;;  %p17253_p1 = scmp.lt.s32.totalorder %s66_s1, %s66_s1 }
   0xe   :  { %p17249_p0 = scmp.ne.s32.totalorder %s66_s1, %s17248_s6  ;;  %p17254_p2 = scmp.lt.s32.totalorder %s17248_s6, %s17248_s6 }
  0x10   :  { %p17255_p3 = por %p17254_p2, %p17253_p1 }
  0x12   :  { %p17256_p4 = pnand %p17255_p3, %p17249_p0 }
  0x14   :  { %17259 = shalt.err (!%p17256_p4)
}
  0x15   :  { %s17348_s20 = smov 128   ;;  %s17349_s21 = smov 8  }
  0x16   :  { %s22398_s28 = sld [smem:[#allocation65_spill]]  ;;  %s17268_s29 = scalar_lea.vmem %s98_s2, 4608 }
  0x17   :  { %p17269_p5 = scmp.ne.s32.totalorder %s98_s2, %s17268_s29  ;;  %p17273_p6 = scmp.lt.s32.totalorder %s98_s2, %s98_s2 }
  0x18   :  { %p17274_p7 = scmp.lt.s32.totalorder %s17268_s29, %s17268_s29 }
  0x1a   :  { %p17275_p8 = por %p17274_p7, %p17273_p6 }
  0x1c   :  { %71 = dma.hbm_to_vmem [thread:$0]  %s22398_s28, 4608, %s66_s1, [#allocation10], %s17348_s20, %s17348_s20, %s17349_s21  }
  0x1d   :  { %p17276_p9 = pnand %p17275_p8, %p17269_p5 }
  0x1f   :  { %17279 = shalt.err (!%p17276_p9)
}
  0x20   :  { %103 = dma.hbm_to_vmem [thread:$0]  %s22367_s13, 4608, %s98_s2, [#allocation13], %s17348_s20, %s17348_s20, %s17349_s21  }
  0x21   :  { %s17350_s4 = smov [#allocation7]   ;;  %s17351_s24 = smov [#allocation11]  }
  0x22   :  { %s49_s30 = sshll.u32 %s17350_s4, 4  ;;  %s81_s25 = sshll.u32 %s17351_s24, 4  ;;  %s50_s30 = int_to_ptr.vmem [resolvable:$true] %s49_s30  ;;  %s82_s25 = int_to_ptr.vmem [resolvable:$true] %s81_s25 }
  0x23   :  { %s17288_s5 = scalar_lea.vmem %s50_s30, 4608  ;;  %p17293_p11 = scmp.lt.s32.totalorder %s50_s30, %s50_s30 }
  0x24   :  { %p17289_p10 = scmp.ne.s32.totalorder %s50_s30, %s17288_s5  ;;  %p17294_p12 = scmp.lt.s32.totalorder %s17288_s5, %s17288_s5 }
  0x26   :  { %p17295_p13 = por %p17294_p12, %p17293_p11 }
  0x28   :  { %p17296_p0 = pnand %p17295_p13, %p17289_p10 }
  0x2a   :  { %17299 = shalt.err (!%p17296_p0)
}
  0x2b   :  { %s22399_s6 = sld [smem:[#allocation62_spill]]  ;;  %s17308_s13 = scalar_lea.vmem %s82_s25, 4608 }
  0x2c   :  { %p17309_p1 = scmp.ne.s32.totalorder %s82_s25, %s17308_s13  ;;  %p17313_p2 = scmp.lt.s32.totalorder %s82_s25, %s82_s25 }
  0x2d   :  { %p17314_p3 = scmp.lt.s32.totalorder %s17308_s13, %s17308_s13 }
  0x2f   :  { %p17315_p4 = por %p17314_p3, %p17313_p2 }
  0x31   :  { %55 = dma.hbm_to_vmem [thread:$0]  %s22399_s6, 4608, %s50_s30, [#allocation8], %s17348_s20, %s17348_s20, %s17349_s21  }
  0x32   :  { %p17316_p5 = pnand %p17315_p4, %p17309_p1 }
  0x34   :  { %17319 = shalt.err (!%p17316_p5)
}
  0x35   :  { %87 = dma.hbm_to_vmem [thread:$0]  %s22364_s10, 4608, %s82_s25, [#allocation10], %s17348_s20, %s17348_s20, %s17349_s21  }
  0x36   :  { %s17352_s7 = smov [#allocation14]  }
  0x37   :  { %s113_s28 = sshll.u32 %s17352_s7, 4  ;;  %s114_s28 = int_to_ptr.vmem [resolvable:$true] %s113_s28 }
  0x38   :  { %s17328_s29 = scalar_lea.vmem %s114_s28, 4608  ;;  %p17333_p7 = scmp.lt.s32.totalorder %s114_s28, %s114_s28 }
  0x39   :  { %p17329_p6 = scmp.ne.s32.totalorder %s114_s28, %s17328_s29  ;;  %p17334_p8 = scmp.lt.s32.totalorder %s17328_s29, %s17328_s29 }
  0x3b   :  { %p17335_p9 = por %p17334_p8, %p17333_p7 }
  0x3d   :  { %p17336_p10 = pnand %p17335_p9, %p17329_p6 }
  0x3f   :  { %17339 = shalt.err (!%p17336_p10)
}
  0x40   :  { %119 = dma.hbm_to_vmem [thread:$0]  %s22370_s16, 4608, %s114_s28, [#allocation13], %s17348_s20, %s17348_s20, %s17349_s21  }
  0x41   :  { %17340 = dma.done.wait [#allocation8], 4608  }
  0x42   :  { %17341 = vsyncadd [#allocation8], 4294962688 }
  0x43   :  { %17342 = dma.done.wait [#allocation10], 9216  }
  0x44   :  { %17343 = vsyncadd [#allocation10], 4294958080 }
  0x45   :  { %17344 = dma.done.wait [#allocation13], 9216  }
  0x46   :  { %17345 = vsyncadd [#allocation13], 4294958080  ;;  %vm145_vm0 = vcmask 261120   ;;  %vm147_vm1 = vcmask 254976   ;;  %v17353_v2 = vmov 0.0   ;;  %s22400_s20 = sld [smem:[#allocation59_spill]] }
  0x47   :  { %167 = vst.msk [vmem:[#allocation2 + $0xa0] sm:$0xff] %vm145_vm0, %v17353_v2  ;;  %146 = vst.msk [vmem:[#allocation2] sm:$0xff] %vm145_vm0, %v17353_v2  ;;  %s22401_s1 = sld [smem:[#allocation58_spill]]  ;;  %vm13410_vm2 = vcmask 7168  }
  0x48   :  { %168 = vst.msk [vmem:[#allocation2 + $0xa8] sm:$0x3] %vm147_vm1, %v17353_v2  ;;  %148 = vst.msk [vmem:[#allocation2 + $0x8] sm:$0x3] %vm147_vm1, %v17353_v2  ;;  %s22436_s7 = sld [smem:[#allocation60_spill]] }
  0x49   :  { %149 = vst.msk [vmem:[#allocation2 + $0x10] sm:$0xff] %vm145_vm0, %v17353_v2  ;;  %151 = vst.msk [vmem:[#allocation2 + $0x20] sm:$0xff] %vm145_vm0, %v17353_v2  ;;  %s22442_s29 = sld [smem:[#allocation61_spill]] }
  0x4a   :  { %150 = vst.msk [vmem:[#allocation2 + $0x18] sm:$0x3] %vm147_vm1, %v17353_v2  ;;  %152 = vst.msk [vmem:[#allocation2 + $0x28] sm:$0x3] %vm147_vm1, %v17353_v2  ;;  %s22514_s10 = sld [smem:[#allocation63_spill]] }
  0x4b   :  { %153 = vst.msk [vmem:[#allocation2 + $0x30] sm:$0xff] %vm145_vm0, %v17353_v2  ;;  %155 = vst.msk [vmem:[#allocation2 + $0x40] sm:$0xff] %vm145_vm0, %v17353_v2  ;;  %s22522_s4 = sld [smem:[#allocation64_spill]] }
  0x4c   :  { %154 = vst.msk [vmem:[#allocation2 + $0x38] sm:$0x3] %vm147_vm1, %v17353_v2  ;;  %156 = vst.msk [vmem:[#allocation2 + $0x48] sm:$0x3] %vm147_vm1, %v17353_v2  ;;  %v13441_v3 = vld [vmem:[%s22400_s20 + $0x38] sm:$0xff]  ;;  %v13440_v4 = vld [vmem:[%s22400_s20 + $0x30] sm:$0xff] }
  0x4d   :  { %157 = vst.msk [vmem:[#allocation2 + $0x50] sm:$0xff] %vm145_vm0, %v17353_v2  ;;  %159 = vst.msk [vmem:[#allocation2 + $0x60] sm:$0xff] %vm145_vm0, %v17353_v2  ;;  %17224 = vmatprep.subr.mxu1 %v13441_v3  ;;  %15464 = vmatprep.subr.mxu0 %v13441_v3  ;;  %v13439_v5 = vld [vmem:[%s22400_s20 + $0x28] sm:$0xff]  ;;  %v195_v6 = vld [vmem:[%s22401_s1 + $0x40] sm:$0xff] }
  0x4e   :  { %158 = vst.msk [vmem:[#allocation2 + $0x58] sm:$0x3] %vm147_vm1, %v17353_v2  ;;  %160 = vst.msk [vmem:[#allocation2 + $0x68] sm:$0x3] %vm147_vm1, %v17353_v2  ;;  %17228 = vmatpush3.msra.mxu1 %v13441_v3  ;;  %15465 = vmatpush3.msra.mxu0 %v13441_v3  ;;  %v187_v7 = vld [vmem:[%s22401_s1] sm:$0xff]  ;;  %v196_v9 = vld [vmem:[%s22401_s1 + $0x48] sm:$0xff] }
  0x4f   :  { %161 = vst.msk [vmem:[#allocation2 + $0x70] sm:$0xff] %vm145_vm0, %v17353_v2  ;;  %163 = vst.msk [vmem:[#allocation2 + $0x80] sm:$0xff] %vm145_vm0, %v17353_v2  ;;  %17225 = vmatprep.subr.mxu1 %v13440_v4  ;;  %15466 = vmatprep.subr.mxu0 %v13440_v4  ;;  %v13438_v8 = vld [vmem:[%s22400_s20 + $0x20] sm:$0xff]  ;;  %v188_v10 = vld [vmem:[%s22401_s1 + $0x8] sm:$0xff] }
  0x50   :  { %162 = vst.msk [vmem:[#allocation2 + $0x78] sm:$0x3] %vm147_vm1, %v17353_v2  ;;  %164 = vst.msk [vmem:[#allocation2 + $0x88] sm:$0x3] %vm147_vm1, %v17353_v2  ;;  %17229 = vmatpush3.msra.mxu1 %v13440_v4  ;;  %15467 = vmatpush3.msra.mxu0 %v13440_v4  ;;  %v248_v11 = vld [vmem:[#allocation2 + $0xa1] sm:$0xff]  ;;  %v197_v12 = vld [vmem:[%s22401_s1 + $0x50] sm:$0xff] }
  0x51   :  { %165 = vst.msk [vmem:[#allocation2 + $0x90] sm:$0xff] %vm145_vm0, %v17353_v2  ;;  %169 = vst.msk [vmem:[#allocation2 + $0xb0] sm:$0xff] %vm145_vm0, %v17353_v2  ;;  %v189_v13 = vld [vmem:[%s22401_s1 + $0x10] sm:$0xff]  ;;  %17226 = vmatprep.subr.mxu1 %v13439_v5  ;;  %15468 = vmatprep.subr.mxu0 %v13439_v5  ;;  %v240_v14 = vld [vmem:[#allocation2 + $0x1] sm:$0xff] }
  0x52   :  { %166 = vst.msk [vmem:[#allocation2 + $0x98] sm:$0x3] %vm147_vm1, %v17353_v2  ;;  %170 = vst.msk [vmem:[#allocation2 + $0xb8] sm:$0x3] %vm147_vm1, %v17353_v2  ;;  %v198_v15 = vld [vmem:[%s22401_s1 + $0x58] sm:$0xff]  ;;  %17230 = vmatpush3.msra.mxu1 %v13439_v5  ;;  %15469 = vmatpush3.msra.mxu0 %v13439_v5  ;;  %v199_v18 = vld [vmem:[%s22401_s1 + $0x60] sm:$0xff] }
  0x53   :  { %171 = vst.msk [vmem:[#allocation2 + $0xc0] sm:$0xff] %vm145_vm0, %v17353_v2  ;;  %173 = vst.msk [vmem:[#allocation2 + $0xd0] sm:$0xff] %vm145_vm0, %v17353_v2  ;;  %v190_v16 = vld [vmem:[%s22401_s1 + $0x18] sm:$0xff]  ;;  %v191_v19 = vld [vmem:[%s22401_s1 + $0x20] sm:$0xff]  ;;  %17227 = vmatprep.subr.mxu1 %v13438_v8  ;;  %15470 = vmatprep.subr.mxu0 %v13438_v8 }
  0x54   :  { %172 = vst.msk [vmem:[#allocation2 + $0xc8] sm:$0x3] %vm147_vm1, %v17353_v2  ;;  %174 = vst.msk [vmem:[#allocation2 + $0xd8] sm:$0x3] %vm147_vm1, %v17353_v2  ;;  %v239_v17 = vld [vmem:[%s22400_s20 + $0x18] sm:$0xff]  ;;  %v200_v21 = vld [vmem:[%s22401_s1 + $0x68] sm:$0xff]  ;;  %17231 = vmatpush3.msra.mxu1 %v13438_v8  ;;  %15484 = vmatprep.mubr.msk.f32.mxu1 %vm145_vm0, %v248_v11 }
  0x55   :  { %175 = vst.msk [vmem:[#allocation2 + $0xe0] sm:$0xff] %vm145_vm0, %v17353_v2  ;;  %177 = vst.msk [vmem:[#allocation2 + $0xf0] sm:$0xff] %vm145_vm0, %v17353_v2  ;;  %v13477_v20 = vld [vmem:[%s22400_s20 + $0x58] sm:$0xff]  ;;  %v192_v22 = vld [vmem:[%s22401_s1 + $0x28] sm:$0xff]  ;;  %15471 = vmatpush3.msra.mxu0 %v13438_v8  ;;  %15472 = vmatprep.mubr.msk.f32.mxu0 %vm145_vm0, %v240_v14 }
  0x56   :  { %176 = vst.msk [vmem:[#allocation2 + $0xe8] sm:$0x3] %vm147_vm1, %v17353_v2  ;;  %178 = vst.msk [vmem:[#allocation2 + $0xf8] sm:$0x3] %vm147_vm1, %v17353_v2  ;;  %v201_v23 = vld [vmem:[%s22401_s1 + $0x70] sm:$0xff]  ;;  %15496 = vmatprep.subr.mxu1 %v239_v17  ;;  %15528 = vmatprep.subr.mxu0 %v13477_v20  ;;  %v237_v35 = vld [vmem:[%s22400_s20 + $0x8] sm:$0xff] }
  0x57   :  { %179 = vst.msk [vmem:[#allocation2 + $0x100] sm:$0xff] %vm145_vm0, %v17353_v2  ;;  %181 = vst.msk [vmem:[#allocation2 + $0x110] sm:$0xff] %vm145_vm0, %v17353_v2  ;;  %v193_v24 = vld [vmem:[%s22401_s1 + $0x30] sm:$0xff]  ;;  %v13475_v36 = vld [vmem:[%s22400_s20 + $0x48] sm:$0xff] }
  0x58   :  { %180 = vst.msk [vmem:[#allocation2 + $0x108] sm:$0x3] %vm147_vm1, %v17353_v2  ;;  %182 = vst.msk [vmem:[#allocation2 + $0x118] sm:$0x3] %vm147_vm1, %v17353_v2  ;;  %v238_v27 = vld [vmem:[%s22400_s20 + $0x10] sm:$0xff]  ;;  %v236_v41 = vld [vmem:[%s22400_s20] sm:$0xff] }
  0x59   :  { %183 = vst.msk [vmem:[#allocation2 + $0x120] sm:$0xff] %vm145_vm0, %v17353_v2  ;;  %185 = vst.msk [vmem:[#allocation2 + $0x130] sm:$0xff] %vm145_vm0, %v17353_v2  ;;  %v13476_v30 = vld [vmem:[%s22400_s20 + $0x50] sm:$0xff]  ;;  %v13474_v42 = vld [vmem:[%s22400_s20 + $0x40] sm:$0xff] }
  0x5a   :  { %184 = vst.msk [vmem:[#allocation2 + $0x128] sm:$0x3] %vm147_vm1, %v17353_v2  ;;  %186 = vst.msk [vmem:[#allocation2 + $0x138] sm:$0x3] %vm147_vm1, %v17353_v2  ;;  %v220_v45 = vld [vmem:[#allocation2] sm:$0xff]  ;;  %v13497_v47 = vld [vmem:[%s22400_s20 + $0x78] sm:$0xff] }
  0x5b   :  { %212 = vst.msk [vmem:[#allocation2 + $0xb1] sm:$0xff] %vm145_vm0, %v195_v6  ;;  %204 = vst.msk [vmem:[#allocation2 + $0x11] sm:$0xff] %vm145_vm0, %v187_v7  ;;  %v647_v46 = vld [vmem:[#allocation2 + $0x2] sm:$0xff]  ;;  %v13517_v48 = vld [vmem:[%s22400_s20 + $0x98] sm:$0xff] }
  0x5c   :  { %213 = vst.msk [vmem:[#allocation2 + $0xc1] sm:$0xff] %vm145_vm0, %v196_v9  ;;  %205 = vst.msk [vmem:[#allocation2 + $0x21] sm:$0xff] %vm145_vm0, %v188_v10  ;;  %v13496_v53 = vld [vmem:[%s22400_s20 + $0x70] sm:$0xff]  ;;  %v194_v57 = vld [vmem:[%s22401_s1 + $0x38] sm:$0xff] }
  0x5d   :  { %214 = vst.msk [vmem:[#allocation2 + $0xd1] sm:$0xff] %vm145_vm0, %v197_v12  ;;  %206 = vst.msk [vmem:[#allocation2 + $0x31] sm:$0xff] %vm145_vm0, %v189_v13  ;;  %v13516_v54 = vld [vmem:[%s22400_s20 + $0x90] sm:$0xff]  ;;  %v202_v60 = vld [vmem:[%s22401_s1 + $0x78] sm:$0xff] }
  0x5e   :  { %215 = vst.msk [vmem:[#allocation2 + $0xe1] sm:$0xff] %vm145_vm0, %v198_v15  ;;  %207 = vst.msk [vmem:[#allocation2 + $0x41] sm:$0xff] %vm145_vm0, %v190_v16  ;;  %v13495_v61 = vld [vmem:[%s22400_s20 + $0x68] sm:$0xff]  ;;  %v13494_v3 = vld [vmem:[%s22400_s20 + $0x60] sm:$0xff] }
  0x5f   :  { %216 = vst.msk [vmem:[#allocation2 + $0xf1] sm:$0xff] %vm145_vm0, %v199_v18  ;;  %208 = vst.msk [vmem:[#allocation2 + $0x51] sm:$0xff] %vm145_vm0, %v191_v19  ;;  %v13515_v62 = vld [vmem:[%s22400_s20 + $0x88] sm:$0xff]  ;;  %v13514_v4 = vld [vmem:[%s22400_s20 + $0x80] sm:$0xff] }
  0x60   :  { %217 = vst.msk [vmem:[#allocation2 + $0x101] sm:$0xff] %vm145_vm0, %v200_v21  ;;  %209 = vst.msk [vmem:[#allocation2 + $0x61] sm:$0xff] %vm145_vm0, %v192_v22  ;;  %v228_v7 = vld [vmem:[#allocation2 + $0xa0] sm:$0xff]  ;;  %v13537_v9 = vld [vmem:[%s22400_s20 + $0xb8] sm:$0xff] }
  0x61   :  { %218 = vst.msk [vmem:[#allocation2 + $0x111] sm:$0xff] %vm145_vm0, %v201_v23  ;;  %210 = vst.msk [vmem:[#allocation2 + $0x71] sm:$0xff] %vm145_vm0, %v193_v24  ;;  %v655_v8 = vld [vmem:[#allocation2 + $0xa2] sm:$0xff]  ;;  %v13557_v10 = vld [vmem:[%s22400_s20 + $0xd8] sm:$0xff] }
  0x62   :  { %v17626_v25 = vld [vmem:[#allocation2 + $0xb1] sm:$0xff]  ;;  %211 = vst.msk [vmem:[#allocation2 + $0x81] sm:$0xff] %vm145_vm0, %v194_v57  ;;  %219 = vst.msk [vmem:[#allocation2 + $0x121] sm:$0xff] %vm145_vm0, %v202_v60 }
  0x63   :  { %v17628_v26 = vld [vmem:[#allocation2 + $0x11] sm:$0xff]  ;;  %15485 = vmatmul.mubr.msk.f32.vlgmr.msra.gmra.mxu1 %vm145_vm0, %v17626_v25  ;;  %v17637_v28 = vld [vmem:[#allocation2 + $0xc1] sm:$0xff] }
  0x64   :  { %15473 = vmatmul.mubr.msk.f32.vlgmr.msra.gmra.mxu0 %vm145_vm0, %v17628_v26  ;;  %v17639_v29 = vld [vmem:[#allocation2 + $0x21] sm:$0xff]  ;;  %15497 = vmatpush3.msra.mxu1 %v239_v17  ;;  %v17646_v31 = vld [vmem:[#allocation2 + $0xd1] sm:$0xff] }
  0x65   :  { %15487 = vmatprep.mubr.msk.f32.mxu1 %vm145_vm0, %v17637_v28  ;;  %v17648_v32 = vld [vmem:[#allocation2 + $0x31] sm:$0xff]  ;;  %15529 = vmatpush3.msra.mxu0 %v13477_v20  ;;  %v17652_v33 = vld [vmem:[#allocation2 + $0xe1] sm:$0xff] }
  0x66   :  { %15475 = vmatprep.mubr.msk.f32.mxu0 %vm145_vm0, %v17639_v29  ;;  %15498 = vmatprep.subr.mxu1 %v238_v27  ;;  %v17654_v34 = vld [vmem:[#allocation2 + $0x41] sm:$0xff]  ;;  %v17668_v37 = vld [vmem:[#allocation2 + $0xf1] sm:$0xff] }
  0x67   :  { %15530 = vmatprep.subr.mxu0 %v13476_v30  ;;  %15488 = vmatmul.mubr.msk.f32.gmra.mxu1 %vm145_vm0, %v17646_v31  ;;  %v17670_v38 = vld [vmem:[#allocation2 + $0x51] sm:$0xff]  ;;  %v17674_v39 = vld [vmem:[#allocation2 + $0x101] sm:$0xff] }
  0x68   :  { %15476 = vmatmul.mubr.msk.f32.gmra.mxu0 %vm145_vm0, %v17648_v32  ;;  %15499 = vmatpush3.msra.mxu1 %v238_v27  ;;  %v17676_v40 = vld [vmem:[#allocation2 + $0x61] sm:$0xff]  ;;  %v17690_v43 = vld [vmem:[#allocation2 + $0x111] sm:$0xff] }
  0x69   :  { %15490 = vmatprep.mubr.msk.f32.mxu1 %vm145_vm0, %v17652_v33  ;;  %15531 = vmatpush3.msra.mxu0 %v13476_v30  ;;  %v17692_v44 = vld [vmem:[#allocation2 + $0x71] sm:$0xff]  ;;  %v17712_v51 = vld [vmem:[#allocation2 + $0x20] sm:$0xff] }
  0x6a   :  { %15478 = vmatprep.mubr.msk.f32.mxu0 %vm145_vm0, %v17654_v34  ;;  %15500 = vmatprep.subr.mxu1 %v237_v35  ;;  %v17707_v49 = vld [vmem:[#allocation2 + $0x10] sm:$0xff]  ;;  %v17714_v52 = vld [vmem:[#allocation2 + $0x22] sm:$0xff] }
  0x6b   :  { %15532 = vmatprep.subr.mxu0 %v13475_v36  ;;  %15491 = vmatmul.mubr.msk.f32.gmra.mxu1 %vm145_vm0, %v17668_v37  ;;  %v17709_v50 = vld [vmem:[#allocation2 + $0x12] sm:$0xff]  ;;  %v17737_v58 = vld [vmem:[#allocation2 + $0x40] sm:$0xff] }
  0x6c   :  { %15479 = vmatmul.mubr.msk.f32.gmra.mxu0 %vm145_vm0, %v17670_v38  ;;  %15501 = vmatpush3.msra.mxu1 %v237_v35  ;;  %v17728_v55 = vld [vmem:[#allocation2 + $0x30] sm:$0xff]  ;;  %v17739_v59 = vld [vmem:[#allocation2 + $0x42] sm:$0xff] }
  0x6d   :  { %15493 = vmatprep.mubr.msk.f32.mxu1 %vm145_vm0, %v17674_v39  ;;  %15533 = vmatpush3.msra.mxu0 %v13475_v36  ;;  %v17730_v56 = vld [vmem:[#allocation2 + $0x32] sm:$0xff]  ;;  %v17764_v1 = vld [vmem:[#allocation2 + $0x60] sm:$0xff]  ;;  %v13555_v35 = vld [vmem:[%s22400_s20 + $0xc8] sm:$0xff] }
  0x6e   :  { %15481 = vmatprep.mubr.msk.f32.mxu0 %vm145_vm0, %v17676_v40  ;;  %15502 = vmatprep.subr.mxu1 %v236_v41  ;;  %v17758_v63 = vld [vmem:[#allocation2 + $0x50] sm:$0xff]  ;;  %v17766_v2 = vld [vmem:[#allocation2 + $0x62] sm:$0xff] }
  0x6f   :  { %15534 = vmatprep.subr.mxu0 %v13474_v42  ;;  %15494 = vmatmul.mubr.msk.f32.gmra.mxu1 %vm145_vm0, %v17690_v43  ;;  %v17762_v0 = vld [vmem:[#allocation2 + $0x52] sm:$0xff]  ;;  %v17802_v13 = vld [vmem:[#allocation2 + $0xc0] sm:$0xff] }
  0x70   :  { %15482 = vmatmul.mubr.msk.f32.gmra.mxu0 %vm145_vm0, %v17692_v44  ;;  %15503 = vmatpush3.msra.mxu1 %v236_v41  ;;  %v17780_v5 = vld [vmem:[#allocation2 + $0x70] sm:$0xff]  ;;  %v17804_v14 = vld [vmem:[#allocation2 + $0xc2] sm:$0xff] }
  0x71   :  { %15504 = vmatprep.mubr.msk.f32.mxu1 %vm145_vm0, %v220_v45  ;;  %15535 = vmatpush3.msra.mxu0 %v13474_v42  ;;  %v17784_v6 = vld [vmem:[#allocation2 + $0x72] sm:$0xff]  ;;  %v17818_v17 = vld [vmem:[#allocation2 + $0xe0] sm:$0xff] }
  0x72   :  { %15536 = vmatprep.mubr.msk.f32.mxu0 %vm145_vm0, %v647_v46  ;;  %15560 = vmatprep.subr.mxu1 %v13497_v47  ;;  %v17797_v11 = vld [vmem:[#allocation2 + $0xb0] sm:$0xff]  ;;  %v17820_v18 = vld [vmem:[#allocation2 + $0xe2] sm:$0xff]  ;;  %v13577_v46 = vld [vmem:[%s22400_s20 + $0xf8] sm:$0xff] }
  0x73   :  { %15592 = vmatprep.subr.mxu0 %v13517_v48  ;;  %15505 = vmatmul.mubr.msk.f32.vlgmr.msra.gmra.mxu1 %vm145_vm0, %v17707_v49  ;;  %v17800_v12 = vld [vmem:[#allocation2 + $0xb2] sm:$0xff]  ;;  %v17834_v21 = vld [vmem:[#allocation2 + $0x100] sm:$0xff] }
  0x74   :  { %15537 = vmatmul.mubr.msk.f32.vlgmr.msra.gmra.mxu0 %vm145_vm0, %v17709_v50  ;;  %15561 = vmatpush3.msra.mxu1 %v13497_v47  ;;  %v17812_v15 = vld [vmem:[#allocation2 + $0xd0] sm:$0xff]  ;;  %v17836_v22 = vld [vmem:[#allocation2 + $0x102] sm:$0xff]  ;;  %v13597_v47 = vld [vmem:[%s22400_s20 + $0x118] sm:$0xff] }
  0x75   :  { %15507 = vmatprep.mubr.msk.f32.mxu1 %vm145_vm0, %v17712_v51  ;;  %15593 = vmatpush3.msra.mxu0 %v13517_v48  ;;  %v17816_v16 = vld [vmem:[#allocation2 + $0xd2] sm:$0xff]  ;;  %v13534_v36 = vld [vmem:[%s22400_s20 + $0xa0] sm:$0xff] }
  0x76   :  { %15539 = vmatprep.mubr.msk.f32.mxu0 %vm145_vm0, %v17714_v52  ;;  %15562 = vmatprep.subr.mxu1 %v13496_v53  ;;  %v17828_v19 = vld [vmem:[#allocation2 + $0xf0] sm:$0xff]  ;;  %v13554_v41 = vld [vmem:[%s22400_s20 + $0xc0] sm:$0xff] }
  0x77   :  { %15594 = vmatprep.subr.mxu0 %v13516_v54  ;;  %15508 = vmatmul.mubr.msk.f32.gmra.mxu1 %vm145_vm0, %v17728_v55  ;;  %v17832_v20 = vld [vmem:[#allocation2 + $0xf2] sm:$0xff]  ;;  %v884_v42 = vld [vmem:[#allocation2 + $0x80] sm:$0xff] }
  0x78   :  { %15540 = vmatmul.mubr.msk.f32.gmra.mxu0 %vm145_vm0, %v17730_v56  ;;  %15510 = vmatprep.mubr.msk.f32.mxu1 %vm145_vm0, %v17737_v58  ;;  %v17844_v23 = vld [vmem:[#allocation2 + $0x110] sm:$0xff]  ;;  %v17900_v45 = vld [vmem:[#allocation2 + $0x81] sm:$0xff] }
  0x79   :  { %15542 = vmatprep.mubr.msk.f32.mxu0 %vm145_vm0, %v17739_v59  ;;  %15563 = vmatpush3.msra.mxu1 %v13496_v53  ;;  %v17848_v24 = vld [vmem:[#allocation2 + $0x112] sm:$0xff]  ;;  %v17939_v48 = vld [vmem:[#allocation2 + $0x121] sm:$0xff] }
  0x7a   :  { %15595 = vmatpush3.msra.mxu0 %v13516_v54  ;;  %15564 = vmatprep.subr.mxu1 %v13495_v61  ;;  %v13536_v27 = vld [vmem:[%s22400_s20 + $0xb0] sm:$0xff]  ;;  %v13574_v54 = vld [vmem:[%s22400_s20 + $0xe0] sm:$0xff] }
  0x7b   :  { %15596 = vmatprep.subr.mxu0 %v13515_v62  ;;  %15511 = vmatmul.mubr.msk.f32.gmra.mxu1 %vm145_vm0, %v17758_v63  ;;  %v13556_v30 = vld [vmem:[%s22400_s20 + $0xd0] sm:$0xff]  ;;  %v1344_v57 = vld [vmem:[#allocation2 + $0x82] sm:$0xff] }
  0x7c   :  { %15543 = vmatmul.mubr.msk.f32.gmra.mxu0 %vm145_vm0, %v17762_v0  ;;  %15513 = vmatprep.mubr.msk.f32.mxu1 %vm145_vm0, %v17764_v1  ;;  %v13596_v53 = vld [vmem:[%s22400_s20 + $0x110] sm:$0xff]  ;;  %v1352_v60 = vld [vmem:[#allocation2 + $0x122] sm:$0xff] }
  0x7d   :  { %15545 = vmatprep.mubr.msk.f32.mxu0 %vm145_vm0, %v17766_v2  ;;  %15565 = vmatpush3.msra.mxu1 %v13495_v61  ;;  %v1583_v61 = vld [vmem:[#allocation2 + $0x130] sm:$0xff] }
  0x7e   :  { %15597 = vmatpush3.msra.mxu0 %v13515_v62  ;;  %15566 = vmatprep.subr.mxu1 %v13494_v3  ;;  %v2386_v62 = vld [vmem:[#allocation7 + $0x10] sm:$0xff] }
  0x7f   :  { %15598 = vmatprep.subr.mxu0 %v13514_v4  ;;  %15514 = vmatmul.mubr.msk.f32.gmra.mxu1 %vm145_vm0, %v17780_v5 }
  0x80   :  { %15546 = vmatmul.mubr.msk.f32.gmra.mxu0 %vm145_vm0, %v17784_v6  ;;  %15516 = vmatprep.mubr.msk.f32.mxu1 %vm145_vm0, %v228_v7 }
  0x81   :  { %15548 = vmatprep.mubr.msk.f32.mxu0 %vm145_vm0, %v655_v8  ;;  %15567 = vmatpush3.msra.mxu1 %v13494_v3 }
  0x82   :  { %15599 = vmatpush3.msra.mxu0 %v13514_v4  ;;  %15624 = vmatprep.subr.mxu1 %v13537_v9 }
  0x83   :  { %15656 = vmatprep.subr.mxu0 %v13557_v10  ;;  %15517 = vmatmul.mubr.msk.f32.gmra.mxu1 %vm145_vm0, %v17797_v11 }
  0x84   :  { %15549 = vmatmul.mubr.msk.f32.gmra.mxu0 %vm145_vm0, %v17800_v12  ;;  %15519 = vmatprep.mubr.msk.f32.mxu1 %vm145_vm0, %v17802_v13 }
  0x85   :  { %15551 = vmatprep.mubr.msk.f32.mxu0 %vm145_vm0, %v17804_v14 }
  0x87   :  { %15520 = vmatmul.mubr.msk.f32.gmra.mxu1 %vm145_vm0, %v17812_v15 }
  0x88   :  { %15552 = vmatmul.mubr.msk.f32.gmra.mxu0 %vm145_vm0, %v17816_v16  ;;  %15522 = vmatprep.mubr.msk.f32.mxu1 %vm145_vm0, %v17818_v17 }
  0x89   :  { %15554 = vmatprep.mubr.msk.f32.mxu0 %vm145_vm0, %v17820_v18 }
  0x8b   :  { %15523 = vmatmul.mubr.msk.f32.gmra.mxu1 %vm145_vm0, %v17828_v19 }
  0x8c   :  { %15555 = vmatmul.mubr.msk.f32.gmra.mxu0 %vm145_vm0, %v17832_v20  ;;  %15525 = vmatprep.mubr.msk.f32.mxu1 %vm145_vm0, %v17834_v21 }
  0x8d   :  { %15557 = vmatprep.mubr.msk.f32.mxu0 %vm145_vm0, %v17836_v22 }
  0x8f   :  { %15526 = vmatmul.mubr.msk.f32.gmra.mxu1 %vm145_vm0, %v17844_v23 }
  0x90   :  { %15558 = vmatmul.mubr.msk.f32.gmra.mxu0 %vm145_vm0, %v17848_v24  ;;  %15568 = vmatprep.mubr.msk.f32.mxu1 %vm145_vm0, %v17707_v49  ;;  %v13576_v49 = vld [vmem:[%s22400_s20 + $0xf0] sm:$0xff] }
  0x91   :  { %15600 = vmatprep.mubr.msk.f32.mxu0 %vm145_vm0, %v17628_v26  ;;  %v13535_v26 = vld [vmem:[%s22400_s20 + $0xa8] sm:$0xff] }
  0x93   :  { %15569 = vmatmul.mubr.msk.f32.vlgmr.msra.gmra.mxu1 %vm145_vm0, %v17712_v51 }
  0x94   :  { %15601 = vmatmul.mubr.msk.f32.vlgmr.msra.gmra.mxu0 %vm145_vm0, %v17639_v29  ;;  %15625 = vmatpush3.msra.mxu1 %v13537_v9  ;;  %v2388_v9 = vld [vmem:[#allocation2 + $0x1] sm:$0xff] }
  0x95   :  { %15571 = vmatprep.mubr.msk.f32.mxu1 %vm145_vm0, %v17728_v55  ;;  %15657 = vmatpush3.msra.mxu0 %v13557_v10  ;;  %v2368_v10 = vld [vmem:[#allocation2] sm:$0xff] }
  0x96   :  { %15603 = vmatprep.mubr.msk.f32.mxu0 %vm145_vm0, %v17648_v32  ;;  %15626 = vmatprep.subr.mxu1 %v13536_v27 }
  0x97   :  { %15658 = vmatprep.subr.mxu0 %v13556_v30  ;;  %15572 = vmatmul.mubr.msk.f32.gmra.mxu1 %vm145_vm0, %v17737_v58 }
  0x98   :  { %15604 = vmatmul.mubr.msk.f32.gmra.mxu0 %vm145_vm0, %v17654_v34  ;;  %15574 = vmatprep.mubr.msk.f32.mxu1 %vm145_vm0, %v17758_v63 }
  0x99   :  { %15606 = vmatprep.mubr.msk.f32.mxu0 %vm145_vm0, %v17670_v38  ;;  %15627 = vmatpush3.msra.mxu1 %v13536_v27 }
  0x9a   :  { %15659 = vmatpush3.msra.mxu0 %v13556_v30  ;;  %15628 = vmatprep.subr.mxu1 %v13535_v26 }
  0x9b   :  { %15660 = vmatprep.subr.mxu0 %v13555_v35  ;;  %15575 = vmatmul.mubr.msk.f32.gmra.mxu1 %vm145_vm0, %v17764_v1 }
  0x9c   :  { %15607 = vmatmul.mubr.msk.f32.gmra.mxu0 %vm145_vm0, %v17676_v40  ;;  %15577 = vmatprep.mubr.msk.f32.mxu1 %vm145_vm0, %v17780_v5 }
  0x9d   :  { %15609 = vmatprep.mubr.msk.f32.mxu0 %vm145_vm0, %v17692_v44  ;;  %15629 = vmatpush3.msra.mxu1 %v13535_v26 }
  0x9e   :  { %15661 = vmatpush3.msra.mxu0 %v13555_v35  ;;  %15630 = vmatprep.subr.mxu1 %v13534_v36 }
  0x9f   :  { %15662 = vmatprep.subr.mxu0 %v13554_v41  ;;  %15578 = vmatmul.mubr.msk.f32.gmra.mxu1 %vm145_vm0, %v884_v42 }
  0xa0   :  { %15610 = vmatmul.mubr.msk.f32.gmra.mxu0 %vm145_vm0, %v17900_v45  ;;  %15580 = vmatprep.mubr.msk.f32.mxu1 %vm145_vm0, %v17797_v11 }
  0xa1   :  { %15612 = vmatprep.mubr.msk.f32.mxu0 %vm145_vm0, %v17626_v25  ;;  %15631 = vmatpush3.msra.mxu1 %v13534_v36  ;;  %v892_v25 = vld [vmem:[#allocation2 + $0x120] sm:$0xff] }
  0xa2   :  { %15663 = vmatpush3.msra.mxu0 %v13554_v41  ;;  %15688 = vmatprep.subr.mxu1 %v13577_v46 }
  0xa3   :  { %15720 = vmatprep.subr.mxu0 %v13597_v47  ;;  %15581 = vmatmul.mubr.msk.f32.gmra.mxu1 %vm145_vm0, %v17802_v13 }
  0xa4   :  { %15613 = vmatmul.mubr.msk.f32.gmra.mxu0 %vm145_vm0, %v17637_v28  ;;  %15583 = vmatprep.mubr.msk.f32.mxu1 %vm145_vm0, %v17812_v15 }
  0xa5   :  { %15615 = vmatprep.mubr.msk.f32.mxu0 %vm145_vm0, %v17646_v31 }
  0xa7   :  { %15584 = vmatmul.mubr.msk.f32.gmra.mxu1 %vm145_vm0, %v17818_v17 }
  0xa8   :  { %15616 = vmatmul.mubr.msk.f32.gmra.mxu0 %vm145_vm0, %v17652_v33  ;;  %15586 = vmatprep.mubr.msk.f32.mxu1 %vm145_vm0, %v17828_v19 }
  0xa9   :  { %15618 = vmatprep.mubr.msk.f32.mxu0 %vm145_vm0, %v17668_v37 }
  0xab   :  { %15587 = vmatmul.mubr.msk.f32.gmra.mxu1 %vm145_vm0, %v17834_v21 }
  0xac   :  { %15619 = vmatmul.mubr.msk.f32.gmra.mxu0 %vm145_vm0, %v17674_v39  ;;  %15589 = vmatprep.mubr.msk.f32.mxu1 %vm145_vm0, %v17844_v23 }
  0xad   :  { %15621 = vmatprep.mubr.msk.f32.mxu0 %vm145_vm0, %v17690_v43 }
  0xaf   :  { %15590 = vmatmul.mubr.msk.f32.gmra.mxu1 %vm145_vm0, %v892_v25 }
  0xb0   :  { %15622 = vmatmul.mubr.msk.f32.gmra.mxu0 %vm145_vm0, %v17939_v48  ;;  %15632 = vmatprep.mubr.msk.f32.mxu1 %vm145_vm0, %v17709_v50  ;;  %v13575_v50 = vld [vmem:[%s22400_s20 + $0xe8] sm:$0xff] }
  0xb1   :  { %15664 = vmatprep.mubr.msk.f32.mxu0 %vm145_vm0, %v17712_v51  ;;  %v13595_v51 = vld [vmem:[%s22400_s20 + $0x108] sm:$0xff] }
  0xb3   :  { %15633 = vmatmul.mubr.msk.f32.vlgmr.msra.gmra.mxu1 %vm145_vm0, %v17714_v52 }
  0xb4   :  { %15665 = vmatmul.mubr.msk.f32.vlgmr.msra.gmra.mxu0 %vm145_vm0, %v17728_v55  ;;  %15689 = vmatpush3.msra.mxu1 %v13577_v46  ;;  %v13594_v55 = vld [vmem:[%s22400_s20 + $0x100] sm:$0xff] }
  0xb5   :  { %15635 = vmatprep.mubr.msk.f32.mxu1 %vm145_vm0, %v17730_v56  ;;  %15721 = vmatpush3.msra.mxu0 %v13597_v47 }
  0xb6   :  { %15667 = vmatprep.mubr.msk.f32.mxu0 %vm145_vm0, %v17737_v58  ;;  %15690 = vmatprep.subr.mxu1 %v13576_v49  ;;  %v1575_v58 = vld [vmem:[#allocation2 + $0x90] sm:$0xff] }
  0xb7   :  { %15722 = vmatprep.subr.mxu0 %v13596_v53  ;;  %15636 = vmatmul.mubr.msk.f32.gmra.mxu1 %vm145_vm0, %v17739_v59 }
  0xb8   :  { %15668 = vmatmul.mubr.msk.f32.gmra.mxu0 %vm145_vm0, %v17758_v63  ;;  %15638 = vmatprep.mubr.msk.f32.mxu1 %vm145_vm0, %v17762_v0 }
  0xb9   :  { %15670 = vmatprep.mubr.msk.f32.mxu0 %vm145_vm0, %v17764_v1  ;;  %15691 = vmatpush3.msra.mxu1 %v13576_v49  ;;  %v2406_v1 = vld [vmem:[#allocation7 + $0x28] sm:$0xff] }
  0xba   :  { %15723 = vmatpush3.msra.mxu0 %v13596_v53  ;;  %15692 = vmatprep.subr.mxu1 %v13575_v50 }
  0xbb   :  { %15724 = vmatprep.subr.mxu0 %v13595_v51  ;;  %15639 = vmatmul.mubr.msk.f32.gmra.mxu1 %vm145_vm0, %v17766_v2 }
  0xbc   :  { %15671 = vmatmul.mubr.msk.f32.gmra.mxu0 %vm145_vm0, %v17780_v5  ;;  %15641 = vmatprep.mubr.msk.f32.mxu1 %vm145_vm0, %v17784_v6  ;;  %v2405_v5 = vld [vmem:[#allocation7 + $0x20] sm:$0xff] }
  0xbd   :  { %15673 = vmatprep.mubr.msk.f32.mxu0 %vm145_vm0, %v884_v42  ;;  %15693 = vmatpush3.msra.mxu1 %v13575_v50  ;;  %v18126_v50 = vld [vmem:[#allocation7 + $0x58] sm:$0xff] }
  0xbe   :  { %15725 = vmatpush3.msra.mxu0 %v13595_v51  ;;  %15694 = vmatprep.subr.mxu1 %v13574_v54  ;;  %22402 = vst [vmem:[#allocation18_spill] sm:$0xff] %v18126_v50 }
  0xbf   :  { %15726 = vmatprep.subr.mxu0 %v13594_v55  ;;  %15642 = vmatmul.mubr.msk.f32.gmra.mxu1 %vm145_vm0, %v1344_v57 }
  0xc0   :  { %15674 = vmatmul.mubr.msk.f32.gmra.mxu0 %vm145_vm0, %v1575_v58  ;;  %15644 = vmatprep.mubr.msk.f32.mxu1 %vm145_vm0, %v17800_v12 }
  0xc1   :  { %15676 = vmatprep.mubr.msk.f32.mxu0 %vm145_vm0, %v17802_v13  ;;  %15695 = vmatpush3.msra.mxu1 %v13574_v54 }
  0xc2   :  { %15727 = vmatpush3.msra.mxu0 %v13594_v55 }
  0xc3   :  { %15645 = vmatmul.mubr.msk.f32.gmra.mxu1 %vm145_vm0, %v17804_v14 }
  0xc4   :  { %15677 = vmatmul.mubr.msk.f32.gmra.mxu0 %vm145_vm0, %v17812_v15  ;;  %15647 = vmatprep.mubr.msk.f32.mxu1 %vm145_vm0, %v17816_v16 }
  0xc5   :  { %15679 = vmatprep.mubr.msk.f32.mxu0 %vm145_vm0, %v17818_v17 }
  0xc7   :  { %15648 = vmatmul.mubr.msk.f32.gmra.mxu1 %vm145_vm0, %v17820_v18 }
  0xc8   :  { %15680 = vmatmul.mubr.msk.f32.gmra.mxu0 %vm145_vm0, %v17828_v19  ;;  %15650 = vmatprep.mubr.msk.f32.mxu1 %vm145_vm0, %v17832_v20 }
  0xc9   :  { %15682 = vmatprep.mubr.msk.f32.mxu0 %vm145_vm0, %v17834_v21 }
  0xcb   :  { %15651 = vmatmul.mubr.msk.f32.gmra.mxu1 %vm145_vm0, %v17836_v22 }
  0xcc   :  { %15683 = vmatmul.mubr.msk.f32.gmra.mxu0 %vm145_vm0, %v17844_v23  ;;  %15653 = vmatprep.mubr.msk.f32.mxu1 %vm145_vm0, %v17848_v24 }
  0xcd   :  { %15685 = vmatprep.mubr.msk.f32.mxu0 %vm145_vm0, %v892_v25 }
  0xcf   :  { %15654 = vmatmul.mubr.msk.f32.gmra.mxu1 %vm145_vm0, %v1352_v60 }
  0xd0   :  { %15686 = vmatmul.mubr.msk.f32.gmra.mxu0 %vm145_vm0, %v1583_v61  ;;  %15696 = vmatprep.mubr.msk.f32.mxu1 %vm145_vm0, %v17639_v29  ;;  %v1805_v29 = vld [vmem:[#allocation2 + $0x91] sm:$0xff] }
  0xd1   :  { %15728 = vmatprep.mubr.msk.f32.mxu0 %vm145_vm0, %v17714_v52 }
  0xd3   :  { %15697 = vmatmul.mubr.msk.f32.vlgmr.msra.gmra.mxu1 %vm145_vm0, %v17648_v32  ;;  %v2035_v32 = vld [vmem:[#allocation2 + $0x92] sm:$0xff] }
  0xd4   :  { %15729 = vmatmul.mubr.msk.f32.vlgmr.msra.gmra.mxu0 %vm145_vm0, %v17730_v56  ;;  %15699 = vmatprep.mubr.msk.f32.mxu1 %vm145_vm0, %v17654_v34 }
  0xd5   :  { %15731 = vmatprep.mubr.msk.f32.mxu0 %vm145_vm0, %v17739_v59  ;;  %v2407_v59 = vld [vmem:[#allocation7 + $0x30] sm:$0xff] }
  0xd7   :  { %15700 = vmatmul.mubr.msk.f32.gmra.mxu1 %vm145_vm0, %v17670_v38 }
  0xd8   :  { %15732 = vmatmul.mubr.msk.f32.gmra.mxu0 %vm145_vm0, %v17762_v0  ;;  %15702 = vmatprep.mubr.msk.f32.mxu1 %vm145_vm0, %v17676_v40 }
  0xd9   :  { %15734 = vmatprep.mubr.msk.f32.mxu0 %vm145_vm0, %v17766_v2  ;;  %v2385_v2 = vld [vmem:[#allocation7 + $0x8] sm:$0xff] }
  0xdb   :  { %15703 = vmatmul.mubr.msk.f32.gmra.mxu1 %vm145_vm0, %v17692_v44  ;;  %v2387_v44 = vld [vmem:[#allocation7 + $0x18] sm:$0xff] }
  0xdc   :  { %15735 = vmatmul.mubr.msk.f32.gmra.mxu0 %vm145_vm0, %v17784_v6  ;;  %15705 = vmatprep.mubr.msk.f32.mxu1 %vm145_vm0, %v17900_v45  ;;  %v2384_v6 = vld [vmem:[#allocation7] sm:$0xff] }
  0xdd   :  { %15737 = vmatprep.mubr.msk.f32.mxu0 %vm145_vm0, %v1344_v57  ;;  %15784 = vmatprep.subr.mxu0 %v2387_v44 }
  0xde   :  { %15785 = vmatpush3.msra.mxu0 %v2387_v44 }
  0xdf   :  { %15706 = vmatmul.mubr.msk.f32.gmra.mxu1 %vm145_vm0, %v1805_v29  ;;  %15786 = vmatprep.subr.mxu0 %v2386_v62  ;;  %v18137_v29 = vld [vmem:[#allocation7 + $0x78] sm:$0xff] }
  0xe0   :  { %15738 = vmatmul.mubr.msk.f32.gmra.mxu0 %vm145_vm0, %v2035_v32  ;;  %15708 = vmatprep.mubr.msk.f32.mxu1 %vm145_vm0, %v17637_v28  ;;  %v1813_v28 = vld [vmem:[#allocation2 + $0x131] sm:$0xff]  ;;  %22403 = vst [vmem:[#allocation19_spill] sm:$0xff] %v18137_v29 }
  0xe1   :  { %15740 = vmatprep.mubr.msk.f32.mxu0 %vm145_vm0, %v17804_v14  ;;  %15787 = vmatpush3.msra.mxu0 %v2386_v62 }
  0xe2   :  { %15788 = vmatprep.subr.mxu0 %v2385_v2 }
  0xe3   :  { %15709 = vmatmul.mubr.msk.f32.gmra.mxu1 %vm145_vm0, %v17646_v31  ;;  %v2043_v31 = vld [vmem:[#allocation2 + $0x132] sm:$0xff]  ;;  %15789 = vmatpush3.msra.mxu0 %v2385_v2 }
  0xe4   :  { %15741 = vmatmul.mubr.msk.f32.gmra.mxu0 %vm145_vm0, %v17816_v16  ;;  %15711 = vmatprep.mubr.msk.f32.mxu1 %vm145_vm0, %v17652_v33  ;;  %v2408_v33 = vld [vmem:[#allocation7 + $0x38] sm:$0xff] }
  0xe5   :  { %15743 = vmatprep.mubr.msk.f32.mxu0 %vm145_vm0, %v17820_v18  ;;  %15752 = vmatprep.subr.mxu1 %v2408_v33 }
  0xe6   :  { %15753 = vmatpush3.msra.mxu1 %v2408_v33  ;;  %15790 = vmatprep.subr.mxu0 %v2384_v6 }
  0xe7   :  { %15712 = vmatmul.mubr.msk.f32.gmra.mxu1 %vm145_vm0, %v17668_v37  ;;  %15754 = vmatprep.subr.mxu1 %v2407_v59 }
  0xe8   :  { %15744 = vmatmul.mubr.msk.f32.gmra.mxu0 %vm145_vm0, %v17832_v20  ;;  %15714 = vmatprep.mubr.msk.f32.mxu1 %vm145_vm0, %v17674_v39 }
  0xe9   :  { %15746 = vmatprep.mubr.msk.f32.mxu0 %vm145_vm0, %v17836_v22  ;;  %15755 = vmatpush3.msra.mxu1 %v2407_v59 }
  0xea   :  { %15756 = vmatprep.subr.mxu1 %v2406_v1  ;;  %15791 = vmatpush3.msra.mxu0 %v2384_v6 }
  0xeb   :  { %15715 = vmatmul.mubr.msk.f32.gmra.mxu1 %vm145_vm0, %v17690_v43  ;;  %15848 = vmatprep.subr.mxu0 %v18137_v29 }
  0xec   :  { %15747 = vmatmul.mubr.msk.f32.gmra.mxu0 %vm145_vm0, %v17848_v24  ;;  %15717 = vmatprep.mubr.msk.f32.mxu1 %vm145_vm0, %v17939_v48 }
  0xed   :  { %15749 = vmatprep.mubr.msk.f32.mxu0 %vm145_vm0, %v1352_v60  ;;  %15757 = vmatpush3.msra.mxu1 %v2406_v1 }
  0xee   :  { %15758 = vmatprep.subr.mxu1 %v2405_v5 }
  0xef   :  { %15718 = vmatmul.mubr.msk.f32.gmra.mxu1 %vm145_vm0, %v1813_v28 }
  0xf0   :  { %15750 = vmatmul.mubr.msk.f32.gmra.mxu0 %vm145_vm0, %v2043_v31  ;;  %15759 = vmatpush3.msra.mxu1 %v2405_v5 }
  0xf1   :  { %15760 = vmatprep.mubr.msk.f32.mxu1 %vm145_vm0, %v2388_v9  ;;  %15792 = vmatprep.mubr.msk.f32.mxu0 %vm145_vm0, %v2368_v10 }
  0xf2   :  { %15816 = vmatprep.subr.mxu1 %v18126_v50 }
 0x123   :  { %v18078_v34 = vpop.f32.mrf.mxu1 }
 0x124   :  { %v15474_v37 = vpop.f32.mrf.mxu0 }
 0x125   :  { %v18080_v38 = vpop.f32.mrf.mxu1 }
 0x126   :  { %v18082_v39 = vpop.f32.mrf.mxu0 }
 0x127   :  { %v18084_v40 = vpop.f32.mrf.mxu1 }
 0x128   :  { %v15477_v43 = vpop.f32.mrf.mxu0 }
 0x129   :  { %v18086_v52 = vpop.f32.mrf.mxu1 }
 0x12a   :  { %v18088_v56 = vpop.f32.mrf.mxu0 }
 0x12b   :  { %v18090_v63 = vpop.f32.mrf.mxu1 }
 0x12c   :  { %v15480_v0 = vpop.f32.mrf.mxu0 }
 0x12d   :  { %v18092_v3 = vpop.f32.mrf.mxu1 }
 0x12e   :  { %v18094_v4 = vpop.f32.mrf.mxu0 }
 0x12f   :  { %v15495_v7 = vpop.f32.mrf.mxu1 }
 0x130   :  { %v15483_v8 = vpop.f32.mrf.mxu0 }
 0x131   :  { %v18097_v11 = vpop.f32.mrf.mxu1 }
 0x132   :  { %v18099_v12 = vpop.f32.mrf.mxu0 }
 0x133   :  { %v15506_v13 = vpop.f32.mrf.mxu1 }
 0x134   :  { %v15538_v14 = vpop.f32.mrf.mxu0  ;;  %v574_v15 = vadd.f32 %v15506_v13, %v15474_v37 }
 0x135   :  { %v18102_v16 = vpop.f32.mrf.mxu1 }
 0x136   :  { %v18104_v17 = vpop.f32.mrf.mxu0  ;;  %v18106_v18 = vadd.f32 %v15538_v14, %v574_v15 }
 0x137   :  { %v15509_v19 = vpop.f32.mrf.mxu1 }
 0x138   :  { %v15541_v20 = vpop.f32.mrf.mxu0  ;;  %v584_v21 = vadd.f32 %v15509_v19, %v15477_v43 }
 0x139   :  { %v18108_v22 = vpop.f32.mrf.mxu1 }
 0x13a   :  { %v18110_v23 = vpop.f32.mrf.mxu0  ;;  %v18112_v24 = vadd.f32 %v15541_v20, %v584_v21 }
 0x13b   :  { %v15512_v27 = vpop.f32.mrf.mxu1 }
 0x13c   :  { %v15544_v30 = vpop.f32.mrf.mxu0  ;;  %v594_v26 = vadd.f32 %v15512_v27, %v15480_v0 }
 0x13d   :  { %v18114_v35 = vpop.f32.mrf.mxu1 }
 0x13e   :  { %v18116_v36 = vpop.f32.mrf.mxu0  ;;  %v18118_v41 = vadd.f32 %v15544_v30, %v594_v26 }
 0x13f   :  { %v15515_v42 = vpop.f32.mrf.mxu1 }
 0x140   :  { %v15547_v45 = vpop.f32.mrf.mxu0  ;;  %v604_v46 = vadd.f32 %v15515_v42, %v15483_v8 }
 0x141   :  { %v18120_v47 = vpop.f32.mrf.mxu1 }
 0x142   :  { %v18122_v25 = vpop.f32.mrf.mxu0  ;;  %v18124_v48 = vadd.f32 %v15547_v45, %v604_v46 }
 0x143   :  { %v15518_v49 = vpop.f32.mrf.mxu1 }
 0x144   :  { %v15550_v53 = vpop.f32.mrf.mxu0  ;;  %v614_v51 = vadd.f32 %v15518_v49, %v18078_v34 }
 0x145   :  { %v18130_v54 = vpop.f32.mrf.mxu1 }
 0x146   :  { %v18132_v55 = vpop.f32.mrf.mxu0  ;;  %v18134_v57 = vadd.f32 %v15550_v53, %v614_v51 }
 0x147   :  { %v15521_v58 = vpop.f32.mrf.mxu1 }
 0x148   :  { %v15553_v60 = vpop.f32.mrf.mxu0  ;;  %v624_v61 = vadd.f32 %v15521_v58, %v18084_v40 }
 0x149   :  { %v18139_v32 = vpop.f32.mrf.mxu1 }
 0x14a   :  { %v18141_v28 = vpop.f32.mrf.mxu0  ;;  %v18144_v31 = vadd.f32 %v15553_v60, %v624_v61 }
 0x14b   :  { %v15524_v33 = vpop.f32.mrf.mxu1 }
 0x14c   :  { %v15556_v34 = vpop.f32.mrf.mxu0  ;;  %v634_v37 = vadd.f32 %v15524_v33, %v18090_v63 }
 0x14d   :  { %v18147_v43 = vpop.f32.mrf.mxu1 }
 0x14e   :  { %v18149_v44 = vpop.f32.mrf.mxu0  ;;  %v18151_v59 = vadd.f32 %v15556_v34, %v634_v37 }
 0x14f   :  { %v15527_v40 = vpop.f32.mrf.mxu1 }
 0x150   :  { %22404 = vst [vmem:[#allocation20_spill] sm:$0xff] %v18151_v59  ;;  %v15559_v62 = vpop.f32.mrf.mxu0  ;;  %v644_v0 = vadd.f32 %v15527_v40, %v15495_v7 }
 0x151   :  { %v18153_v1 = vpop.f32.mrf.mxu1 }
 0x152   :  { %v18155_v2 = vpop.f32.mrf.mxu0  ;;  %v18157_v5 = vadd.f32 %v15559_v62, %v644_v0 }
 0x153   :  { %v15570_v6 = vpop.f32.mrf.mxu1 }
 0x154   :  { %22405 = vst [vmem:[#allocation21_spill] sm:$0xff] %v18157_v5  ;;  %v18159_v8 = vpop.f32.mrf.mxu0 }
 0x155   :  { %v1012_v9 = vpop.f32.mrf.mxu1 }
 0x156   :  { %v18161_v63 = vpop.f32.mrf.mxu0 }
 0x157   :  { %v18163_v10 = vpop.f32.mrf.mxu1 }
 0x158   :  { %v18165_v13 = vpop.f32.mrf.mxu0 }
 0x159   :  { %v18167_v14 = vpop.f32.mrf.mxu1 }
 0x15a   :  { %v18169_v15 = vpop.f32.mrf.mxu0 }
 0x15b   :  { %v18171_v7 = vpop.f32.mrf.mxu1 }
 0x15c   :  { %v18173_v19 = vpop.f32.mrf.mxu0 }
 0x15d   :  { %v18175_v20 = vpop.f32.mrf.mxu1 }
 0x15e   :  { %v18177_v21 = vpop.f32.mrf.mxu0 }
 0x15f   :  { %v18179_v27 = vpop.f32.mrf.mxu1 }
 0x160   :  { %v18181_v30 = vpop.f32.mrf.mxu0 }
 0x161   :  { %v18183_v26 = vpop.f32.mrf.mxu1 }
 0x162   :  { %v18185_v42 = vpop.f32.mrf.mxu0 }
 0x163   :  { %22406 = vst [vmem:[#allocation22_spill] sm:$0xff] %v18185_v42  ;;  %v18187_v45 = vpop.f32.mrf.mxu1 }
 0x164   :  { %v18189_v46 = vpop.f32.mrf.mxu0 }
 0x165   :  { %22407 = vst [vmem:[#allocation23_spill] sm:$0xff] %v18189_v46  ;;  %v18191_v49 = vpop.f32.mrf.mxu1 }
 0x166   :  { %v18193_v53 = vpop.f32.mrf.mxu0 }
 0x167   :  { %22408 = vst [vmem:[#allocation24_spill] sm:$0xff] %v18193_v53  ;;  %v18195_v51 = vpop.f32.mrf.mxu1 }
 0x168   :  { %22409 = vst [vmem:[#allocation25_spill] sm:$0xff] %v18195_v51  ;;  %v18197_v58 = vpop.f32.mrf.mxu0 }
 0x169   :  { %22410 = vst [vmem:[#allocation26_spill] sm:$0xff] %v18197_v58  ;;  %v18199_v60 = vpop.f32.mrf.mxu1 }
 0x16a   :  { %22411 = vst [vmem:[#allocation27_spill] sm:$0xff] %v18199_v60  ;;  %v18201_v61 = vpop.f32.mrf.mxu0 }
 0x16b   :  { %22412 = vst [vmem:[#allocation28_spill] sm:$0xff] %v18201_v61  ;;  %v18203_v33 = vpop.f32.mrf.mxu1 }
 0x16c   :  { %22413 = vst [vmem:[#allocation29_spill] sm:$0xff] %v18203_v33  ;;  %v18205_v34 = vpop.f32.mrf.mxu0 }
 0x16d   :  { %22414 = vst [vmem:[#allocation30_spill] sm:$0xff] %v18205_v34  ;;  %v18207_v37 = vpop.f32.mrf.mxu1 }
 0x16e   :  { %22415 = vst [vmem:[#allocation31_spill] sm:$0xff] %v18207_v37  ;;  %v18209_v40 = vpop.f32.mrf.mxu0 }
 0x16f   :  { %22416 = vst [vmem:[#allocation32_spill] sm:$0xff] %v18209_v40  ;;  %v18211_v62 = vpop.f32.mrf.mxu1 }
 0x170   :  { %22417 = vst [vmem:[#allocation33_spill] sm:$0xff] %v18211_v62  ;;  %v18213_v0 = vpop.f32.mrf.mxu0 }
 0x171   :  { %22418 = vst [vmem:[#allocation34_spill] sm:$0xff] %v18213_v0  ;;  %v18215_v29 = vpop.f32.mrf.mxu1 }
 0x172   :  { %22419 = vst [vmem:[#allocation35_spill] sm:$0xff] %v18215_v29  ;;  %v18217_v50 = vpop.f32.mrf.mxu0 }
 0x173   :  { %22420 = vst [vmem:[#allocation36_spill] sm:$0xff] %v18217_v50  ;;  %v15634_v5 = vpop.f32.mrf.mxu1 }
 0x174   :  { %v15666_v59 = vpop.f32.mrf.mxu0 }
 0x175   :  { %v1472_v60 = vpop.f32.mrf.mxu1 }
 0x176   :  { %v18219_v61 = vpop.f32.mrf.mxu0 }
 0x177   :  { %v15637_v33 = vpop.f32.mrf.mxu1 }
 0x178   :  { %v18221_v58 = vpop.f32.mrf.mxu0 }
 0x179   :  { %22421 = vst [vmem:[#allocation37_spill] sm:$0xff] %v18221_v58  ;;  %v18223_v34 = vpop.f32.mrf.mxu1 }
 0x17a   :  { %v18225_v37 = vpop.f32.mrf.mxu0 }
 0x17b   :  { %22422 = vst [vmem:[#allocation38_spill] sm:$0xff] %v18225_v37  ;;  %v18227_v40 = vpop.f32.mrf.mxu1  ;;  %v569_v37 = vadd.f32 %v18102_v16, %v18082_v39  ;;  %v589_v16 = vadd.f32 %v18114_v35, %v18094_v4 }
 0x17c   :  { %v18229_v62 = vpop.f32.mrf.mxu0 }
 0x17d   :  { %22423 = vst [vmem:[#allocation39_spill] sm:$0xff] %v18229_v62  ;;  %v18231_v0 = vpop.f32.mrf.mxu1 }
 0x17e   :  { %22424 = vst [vmem:[#allocation40_spill] sm:$0xff] %v18231_v0  ;;  %v18233_v29 = vpop.f32.mrf.mxu0 }
 0x17f   :  { %22425 = vst [vmem:[#allocation41_spill] sm:$0xff] %v18233_v29  ;;  %v18235_v50 = vpop.f32.mrf.mxu1 }
 0x180   :  { %22426 = vst [vmem:[#allocation42_spill] sm:$0xff] %v18235_v50  ;;  %v18237_v53 = vpop.f32.mrf.mxu0 }
 0x181   :  { %22427 = vst [vmem:[#allocation43_spill] sm:$0xff] %v18237_v53  ;;  %v18239_v46 = vpop.f32.mrf.mxu1  ;;  %v861_v53 = vadd.f32 %v18104_v17, %v569_v37  ;;  %v599_v17 = vadd.f32 %v18120_v47, %v18099_v12  ;;  %v619_v12 = vadd.f32 %v18139_v32, %v18086_v52  ;;  %v1096_v52 = vadd.f32 %v18171_v7, %v18118_v41  ;;  %v22439_v37 = vld [vmem:[#allocation23_spill] sm:$0xff] }
 0x182   :  { %22428 = vst [vmem:[#allocation44_spill] sm:$0xff] %v18239_v46  ;;  %v18241_v42 = vpop.f32.mrf.mxu0  ;;  %v1100_v41 = vadd.f32 %v18187_v45, %v18134_v57  ;;  %v22435_v57 = vld [vmem:[#allocation25_spill] sm:$0xff] }
 0x183   :  { %22429 = vst [vmem:[#allocation45_spill] sm:$0xff] %v18241_v42  ;;  %v18243_v58 = vpop.f32.mrf.mxu1  ;;  %v579_v42 = vadd.f32 %v18108_v22, %v18088_v56  ;;  %v1091_v39 = vadd.f32 %v1012_v9, %v861_v53  ;;  %v609_v22 = vadd.f32 %v18130_v54, %v18080_v38  ;;  %v867_v54 = vadd.f32 %v18122_v25, %v599_v17 }
 0x184   :  { %22430 = vst [vmem:[#allocation46_spill] sm:$0xff] %v18243_v58  ;;  %v18245_v51 = vpop.f32.mrf.mxu0  ;;  %v1092_v58 = vadd.f32 %v15570_v6, %v18106_v18  ;;  %v1094_v18 = vadd.f32 %v18163_v10, %v18112_v24  ;;  %v629_v24 = vadd.f32 %v18147_v43, %v18092_v3  ;;  %v1098_v3 = vadd.f32 %v18179_v27, %v18124_v48 }
 0x185   :  { %22431 = vst [vmem:[#allocation47_spill] sm:$0xff] %v18245_v51  ;;  %v18249_v62 = vpop.f32.mrf.mxu1  ;;  %v1321_v35 = vadd.f32 %v18161_v63, %v1091_v39  ;;  %v1102_v45 = vadd.f32 %v22435_v57, %v18144_v31  ;;  %v22440_v39 = vld [vmem:[#allocation24_spill] sm:$0xff] }
 0x186   :  { %v18251_v0 = vpop.f32.mrf.mxu0  ;;  %v1322_v56 = vadd.f32 %v18159_v8, %v1092_v58  ;;  %v639_v8 = vadd.f32 %v18153_v1, %v18097_v11  ;;  %v1097_v11 = vadd.f32 %v18183_v26, %v867_v54  ;;  %v1326_v26 = vadd.f32 %v18173_v19, %v1096_v52  ;;  %v22437_v58 = vld [vmem:[#allocation22_spill] sm:$0xff]  ;;  %v22441_v31 = vld [vmem:[#allocation40_spill] sm:$0xff] }
 0x187   :  { %22432 = vst [vmem:[#allocation48_spill] sm:$0xff] %v18251_v0  ;;  %v18253_v29 = vpop.f32.mrf.mxu1  ;;  %v22448_v52 = vld [vmem:[#allocation42_spill] sm:$0xff] }
 0x188   :  { %22433 = vst [vmem:[#allocation49_spill] sm:$0xff] %v18253_v29  ;;  %v18255_v50 = vpop.f32.mrf.mxu0 }
 0x189   :  { %22434 = vst [vmem:[#allocation50_spill] sm:$0xff] %v18255_v50  ;;  %v18261_v46 = vpop.f32.mrf.mxu1  ;;  %v863_v50 = vadd.f32 %v18110_v23, %v579_v42  ;;  %v1552_v23 = vadd.f32 %v15634_v5, %v1322_v56  ;;  %v865_v42 = vadd.f32 %v18116_v36, %v589_v16  ;;  %v1551_v5 = vadd.f32 %v1472_v60, %v1321_v35  ;;  %v18339_v56 = vld [vmem:[%s22442_s29] ss:$0 sm:$0xff]  ;;  %v22443_v35 = vld [vmem:[#allocation38_spill] sm:$0xff] }
 0x18a   :  { %v18263_v51 = vpop.f32.mrf.mxu0  ;;  %v869_v36 = vadd.f32 %v18132_v55, %v609_v22  ;;  %v871_v55 = vadd.f32 %v18141_v28, %v619_v12  ;;  %v1327_v60 = vadd.f32 %v22437_v58, %v1097_v11  ;;  %v1556_v16 = vadd.f32 %v18227_v40, %v1326_v26  ;;  %v22446_v40 = vld [vmem:[#allocation20_spill] sm:$0xff] }
 0x18b   :  { %v18267_v0 = vpop.f32.mrf.mxu1  ;;  %v1093_v9 = vadd.f32 %v18167_v14, %v863_v50  ;;  %v1324_v50 = vadd.f32 %v18165_v13, %v1094_v18  ;;  %v1095_v32 = vadd.f32 %v18175_v20, %v865_v42  ;;  %v1783_v1 = vadd.f32 %v15666_v59, %v1552_v23  ;;  %v22453_v58 = vld [vmem:[#allocation28_spill] sm:$0xff] }
 0x18c   :  { %v18269_v29 = vpop.f32.mrf.mxu0  ;;  %v873_v13 = vadd.f32 %v18149_v44, %v629_v24  ;;  %v1099_v14 = vadd.f32 %v18191_v49, %v869_v36  ;;  %v18316_v20 = vadd.f32 %v18155_v2, %v639_v8  ;;  %v1328_v44 = vadd.f32 %v18181_v30, %v1098_v3  ;;  %v18328_v49 = vld [vmem:[%s22436_s7] ss:$0 sm:$0xff]  ;;  %v22444_v24 = vld [vmem:[#allocation26_spill] sm:$0xff]  ;;  %v22445_v8 = vld [vmem:[#allocation27_spill] sm:$0xff] }
 0x18d   :  { %v18279_v6 = vpop.f32.mrf.mxu1  ;;  %v1323_v25 = vadd.f32 %v18169_v15, %v1093_v9  ;;  %v1554_v10 = vadd.f32 %v15637_v33, %v1324_v50  ;;  %v1782_v15 = vadd.f32 %v18219_v61, %v1551_v5  ;;  %v1325_v28 = vadd.f32 %v18177_v21, %v1095_v32  ;;  %v22438_v61 = vld [vmem:[#allocation37_spill] sm:$0xff] }
 0x18e   :  { %v18281_v4 = vpop.f32.mrf.mxu0  ;;  %v1330_v21 = vadd.f32 %v22439_v37, %v1100_v41  ;;  %v1329_v30 = vadd.f32 %v22440_v39, %v1099_v14  ;;  %v1332_v54 = vadd.f32 %v22444_v24, %v1102_v45  ;;  %v1101_v50 = vadd.f32 %v22445_v8, %v871_v55  ;;  %v22447_v5 = vld [vmem:[#allocation29_spill] sm:$0xff]  ;;  %v22449_v14 = vld [vmem:[#allocation31_spill] sm:$0xff]  ;;  %v22452_v55 = vld [vmem:[#allocation44_spill] sm:$0xff] }
 0x18f   :  { %v18290_v47 = vpop.f32.mrf.mxu1  ;;  %v1553_v27 = vadd.f32 %v18223_v34, %v1323_v25  ;;  %v1785_v33 = vadd.f32 %v22438_v61, %v1554_v10  ;;  %v1555_v17 = vadd.f32 %v22441_v31, %v1325_v28  ;;  %v1104_v36 = vadd.f32 %v22447_v5, %v22446_v40 }
 0x190   :  { %v18292_v38 = vpop.f32.mrf.mxu0  ;;  %v1558_v32 = vadd.f32 %v22448_v52, %v1328_v44  ;;  %v1557_v26 = vadd.f32 %v22452_v55, %v1327_v60  ;;  %v1331_v61 = vadd.f32 %v22453_v58, %v1101_v50  ;;  %v22464_v58 = vld [vmem:[#allocation48_spill] sm:$0xff] }
 0x191   :  { %v18304_v43 = vpop.f32.mrf.mxu1  ;;  %v1784_v9 = vadd.f32 %v22443_v35, %v1553_v27  ;;  %v22451_v27 = vld [vmem:[#allocation41_spill] sm:$0xff] }
 0x192   :  { %v18306_v63 = vpop.f32.mrf.mxu0 }
 0x193   :  { %v15698_v48 = vpop.f32.mrf.mxu1 }
 0x194   :  { %v15730_v7 = vpop.f32.mrf.mxu0  ;;  %v2013_v59 = vadd.f32 %v15698_v48, %v1783_v1  ;;  %v1103_v48 = vadd.f32 %v22449_v14, %v873_v13 }
 0x195   :  { %v1933_v2 = vpop.f32.mrf.mxu1 }
 0x196   :  { %v2163_v53 = vpop.f32.mrf.mxu0  ;;  %v2243_v34 = vadd.f32 %v15730_v7, %v2013_v59  ;;  %v2012_v19 = vadd.f32 %v1933_v2, %v1782_v15  ;;  %v22450_v7 = vld [vmem:[#allocation39_spill] sm:$0xff]  ;;  %v1786_v59 = vadd.f32 %v22451_v27, %v1555_v17  ;;  %v22461_v27 = vld [vmem:[#allocation21_spill] sm:$0xff] }
 0x197   :  { %v15701_v18 = vpop.f32.mrf.mxu1  ;;  %v1787_v15 = vadd.f32 %v22450_v7, %v1556_v16 }
 0x198   :  { %v15733_v22 = vpop.f32.mrf.mxu0  ;;  %v2266_v23 = vmul.f32 %v18328_v49, %v2243_v34  ;;  %v2242_v42 = vadd.f32 %v2163_v53, %v2012_v19  ;;  %v2015_v12 = vadd.f32 %v15701_v18, %v1785_v33  ;;  %v22454_v33 = vld [vmem:[#allocation43_spill] sm:$0xff]  ;;  %v22455_v19 = vld [vmem:[#allocation46_spill] sm:$0xff] }
 0x199   :  { %v1943_v3 = vpop.f32.mrf.mxu1  ;;  %v1789_v34 = vadd.f32 %v22454_v33, %v1558_v32  ;;  %v1560_v13 = vadd.f32 %v22455_v19, %v1330_v21  ;;  %v22459_v32 = vld [vmem:[#allocation47_spill] sm:$0xff] }
 0x19a   :  { %v2173_v25 = vpop.f32.mrf.mxu0  ;;  %v2289_v11 = vadd.f32 %v18339_v56, %v2266_v23  ;;  %v2265_v1 = vmul.f32 %v18328_v49, %v2242_v42  ;;  %v2245_v10 = vadd.f32 %v15733_v22, %v2015_v12  ;;  %v2014_v41 = vadd.f32 %v1943_v3, %v1784_v9  ;;  %v22456_v22 = vld [vmem:[#allocation30_spill] sm:$0xff]  ;;  %v22457_v9 = vld [vmem:[#allocation32_spill] sm:$0xff]  ;;  %v22458_v42 = vld [vmem:[#allocation45_spill] sm:$0xff] }
 0x19b   :  { %v15704_v28 = vpop.f32.mrf.mxu1  ;;  %v1334_v35 = vadd.f32 %v22456_v22, %v1104_v36  ;;  %v1333_v23 = vadd.f32 %v22457_v9, %v1103_v48  ;;  %v1788_v12 = vadd.f32 %v22458_v42, %v1557_v26  ;;  %v1791_v3 = vadd.f32 %v22459_v32, %v1560_v13  ;;  %v22463_v26 = vld [vmem:[#allocation35_spill] sm:$0xff] }
 0x19c   :  { %v15736_v57 = vpop.f32.mrf.mxu0  ;;  %v2305_v45 = vmax.f32 %v2289_v11, 0.0  ;;  %v2288_v44 = vadd.f32 %v18339_v56, %v2265_v1  ;;  %v2268_v2 = vmul.f32 %v18328_v49, %v2245_v10  ;;  %v2244_v53 = vadd.f32 %v2173_v25, %v2014_v41  ;;  %v22460_v11 = vld [vmem:[#allocation49_spill] sm:$0xff] }
 0x19d   :  { %v2017_v37 = vadd.f32 %v15704_v28, %v1787_v15  ;;  %v1953_v39 = vpop.f32.mrf.mxu1  ;;  %v1559_v25 = vadd.f32 %v18249_v62, %v1329_v30  ;;  %v1562_v36 = vadd.f32 %v22460_v11, %v1332_v54  ;;  %v1105_v28 = vadd.f32 %v22463_v26, %v18316_v20 }
 0x19e   :  { %v2183_v16 = vpop.f32.mrf.mxu0  ;;  %2321 = vst.msk [vmem:[#allocation3 + $0x8] sm:$0xff] %vm145_vm0, %v2305_v45  ;;  %v2304_v60 = vmax.f32 %v2288_v44, 0.0  ;;  %v2291_v31 = vadd.f32 %v18339_v56, %v2268_v2  ;;  %v2267_v17 = vmul.f32 %v18328_v49, %v2244_v53  ;;  %v2016_v18 = vadd.f32 %v1953_v39, %v1786_v59  ;;  %v22462_v59 = vld [vmem:[#allocation33_spill] sm:$0xff] }
 0x19f   :  { %v2247_v24 = vadd.f32 %v15736_v57, %v2017_v37  ;;  %v15707_v8 = vpop.f32.mrf.mxu1  ;;  %v1106_v55 = vadd.f32 %v22462_v59, %v22461_v27  ;;  %v1561_v62 = vadd.f32 %v18261_v46, %v1331_v61  ;;  %v1790_v33 = vadd.f32 %v22464_v58, %v1559_v25 }
 0x1a0   :  { %v15739_v21 = vpop.f32.mrf.mxu0  ;;  %2320 = vst.msk [vmem:[#allocation3] sm:$0xff] %vm145_vm0, %v2304_v60  ;;  %v2307_v50 = vmax.f32 %v2291_v31, 0.0  ;;  %v2290_v40 = vadd.f32 %v18339_v56, %v2267_v17  ;;  %v2246_v5 = vadd.f32 %v2183_v16, %v2016_v18  ;;  %v2019_v52 = vadd.f32 %v15707_v8, %v1789_v34  ;;  %v22465_v34 = vld [vmem:[#allocation50_spill] sm:$0xff] }
 0x1a1   :  { %v2270_v1 = vmul.f32 %v18328_v49, %v2247_v24  ;;  %v1963_v10 = vpop.f32.mrf.mxu1  ;;  %v1793_v19 = vadd.f32 %v22465_v34, %v1562_v36  ;;  %v1564_v20 = vadd.f32 %v18267_v0, %v1334_v35  ;;  %v1792_v17 = vadd.f32 %v18263_v51, %v1561_v62 }
 0x1a2   :  { %v2193_v41 = vpop.f32.mrf.mxu0  ;;  %2323 = vst.msk [vmem:[#allocation3 + $0x18] sm:$0xff] %vm145_vm0, %v2307_v50  ;;  %v2306_v14 = vmax.f32 %v2290_v40, 0.0  ;;  %v2269_v48 = vmul.f32 %v18328_v49, %v2246_v5  ;;  %v2249_v7 = vadd.f32 %v15739_v21, %v2019_v52  ;;  %v2018_v15 = vadd.f32 %v1963_v10, %v1788_v12  ;;  %v22466_v21 = vld [vmem:[#allocation34_spill] sm:$0xff]  ;;  %v22467_v50 = vld [vmem:[#allocation36_spill] sm:$0xff] }
 0x1a3   :  { %v2293_v30 = vadd.f32 %v18339_v56, %v2270_v1  ;;  %v15710_v54 = vpop.f32.mrf.mxu1  ;;  %v1563_v18 = vadd.f32 %v18279_v6, %v1333_v23  ;;  %v1336_v51 = vadd.f32 %v22466_v21, %v1106_v55  ;;  %v1335_v6 = vadd.f32 %v22467_v50, %v1105_v28 }
 0x1a4   :  { %v15742_v57 = vpop.f32.mrf.mxu0  ;;  %2322 = vst.msk [vmem:[#allocation3 + $0x10] sm:$0xff] %vm145_vm0, %v2306_v14  ;;  %v2292_v45 = vadd.f32 %v18339_v56, %v2269_v48  ;;  %v2272_v44 = vmul.f32 %v18328_v49, %v2249_v7  ;;  %v2248_v2 = vadd.f32 %v2193_v41, %v2018_v15  ;;  %v2021_v53 = vadd.f32 %v15710_v54, %v1791_v3 }
 0x1a5   :  { %v2337_v13 = vld [vmem:[#allocation3 + $0x8] sm:$0xff]  ;;  %v2309_v46 = vmax.f32 %v2293_v30, 0.0  ;;  %v1973_v61 = vpop.f32.mrf.mxu1  ;;  %v1795_v23 = vadd.f32 %v18269_v29, %v1564_v20  ;;  %v1794_v1 = vadd.f32 %v18281_v4, %v1563_v18  ;;  %v1566_v10 = vadd.f32 %v18290_v47, %v1336_v51 }
 0x1a6   :  { %v2203_v37 = vpop.f32.mrf.mxu0  ;;  %2353 = vst.msk [vmem:[#allocation2 + $0x21] sm:$0xff] %vm145_vm0, %v2337_v13  ;;  %v2308_v39 = vmax.f32 %v2292_v45, 0.0  ;;  %v2295_v16 = vadd.f32 %v18339_v56, %v2272_v44  ;;  %v2271_v60 = vmul.f32 %v18328_v49, %v2248_v2  ;;  %v2251_v31 = vadd.f32 %v15742_v57, %v2021_v53  ;;  %v2814_v57 = vld [vmem:[#allocation7 + $0x50] sm:$0xff] }
 0x1a7   :  { %v2336_v22 = vld [vmem:[#allocation3] sm:$0xff]  ;;  %2325 = vst.msk [vmem:[#allocation3 + $0x28] sm:$0xff] %vm145_vm0, %v2309_v46  ;;  %v2020_v0 = vadd.f32 %v1973_v61, %v1790_v33  ;;  %v15713_v35 = vpop.f32.mrf.mxu1  ;;  %v1565_v41 = vadd.f32 %v18304_v43, %v1335_v6  ;;  %v1797_v45 = vadd.f32 %v18292_v38, %v1566_v10 }
 0x1a8   :  { %v15745_v9 = vpop.f32.mrf.mxu0  ;;  %2352 = vst.msk [vmem:[#allocation2 + $0x11] sm:$0xff] %vm145_vm0, %v2336_v22  ;;  %2324 = vst.msk [vmem:[#allocation3 + $0x20] sm:$0xff] %vm145_vm0, %v2308_v39  ;;  %v2311_v42 = vmax.f32 %v2295_v16, 0.0  ;;  %v2294_v12 = vadd.f32 %v18339_v56, %v2271_v60  ;;  %v2274_v24 = vmul.f32 %v18328_v49, %v2251_v31  ;;  %v2023_v8 = vadd.f32 %v15713_v35, %v1793_v19  ;;  %v2813_v35 = vld [vmem:[#allocation7 + $0x48] sm:$0xff] }
 0x1a9   :  { %v2339_v40 = vld [vmem:[#allocation3 + $0x18] sm:$0xff]  ;;  %v2250_v5 = vadd.f32 %v2203_v37, %v2020_v0  ;;  %v1983_v52 = vpop.f32.mrf.mxu1  ;;  %v1796_v44 = vadd.f32 %v18306_v63, %v1565_v41  ;;  %v22468_v0 = vld [vmem:[#allocation18_spill] sm:$0xff] }
 0x1aa   :  { %v2213_v32 = vpop.f32.mrf.mxu0  ;;  %2355 = vst.msk [vmem:[#allocation2 + $0x41] sm:$0xff] %vm145_vm0, %v2339_v40  ;;  %2327 = vst.msk [vmem:[#allocation3 + $0x38] sm:$0xff] %vm145_vm0, %v2311_v42  ;;  %v2310_v3 = vmax.f32 %v2294_v12, 0.0  ;;  %v2297_v25 = vadd.f32 %v18339_v56, %v2274_v24  ;;  %v2253_v11 = vadd.f32 %v15745_v9, %v2023_v8  ;;  %v2022_v36 = vadd.f32 %v1983_v52, %v1792_v17  ;;  %v3044_v37 = vld [vmem:[#allocation7 + $0x70] sm:$0xff]  ;;  %v22469_v9 = vld [vmem:[#allocation19_spill] sm:$0xff] }
 0x1ab   :  { %v2338_v29 = vld [vmem:[#allocation3 + $0x10] sm:$0xff]  ;;  %v2273_v14 = vmul.f32 %v18328_v49, %v2250_v5  ;;  %v15716_v48 = vpop.f32.mrf.mxu1  ;;  %v3042_v41 = vld [vmem:[#allocation7 + $0x60] sm:$0xff] }
 0x1ac   :  { %v15748_v7 = vpop.f32.mrf.mxu0  ;;  %2354 = vst.msk [vmem:[#allocation2 + $0x31] sm:$0xff] %vm145_vm0, %v2338_v29  ;;  %2326 = vst.msk [vmem:[#allocation3 + $0x30] sm:$0xff] %vm145_vm0, %v2310_v3  ;;  %v2313_v15 = vmax.f32 %v2297_v25, 0.0  ;;  %v2276_v27 = vmul.f32 %v18328_v49, %v2253_v11  ;;  %v2252_v59 = vadd.f32 %v2213_v32, %v2022_v36  ;;  %v2025_v55 = vadd.f32 %v15716_v48, %v1795_v23  ;;  %v3043_v5 = vld [vmem:[#allocation7 + $0x68] sm:$0xff]  ;;  %v2812_v11 = vld [vmem:[#allocation7 + $0x40] sm:$0xff] }
 0x1ad   :  { %v2296_v4 = vadd.f32 %v18339_v56, %v2273_v14  ;;  %v1993_v26 = vpop.f32.mrf.mxu1  ;;  %v18426_v63 = vld [vmem:[#allocation2 + $0x21] sm:$0xff] }
 0x1ae   :  { %v2223_v47 = vpop.f32.mrf.mxu0  ;;  %v2341_v28 = vld [vmem:[#allocation3 + $0x28] sm:$0xff]  ;;  %2329 = vst.msk [vmem:[#allocation3 + $0x48] sm:$0xff] %vm145_vm0, %v2313_v15  ;;  %v2299_v43 = vadd.f32 %v18339_v56, %v2276_v27  ;;  %v2275_v62 = vmul.f32 %v18328_v49, %v2252_v59  ;;  %v2255_v30 = vadd.f32 %v15748_v7, %v2025_v55  ;;  %v2024_v54 = vadd.f32 %v1993_v26, %v1794_v1  ;;  %v18428_v61 = vld [vmem:[#allocation2 + $0x20] sm:$0xff] }
 0x1af   :  { %2357 = vst.msk [vmem:[#allocation2 + $0x61] sm:$0xff] %vm145_vm0, %v2341_v28  ;;  %v2340_v2 = vld [vmem:[#allocation3 + $0x20] sm:$0xff]  ;;  %v2312_v53 = vmax.f32 %v2296_v4, 0.0  ;;  %v15719_v58 = vpop.f32.mrf.mxu1  ;;  %v18415_v34 = vld [vmem:[#allocation2 + $0x11] sm:$0xff] }
 0x1b0   :  { %v15751_v33 = vpop.f32.mrf.mxu0  ;;  %v18417_v19 = vld [vmem:[#allocation2 + $0x10] sm:$0xff]  ;;  %2356 = vst.msk [vmem:[#allocation2 + $0x51] sm:$0xff] %vm145_vm0, %v2340_v2  ;;  %v2315_v20 = vmax.f32 %v2299_v43, 0.0  ;;  %v2298_v13 = vadd.f32 %v18339_v56, %v2275_v62  ;;  %v2278_v46 = vmul.f32 %v18328_v49, %v2255_v30  ;;  %v2254_v38 = vadd.f32 %v2223_v47, %v2024_v54  ;;  %15761 = vmatmul.mubr.msk.f32.vlgmr.msra.gmra.mxu1 %vm145_vm0, %v18415_v34  ;;  %v2396_v27 = vld [vmem:[#allocation2 + $0xa1] sm:$0xff] }
 0x1b1   :  { %15793 = vmatmul.mubr.msk.f32.vlgmr.msra.gmra.mxu0 %vm145_vm0, %v18417_v19  ;;  %v2343_v39 = vld [vmem:[#allocation3 + $0x38] sm:$0xff]  ;;  %2328 = vst.msk [vmem:[#allocation3 + $0x40] sm:$0xff] %vm145_vm0, %v2312_v53  ;;  %v2027_v16 = vadd.f32 %v15719_v58, %v1797_v45  ;;  %v2003_v60 = vpop.f32.mrf.mxu1  ;;  %15763 = vmatprep.mubr.msk.f32.mxu1 %vm145_vm0, %v18426_v63  ;;  %v18452_v23 = vld [vmem:[#allocation2 + $0x41] sm:$0xff] }
 0x1b2   :  { %15795 = vmatprep.mubr.msk.f32.mxu0 %vm145_vm0, %v18428_v61  ;;  %2359 = vst.msk [vmem:[#allocation2 + $0x81] sm:$0xff] %vm145_vm0, %v2343_v39  ;;  %2331 = vst.msk [vmem:[#allocation3 + $0x58] sm:$0xff] %vm145_vm0, %v2315_v20  ;;  %v2314_v31 = vmax.f32 %v2298_v13, 0.0  ;;  %v2301_v17 = vadd.f32 %v18339_v56, %v2278_v46  ;;  %v2277_v18 = vmul.f32 %v18328_v49, %v2254_v38  ;;  %15817 = vmatpush3.msra.mxu1 %v22468_v0  ;;  %v2233_v24 = vpop.f32.mrf.mxu0  ;;  %v18454_v40 = vld [vmem:[#allocation2 + $0x40] sm:$0xff] }
 0x1b3   :  { %v2026_v22 = vadd.f32 %v2003_v60, %v1796_v44  ;;  %15849 = vmatpush3.msra.mxu0 %v22469_v9  ;;  %v2342_v42 = vld [vmem:[#allocation3 + $0x30] sm:$0xff]  ;;  %v2257_v12 = vadd.f32 %v15751_v33, %v2027_v16  ;;  %15818 = vmatprep.subr.mxu1 %v2814_v57  ;;  %v2376_v59 = vld [vmem:[#allocation2 + $0xa0] sm:$0xff] }
 0x1b4   :  { %v18441_v8 = vld [vmem:[#allocation2 + $0x31] sm:$0xff]  ;;  %15850 = vmatprep.subr.mxu0 %v3044_v37  ;;  %2358 = vst.msk [vmem:[#allocation2 + $0x71] sm:$0xff] %vm145_vm0, %v2342_v42  ;;  %2330 = vst.msk [vmem:[#allocation3 + $0x50] sm:$0xff] %vm145_vm0, %v2314_v31  ;;  %v2317_v51 = vmax.f32 %v2301_v17, 0.0  ;;  %v2300_v50 = vadd.f32 %v18339_v56, %v2277_v18  ;;  %15819 = vmatpush3.msra.mxu1 %v2814_v57  ;;  %v3275_v47 = vld [vmem:[#allocation7 + $0x98] sm:$0xff] }
 0x1b5   :  { %v18443_v21 = vld [vmem:[#allocation2 + $0x30] sm:$0xff]  ;;  %v2256_v6 = vadd.f32 %v2233_v24, %v2026_v22  ;;  %15764 = vmatmul.mubr.msk.f32.gmra.mxu1 %vm145_vm0, %v18441_v8  ;;  %v2345_v52 = vld [vmem:[#allocation3 + $0x48] sm:$0xff]  ;;  %v2280_v32 = vmul.f32 %v18328_v49, %v2257_v12  ;;  %15851 = vmatpush3.msra.mxu0 %v3044_v37  ;;  %v3505_v28 = vld [vmem:[#allocation7 + $0xb8] sm:$0xff] }
 0x1b6   :  { %15796 = vmatmul.mubr.msk.f32.gmra.mxu0 %vm145_vm0, %v18443_v21  ;;  %15766 = vmatprep.mubr.msk.f32.mxu1 %vm145_vm0, %v18452_v23  ;;  %2361 = vst.msk [vmem:[#allocation2 + $0xc1] sm:$0xff] %vm145_vm0, %v2345_v52  ;;  %2333 = vst.msk [vmem:[#allocation3 + $0x68] sm:$0xff] %vm145_vm0, %v2317_v51  ;;  %v2316_v3 = vmax.f32 %v2300_v50, 0.0  ;;  %v18477_v48 = vld [vmem:[#allocation2 + $0x60] sm:$0xff]  ;;  %v18561_v31 = vld [vmem:[#allocation2 + $0x12] sm:$0xff] }
 0x1b7   :  { %15798 = vmatprep.mubr.msk.f32.mxu0 %vm145_vm0, %v18454_v40  ;;  %v2279_v25 = vmul.f32 %v18328_v49, %v2256_v6  ;;  %v2303_v36 = vadd.f32 %v18339_v56, %v2280_v32  ;;  %v18465_v1 = vld [vmem:[#allocation2 + $0x51] sm:$0xff]  ;;  %15820 = vmatprep.subr.mxu1 %v2813_v35  ;;  %v18475_v49 = vld [vmem:[#allocation2 + $0x61] sm:$0xff] }
 0x1b8   :  { %v18467_v10 = vld [vmem:[#allocation2 + $0x50] sm:$0xff]  ;;  %15852 = vmatprep.subr.mxu0 %v3043_v5  ;;  %v2344_v29 = vld [vmem:[#allocation3 + $0x40] sm:$0xff]  ;;  %2332 = vst.msk [vmem:[#allocation3 + $0x60] sm:$0xff] %vm145_vm0, %v2316_v3  ;;  %15821 = vmatpush3.msra.mxu1 %v2813_v35 }
 0x1b9   :  { %v2302_v14 = vadd.f32 %v18339_v56, %v2279_v25  ;;  %15767 = vmatmul.mubr.msk.f32.gmra.mxu1 %vm145_vm0, %v18465_v1  ;;  %2360 = vst.msk [vmem:[#allocation2 + $0xb1] sm:$0xff] %vm145_vm0, %v2344_v29  ;;  %v2347_v7 = vld [vmem:[#allocation3 + $0x58] sm:$0xff]  ;;  %v2319_v15 = vmax.f32 %v2303_v36, 0.0  ;;  %15853 = vmatpush3.msra.mxu0 %v3043_v5  ;;  %v2795_v60 = vld [vmem:[#allocation2 + $0x2] sm:$0xff]  ;;  %v3273_v35 = vld [vmem:[#allocation7 + $0x88] sm:$0xff] }
 0x1ba   :  { %15799 = vmatmul.mubr.msk.f32.gmra.mxu0 %vm145_vm0, %v18467_v10  ;;  %15769 = vmatprep.mubr.msk.f32.mxu1 %vm145_vm0, %v18475_v49  ;;  %2363 = vst.msk [vmem:[#allocation2 + $0xe1] sm:$0xff] %vm145_vm0, %v2347_v7  ;;  %v18567_v17 = vld [vmem:[#allocation2 + $0x22] sm:$0xff]  ;;  %v3274_v18 = vld [vmem:[#allocation7 + $0x90] sm:$0xff]  ;;  %v3503_v9 = vld [vmem:[#allocation7 + $0xa8] sm:$0xff] }
 0x1bb   :  { %15801 = vmatprep.mubr.msk.f32.mxu0 %vm145_vm0, %v18477_v48  ;;  %v2318_v56 = vmax.f32 %v2302_v14, 0.0  ;;  %v2346_v55 = vld [vmem:[#allocation3 + $0x50] sm:$0xff]  ;;  %2335 = vst.msk [vmem:[#allocation3 + $0x78] sm:$0xff] %vm145_vm0, %v2319_v15  ;;  %15822 = vmatprep.subr.mxu1 %v2812_v11  ;;  %v18579_v0 = vld [vmem:[#allocation2 + $0x42] sm:$0xff]  ;;  %v3735_v52 = vld [vmem:[#allocation7 + $0xd8] sm:$0xff] }
 0x1bc   :  { %v18486_v4 = vld [vmem:[#allocation2 + $0x71] sm:$0xff]  ;;  %15854 = vmatprep.subr.mxu0 %v3042_v41  ;;  %2362 = vst.msk [vmem:[#allocation2 + $0xd1] sm:$0xff] %vm145_vm0, %v2346_v55  ;;  %15823 = vmatpush3.msra.mxu1 %v2812_v11  ;;  %v18591_v12 = vld [vmem:[#allocation2 + $0x62] sm:$0xff]  ;;  %v3965_v32 = vld [vmem:[#allocation7 + $0xf8] sm:$0xff] }
 0x1bd   :  { %v18488_v26 = vld [vmem:[#allocation2 + $0x70] sm:$0xff]  ;;  %2334 = vst.msk [vmem:[#allocation3 + $0x70] sm:$0xff] %vm145_vm0, %v2318_v56  ;;  %15770 = vmatmul.mubr.msk.f32.gmra.mxu1 %vm145_vm0, %v18486_v4  ;;  %v2349_v43 = vld [vmem:[#allocation3 + $0x68] sm:$0xff]  ;;  %15855 = vmatpush3.msra.mxu0 %v3042_v41  ;;  %v18510_v45 = vld [vmem:[#allocation2 + $0xc0] sm:$0xff] }
 0x1be   :  { %15802 = vmatmul.mubr.msk.f32.gmra.mxu0 %vm145_vm0, %v18488_v26  ;;  %15772 = vmatprep.mubr.msk.f32.mxu1 %vm145_vm0, %v2396_v27  ;;  %2365 = vst.msk [vmem:[#allocation2 + $0x101] sm:$0xff] %vm145_vm0, %v2349_v43  ;;  %v18508_v57 = vld [vmem:[#allocation2 + $0xc1] sm:$0xff]  ;;  %v3504_v22 = vld [vmem:[#allocation7 + $0xb0] sm:$0xff]  ;;  %v3963_v27 = vld [vmem:[#allocation7 + $0xe8] sm:$0xff] }
 0x1bf   :  { %15804 = vmatprep.mubr.msk.f32.mxu0 %vm145_vm0, %v2376_v59  ;;  %v2348_v62 = vld [vmem:[#allocation3 + $0x60] sm:$0xff]  ;;  %15880 = vmatprep.subr.mxu1 %v3275_v47  ;;  %v18585_v42 = vld [vmem:[#allocation2 + $0x52] sm:$0xff] }
 0x1c0   :  { %15912 = vmatprep.subr.mxu0 %v3505_v28  ;;  %2364 = vst.msk [vmem:[#allocation2 + $0xf1] sm:$0xff] %vm145_vm0, %v2348_v62  ;;  %v18500_v30 = vld [vmem:[#allocation2 + $0xb1] sm:$0xff]  ;;  %v3272_v24 = vld [vmem:[#allocation7 + $0x80] sm:$0xff]  ;;  %v4195_v43 = vld [vmem:[#allocation7 + $0x118] sm:$0xff] }
 0x1c1   :  { %v18502_v54 = vld [vmem:[#allocation2 + $0xb0] sm:$0xff]  ;;  %15773 = vmatmul.mubr.msk.f32.gmra.mxu1 %vm145_vm0, %v18500_v30  ;;  %v18526_v33 = vld [vmem:[#allocation2 + $0xe1] sm:$0xff] }
 0x1c2   :  { %15805 = vmatmul.mubr.msk.f32.gmra.mxu0 %vm145_vm0, %v18502_v54  ;;  %v2351_v44 = vld [vmem:[#allocation3 + $0x78] sm:$0xff]  ;;  %15775 = vmatprep.mubr.msk.f32.mxu1 %vm145_vm0, %v18508_v57  ;;  %v18528_v20 = vld [vmem:[#allocation2 + $0xe0] sm:$0xff] }
 0x1c3   :  { %15807 = vmatprep.mubr.msk.f32.mxu0 %vm145_vm0, %v18510_v45  ;;  %2367 = vst.msk [vmem:[#allocation2 + $0x121] sm:$0xff] %vm145_vm0, %v2351_v44  ;;  %v18517_v53 = vld [vmem:[#allocation2 + $0xd1] sm:$0xff]  ;;  %v3502_v51 = vld [vmem:[#allocation7 + $0xa0] sm:$0xff] }
 0x1c4   :  { %v2350_v2 = vld [vmem:[#allocation3 + $0x70] sm:$0xff]  ;;  %v2803_v50 = vld [vmem:[#allocation2 + $0xa2] sm:$0xff] }
 0x1c5   :  { %v18519_v58 = vld [vmem:[#allocation2 + $0xd0] sm:$0xff]  ;;  %2366 = vst.msk [vmem:[#allocation2 + $0x111] sm:$0xff] %vm145_vm0, %v2350_v2  ;;  %15776 = vmatmul.mubr.msk.f32.gmra.mxu1 %vm145_vm0, %v18517_v53  ;;  %v18542_v38 = vld [vmem:[#allocation2 + $0x101] sm:$0xff] }
 0x1c6   :  { %15808 = vmatmul.mubr.msk.f32.gmra.mxu0 %vm145_vm0, %v18519_v58  ;;  %15778 = vmatprep.mubr.msk.f32.mxu1 %vm145_vm0, %v18526_v33  ;;  %v18544_v37 = vld [vmem:[#allocation2 + $0x100] sm:$0xff]  ;;  %v18597_v6 = vld [vmem:[#allocation2 + $0x72] sm:$0xff] }
 0x1c7   :  { %15810 = vmatprep.mubr.msk.f32.mxu0 %vm145_vm0, %v18528_v20  ;;  %v18534_v13 = vld [vmem:[#allocation2 + $0xf1] sm:$0xff]  ;;  %v18599_v5 = vld [vmem:[#allocation2 + $0x80] sm:$0xff] }
 0x1c8   :  { %v18536_v46 = vld [vmem:[#allocation2 + $0xf0] sm:$0xff]  ;;  %v18611_v25 = vld [vmem:[#allocation2 + $0xc2] sm:$0xff] }
 0x1c9   :  { %15779 = vmatmul.mubr.msk.f32.gmra.mxu1 %vm145_vm0, %v18534_v13  ;;  %v2804_v3 = vld [vmem:[#allocation2 + $0xb2] sm:$0xff]  ;;  %v18623_v36 = vld [vmem:[#allocation2 + $0xe2] sm:$0xff] }
 0x1ca   :  { %15811 = vmatmul.mubr.msk.f32.gmra.mxu0 %vm145_vm0, %v18536_v46  ;;  %15781 = vmatprep.mubr.msk.f32.mxu1 %vm145_vm0, %v18542_v38  ;;  %v18617_v11 = vld [vmem:[#allocation2 + $0xd2] sm:$0xff]  ;;  %v18635_v29 = vld [vmem:[#allocation2 + $0x102] sm:$0xff] }
 0x1cb   :  { %15813 = vmatprep.mubr.msk.f32.mxu0 %vm145_vm0, %v18544_v37  ;;  %v18629_v41 = vld [vmem:[#allocation2 + $0xf2] sm:$0xff]  ;;  %v18643_v7 = vld [vmem:[#allocation2 + $0x120] sm:$0xff] }
 0x1cc   :  { %v18550_v39 = vld [vmem:[#allocation2 + $0x111] sm:$0xff]  ;;  %v3732_v59 = vld [vmem:[#allocation7 + $0xc0] sm:$0xff] }
 0x1cd   :  { %v18552_v16 = vld [vmem:[#allocation2 + $0x110] sm:$0xff]  ;;  %15782 = vmatmul.mubr.msk.f32.gmra.mxu1 %vm145_vm0, %v18550_v39  ;;  %v3962_v55 = vld [vmem:[#allocation7 + $0xe0] sm:$0xff] }
 0x1ce   :  { %15814 = vmatmul.mubr.msk.f32.gmra.mxu0 %vm145_vm0, %v18552_v16  ;;  %15824 = vmatprep.mubr.msk.f32.mxu1 %vm145_vm0, %v2795_v60  ;;  %v18641_v14 = vld [vmem:[#allocation2 + $0x112] sm:$0xff]  ;;  %v3270_v62 = vld [vmem:[#allocation2 + $0x121] sm:$0xff] }
 0x1cf   :  { %15856 = vmatprep.mubr.msk.f32.mxu0 %vm145_vm0, %v18417_v19  ;;  %v18573_v19 = vld [vmem:[#allocation2 + $0x32] sm:$0xff] }
 0x1d0   :  { %v3734_v15 = vld [vmem:[#allocation7 + $0xd0] sm:$0xff] }
 0x1d1   :  { %15825 = vmatmul.mubr.msk.f32.vlgmr.msra.gmra.mxu1 %vm145_vm0, %v18561_v31  ;;  %v3964_v56 = vld [vmem:[#allocation7 + $0xf0] sm:$0xff] }
 0x1d2   :  { %15857 = vmatmul.mubr.msk.f32.vlgmr.msra.gmra.mxu0 %vm145_vm0, %v18428_v61  ;;  %15827 = vmatprep.mubr.msk.f32.mxu1 %vm145_vm0, %v18567_v17 }
 0x1d3   :  { %15859 = vmatprep.mubr.msk.f32.mxu0 %vm145_vm0, %v18443_v21  ;;  %15881 = vmatpush3.msra.mxu1 %v3275_v47  ;;  %v3262_v47 = vld [vmem:[#allocation2 + $0x81] sm:$0xff] }
 0x1d4   :  { %15913 = vmatpush3.msra.mxu0 %v3505_v28  ;;  %15882 = vmatprep.subr.mxu1 %v3274_v18  ;;  %v18677_v28 = vld [vmem:[#allocation2 + $0x82] sm:$0xff] }
 0x1d5   :  { %15914 = vmatprep.subr.mxu0 %v3504_v22  ;;  %15828 = vmatmul.mubr.msk.f32.gmra.mxu1 %vm145_vm0, %v18573_v19 }
 0x1d6   :  { %15860 = vmatmul.mubr.msk.f32.gmra.mxu0 %vm145_vm0, %v18454_v40  ;;  %15830 = vmatprep.mubr.msk.f32.mxu1 %vm145_vm0, %v18579_v0 }
 0x1d7   :  { %15862 = vmatprep.mubr.msk.f32.mxu0 %vm145_vm0, %v18467_v10  ;;  %15883 = vmatpush3.msra.mxu1 %v3274_v18 }
 0x1d8   :  { %15915 = vmatpush3.msra.mxu0 %v3504_v22  ;;  %15884 = vmatprep.subr.mxu1 %v3273_v35 }
 0x1d9   :  { %15916 = vmatprep.subr.mxu0 %v3503_v9  ;;  %15831 = vmatmul.mubr.msk.f32.gmra.mxu1 %vm145_vm0, %v18585_v42 }
 0x1da   :  { %15863 = vmatmul.mubr.msk.f32.gmra.mxu0 %vm145_vm0, %v18477_v48  ;;  %15833 = vmatprep.mubr.msk.f32.mxu1 %vm145_vm0, %v18591_v12 }
 0x1db   :  { %15865 = vmatprep.mubr.msk.f32.mxu0 %vm145_vm0, %v18488_v26  ;;  %15885 = vmatpush3.msra.mxu1 %v3273_v35 }
 0x1dc   :  { %15917 = vmatpush3.msra.mxu0 %v3503_v9  ;;  %15886 = vmatprep.subr.mxu1 %v3272_v24  ;;  %v4550_v9 = vld [vmem:[#allocation9 + $0x18] sm:$0xff] }
 0x1dd   :  { %15918 = vmatprep.subr.mxu0 %v3502_v51  ;;  %15834 = vmatmul.mubr.msk.f32.gmra.mxu1 %vm145_vm0, %v18597_v6 }
 0x1de   :  { %15866 = vmatmul.mubr.msk.f32.gmra.mxu0 %vm145_vm0, %v18599_v5  ;;  %15836 = vmatprep.mubr.msk.f32.mxu1 %vm145_vm0, %v2803_v50 }
 0x1df   :  { %15868 = vmatprep.mubr.msk.f32.mxu0 %vm145_vm0, %v18502_v54  ;;  %15887 = vmatpush3.msra.mxu1 %v3272_v24  ;;  %v4194_v54 = vld [vmem:[#allocation7 + $0x110] sm:$0xff] }
 0x1e0   :  { %15919 = vmatpush3.msra.mxu0 %v3502_v51  ;;  %15944 = vmatprep.subr.mxu1 %v3735_v52  ;;  %v4549_v51 = vld [vmem:[#allocation9 + $0x10] sm:$0xff] }
 0x1e1   :  { %15976 = vmatprep.subr.mxu0 %v3965_v32  ;;  %15837 = vmatmul.mubr.msk.f32.gmra.mxu1 %vm145_vm0, %v2804_v3 }
 0x1e2   :  { %15869 = vmatmul.mubr.msk.f32.gmra.mxu0 %vm145_vm0, %v18510_v45  ;;  %15839 = vmatprep.mubr.msk.f32.mxu1 %vm145_vm0, %v18611_v25 }
 0x1e3   :  { %15871 = vmatprep.mubr.msk.f32.mxu0 %vm145_vm0, %v18519_v58 }
 0x1e5   :  { %15840 = vmatmul.mubr.msk.f32.gmra.mxu1 %vm145_vm0, %v18617_v11 }
 0x1e6   :  { %15872 = vmatmul.mubr.msk.f32.gmra.mxu0 %vm145_vm0, %v18528_v20  ;;  %15842 = vmatprep.mubr.msk.f32.mxu1 %vm145_vm0, %v18623_v36 }
 0x1e7   :  { %15874 = vmatprep.mubr.msk.f32.mxu0 %vm145_vm0, %v18536_v46 }
 0x1e9   :  { %15843 = vmatmul.mubr.msk.f32.gmra.mxu1 %vm145_vm0, %v18629_v41 }
 0x1ea   :  { %15875 = vmatmul.mubr.msk.f32.gmra.mxu0 %vm145_vm0, %v18544_v37  ;;  %15845 = vmatprep.mubr.msk.f32.mxu1 %vm145_vm0, %v18635_v29 }
 0x1eb   :  { %15877 = vmatprep.mubr.msk.f32.mxu0 %vm145_vm0, %v18552_v16 }
 0x1ed   :  { %15846 = vmatmul.mubr.msk.f32.gmra.mxu1 %vm145_vm0, %v18641_v14 }
 0x1ee   :  { %15878 = vmatmul.mubr.msk.f32.gmra.mxu0 %vm145_vm0, %v18643_v7  ;;  %15888 = vmatprep.mubr.msk.f32.mxu1 %vm145_vm0, %v18415_v34  ;;  %v3733_v34 = vld [vmem:[#allocation7 + $0xc8] sm:$0xff] }
 0x1ef   :  { %15920 = vmatprep.mubr.msk.f32.mxu0 %vm145_vm0, %v18561_v31 }
 0x1f1   :  { %15889 = vmatmul.mubr.msk.f32.vlgmr.msra.gmra.mxu1 %vm145_vm0, %v18426_v63 }
 0x1f2   :  { %15921 = vmatmul.mubr.msk.f32.vlgmr.msra.gmra.mxu0 %vm145_vm0, %v18567_v17  ;;  %15891 = vmatprep.mubr.msk.f32.mxu1 %vm145_vm0, %v18441_v8 }
 0x1f3   :  { %15923 = vmatprep.mubr.msk.f32.mxu0 %vm145_vm0, %v18573_v19  ;;  %15945 = vmatpush3.msra.mxu1 %v3735_v52  ;;  %v4569_v52 = vld [vmem:[#allocation9 + $0x28] sm:$0xff] }
 0x1f4   :  { %15977 = vmatpush3.msra.mxu0 %v3965_v32  ;;  %15946 = vmatprep.subr.mxu1 %v3734_v15  ;;  %v4548_v32 = vld [vmem:[#allocation9 + $0x8] sm:$0xff] }
 0x1f5   :  { %15978 = vmatprep.subr.mxu0 %v3964_v56  ;;  %15892 = vmatmul.mubr.msk.f32.gmra.mxu1 %vm145_vm0, %v18452_v23 }
 0x1f6   :  { %15924 = vmatmul.mubr.msk.f32.gmra.mxu0 %vm145_vm0, %v18579_v0  ;;  %15894 = vmatprep.mubr.msk.f32.mxu1 %vm145_vm0, %v18465_v1 }
 0x1f7   :  { %15926 = vmatprep.mubr.msk.f32.mxu0 %vm145_vm0, %v18585_v42  ;;  %15947 = vmatpush3.msra.mxu1 %v3734_v15 }
 0x1f8   :  { %15979 = vmatpush3.msra.mxu0 %v3964_v56  ;;  %15948 = vmatprep.subr.mxu1 %v3733_v34 }
 0x1f9   :  { %15980 = vmatprep.subr.mxu0 %v3963_v27  ;;  %15895 = vmatmul.mubr.msk.f32.gmra.mxu1 %vm145_vm0, %v18475_v49 }
 0x1fa   :  { %15927 = vmatmul.mubr.msk.f32.gmra.mxu0 %vm145_vm0, %v18591_v12  ;;  %15897 = vmatprep.mubr.msk.f32.mxu1 %vm145_vm0, %v18486_v4 }
 0x1fb   :  { %15929 = vmatprep.mubr.msk.f32.mxu0 %vm145_vm0, %v18597_v6  ;;  %15949 = vmatpush3.msra.mxu1 %v3733_v34 }
 0x1fc   :  { %15981 = vmatpush3.msra.mxu0 %v3963_v27  ;;  %15950 = vmatprep.subr.mxu1 %v3732_v59 }
 0x1fd   :  { %15982 = vmatprep.subr.mxu0 %v3962_v55  ;;  %15898 = vmatmul.mubr.msk.f32.gmra.mxu1 %vm145_vm0, %v3262_v47 }
 0x1fe   :  { %15930 = vmatmul.mubr.msk.f32.gmra.mxu0 %vm145_vm0, %v18677_v28  ;;  %15900 = vmatprep.mubr.msk.f32.mxu1 %vm145_vm0, %v18500_v30  ;;  %v18709_v30 = vld [vmem:[#allocation2 + $0x122] sm:$0xff] }
 0x1ff   :  { %15932 = vmatprep.mubr.msk.f32.mxu0 %vm145_vm0, %v2804_v3  ;;  %15951 = vmatpush3.msra.mxu1 %v3732_v59 }
 0x200   :  { %15983 = vmatpush3.msra.mxu0 %v3962_v55  ;;  %16008 = vmatprep.subr.mxu1 %v4195_v43 }
 0x201   :  { %15901 = vmatmul.mubr.msk.f32.gmra.mxu1 %vm145_vm0, %v18508_v57 }
 0x202   :  { %15933 = vmatmul.mubr.msk.f32.gmra.mxu0 %vm145_vm0, %v18611_v25  ;;  %15903 = vmatprep.mubr.msk.f32.mxu1 %vm145_vm0, %v18517_v53 }
 0x203   :  { %15935 = vmatprep.mubr.msk.f32.mxu0 %vm145_vm0, %v18617_v11 }
 0x205   :  { %15904 = vmatmul.mubr.msk.f32.gmra.mxu1 %vm145_vm0, %v18526_v33 }
 0x206   :  { %15936 = vmatmul.mubr.msk.f32.gmra.mxu0 %vm145_vm0, %v18623_v36  ;;  %15906 = vmatprep.mubr.msk.f32.mxu1 %vm145_vm0, %v18534_v13 }
 0x207   :  { %15938 = vmatprep.mubr.msk.f32.mxu0 %vm145_vm0, %v18629_v41 }
 0x209   :  { %15907 = vmatmul.mubr.msk.f32.gmra.mxu1 %vm145_vm0, %v18542_v38 }
 0x20a   :  { %15939 = vmatmul.mubr.msk.f32.gmra.mxu0 %vm145_vm0, %v18635_v29  ;;  %15909 = vmatprep.mubr.msk.f32.mxu1 %vm145_vm0, %v18550_v39 }
 0x20b   :  { %15941 = vmatprep.mubr.msk.f32.mxu0 %vm145_vm0, %v18641_v14 }
 0x20d   :  { %15910 = vmatmul.mubr.msk.f32.gmra.mxu1 %vm145_vm0, %v3270_v62 }
 0x20e   :  { %15942 = vmatmul.mubr.msk.f32.gmra.mxu0 %vm145_vm0, %v18709_v30  ;;  %15952 = vmatprep.mubr.msk.f32.mxu1 %vm145_vm0, %v18428_v61  ;;  %v4192_v61 = vld [vmem:[#allocation7 + $0x100] sm:$0xff] }
 0x20f   :  { %15984 = vmatprep.mubr.msk.f32.mxu0 %vm145_vm0, %v18426_v63  ;;  %v4193_v63 = vld [vmem:[#allocation7 + $0x108] sm:$0xff] }
 0x211   :  { %15953 = vmatmul.mubr.msk.f32.vlgmr.msra.gmra.mxu1 %vm145_vm0, %v18443_v21  ;;  %v3952_v21 = vld [vmem:[#allocation2 + $0x91] sm:$0xff] }
 0x212   :  { %15985 = vmatmul.mubr.msk.f32.vlgmr.msra.gmra.mxu0 %vm145_vm0, %v18441_v8  ;;  %15955 = vmatprep.mubr.msk.f32.mxu1 %vm145_vm0, %v18454_v40  ;;  %v3722_v8 = vld [vmem:[#allocation2 + $0x90] sm:$0xff] }
 0x213   :  { %15987 = vmatprep.mubr.msk.f32.mxu0 %vm145_vm0, %v18452_v23  ;;  %16009 = vmatpush3.msra.mxu1 %v4195_v43  ;;  %v3730_v23 = vld [vmem:[#allocation2 + $0x130] sm:$0xff] }
 0x214   :  { %16010 = vmatprep.subr.mxu1 %v4194_v54  ;;  %v3960_v40 = vld [vmem:[#allocation2 + $0x131] sm:$0xff] }
 0x215   :  { %15956 = vmatmul.mubr.msk.f32.gmra.mxu1 %vm145_vm0, %v18467_v10  ;;  %v4190_v10 = vld [vmem:[#allocation2 + $0x132] sm:$0xff] }
 0x216   :  { %15988 = vmatmul.mubr.msk.f32.gmra.mxu0 %vm145_vm0, %v18465_v1  ;;  %15958 = vmatprep.mubr.msk.f32.mxu1 %vm145_vm0, %v18477_v48  ;;  %v4182_v1 = vld [vmem:[#allocation2 + $0x92] sm:$0xff] }
 0x217   :  { %15990 = vmatprep.mubr.msk.f32.mxu0 %vm145_vm0, %v18475_v49  ;;  %16011 = vmatpush3.msra.mxu1 %v4194_v54  ;;  %v4571_v49 = vld [vmem:[#allocation9 + $0x38] sm:$0xff] }
 0x218   :  { %16012 = vmatprep.subr.mxu1 %v4193_v63  ;;  %16040 = vmatprep.subr.mxu0 %v4571_v49 }
 0x219   :  { %15959 = vmatmul.mubr.msk.f32.gmra.mxu1 %vm145_vm0, %v18488_v26  ;;  %16041 = vmatpush3.msra.mxu0 %v4571_v49 }
 0x21a   :  { %15991 = vmatmul.mubr.msk.f32.gmra.mxu0 %vm145_vm0, %v18486_v4  ;;  %15961 = vmatprep.mubr.msk.f32.mxu1 %vm145_vm0, %v18599_v5 }
 0x21b   :  { %15993 = vmatprep.mubr.msk.f32.mxu0 %vm145_vm0, %v3262_v47  ;;  %16013 = vmatpush3.msra.mxu1 %v4193_v63 }
 0x21c   :  { %16014 = vmatprep.subr.mxu1 %v4192_v61 }
 0x21d   :  { %15962 = vmatmul.mubr.msk.f32.gmra.mxu1 %vm145_vm0, %v3722_v8 }
 0x21e   :  { %15994 = vmatmul.mubr.msk.f32.gmra.mxu0 %vm145_vm0, %v3952_v21  ;;  %15964 = vmatprep.mubr.msk.f32.mxu1 %vm145_vm0, %v18510_v45 }
 0x21f   :  { %15996 = vmatprep.mubr.msk.f32.mxu0 %vm145_vm0, %v18508_v57  ;;  %16015 = vmatpush3.msra.mxu1 %v4192_v61 }
 0x220   :  { %16072 = vmatprep.subr.mxu1 %v4550_v9 }
 0x221   :  { %15965 = vmatmul.mubr.msk.f32.gmra.mxu1 %vm145_vm0, %v18519_v58 }
 0x222   :  { %15997 = vmatmul.mubr.msk.f32.gmra.mxu0 %vm145_vm0, %v18517_v53  ;;  %15967 = vmatprep.mubr.msk.f32.mxu1 %vm145_vm0, %v18528_v20 }
 0x223   :  { %15999 = vmatprep.mubr.msk.f32.mxu0 %vm145_vm0, %v18526_v33 }
 0x225   :  { %15968 = vmatmul.mubr.msk.f32.gmra.mxu1 %vm145_vm0, %v18536_v46 }
 0x226   :  { %16000 = vmatmul.mubr.msk.f32.gmra.mxu0 %vm145_vm0, %v18534_v13  ;;  %15970 = vmatprep.mubr.msk.f32.mxu1 %vm145_vm0, %v18544_v37 }
 0x227   :  { %16002 = vmatprep.mubr.msk.f32.mxu0 %vm145_vm0, %v18542_v38 }
 0x229   :  { %15971 = vmatmul.mubr.msk.f32.gmra.mxu1 %vm145_vm0, %v18552_v16 }
 0x22a   :  { %16003 = vmatmul.mubr.msk.f32.gmra.mxu0 %vm145_vm0, %v18550_v39  ;;  %15973 = vmatprep.mubr.msk.f32.mxu1 %vm145_vm0, %v18643_v7 }
 0x22b   :  { %16005 = vmatprep.mubr.msk.f32.mxu0 %vm145_vm0, %v3270_v62 }
 0x22d   :  { %15974 = vmatmul.mubr.msk.f32.gmra.mxu1 %vm145_vm0, %v3730_v23 }
 0x22e   :  { %16006 = vmatmul.mubr.msk.f32.gmra.mxu0 %vm145_vm0, %v3960_v40  ;;  %16016 = vmatprep.mubr.msk.f32.mxu1 %vm145_vm0, %v18567_v17 }
 0x231   :  { %16017 = vmatmul.mubr.msk.f32.vlgmr.msra.gmra.mxu1 %vm145_vm0, %v18573_v19 }
 0x232   :  { %16019 = vmatprep.mubr.msk.f32.mxu1 %vm145_vm0, %v18579_v0  ;;  %16073 = vmatpush3.msra.mxu1 %v4550_v9 }
 0x233   :  { %16074 = vmatprep.subr.mxu1 %v4549_v51 }
 0x234   :  { %16075 = vmatpush3.msra.mxu1 %v4549_v51 }
 0x235   :  { %16020 = vmatmul.mubr.msk.f32.gmra.mxu1 %vm145_vm0, %v18585_v42  ;;  %v4570_v42 = vld [vmem:[#allocation9 + $0x30] sm:$0xff]  ;;  %16076 = vmatprep.subr.mxu1 %v4548_v32 }
 0x236   :  { %16022 = vmatprep.mubr.msk.f32.mxu1 %vm145_vm0, %v18591_v12  ;;  %16042 = vmatprep.subr.mxu0 %v4570_v42 }
 0x237   :  { %16043 = vmatpush3.msra.mxu0 %v4570_v42  ;;  %16077 = vmatpush3.msra.mxu1 %v4548_v32 }
 0x238   :  { %16044 = vmatprep.subr.mxu0 %v4569_v52 }
 0x239   :  { %16023 = vmatmul.mubr.msk.f32.gmra.mxu1 %vm145_vm0, %v18597_v6  ;;  %16045 = vmatpush3.msra.mxu0 %v4569_v52 }
 0x23a   :  { %16025 = vmatprep.mubr.msk.f32.mxu1 %vm145_vm0, %v18677_v28 }
 0x23d   :  { %16026 = vmatmul.mubr.msk.f32.gmra.mxu1 %vm145_vm0, %v4182_v1 }
 0x23e   :  { %16028 = vmatprep.mubr.msk.f32.mxu1 %vm145_vm0, %v18611_v25 }
 0x241   :  { %16029 = vmatmul.mubr.msk.f32.gmra.mxu1 %vm145_vm0, %v18617_v11  ;;  %v4568_v11 = vld [vmem:[#allocation9 + $0x20] sm:$0xff] }
 0x242   :  { %16031 = vmatprep.mubr.msk.f32.mxu1 %vm145_vm0, %v18623_v36  ;;  %v4547_v36 = vld [vmem:[#allocation9] sm:$0xff]  ;;  %16046 = vmatprep.subr.mxu0 %v4568_v11 }
 0x243   :  { %16078 = vmatprep.subr.mxu1 %v4547_v36  ;;  %16047 = vmatpush3.msra.mxu0 %v4568_v11 }
 0x244   :  { %16079 = vmatpush3.msra.mxu1 %v4547_v36 }
 0x245   :  { %16032 = vmatmul.mubr.msk.f32.gmra.mxu1 %vm145_vm0, %v18629_v41 }
 0x246   :  { %16034 = vmatprep.mubr.msk.f32.mxu1 %vm145_vm0, %v18635_v29  ;;  %v4551_v29 = vld [vmem:[#allocation2 + $0x1] sm:$0xff] }
 0x247   :  { %16048 = vmatprep.mubr.msk.f32.mxu0 %vm145_vm0, %v4551_v29 }
 0x249   :  { %16035 = vmatmul.mubr.msk.f32.gmra.mxu1 %vm145_vm0, %v18641_v14  ;;  %v4531_v14 = vld [vmem:[#allocation2] sm:$0xff] }
 0x24a   :  { %16037 = vmatprep.mubr.msk.f32.mxu1 %vm145_vm0, %v18709_v30 }
 0x24d   :  { %16038 = vmatmul.mubr.msk.f32.gmra.mxu1 %vm145_vm0, %v4190_v10 }
 0x24e   :  { %16080 = vmatprep.mubr.msk.f32.mxu1 %vm145_vm0, %v4531_v14 }
 0x270   :  { %v15762_v48 = vpop.f32.mrf.mxu1 }
 0x271   :  { %v15794_v4 = vpop.f32.mrf.mxu0 }
 0x272   :  { %v18802_v26 = vadd.f32 %v15794_v4, %v15762_v48  ;;  %v18804_v57 = vpop.f32.mrf.mxu1  ;;  %v18875_v48 = vld [vmem:[#allocation9 + $0x58] sm:$0xff] }
 0x273   :  { %v18806_v45 = vpop.f32.mrf.mxu0  ;;  %22470 = vst [vmem:[#allocation25_spill] sm:$0xff] %v18875_v48  ;;  %16104 = vmatprep.subr.mxu0 %v18875_v48 }
 0x275   :  { %v15765_v44 = vpop.f32.mrf.mxu1 }
 0x276   :  { %v15797_v2 = vpop.f32.mrf.mxu0 }
 0x277   :  { %v18808_v53 = vadd.f32 %v15797_v2, %v15765_v44  ;;  %v18810_v58 = vpop.f32.mrf.mxu1 }
 0x278   :  { %v18812_v33 = vpop.f32.mrf.mxu0 }
 0x279   :  { %v15768_v20 = vpop.f32.mrf.mxu1 }
 0x27a   :  { %v15800_v13 = vpop.f32.mrf.mxu0 }
 0x27b   :  { %v18814_v46 = vadd.f32 %v15800_v13, %v15768_v20  ;;  %v18816_v38 = vpop.f32.mrf.mxu1 }
 0x27c   :  { %v18818_v37 = vpop.f32.mrf.mxu0 }
 0x27d   :  { %v15771_v39 = vpop.f32.mrf.mxu1 }
 0x27e   :  { %v15803_v16 = vpop.f32.mrf.mxu0 }
 0x27f   :  { %v18820_v60 = vadd.f32 %v15803_v16, %v15771_v39  ;;  %v18822_v31 = vpop.f32.mrf.mxu1 }
 0x280   :  { %v18824_v17 = vpop.f32.mrf.mxu0 }
 0x281   :  { %v15774_v18 = vpop.f32.mrf.mxu1 }
 0x282   :  { %v15806_v22 = vpop.f32.mrf.mxu0 }
 0x283   :  { %v18826_v19 = vadd.f32 %v15806_v22, %v15774_v18  ;;  %v18828_v0 = vpop.f32.mrf.mxu1  ;;  %v18896_v18 = vld [vmem:[#allocation9 + $0x78] sm:$0xff] }
 0x284   :  { %v18830_v35 = vpop.f32.mrf.mxu0  ;;  %22471 = vst [vmem:[#allocation22_spill] sm:$0xff] %v18896_v18  ;;  %16136 = vmatprep.subr.mxu1 %v18896_v18 }
 0x285   :  { %v15777_v12 = vpop.f32.mrf.mxu1 }
 0x286   :  { %v15809_v24 = vpop.f32.mrf.mxu0 }
 0x287   :  { %v18832_v50 = vadd.f32 %v15809_v24, %v15777_v12  ;;  %v18834_v6 = vpop.f32.mrf.mxu1 }
 0x288   :  { %v18836_v5 = vpop.f32.mrf.mxu0 }
 0x289   :  { %v15780_v3 = vpop.f32.mrf.mxu1 }
 0x28a   :  { %v15812_v25 = vpop.f32.mrf.mxu0 }
 0x28b   :  { %v2782_v41 = vadd.f32 %v15812_v25, %v15780_v3  ;;  %v18838_v7 = vpop.f32.mrf.mxu1 }
 0x28c   :  { %v18840_v15 = vpop.f32.mrf.mxu0 }
 0x28d   :  { %v15783_v56 = vpop.f32.mrf.mxu1 }
 0x28e   :  { %v15815_v34 = vpop.f32.mrf.mxu0 }
 0x28f   :  { %v2792_v27 = vadd.f32 %v15815_v34, %v15783_v56  ;;  %v18844_v59 = vpop.f32.mrf.mxu1 }
 0x290   :  { %v18846_v55 = vpop.f32.mrf.mxu0 }
 0x291   :  { %v15826_v47 = vpop.f32.mrf.mxu1 }
 0x292   :  { %v18848_v28 = vpop.f32.mrf.mxu0  ;;  %v18851_v43 = vadd.f32 %v15826_v47, %v18802_v26 }
 0x293   :  { %v18853_v62 = vpop.f32.mrf.mxu1 }
 0x294   :  { %v18855_v30 = vpop.f32.mrf.mxu0 }
 0x295   :  { %v15829_v54 = vpop.f32.mrf.mxu1 }
 0x296   :  { %v18857_v63 = vpop.f32.mrf.mxu0  ;;  %v18860_v61 = vadd.f32 %v15829_v54, %v18808_v53 }
 0x297   :  { %v18862_v8 = vpop.f32.mrf.mxu1 }
 0x298   :  { %v18864_v21 = vpop.f32.mrf.mxu0 }
 0x299   :  { %v15832_v23 = vpop.f32.mrf.mxu1 }
 0x29a   :  { %v18866_v40 = vpop.f32.mrf.mxu0  ;;  %v18869_v1 = vadd.f32 %v15832_v23, %v18814_v46 }
 0x29b   :  { %v18871_v10 = vpop.f32.mrf.mxu1 }
 0x29c   :  { %v18873_v49 = vpop.f32.mrf.mxu0 }
 0x29d   :  { %v15835_v4 = vpop.f32.mrf.mxu1 }
 0x29e   :  { %v18877_v26 = vpop.f32.mrf.mxu0  ;;  %v18881_v44 = vadd.f32 %v15835_v4, %v18820_v60 }
 0x29f   :  { %v18883_v2 = vpop.f32.mrf.mxu1 }
 0x2a0   :  { %v18885_v53 = vpop.f32.mrf.mxu0 }
 0x2a1   :  { %v15838_v20 = vpop.f32.mrf.mxu1 }
 0x2a2   :  { %v18887_v13 = vpop.f32.mrf.mxu0  ;;  %v18890_v46 = vadd.f32 %v15838_v20, %v18826_v19 }
 0x2a3   :  { %v18892_v39 = vpop.f32.mrf.mxu1 }
 0x2a4   :  { %v18894_v16 = vpop.f32.mrf.mxu0 }
 0x2a5   :  { %v15841_v60 = vpop.f32.mrf.mxu1 }
 0x2a6   :  { %v18899_v22 = vpop.f32.mrf.mxu0  ;;  %v18902_v9 = vadd.f32 %v15841_v60, %v18832_v50 }
 0x2a7   :  { %v18904_v42 = vpop.f32.mrf.mxu1 }
 0x2a8   :  { %v18906_v12 = vpop.f32.mrf.mxu0 }
 0x2a9   :  { %22472 = vst [vmem:[#allocation37_spill] sm:$0xff] %v18906_v12  ;;  %v15844_v19 = vpop.f32.mrf.mxu1 }
 0x2aa   :  { %v18908_v24 = vpop.f32.mrf.mxu0  ;;  %v18910_v51 = vadd.f32 %v15844_v19, %v2782_v41 }
 0x2ab   :  { %22473 = vst [vmem:[#allocation23_spill] sm:$0xff] %v18908_v24  ;;  %v18912_v52 = vpop.f32.mrf.mxu1 }
 0x2ac   :  { %22474 = vst [vmem:[#allocation24_spill] sm:$0xff] %v18910_v51  ;;  %v18914_v32 = vpop.f32.mrf.mxu0 }
 0x2ad   :  { %22475 = vst [vmem:[#allocation40_spill] sm:$0xff] %v18914_v32  ;;  %v15847_v3 = vpop.f32.mrf.mxu1 }
 0x2ae   :  { %v18916_v25 = vpop.f32.mrf.mxu0  ;;  %v18918_v11 = vadd.f32 %v15847_v3, %v2792_v27 }
 0x2af   :  { %22476 = vst [vmem:[#allocation38_spill] sm:$0xff] %v18916_v25  ;;  %v18920_v50 = vpop.f32.mrf.mxu1 }
 0x2b0   :  { %22477 = vst [vmem:[#allocation26_spill] sm:$0xff] %v18918_v11  ;;  %22478 = vst [vmem:[#allocation27_spill] sm:$0xff] %v18920_v50  ;;  %v18922_v36 = vpop.f32.mrf.mxu0 }
 0x2b1   :  { %22479 = vst [vmem:[#allocation20_spill] sm:$0xff] %v18922_v36  ;;  %v15890_v29 = vpop.f32.mrf.mxu1 }
 0x2b2   :  { %v18924_v14 = vpop.f32.mrf.mxu0 }
 0x2b3   :  { %v3390_v56 = vpop.f32.mrf.mxu1 }
 0x2b4   :  { %v18926_v34 = vpop.f32.mrf.mxu0 }
 0x2b5   :  { %v18928_v41 = vpop.f32.mrf.mxu1 }
 0x2b6   :  { %v18930_v47 = vpop.f32.mrf.mxu0 }
 0x2b7   :  { %v18932_v54 = vpop.f32.mrf.mxu1 }
 0x2b8   :  { %v18934_v23 = vpop.f32.mrf.mxu0 }
 0x2b9   :  { %v18936_v27 = vpop.f32.mrf.mxu1 }
 0x2ba   :  { %v18938_v4 = vpop.f32.mrf.mxu0 }
 0x2bb   :  { %22480 = vst [vmem:[#allocation29_spill] sm:$0xff] %v18938_v4  ;;  %v18940_v20 = vpop.f32.mrf.mxu1 }
 0x2bc   :  { %v18942_v60 = vpop.f32.mrf.mxu0 }
 0x2bd   :  { %22481 = vst [vmem:[#allocation42_spill] sm:$0xff] %v18942_v60  ;;  %v18944_v19 = vpop.f32.mrf.mxu1 }
 0x2be   :  { %22482 = vst [vmem:[#allocation31_spill] sm:$0xff] %v18944_v19  ;;  %v18946_v3 = vpop.f32.mrf.mxu0 }
 0x2bf   :  { %22483 = vst [vmem:[#allocation39_spill] sm:$0xff] %v18946_v3  ;;  %v18948_v18 = vpop.f32.mrf.mxu1 }
 0x2c0   :  { %22484 = vst [vmem:[#allocation41_spill] sm:$0xff] %v18948_v18  ;;  %v18950_v48 = vpop.f32.mrf.mxu0 }
 0x2c1   :  { %22485 = vst [vmem:[#allocation44_spill] sm:$0xff] %v18950_v48  ;;  %v18952_v36 = vpop.f32.mrf.mxu1 }
 0x2c2   :  { %22486 = vst [vmem:[#allocation28_spill] sm:$0xff] %v18952_v36  ;;  %v18954_v25 = vpop.f32.mrf.mxu0 }
 0x2c3   :  { %22487 = vst [vmem:[#allocation43_spill] sm:$0xff] %v18954_v25  ;;  %v18956_v11 = vpop.f32.mrf.mxu1 }
 0x2c4   :  { %22488 = vst [vmem:[#allocation46_spill] sm:$0xff] %v18956_v11  ;;  %v18958_v32 = vpop.f32.mrf.mxu0 }
 0x2c5   :  { %22489 = vst [vmem:[#allocation30_spill] sm:$0xff] %v18958_v32  ;;  %v18960_v24 = vpop.f32.mrf.mxu1 }
 0x2c6   :  { %22490 = vst [vmem:[#allocation32_spill] sm:$0xff] %v18960_v24  ;;  %v18962_v51 = vpop.f32.mrf.mxu0 }
 0x2c7   :  { %22491 = vst [vmem:[#allocation45_spill] sm:$0xff] %v18962_v51  ;;  %v18964_v60 = vpop.f32.mrf.mxu1 }
 0x2c8   :  { %22492 = vst [vmem:[#allocation47_spill] sm:$0xff] %v18964_v60  ;;  %v18966_v19 = vpop.f32.mrf.mxu0 }
 0x2c9   :  { %22493 = vst [vmem:[#allocation49_spill] sm:$0xff] %v18966_v19  ;;  %v18968_v3 = vpop.f32.mrf.mxu1 }
 0x2ca   :  { %22494 = vst [vmem:[#allocation21_spill] sm:$0xff] %v18968_v3  ;;  %v18970_v18 = vpop.f32.mrf.mxu0 }
 0x2cb   :  { %22495 = vst [vmem:[#allocation33_spill] sm:$0xff] %v18970_v18  ;;  %v18972_v48 = vpop.f32.mrf.mxu1 }
 0x2cc   :  { %22496 = vst [vmem:[#allocation35_spill] sm:$0xff] %v18972_v48  ;;  %v18974_v36 = vpop.f32.mrf.mxu0 }
 0x2cd   :  { %22497 = vst [vmem:[#allocation48_spill] sm:$0xff] %v18974_v36  ;;  %v18976_v25 = vpop.f32.mrf.mxu1 }
 0x2ce   :  { %22498 = vst [vmem:[#allocation50_spill] sm:$0xff] %v18976_v25  ;;  %v18978_v11 = vpop.f32.mrf.mxu0 }
 0x2cf   :  { %22499 = vst [vmem:[#allocation34_spill] sm:$0xff] %v18978_v11  ;;  %v18980_v32 = vpop.f32.mrf.mxu1 }
 0x2d0   :  { %22500 = vst [vmem:[#allocation36_spill] sm:$0xff] %v18980_v32  ;;  %v18982_v24 = vpop.f32.mrf.mxu0 }
 0x2d1   :  { %22501 = vst [vmem:[#allocation18_spill] sm:$0xff] %v18982_v24  ;;  %v15954_v51 = vpop.f32.mrf.mxu1  ;;  %v2717_v24 = vadd.f32 %v18806_v45, %v18804_v57 }
 0x2d2   :  { %v15986_v60 = vpop.f32.mrf.mxu0 }
 0x2d3   :  { %v3850_v4 = vpop.f32.mrf.mxu1 }
 0x2d4   :  { %v18984_v19 = vpop.f32.mrf.mxu0 }
 0x2d5   :  { %22502 = vst [vmem:[#allocation19_spill] sm:$0xff] %v18984_v19  ;;  %v15957_v3 = vpop.f32.mrf.mxu1 }
 0x2d6   :  { %v18988_v18 = vpop.f32.mrf.mxu0 }
 0x2d7   :  { %v18986_v50 = vpop.f32.mrf.mxu1  ;;  %22504 = vst [vmem:[#allocation52_spill] sm:$0xff] %v18988_v18 }
 0x2d8   :  { %22503 = vst [vmem:[#allocation51_spill] sm:$0xff] %v18986_v50  ;;  %v18994_v25 = vpop.f32.mrf.mxu0  ;;  %v3009_v50 = vadd.f32 %v18853_v62, %v2717_v24  ;;  %v2737_v62 = vadd.f32 %v18818_v37, %v18816_v38 }
 0x2d9   :  { %v18990_v48 = vpop.f32.mrf.mxu1  ;;  %22506 = vst [vmem:[#allocation54_spill] sm:$0xff] %v18994_v25  ;;  %v3240_v25 = vadd.f32 %v18848_v28, %v18851_v43 }
 0x2da   :  { %v19002_v12 = vpop.f32.mrf.mxu0  ;;  %v3239_v57 = vadd.f32 %v18855_v30, %v3009_v50  ;;  %v2757_v30 = vadd.f32 %v18830_v35, %v18828_v0 }
 0x2db   :  { %v18992_v36 = vpop.f32.mrf.mxu1  ;;  %22509 = vst [vmem:[#allocation57_spill] sm:$0xff] %v19002_v12  ;;  %v3470_v12 = vadd.f32 %v15890_v29, %v3240_v25  ;;  %v3248_v29 = vadd.f32 %v18887_v13, %v18890_v46  ;;  %v22511_v13 = vld [vmem:[#allocation27_spill] sm:$0xff] }
 0x2dc   :  { %22505 = vst [vmem:[#allocation53_spill] sm:$0xff] %v18992_v36  ;;  %v2727_v36 = vadd.f32 %v18812_v33, %v18810_v58  ;;  %v2747_v58 = vadd.f32 %v18824_v17, %v18822_v31  ;;  %v3242_v33 = vadd.f32 %v18857_v63, %v18860_v61  ;;  %v3469_v28 = vadd.f32 %v3390_v56, %v3239_v57 }
 0x2dd   :  { %v18996_v11 = vpop.f32.mrf.mxu1  ;;  %v3700_v50 = vadd.f32 %v18924_v14, %v3470_v12  ;;  %v2767_v17 = vadd.f32 %v18836_v5, %v18834_v6  ;;  %v3244_v63 = vadd.f32 %v18866_v40, %v18869_v1  ;;  %v3017_v0 = vadd.f32 %v18892_v39, %v2757_v30  ;;  %v22521_v30 = vld [vmem:[#allocation41_spill] sm:$0xff] }
 0x2de   :  { %22507 = vst [vmem:[#allocation55_spill] sm:$0xff] %v18996_v11  ;;  %v19013_v11 = vpop.f32.mrf.mxu0  ;;  %v3011_v45 = vadd.f32 %v18862_v8, %v2727_v36  ;;  %v3013_v8 = vadd.f32 %v18871_v10, %v2737_v62  ;;  %v3015_v37 = vadd.f32 %v18883_v2, %v2747_v58  ;;  %v3472_v31 = vadd.f32 %v18928_v41, %v3242_v33  ;;  %v22519_v62 = vld [vmem:[#allocation40_spill] sm:$0xff]  ;;  %v22520_v33 = vld [vmem:[#allocation42_spill] sm:$0xff] }
 0x2df   :  { %v18998_v32 = vpop.f32.mrf.mxu1  ;;  %v2777_v61 = vadd.f32 %v18840_v15, %v18838_v7  ;;  %v3930_v2 = vadd.f32 %v15954_v51, %v3700_v50  ;;  %v2787_v6 = vadd.f32 %v18846_v55, %v18844_v59  ;;  %v3019_v40 = vadd.f32 %v18904_v42, %v2767_v17  ;;  %v22524_v17 = vld [vmem:[#allocation38_spill] sm:$0xff] }
 0x2e0   :  { %22508 = vst [vmem:[#allocation56_spill] sm:$0xff] %v18998_v32  ;;  %v19027_v43 = vpop.f32.mrf.mxu0  ;;  %v3241_v38 = vadd.f32 %v18864_v21, %v3011_v45  ;;  %v3699_v21 = vadd.f32 %v18926_v34, %v3469_v28  ;;  %v3243_v5 = vadd.f32 %v18873_v49, %v3013_v8  ;;  %v3474_v1 = vadd.f32 %v18936_v27, %v3244_v63  ;;  %v22510_v34 = vld [vmem:[#allocation37_spill] sm:$0xff] }
 0x2e1   :  { %v19004_v19 = vpop.f32.mrf.mxu1  ;;  %v3246_v7 = vadd.f32 %v18877_v26, %v18881_v44  ;;  %v3245_v15 = vadd.f32 %v18885_v53, %v3015_v37  ;;  %v3702_v51 = vadd.f32 %v18930_v47, %v3472_v31  ;;  %v3247_v59 = vadd.f32 %v18894_v16, %v3017_v0  ;;  %v22512_v16 = vld [vmem:[#allocation29_spill] sm:$0xff]  ;;  %v22523_v31 = vld [vmem:[#allocation26_spill] sm:$0xff]  ;;  %v22525_v0 = vld [vmem:[#allocation52_spill] sm:$0xff] }
 0x2e2   :  { %v3471_v10 = vadd.f32 %v18932_v54, %v3241_v38  ;;  %v19049_v12 = vpop.f32.mrf.mxu0  ;;  %v3929_v36 = vadd.f32 %v3850_v4, %v3699_v21  ;;  %v3021_v55 = vadd.f32 %v18912_v52, %v2777_v61  ;;  %v3473_v49 = vadd.f32 %v18940_v20, %v3243_v5  ;;  %v22513_v52 = vld [vmem:[#allocation31_spill] sm:$0xff]  ;;  %v19081_v4 = vld [vmem:[%s22514_s10] ss:$0 sm:$0xff] }
 0x2e3   :  { %v19007_v18 = vpop.f32.mrf.mxu1  ;;  %v3250_v14 = vadd.f32 %v18899_v22, %v18902_v9  ;;  %v4160_v44 = vadd.f32 %v15986_v60, %v3930_v2  ;;  %v3932_v53 = vadd.f32 %v15957_v3, %v3702_v51  ;;  %v3249_v41 = vadd.f32 %v22510_v34, %v3019_v40  ;;  %v22515_v22 = vld [vmem:[#allocation24_spill] sm:$0xff]  ;;  %v22516_v9 = vld [vmem:[#allocation23_spill] sm:$0xff]  ;;  %v19094_v37 = vld [vmem:[%s22522_s4] ss:$0 sm:$0xff] }
 0x2e4   :  { %v3701_v26 = vadd.f32 %v18934_v23, %v3471_v10  ;;  %v19072_v56 = vpop.f32.mrf.mxu0  ;;  %v3023_v46 = vadd.f32 %v22511_v13, %v2787_v6  ;;  %v3704_v47 = vadd.f32 %v22512_v16, %v3474_v1  ;;  %v3476_v54 = vadd.f32 %v22513_v52, %v3246_v7  ;;  %v22517_v20 = vld [vmem:[#allocation19_spill] sm:$0xff]  ;;  %v22526_v6 = vld [vmem:[#allocation20_spill] sm:$0xff]  ;;  %v22532_v16 = vld [vmem:[#allocation46_spill] sm:$0xff] }
 0x2e5   :  { %v19015_v32 = vpop.f32.mrf.mxu1  ;;  %v3252_v23 = vadd.f32 %v22516_v9, %v22515_v22  ;;  %v4159_v60 = vadd.f32 %v22517_v20, %v3929_v36  ;;  %v22518_v3 = vld [vmem:[#allocation51_spill] sm:$0xff]  ;;  %v3251_v58 = vadd.f32 %v22519_v62, %v3021_v55  ;;  %v3703_v28 = vadd.f32 %v22520_v33, %v3473_v49  ;;  %v22528_v1 = vld [vmem:[#allocation28_spill] sm:$0xff]  ;;  %v22530_v55 = vld [vmem:[#allocation54_spill] sm:$0xff] }
 0x2e6   :  { %v3931_v57 = vadd.f32 %v22518_v3, %v3701_v26  ;;  %v3475_v8 = vadd.f32 %v22521_v30, %v3245_v15  ;;  %v3934_v38 = vadd.f32 %v18990_v48, %v3704_v47  ;;  %v19098_v63 = vadd.f32 %v22524_v17, %v22523_v31  ;;  %v19101_v21 = vpop.f32.mrf.mxu0  ;;  %v22527_v48 = vld [vmem:[#allocation39_spill] sm:$0xff]  ;;  %v22529_v15 = vld [vmem:[#allocation53_spill] sm:$0xff]  ;;  %v22531_v34 = vld [vmem:[#allocation44_spill] sm:$0xff] }
 0x2e7   :  { %v19021_v24 = vpop.f32.mrf.mxu1  ;;  %v4162_v61 = vadd.f32 %v22525_v0, %v3932_v53  ;;  %v19105_v5 = vadd.f32 %v22526_v6, %v3023_v46  ;;  %v3706_v40 = vadd.f32 %v22527_v48, %v3476_v54  ;;  %v3478_v7 = vadd.f32 %v22528_v1, %v3248_v29  ;;  %v22533_v46 = vld [vmem:[#allocation57_spill] sm:$0xff]  ;;  %v22536_v62 = vld [vmem:[#allocation32_spill] sm:$0xff]  ;;  %v22538_v0 = vld [vmem:[#allocation30_spill] sm:$0xff] }
 0x2e8   :  { %v3933_v51 = vadd.f32 %v22529_v15, %v3703_v28  ;;  %v4161_v49 = vadd.f32 %v22530_v55, %v3931_v57  ;;  %v3705_v13 = vadd.f32 %v22531_v34, %v3475_v8  ;;  %v3477_v47 = vadd.f32 %v22532_v16, %v3247_v59  ;;  %v16001_v29 = vpop.f32.mrf.mxu0  ;;  %v22535_v57 = vld [vmem:[#allocation43_spill] sm:$0xff]  ;;  %v22537_v30 = vld [vmem:[#allocation56_spill] sm:$0xff]  ;;  %v22541_v55 = vld [vmem:[#allocation21_spill] sm:$0xff] }
 0x2e9   :  { %v19032_v25 = vpop.f32.mrf.mxu1  ;;  %v4164_v52 = vadd.f32 %v22533_v46, %v3934_v38  ;;  %v3480_v33 = vadd.f32 %v22536_v62, %v3250_v14 }
 0x2ea   :  { %v4163_v28 = vadd.f32 %v19013_v11, %v3933_v51  ;;  %v3935_v59 = vadd.f32 %v22537_v30, %v3705_v13  ;;  %v4130_v48 = vpop.f32.mrf.mxu0  ;;  %v22540_v51 = vld [vmem:[#allocation45_spill] sm:$0xff] }
 0x2eb   :  { %v19043_v35 = vpop.f32.mrf.mxu1  ;;  %v22542_v13 = vld [vmem:[#allocation49_spill] sm:$0xff] }
 0x2ed   :  { %v19056_v39 = vpop.f32.mrf.mxu1 }
 0x2ef   :  { %v19067_v42 = vpop.f32.mrf.mxu1 }
 0x2f1   :  { %v16018_v27 = vpop.f32.mrf.mxu1 }
 0x2f2   :  { %v4390_v45 = vadd.f32 %v16018_v27, %v4160_v44  ;;  %v22534_v27 = vld [vmem:[#allocation55_spill] sm:$0xff] }
 0x2f3   :  { %v4310_v50 = vpop.f32.mrf.mxu1  ;;  %v3936_v54 = vadd.f32 %v22534_v27, %v3706_v40  ;;  %v16004_v27 = vpop.f32.mrf.mxu0 }
 0x2f4   :  { %v4413_v10 = vmul.f32 %v19081_v4, %v4390_v45  ;;  %v4389_v2 = vadd.f32 %v4310_v50, %v4159_v60  ;;  %v3708_v45 = vadd.f32 %v22535_v57, %v3478_v7 }
 0x2f5   :  { %v16021_v36 = vpop.f32.mrf.mxu1  ;;  %v4166_v6 = vadd.f32 %v19027_v43, %v3936_v54 }
 0x2f6   :  { %v4436_v26 = vadd.f32 %v19094_v37, %v4413_v10  ;;  %v4412_v44 = vmul.f32 %v19081_v4, %v4389_v2  ;;  %v4392_v53 = vadd.f32 %v16021_v36, %v4162_v61  ;;  %v3707_v61 = vadd.f32 %v22538_v0, %v3477_v47  ;;  %v22539_v10 = vld [vmem:[#allocation47_spill] sm:$0xff] }
 0x2f7   :  { %v4320_v22 = vpop.f32.mrf.mxu1  ;;  %v3479_v2 = vadd.f32 %v22539_v10, %v3249_v41  ;;  %v3938_v14 = vadd.f32 %v19004_v19, %v3708_v45  ;;  %v3710_v36 = vadd.f32 %v22540_v51, %v3480_v33  ;;  %v4165_v41 = vadd.f32 %v19049_v12, %v3935_v59  ;;  %v22543_v47 = vld [vmem:[#allocation35_spill] sm:$0xff]  ;;  %v22546_v59 = vld [vmem:[#allocation48_spill] sm:$0xff] }
 0x2f8   :  { %v4452_v9 = vmax.f32 %v4436_v26, 0.0  ;;  %v4435_v20 = vadd.f32 %v19094_v37, %v4412_v44  ;;  %v4415_v60 = vmul.f32 %v19081_v4, %v4392_v53  ;;  %v4391_v3 = vadd.f32 %v4320_v22, %v4161_v49 }
 0x2f9   :  { %v16024_v8 = vpop.f32.mrf.mxu1  ;;  %v3482_v49 = vadd.f32 %v22541_v55, %v3252_v23  ;;  %v3937_v43 = vadd.f32 %v19007_v18, %v3707_v61  ;;  %v3709_v16 = vadd.f32 %v22542_v13, %v3479_v2  ;;  %v3481_v46 = vadd.f32 %v22543_v47, %v3251_v58 }
 0x2fa   :  { %4468 = vst.msk [vmem:[#allocation4 + $0x8] sm:$0xff] %vm145_vm0, %v4452_v9  ;;  %v4451_v38 = vmax.f32 %v4435_v20, 0.0  ;;  %v4438_v50 = vadd.f32 %v19094_v37, %v4415_v60  ;;  %v4414_v31 = vmul.f32 %v19081_v4, %v4391_v3  ;;  %v4394_v17 = vadd.f32 %v16024_v8, %v4164_v52  ;;  %v22544_v20 = vld [vmem:[#allocation33_spill] sm:$0xff]  ;;  %v22545_v3 = vld [vmem:[#allocation50_spill] sm:$0xff] }
 0x2fb   :  { %v4330_v11 = vpop.f32.mrf.mxu1  ;;  %v4168_v52 = vadd.f32 %v19072_v56, %v3938_v14  ;;  %v3940_v23 = vadd.f32 %v19015_v32, %v3710_v36  ;;  %v3712_v60 = vadd.f32 %v22544_v20, %v3482_v49  ;;  %v3484_v57 = vadd.f32 %v22545_v3, %v19098_v63  ;;  %v22547_v63 = vld [vmem:[#allocation36_spill] sm:$0xff]  ;;  %v22549_v36 = vld [vmem:[#allocation18_spill] sm:$0xff] }
 0x2fc   :  { %4467 = vst.msk [vmem:[#allocation4] sm:$0xff] %vm145_vm0, %v4451_v38  ;;  %v4454_v40 = vmax.f32 %v4438_v50, 0.0  ;;  %v4437_v1 = vadd.f32 %v19094_v37, %v4414_v31  ;;  %v4417_v7 = vmul.f32 %v19081_v4, %v4394_v17  ;;  %v4393_v15 = vadd.f32 %v4330_v11, %v4163_v28  ;;  %v4140_v17 = vpop.f32.mrf.mxu0 }
 0x2fd   :  { %v16027_v26 = vpop.f32.mrf.mxu1  ;;  %v4167_v58 = vadd.f32 %v19101_v21, %v3937_v43  ;;  %v3939_v56 = vadd.f32 %v19021_v24, %v3709_v16  ;;  %v3711_v8 = vadd.f32 %v22546_v59, %v3481_v46  ;;  %v3483_v38 = vadd.f32 %v22547_v63, %v19105_v5  ;;  %v4976_v63 = vld [vmem:[#allocation9 + $0x48] sm:$0xff] }
 0x2fe   :  { %4470 = vst.msk [vmem:[#allocation4 + $0x18] sm:$0xff] %vm145_vm0, %v4454_v40  ;;  %v4453_v19 = vmax.f32 %v4437_v1, 0.0  ;;  %v4440_v44 = vadd.f32 %v19094_v37, %v4417_v7  ;;  %v4416_v53 = vmul.f32 %v19081_v4, %v4393_v15  ;;  %v4396_v34 = vadd.f32 %v16027_v26, %v4166_v6  ;;  %v22548_v6 = vld [vmem:[#allocation34_spill] sm:$0xff]  ;;  %v16007_v40 = vpop.f32.mrf.mxu0 }
 0x2ff   :  { %v4340_v12 = vpop.f32.mrf.mxu1  ;;  %v4170_v21 = vadd.f32 %v16001_v29, %v3940_v23  ;;  %v3942_v24 = vadd.f32 %v19032_v25, %v3712_v60  ;;  %v3714_v14 = vadd.f32 %v22548_v6, %v3484_v57  ;;  %v4169_v11 = vadd.f32 %v4130_v48, %v3939_v56  ;;  %v5207_v56 = vld [vmem:[#allocation9 + $0x70] sm:$0xff] }
 0x300   :  { %4469 = vst.msk [vmem:[#allocation4 + $0x10] sm:$0xff] %vm145_vm0, %v4453_v19  ;;  %v4456_v18 = vmax.f32 %v4440_v44, 0.0  ;;  %v4439_v54 = vadd.f32 %v19094_v37, %v4416_v53  ;;  %v4419_v22 = vmul.f32 %v19081_v4, %v4396_v34  ;;  %v4395_v9 = vadd.f32 %v4340_v12, %v4165_v41  ;;  %v4150_v47 = vpop.f32.mrf.mxu0  ;;  %v4977_v12 = vld [vmem:[#allocation9 + $0x50] sm:$0xff] }
 0x301   :  { %v4500_v32 = vld [vmem:[#allocation4 + $0x8] sm:$0xff]  ;;  %v16030_v45 = vpop.f32.mrf.mxu1  ;;  %v3941_v5 = vadd.f32 %v19043_v35, %v3711_v8  ;;  %v3713_v55 = vadd.f32 %v22549_v36, %v3483_v38  ;;  %v4172_v49 = vadd.f32 %v16004_v27, %v3942_v24  ;;  %v3944_v48 = vadd.f32 %v19056_v39, %v3714_v14  ;;  %v22550_v8 = vld [vmem:[#allocation25_spill] sm:$0xff] }
 0x302   :  { %4516 = vst.msk [vmem:[#allocation2 + $0x21] sm:$0xff] %vm145_vm0, %v4500_v32  ;;  %4472 = vst.msk [vmem:[#allocation4 + $0x28] sm:$0xff] %vm145_vm0, %v4456_v18  ;;  %v4455_v62 = vmax.f32 %v4439_v54, 0.0  ;;  %v4442_v33 = vadd.f32 %v19094_v37, %v4419_v22  ;;  %v4418_v28 = vmul.f32 %v19081_v4, %v4395_v9  ;;  %v4398_v30 = vadd.f32 %v16030_v45, %v4168_v52  ;;  %v22551_v38 = vld [vmem:[#allocation22_spill] sm:$0xff]  ;;  %v5206_v14 = vld [vmem:[#allocation9 + $0x68] sm:$0xff] }
 0x303   :  { %v4499_v50 = vld [vmem:[#allocation4] sm:$0xff]  ;;  %v4350_v31 = vpop.f32.mrf.mxu1  ;;  %v4171_v53 = vadd.f32 %v4140_v17, %v3941_v5  ;;  %v3943_v34 = vadd.f32 %v19067_v42, %v3713_v55  ;;  %v4174_v27 = vadd.f32 %v16007_v40, %v3944_v48 }
 0x304   :  { %4515 = vst.msk [vmem:[#allocation2 + $0x11] sm:$0xff] %vm145_vm0, %v4499_v50  ;;  %4471 = vst.msk [vmem:[#allocation4 + $0x20] sm:$0xff] %vm145_vm0, %v4455_v62  ;;  %v4458_v0 = vmax.f32 %v4442_v33, 0.0  ;;  %v4441_v61 = vadd.f32 %v19094_v37, %v4418_v28  ;;  %v4421_v10 = vmul.f32 %v19081_v4, %v4398_v30  ;;  %v4397_v2 = vadd.f32 %v4350_v31, %v4167_v58  ;;  %v4975_v40 = vld [vmem:[#allocation9 + $0x40] sm:$0xff] }
 0x305   :  { %v4502_v29 = vld [vmem:[#allocation4 + $0x18] sm:$0xff]  ;;  %v16033_v25 = vpop.f32.mrf.mxu1  ;;  %v4173_v32 = vadd.f32 %v4150_v47, %v3943_v34 }
 0x306   :  { %4518 = vst.msk [vmem:[#allocation2 + $0x41] sm:$0xff] %vm145_vm0, %v4502_v29  ;;  %4474 = vst.msk [vmem:[#allocation4 + $0x38] sm:$0xff] %vm145_vm0, %v4458_v0  ;;  %v4457_v1 = vmax.f32 %v4441_v61, 0.0  ;;  %v4444_v7 = vadd.f32 %v19094_v37, %v4421_v10  ;;  %v4420_v15 = vmul.f32 %v19081_v4, %v4397_v2  ;;  %v4400_v51 = vadd.f32 %v16033_v25, %v4170_v21 }
 0x307   :  { %v4501_v41 = vld [vmem:[#allocation4 + $0x10] sm:$0xff]  ;;  %v4360_v35 = vpop.f32.mrf.mxu1 }
 0x308   :  { %4517 = vst.msk [vmem:[#allocation2 + $0x31] sm:$0xff] %vm145_vm0, %v4501_v41  ;;  %4473 = vst.msk [vmem:[#allocation4 + $0x30] sm:$0xff] %vm145_vm0, %v4457_v1  ;;  %v4460_v43 = vmax.f32 %v4444_v7, 0.0  ;;  %v4443_v26 = vadd.f32 %v19094_v37, %v4420_v15  ;;  %v4423_v19 = vmul.f32 %v19081_v4, %v4400_v51  ;;  %v4399_v44 = vadd.f32 %v4360_v35, %v4169_v11  ;;  %v4559_v41 = vld [vmem:[#allocation2 + $0xa1] sm:$0xff] }
 0x309   :  { %v4504_v13 = vld [vmem:[#allocation4 + $0x28] sm:$0xff]  ;;  %v16036_v16 = vpop.f32.mrf.mxu1  ;;  %v19195_v58 = vld [vmem:[#allocation2 + $0x20] sm:$0xff] }
 0x30a   :  { %4520 = vst.msk [vmem:[#allocation2 + $0x61] sm:$0xff] %vm145_vm0, %v4504_v13  ;;  %4476 = vst.msk [vmem:[#allocation4 + $0x48] sm:$0xff] %vm145_vm0, %v4460_v43  ;;  %v4459_v39 = vmax.f32 %v4443_v26, 0.0  ;;  %v4446_v46 = vadd.f32 %v19094_v37, %v4423_v19  ;;  %v4422_v52 = vmul.f32 %v19081_v4, %v4399_v44  ;;  %v4402_v23 = vadd.f32 %v16036_v16, %v4172_v49  ;;  %v19193_v57 = vld [vmem:[#allocation2 + $0x21] sm:$0xff] }
 0x30b   :  { %v4503_v18 = vld [vmem:[#allocation4 + $0x20] sm:$0xff]  ;;  %v4370_v54 = vpop.f32.mrf.mxu1  ;;  %v19181_v22 = vld [vmem:[#allocation2 + $0x11] sm:$0xff] }
 0x30c   :  { %v19183_v42 = vld [vmem:[#allocation2 + $0x10] sm:$0xff]  ;;  %4519 = vst.msk [vmem:[#allocation2 + $0x51] sm:$0xff] %vm145_vm0, %v4503_v18  ;;  %4475 = vst.msk [vmem:[#allocation4 + $0x40] sm:$0xff] %vm145_vm0, %v4459_v39  ;;  %v4462_v9 = vmax.f32 %v4446_v46, 0.0  ;;  %v4445_v20 = vadd.f32 %v19094_v37, %v4422_v52  ;;  %v4425_v60 = vmul.f32 %v19081_v4, %v4402_v23  ;;  %v4401_v3 = vadd.f32 %v4370_v54, %v4171_v53  ;;  %v5205_v49 = vld [vmem:[#allocation9 + $0x60] sm:$0xff] }
 0x30d   :  { %16049 = vmatmul.mubr.msk.f32.vlgmr.msra.gmra.mxu0 %vm145_vm0, %v19181_v22  ;;  %16081 = vmatmul.mubr.msk.f32.vlgmr.msra.gmra.mxu1 %vm145_vm0, %v19183_v42  ;;  %v4506_v45 = vld [vmem:[#allocation4 + $0x38] sm:$0xff]  ;;  %v16039_v62 = vpop.f32.mrf.mxu1  ;;  %v19219_v2 = vld [vmem:[#allocation2 + $0x41] sm:$0xff] }
 0x30e   :  { %16051 = vmatprep.mubr.msk.f32.mxu0 %vm145_vm0, %v19193_v57  ;;  %16083 = vmatprep.mubr.msk.f32.mxu1 %vm145_vm0, %v19195_v58  ;;  %4522 = vst.msk [vmem:[#allocation2 + $0x81] sm:$0xff] %vm145_vm0, %v4506_v45  ;;  %4478 = vst.msk [vmem:[#allocation4 + $0x58] sm:$0xff] %vm145_vm0, %v4462_v9  ;;  %v4461_v33 = vmax.f32 %v4445_v20, 0.0  ;;  %v4448_v28 = vadd.f32 %v19094_v37, %v4425_v60  ;;  %v4424_v30 = vmul.f32 %v19081_v4, %v4401_v3  ;;  %v19221_v6 = vld [vmem:[#allocation2 + $0x40] sm:$0xff] }
 0x30f   :  { %v4404_v59 = vadd.f32 %v16039_v62, %v4174_v27  ;;  %16105 = vmatpush3.msra.mxu0 %v22550_v8  ;;  %16137 = vmatpush3.msra.mxu1 %v22551_v38  ;;  %v4505_v21 = vld [vmem:[#allocation4 + $0x30] sm:$0xff]  ;;  %v4380_v24 = vpop.f32.mrf.mxu1  ;;  %v4539_v35 = vld [vmem:[#allocation2 + $0xa0] sm:$0xff] }
 0x310   :  { %v19207_v50 = vld [vmem:[#allocation2 + $0x31] sm:$0xff]  ;;  %16106 = vmatprep.subr.mxu0 %v4977_v12  ;;  %16138 = vmatprep.subr.mxu1 %v5207_v56  ;;  %4521 = vst.msk [vmem:[#allocation2 + $0x71] sm:$0xff] %vm145_vm0, %v4505_v21  ;;  %4477 = vst.msk [vmem:[#allocation4 + $0x50] sm:$0xff] %vm145_vm0, %v4461_v33  ;;  %v4464_v17 = vmax.f32 %v4448_v28, 0.0  ;;  %v4447_v0 = vadd.f32 %v19094_v37, %v4424_v30  ;;  %v4403_v10 = vadd.f32 %v4380_v24, %v4173_v32  ;;  %v5438_v44 = vld [vmem:[#allocation9 + $0x98] sm:$0xff] }
 0x311   :  { %v19209_v31 = vld [vmem:[#allocation2 + $0x30] sm:$0xff]  ;;  %v4427_v61 = vmul.f32 %v19081_v4, %v4404_v59  ;;  %16052 = vmatmul.mubr.msk.f32.gmra.mxu0 %vm145_vm0, %v19207_v50  ;;  %v4508_v11 = vld [vmem:[#allocation4 + $0x48] sm:$0xff]  ;;  %16139 = vmatpush3.msra.mxu1 %v5207_v56  ;;  %v19244_v55 = vld [vmem:[#allocation2 + $0x60] sm:$0xff] }
 0x312   :  { %16084 = vmatmul.mubr.msk.f32.gmra.mxu1 %vm145_vm0, %v19209_v31  ;;  %16054 = vmatprep.mubr.msk.f32.mxu0 %vm145_vm0, %v19219_v2  ;;  %4524 = vst.msk [vmem:[#allocation2 + $0xc1] sm:$0xff] %vm145_vm0, %v4508_v11  ;;  %4480 = vst.msk [vmem:[#allocation4 + $0x68] sm:$0xff] %vm145_vm0, %v4464_v17  ;;  %v4463_v5 = vmax.f32 %v4447_v0, 0.0  ;;  %v4426_v25 = vmul.f32 %v19081_v4, %v4403_v10  ;;  %v19242_v4 = vld [vmem:[#allocation2 + $0x61] sm:$0xff]  ;;  %v19327_v62 = vld [vmem:[#allocation2 + $0x12] sm:$0xff] }
 0x313   :  { %16086 = vmatprep.mubr.msk.f32.mxu1 %vm145_vm0, %v19221_v6  ;;  %v4450_v29 = vadd.f32 %v19094_v37, %v4427_v61  ;;  %16107 = vmatpush3.msra.mxu0 %v4977_v12  ;;  %v4507_v1 = vld [vmem:[#allocation4 + $0x40] sm:$0xff]  ;;  %v19231_v7 = vld [vmem:[#allocation2 + $0x51] sm:$0xff] }
 0x314   :  { %v19233_v15 = vld [vmem:[#allocation2 + $0x50] sm:$0xff]  ;;  %16108 = vmatprep.subr.mxu0 %v4976_v63  ;;  %16140 = vmatprep.subr.mxu1 %v5206_v14  ;;  %4523 = vst.msk [vmem:[#allocation2 + $0xb1] sm:$0xff] %vm145_vm0, %v4507_v1  ;;  %4479 = vst.msk [vmem:[#allocation4 + $0x60] sm:$0xff] %vm145_vm0, %v4463_v5  ;;  %v4449_v36 = vadd.f32 %v19094_v37, %v4426_v25  ;;  %v5668_v53 = vld [vmem:[#allocation9 + $0xb8] sm:$0xff] }
 0x315   :  { %v4466_v51 = vmax.f32 %v4450_v29, 0.0  ;;  %16055 = vmatmul.mubr.msk.f32.gmra.mxu0 %vm145_vm0, %v19231_v7  ;;  %v4510_v48 = vld [vmem:[#allocation4 + $0x58] sm:$0xff]  ;;  %16141 = vmatpush3.msra.mxu1 %v5206_v14  ;;  %v4958_v56 = vld [vmem:[#allocation2 + $0x2] sm:$0xff]  ;;  %v5436_v8 = vld [vmem:[#allocation9 + $0x88] sm:$0xff] }
 0x316   :  { %16087 = vmatmul.mubr.msk.f32.gmra.mxu1 %vm145_vm0, %v19233_v15  ;;  %16057 = vmatprep.mubr.msk.f32.mxu0 %vm145_vm0, %v19242_v4  ;;  %4526 = vst.msk [vmem:[#allocation2 + $0xe1] sm:$0xff] %vm145_vm0, %v4510_v48  ;;  %v4465_v37 = vmax.f32 %v4449_v36, 0.0  ;;  %v19333_v33 = vld [vmem:[#allocation2 + $0x22] sm:$0xff]  ;;  %v5437_v28 = vld [vmem:[#allocation9 + $0x90] sm:$0xff]  ;;  %v5898_v14 = vld [vmem:[#allocation9 + $0xd8] sm:$0xff] }
 0x317   :  { %16089 = vmatprep.mubr.msk.f32.mxu1 %vm145_vm0, %v19244_v55  ;;  %4482 = vst.msk [vmem:[#allocation4 + $0x78] sm:$0xff] %vm145_vm0, %v4466_v51  ;;  %16109 = vmatpush3.msra.mxu0 %v4976_v63  ;;  %v4509_v43 = vld [vmem:[#allocation4 + $0x50] sm:$0xff]  ;;  %v19345_v59 = vld [vmem:[#allocation2 + $0x42] sm:$0xff]  ;;  %v6128_v11 = vld [vmem:[#allocation9 + $0xf8] sm:$0xff] }
 0x318   :  { %v19252_v26 = vld [vmem:[#allocation2 + $0x71] sm:$0xff]  ;;  %16110 = vmatprep.subr.mxu0 %v4975_v40  ;;  %16142 = vmatprep.subr.mxu1 %v5205_v49  ;;  %4525 = vst.msk [vmem:[#allocation2 + $0xd1] sm:$0xff] %vm145_vm0, %v4509_v43  ;;  %4481 = vst.msk [vmem:[#allocation4 + $0x70] sm:$0xff] %vm145_vm0, %v4465_v37  ;;  %v19357_v21 = vld [vmem:[#allocation2 + $0x62] sm:$0xff] }
 0x319   :  { %v19254_v19 = vld [vmem:[#allocation2 + $0x70] sm:$0xff]  ;;  %16058 = vmatmul.mubr.msk.f32.gmra.mxu0 %vm145_vm0, %v19252_v26  ;;  %v4512_v34 = vld [vmem:[#allocation4 + $0x68] sm:$0xff]  ;;  %16143 = vmatpush3.msra.mxu1 %v5205_v49  ;;  %v19276_v46 = vld [vmem:[#allocation2 + $0xc0] sm:$0xff] }
 0x31a   :  { %16090 = vmatmul.mubr.msk.f32.gmra.mxu1 %vm145_vm0, %v19254_v19  ;;  %16060 = vmatprep.mubr.msk.f32.mxu0 %vm145_vm0, %v4559_v41  ;;  %4528 = vst.msk [vmem:[#allocation2 + $0x101] sm:$0xff] %vm145_vm0, %v4512_v34  ;;  %v19274_v39 = vld [vmem:[#allocation2 + $0xc1] sm:$0xff]  ;;  %v5667_v30 = vld [vmem:[#allocation9 + $0xb0] sm:$0xff]  ;;  %v5666_v63 = vld [vmem:[#allocation9 + $0xa8] sm:$0xff] }
 0x31b   :  { %16092 = vmatprep.mubr.msk.f32.mxu1 %vm145_vm0, %v4539_v35  ;;  %16111 = vmatpush3.msra.mxu0 %v4975_v40  ;;  %v4511_v13 = vld [vmem:[#allocation4 + $0x60] sm:$0xff]  ;;  %v19265_v16 = vld [vmem:[#allocation2 + $0xb1] sm:$0xff] }
 0x31c   :  { %v19267_v47 = vld [vmem:[#allocation2 + $0xb0] sm:$0xff]  ;;  %16168 = vmatprep.subr.mxu0 %v5438_v44  ;;  %16200 = vmatprep.subr.mxu1 %v5668_v53  ;;  %4527 = vst.msk [vmem:[#allocation2 + $0xf1] sm:$0xff] %vm145_vm0, %v4511_v13  ;;  %v5435_v24 = vld [vmem:[#allocation9 + $0x80] sm:$0xff]  ;;  %v6358_v34 = vld [vmem:[#allocation9 + $0x118] sm:$0xff] }
 0x31d   :  { %16061 = vmatmul.mubr.msk.f32.gmra.mxu0 %vm145_vm0, %v19265_v16  ;;  %v19292_v18 = vld [vmem:[#allocation2 + $0xe1] sm:$0xff]  ;;  %v19351_v38 = vld [vmem:[#allocation2 + $0x52] sm:$0xff]  ;;  %v6126_v41 = vld [vmem:[#allocation9 + $0xe8] sm:$0xff] }
 0x31e   :  { %16093 = vmatmul.mubr.msk.f32.gmra.mxu1 %vm145_vm0, %v19267_v47  ;;  %v4514_v52 = vld [vmem:[#allocation4 + $0x78] sm:$0xff]  ;;  %16063 = vmatprep.mubr.msk.f32.mxu0 %vm145_vm0, %v19274_v39  ;;  %v19294_v54 = vld [vmem:[#allocation2 + $0xe0] sm:$0xff] }
 0x31f   :  { %16095 = vmatprep.mubr.msk.f32.mxu1 %vm145_vm0, %v19276_v46  ;;  %4530 = vst.msk [vmem:[#allocation2 + $0x121] sm:$0xff] %vm145_vm0, %v4514_v52  ;;  %v4513_v23 = vld [vmem:[#allocation4 + $0x70] sm:$0xff]  ;;  %v5665_v17 = vld [vmem:[#allocation9 + $0xa0] sm:$0xff] }
 0x320   :  { %v19283_v12 = vld [vmem:[#allocation2 + $0xd1] sm:$0xff]  ;;  %4529 = vst.msk [vmem:[#allocation2 + $0x111] sm:$0xff] %vm145_vm0, %v4513_v23  ;;  %v4966_v0 = vld [vmem:[#allocation2 + $0xa2] sm:$0xff] }
 0x321   :  { %v19285_v27 = vld [vmem:[#allocation2 + $0xd0] sm:$0xff]  ;;  %16064 = vmatmul.mubr.msk.f32.gmra.mxu0 %vm145_vm0, %v19283_v12  ;;  %v19308_v60 = vld [vmem:[#allocation2 + $0x101] sm:$0xff] }
 0x322   :  { %16096 = vmatmul.mubr.msk.f32.gmra.mxu1 %vm145_vm0, %v19285_v27  ;;  %16066 = vmatprep.mubr.msk.f32.mxu0 %vm145_vm0, %v19292_v18  ;;  %v19310_v3 = vld [vmem:[#allocation2 + $0x100] sm:$0xff]  ;;  %v19363_v61 = vld [vmem:[#allocation2 + $0x72] sm:$0xff] }
 0x323   :  { %16098 = vmatprep.mubr.msk.f32.mxu1 %vm145_vm0, %v19294_v54  ;;  %v19300_v9 = vld [vmem:[#allocation2 + $0xf1] sm:$0xff]  ;;  %v19365_v10 = vld [vmem:[#allocation2 + $0x80] sm:$0xff] }
 0x324   :  { %v19302_v20 = vld [vmem:[#allocation2 + $0xf0] sm:$0xff]  ;;  %v19377_v29 = vld [vmem:[#allocation2 + $0xc2] sm:$0xff] }
 0x325   :  { %16067 = vmatmul.mubr.msk.f32.gmra.mxu0 %vm145_vm0, %v19300_v9  ;;  %v4967_v5 = vld [vmem:[#allocation2 + $0xb2] sm:$0xff]  ;;  %v19389_v40 = vld [vmem:[#allocation2 + $0xe2] sm:$0xff] }
 0x326   :  { %16099 = vmatmul.mubr.msk.f32.gmra.mxu1 %vm145_vm0, %v19302_v20  ;;  %16069 = vmatprep.mubr.msk.f32.mxu0 %vm145_vm0, %v19308_v60  ;;  %v19383_v25 = vld [vmem:[#allocation2 + $0xd2] sm:$0xff]  ;;  %v19401_v51 = vld [vmem:[#allocation2 + $0x102] sm:$0xff] }
 0x327   :  { %16101 = vmatprep.mubr.msk.f32.mxu1 %vm145_vm0, %v19310_v3  ;;  %v19316_v32 = vld [vmem:[#allocation2 + $0x111] sm:$0xff]  ;;  %v19409_v49 = vld [vmem:[#allocation2 + $0x120] sm:$0xff] }
 0x328   :  { %v19318_v45 = vld [vmem:[#allocation2 + $0x110] sm:$0xff]  ;;  %v5895_v35 = vld [vmem:[#allocation9 + $0xc0] sm:$0xff] }
 0x329   :  { %16070 = vmatmul.mubr.msk.f32.gmra.mxu0 %vm145_vm0, %v19316_v32  ;;  %v19395_v1 = vld [vmem:[#allocation2 + $0xf2] sm:$0xff]  ;;  %v6125_v43 = vld [vmem:[#allocation9 + $0xe0] sm:$0xff] }
 0x32a   :  { %16102 = vmatmul.mubr.msk.f32.gmra.mxu1 %vm145_vm0, %v19318_v45  ;;  %16112 = vmatprep.mubr.msk.f32.mxu0 %vm145_vm0, %v4958_v56  ;;  %v19407_v36 = vld [vmem:[#allocation2 + $0x112] sm:$0xff]  ;;  %v5433_v13 = vld [vmem:[#allocation2 + $0x121] sm:$0xff] }
 0x32b   :  { %16144 = vmatprep.mubr.msk.f32.mxu1 %vm145_vm0, %v19183_v42  ;;  %v19339_v42 = vld [vmem:[#allocation2 + $0x32] sm:$0xff] }
 0x32c   :  { %v5897_v48 = vld [vmem:[#allocation9 + $0xd0] sm:$0xff] }
 0x32d   :  { %16113 = vmatmul.mubr.msk.f32.vlgmr.msra.gmra.mxu0 %vm145_vm0, %v19327_v62  ;;  %v6127_v37 = vld [vmem:[#allocation9 + $0xf0] sm:$0xff] }
 0x32e   :  { %16145 = vmatmul.mubr.msk.f32.vlgmr.msra.gmra.mxu1 %vm145_vm0, %v19195_v58  ;;  %16115 = vmatprep.mubr.msk.f32.mxu0 %vm145_vm0, %v19333_v33 }
 0x32f   :  { %16147 = vmatprep.mubr.msk.f32.mxu1 %vm145_vm0, %v19209_v31  ;;  %16169 = vmatpush3.msra.mxu0 %v5438_v44  ;;  %v5425_v44 = vld [vmem:[#allocation2 + $0x81] sm:$0xff] }
 0x330   :  { %16201 = vmatpush3.msra.mxu1 %v5668_v53  ;;  %16170 = vmatprep.subr.mxu0 %v5437_v28  ;;  %v19443_v53 = vld [vmem:[#allocation2 + $0x82] sm:$0xff] }
 0x331   :  { %16202 = vmatprep.subr.mxu1 %v5667_v30  ;;  %16116 = vmatmul.mubr.msk.f32.gmra.mxu0 %vm145_vm0, %v19339_v42 }
 0x332   :  { %16148 = vmatmul.mubr.msk.f32.gmra.mxu1 %vm145_vm0, %v19221_v6  ;;  %16118 = vmatprep.mubr.msk.f32.mxu0 %vm145_vm0, %v19345_v59 }
 0x333   :  { %16150 = vmatprep.mubr.msk.f32.mxu1 %vm145_vm0, %v19233_v15  ;;  %16171 = vmatpush3.msra.mxu0 %v5437_v28 }
 0x334   :  { %16203 = vmatpush3.msra.mxu1 %v5667_v30  ;;  %16172 = vmatprep.subr.mxu0 %v5436_v8 }
 0x335   :  { %16204 = vmatprep.subr.mxu1 %v5666_v63  ;;  %16119 = vmatmul.mubr.msk.f32.gmra.mxu0 %vm145_vm0, %v19351_v38 }
 0x336   :  { %16151 = vmatmul.mubr.msk.f32.gmra.mxu1 %vm145_vm0, %v19244_v55  ;;  %16121 = vmatprep.mubr.msk.f32.mxu0 %vm145_vm0, %v19357_v21 }
 0x337   :  { %16153 = vmatprep.mubr.msk.f32.mxu1 %vm145_vm0, %v19254_v19  ;;  %16173 = vmatpush3.msra.mxu0 %v5436_v8 }
 0x338   :  { %16205 = vmatpush3.msra.mxu1 %v5666_v63  ;;  %16174 = vmatprep.subr.mxu0 %v5435_v24 }
 0x339   :  { %16206 = vmatprep.subr.mxu1 %v5665_v17  ;;  %16122 = vmatmul.mubr.msk.f32.gmra.mxu0 %vm145_vm0, %v19363_v61 }
 0x33a   :  { %16154 = vmatmul.mubr.msk.f32.gmra.mxu1 %vm145_vm0, %v19365_v10  ;;  %16124 = vmatprep.mubr.msk.f32.mxu0 %vm145_vm0, %v4966_v0 }
 0x33b   :  { %16156 = vmatprep.mubr.msk.f32.mxu1 %vm145_vm0, %v19267_v47  ;;  %16175 = vmatpush3.msra.mxu0 %v5435_v24  ;;  %v6357_v47 = vld [vmem:[#allocation9 + $0x110] sm:$0xff]  ;;  %v6713_v24 = vld [vmem:[#allocation11 + $0x18] sm:$0xff] }
 0x33c   :  { %16207 = vmatpush3.msra.mxu1 %v5665_v17  ;;  %16232 = vmatprep.subr.mxu0 %v5898_v14 }
 0x33d   :  { %16264 = vmatprep.subr.mxu1 %v6128_v11  ;;  %16125 = vmatmul.mubr.msk.f32.gmra.mxu0 %vm145_vm0, %v4967_v5 }
 0x33e   :  { %16157 = vmatmul.mubr.msk.f32.gmra.mxu1 %vm145_vm0, %v19276_v46  ;;  %16127 = vmatprep.mubr.msk.f32.mxu0 %vm145_vm0, %v19377_v29 }
 0x33f   :  { %16159 = vmatprep.mubr.msk.f32.mxu1 %vm145_vm0, %v19285_v27 }
 0x341   :  { %16128 = vmatmul.mubr.msk.f32.gmra.mxu0 %vm145_vm0, %v19383_v25 }
 0x342   :  { %16160 = vmatmul.mubr.msk.f32.gmra.mxu1 %vm145_vm0, %v19294_v54  ;;  %16130 = vmatprep.mubr.msk.f32.mxu0 %vm145_vm0, %v19389_v40 }
 0x343   :  { %16162 = vmatprep.mubr.msk.f32.mxu1 %vm145_vm0, %v19302_v20 }
 0x345   :  { %16131 = vmatmul.mubr.msk.f32.gmra.mxu0 %vm145_vm0, %v19395_v1 }
 0x346   :  { %16163 = vmatmul.mubr.msk.f32.gmra.mxu1 %vm145_vm0, %v19310_v3  ;;  %16133 = vmatprep.mubr.msk.f32.mxu0 %vm145_vm0, %v19401_v51 }
 0x347   :  { %16165 = vmatprep.mubr.msk.f32.mxu1 %vm145_vm0, %v19318_v45 }
 0x349   :  { %16134 = vmatmul.mubr.msk.f32.gmra.mxu0 %vm145_vm0, %v19407_v36 }
 0x34a   :  { %16166 = vmatmul.mubr.msk.f32.gmra.mxu1 %vm145_vm0, %v19409_v49  ;;  %16176 = vmatprep.mubr.msk.f32.mxu0 %vm145_vm0, %v19181_v22  ;;  %v5896_v22 = vld [vmem:[#allocation9 + $0xc8] sm:$0xff] }
 0x34b   :  { %16208 = vmatprep.mubr.msk.f32.mxu1 %vm145_vm0, %v19327_v62 }
 0x34d   :  { %16177 = vmatmul.mubr.msk.f32.vlgmr.msra.gmra.mxu0 %vm145_vm0, %v19193_v57 }
 0x34e   :  { %16209 = vmatmul.mubr.msk.f32.vlgmr.msra.gmra.mxu1 %vm145_vm0, %v19333_v33  ;;  %16179 = vmatprep.mubr.msk.f32.mxu0 %vm145_vm0, %v19207_v50 }
 0x34f   :  { %16211 = vmatprep.mubr.msk.f32.mxu1 %vm145_vm0, %v19339_v42  ;;  %16233 = vmatpush3.msra.mxu0 %v5898_v14 }
 0x350   :  { %16265 = vmatpush3.msra.mxu1 %v6128_v11  ;;  %16234 = vmatprep.subr.mxu0 %v5897_v48 }
 0x351   :  { %16266 = vmatprep.subr.mxu1 %v6127_v37  ;;  %16180 = vmatmul.mubr.msk.f32.gmra.mxu0 %vm145_vm0, %v19219_v2 }
 0x352   :  { %16212 = vmatmul.mubr.msk.f32.gmra.mxu1 %vm145_vm0, %v19345_v59  ;;  %16182 = vmatprep.mubr.msk.f32.mxu0 %vm145_vm0, %v19231_v7 }
 0x353   :  { %16214 = vmatprep.mubr.msk.f32.mxu1 %vm145_vm0, %v19351_v38  ;;  %16235 = vmatpush3.msra.mxu0 %v5897_v48 }
 0x354   :  { %16267 = vmatpush3.msra.mxu1 %v6127_v37  ;;  %16236 = vmatprep.subr.mxu0 %v5896_v22  ;;  %v6714_v37 = vld [vmem:[#allocation2 + $0x1] sm:$0xff] }
 0x355   :  { %16268 = vmatprep.subr.mxu1 %v6126_v41  ;;  %16183 = vmatmul.mubr.msk.f32.gmra.mxu0 %vm145_vm0, %v19242_v4 }
 0x356   :  { %16215 = vmatmul.mubr.msk.f32.gmra.mxu1 %vm145_vm0, %v19357_v21  ;;  %16185 = vmatprep.mubr.msk.f32.mxu0 %vm145_vm0, %v19252_v26 }
 0x357   :  { %16217 = vmatprep.mubr.msk.f32.mxu1 %vm145_vm0, %v19363_v61  ;;  %16237 = vmatpush3.msra.mxu0 %v5896_v22  ;;  %v6694_v22 = vld [vmem:[#allocation2] sm:$0xff] }
 0x358   :  { %16269 = vmatpush3.msra.mxu1 %v6126_v41  ;;  %16238 = vmatprep.subr.mxu0 %v5895_v35 }
 0x359   :  { %16270 = vmatprep.subr.mxu1 %v6125_v43  ;;  %16186 = vmatmul.mubr.msk.f32.gmra.mxu0 %vm145_vm0, %v5425_v44 }
 0x35a   :  { %16218 = vmatmul.mubr.msk.f32.gmra.mxu1 %vm145_vm0, %v19443_v53  ;;  %16188 = vmatprep.mubr.msk.f32.mxu0 %vm145_vm0, %v19265_v16  ;;  %v19475_v16 = vld [vmem:[#allocation2 + $0x122] sm:$0xff] }
 0x35b   :  { %16220 = vmatprep.mubr.msk.f32.mxu1 %vm145_vm0, %v4967_v5  ;;  %16239 = vmatpush3.msra.mxu0 %v5895_v35 }
 0x35c   :  { %16271 = vmatpush3.msra.mxu1 %v6125_v43  ;;  %16296 = vmatprep.subr.mxu0 %v6358_v34 }
 0x35d   :  { %16189 = vmatmul.mubr.msk.f32.gmra.mxu0 %vm145_vm0, %v19274_v39 }
 0x35e   :  { %16221 = vmatmul.mubr.msk.f32.gmra.mxu1 %vm145_vm0, %v19377_v29  ;;  %16191 = vmatprep.mubr.msk.f32.mxu0 %vm145_vm0, %v19283_v12 }
 0x35f   :  { %16223 = vmatprep.mubr.msk.f32.mxu1 %vm145_vm0, %v19383_v25 }
 0x361   :  { %16192 = vmatmul.mubr.msk.f32.gmra.mxu0 %vm145_vm0, %v19292_v18 }
 0x362   :  { %16224 = vmatmul.mubr.msk.f32.gmra.mxu1 %vm145_vm0, %v19389_v40  ;;  %16194 = vmatprep.mubr.msk.f32.mxu0 %vm145_vm0, %v19300_v9 }
 0x363   :  { %16226 = vmatprep.mubr.msk.f32.mxu1 %vm145_vm0, %v19395_v1 }
 0x365   :  { %16195 = vmatmul.mubr.msk.f32.gmra.mxu0 %vm145_vm0, %v19308_v60 }
 0x366   :  { %16227 = vmatmul.mubr.msk.f32.gmra.mxu1 %vm145_vm0, %v19401_v51  ;;  %16197 = vmatprep.mubr.msk.f32.mxu0 %vm145_vm0, %v19316_v32 }
 0x367   :  { %16229 = vmatprep.mubr.msk.f32.mxu1 %vm145_vm0, %v19407_v36 }
 0x369   :  { %16198 = vmatmul.mubr.msk.f32.gmra.mxu0 %vm145_vm0, %v5433_v13 }
 0x36a   :  { %16230 = vmatmul.mubr.msk.f32.gmra.mxu1 %vm145_vm0, %v19475_v16  ;;  %16240 = vmatprep.mubr.msk.f32.mxu0 %vm145_vm0, %v19195_v58  ;;  %v6355_v58 = vld [vmem:[#allocation9 + $0x100] sm:$0xff] }
 0x36b   :  { %16272 = vmatprep.mubr.msk.f32.mxu1 %vm145_vm0, %v19193_v57  ;;  %v6356_v57 = vld [vmem:[#allocation9 + $0x108] sm:$0xff] }
 0x36d   :  { %16241 = vmatmul.mubr.msk.f32.vlgmr.msra.gmra.mxu0 %vm145_vm0, %v19209_v31  ;;  %v6115_v31 = vld [vmem:[#allocation2 + $0x91] sm:$0xff] }
 0x36e   :  { %16273 = vmatmul.mubr.msk.f32.vlgmr.msra.gmra.mxu1 %vm145_vm0, %v19207_v50  ;;  %16243 = vmatprep.mubr.msk.f32.mxu0 %vm145_vm0, %v19221_v6  ;;  %v5885_v50 = vld [vmem:[#allocation2 + $0x90] sm:$0xff] }
 0x36f   :  { %16275 = vmatprep.mubr.msk.f32.mxu1 %vm145_vm0, %v19219_v2  ;;  %16297 = vmatpush3.msra.mxu0 %v6358_v34  ;;  %v5893_v2 = vld [vmem:[#allocation2 + $0x130] sm:$0xff] }
 0x370   :  { %16298 = vmatprep.subr.mxu0 %v6357_v47  ;;  %v6123_v6 = vld [vmem:[#allocation2 + $0x131] sm:$0xff] }
 0x371   :  { %16244 = vmatmul.mubr.msk.f32.gmra.mxu0 %vm145_vm0, %v19233_v15  ;;  %v6353_v15 = vld [vmem:[#allocation2 + $0x132] sm:$0xff] }
 0x372   :  { %16276 = vmatmul.mubr.msk.f32.gmra.mxu1 %vm145_vm0, %v19231_v7  ;;  %16246 = vmatprep.mubr.msk.f32.mxu0 %vm145_vm0, %v19244_v55  ;;  %v6345_v7 = vld [vmem:[#allocation2 + $0x92] sm:$0xff] }
 0x373   :  { %16278 = vmatprep.mubr.msk.f32.mxu1 %vm145_vm0, %v19242_v4  ;;  %16299 = vmatpush3.msra.mxu0 %v6357_v47  ;;  %v6734_v4 = vld [vmem:[#allocation11 + $0x38] sm:$0xff] }
 0x374   :  { %16300 = vmatprep.subr.mxu0 %v6356_v57  ;;  %16328 = vmatprep.subr.mxu1 %v6734_v4 }
 0x375   :  { %16247 = vmatmul.mubr.msk.f32.gmra.mxu0 %vm145_vm0, %v19254_v19  ;;  %16329 = vmatpush3.msra.mxu1 %v6734_v4 }
 0x376   :  { %16279 = vmatmul.mubr.msk.f32.gmra.mxu1 %vm145_vm0, %v19252_v26  ;;  %16249 = vmatprep.mubr.msk.f32.mxu0 %vm145_vm0, %v19365_v10  ;;  %v6712_v10 = vld [vmem:[#allocation11 + $0x10] sm:$0xff] }
 0x377   :  { %16281 = vmatprep.mubr.msk.f32.mxu1 %vm145_vm0, %v5425_v44  ;;  %16301 = vmatpush3.msra.mxu0 %v6356_v57 }
 0x378   :  { %16302 = vmatprep.subr.mxu0 %v6355_v58 }
 0x379   :  { %16250 = vmatmul.mubr.msk.f32.gmra.mxu0 %vm145_vm0, %v5885_v50 }
 0x37a   :  { %16282 = vmatmul.mubr.msk.f32.gmra.mxu1 %vm145_vm0, %v6115_v31  ;;  %16252 = vmatprep.mubr.msk.f32.mxu0 %vm145_vm0, %v19276_v46 }
 0x37b   :  { %16284 = vmatprep.mubr.msk.f32.mxu1 %vm145_vm0, %v19274_v39  ;;  %16303 = vmatpush3.msra.mxu0 %v6355_v58 }
 0x37c   :  { %16360 = vmatprep.subr.mxu0 %v6713_v24 }
 0x37d   :  { %16253 = vmatmul.mubr.msk.f32.gmra.mxu0 %vm145_vm0, %v19285_v27 }
 0x37e   :  { %16285 = vmatmul.mubr.msk.f32.gmra.mxu1 %vm145_vm0, %v19283_v12  ;;  %16255 = vmatprep.mubr.msk.f32.mxu0 %vm145_vm0, %v19294_v54 }
 0x37f   :  { %16287 = vmatprep.mubr.msk.f32.mxu1 %vm145_vm0, %v19292_v18 }
 0x381   :  { %16256 = vmatmul.mubr.msk.f32.gmra.mxu0 %vm145_vm0, %v19302_v20 }
 0x382   :  { %16288 = vmatmul.mubr.msk.f32.gmra.mxu1 %vm145_vm0, %v19300_v9  ;;  %16258 = vmatprep.mubr.msk.f32.mxu0 %vm145_vm0, %v19310_v3 }
 0x383   :  { %16290 = vmatprep.mubr.msk.f32.mxu1 %vm145_vm0, %v19308_v60 }
 0x385   :  { %16259 = vmatmul.mubr.msk.f32.gmra.mxu0 %vm145_vm0, %v19318_v45 }
 0x386   :  { %16291 = vmatmul.mubr.msk.f32.gmra.mxu1 %vm145_vm0, %v19316_v32  ;;  %16261 = vmatprep.mubr.msk.f32.mxu0 %vm145_vm0, %v19409_v49 }
 0x387   :  { %16293 = vmatprep.mubr.msk.f32.mxu1 %vm145_vm0, %v5433_v13 }
 0x389   :  { %16262 = vmatmul.mubr.msk.f32.gmra.mxu0 %vm145_vm0, %v5893_v2 }
 0x38a   :  { %16294 = vmatmul.mubr.msk.f32.gmra.mxu1 %vm145_vm0, %v6123_v6  ;;  %16304 = vmatprep.mubr.msk.f32.mxu0 %vm145_vm0, %v19333_v33 }
 0x38b   :  { %16336 = vmatprep.mubr.msk.f32.mxu1 %vm145_vm0, %v6714_v37 }
 0x38d   :  { %16305 = vmatmul.mubr.msk.f32.vlgmr.msra.gmra.mxu0 %vm145_vm0, %v19339_v42 }
 0x38e   :  { %16307 = vmatprep.mubr.msk.f32.mxu0 %vm145_vm0, %v19345_v59  ;;  %16361 = vmatpush3.msra.mxu0 %v6713_v24 }
 0x38f   :  { %16362 = vmatprep.subr.mxu0 %v6712_v10 }
 0x390   :  { %16363 = vmatpush3.msra.mxu0 %v6712_v10 }
 0x391   :  { %16308 = vmatmul.mubr.msk.f32.gmra.mxu0 %vm145_vm0, %v19351_v38 }
 0x392   :  { %16310 = vmatprep.mubr.msk.f32.mxu0 %vm145_vm0, %v19357_v21 }
 0x395   :  { %16311 = vmatmul.mubr.msk.f32.gmra.mxu0 %vm145_vm0, %v19363_v61  ;;  %v6733_v61 = vld [vmem:[#allocation11 + $0x30] sm:$0xff] }
 0x396   :  { %16313 = vmatprep.mubr.msk.f32.mxu0 %vm145_vm0, %v19443_v53  ;;  %16330 = vmatprep.subr.mxu1 %v6733_v61 }
 0x397   :  { %16331 = vmatpush3.msra.mxu1 %v6733_v61 }
 0x399   :  { %16314 = vmatmul.mubr.msk.f32.gmra.mxu0 %vm145_vm0, %v6345_v7 }
 0x39a   :  { %16316 = vmatprep.mubr.msk.f32.mxu0 %vm145_vm0, %v19377_v29  ;;  %v6732_v29 = vld [vmem:[#allocation11 + $0x28] sm:$0xff] }
 0x39b   :  { %16332 = vmatprep.subr.mxu1 %v6732_v29 }
 0x39c   :  { %16333 = vmatpush3.msra.mxu1 %v6732_v29 }
 0x39d   :  { %16317 = vmatmul.mubr.msk.f32.gmra.mxu0 %vm145_vm0, %v19383_v25  ;;  %v6711_v25 = vld [vmem:[#allocation11 + $0x8] sm:$0xff] }
 0x39e   :  { %16319 = vmatprep.mubr.msk.f32.mxu0 %vm145_vm0, %v19389_v40  ;;  %16364 = vmatprep.subr.mxu0 %v6711_v25 }
 0x39f   :  { %16365 = vmatpush3.msra.mxu0 %v6711_v25 }
 0x3a1   :  { %16320 = vmatmul.mubr.msk.f32.gmra.mxu0 %vm145_vm0, %v19395_v1 }
 0x3a2   :  { %16322 = vmatprep.mubr.msk.f32.mxu0 %vm145_vm0, %v19401_v51  ;;  %v6731_v51 = vld [vmem:[#allocation11 + $0x20] sm:$0xff] }
 0x3a3   :  { %16334 = vmatprep.subr.mxu1 %v6731_v51 }
 0x3a4   :  { %16335 = vmatpush3.msra.mxu1 %v6731_v51 }
 0x3a5   :  { %16323 = vmatmul.mubr.msk.f32.gmra.mxu0 %vm145_vm0, %v19407_v36  ;;  %v6710_v36 = vld [vmem:[#allocation11] sm:$0xff] }
 0x3a6   :  { %16325 = vmatprep.mubr.msk.f32.mxu0 %vm145_vm0, %v19475_v16  ;;  %16366 = vmatprep.subr.mxu0 %v6710_v36 }
 0x3a7   :  { %16367 = vmatpush3.msra.mxu0 %v6710_v36 }
 0x3a9   :  { %16326 = vmatmul.mubr.msk.f32.gmra.mxu0 %vm145_vm0, %v6353_v15 }
 0x3aa   :  { %16368 = vmatprep.mubr.msk.f32.mxu0 %vm145_vm0, %v6694_v22 }
 0x3cd   :  { %v16050_v55 = vpop.f32.mrf.mxu0  ;;  %v16082_v26 = vpop.f32.mrf.mxu1 }
 0x3ce   :  { %v19568_v19 = vadd.f32 %v16082_v26, %v16050_v55 }
 0x3cf   :  { %v19570_v39 = vpop.f32.mrf.mxu0  ;;  %v19572_v46 = vpop.f32.mrf.mxu1 }
 0x3d1   :  { %v16053_v52 = vpop.f32.mrf.mxu0 }
 0x3d2   :  { %v16085_v23 = vpop.f32.mrf.mxu1 }
 0x3d3   :  { %v19574_v12 = vadd.f32 %v16085_v23, %v16053_v52  ;;  %v19576_v27 = vpop.f32.mrf.mxu0 }
 0x3d4   :  { %v19578_v18 = vpop.f32.mrf.mxu1 }
 0x3d5   :  { %v16056_v54 = vpop.f32.mrf.mxu0 }
 0x3d6   :  { %v16088_v9 = vpop.f32.mrf.mxu1 }
 0x3d7   :  { %v19580_v20 = vadd.f32 %v16088_v9, %v16056_v54  ;;  %v19582_v60 = vpop.f32.mrf.mxu0  ;;  %v19652_v9 = vld [vmem:[#allocation11 + $0x58] sm:$0xff] }
 0x3d8   :  { %v19584_v3 = vpop.f32.mrf.mxu1  ;;  %22552 = vst [vmem:[#allocation37_spill] sm:$0xff] %v19652_v9  ;;  %16392 = vmatprep.subr.mxu1 %v19652_v9 }
 0x3d9   :  { %v16059_v56 = vpop.f32.mrf.mxu0 }
 0x3da   :  { %v16091_v32 = vpop.f32.mrf.mxu1 }
 0x3db   :  { %v19586_v45 = vadd.f32 %v16091_v32, %v16059_v56  ;;  %v19588_v62 = vpop.f32.mrf.mxu0 }
 0x3dc   :  { %v19590_v33 = vpop.f32.mrf.mxu1 }
 0x3dd   :  { %v16062_v28 = vpop.f32.mrf.mxu0 }
 0x3de   :  { %v16094_v30 = vpop.f32.mrf.mxu1 }
 0x3df   :  { %v19592_v42 = vadd.f32 %v16094_v30, %v16062_v28  ;;  %v19594_v59 = vpop.f32.mrf.mxu0 }
 0x3e0   :  { %v19596_v8 = vpop.f32.mrf.mxu1 }
 0x3e1   :  { %v16065_v63 = vpop.f32.mrf.mxu0 }
 0x3e2   :  { %v16097_v38 = vpop.f32.mrf.mxu1 }
 0x3e3   :  { %v19598_v21 = vadd.f32 %v16097_v38, %v16065_v63  ;;  %v19600_v17 = vpop.f32.mrf.mxu0  ;;  %v19667_v63 = vld [vmem:[#allocation11 + $0x78] sm:$0xff] }
 0x3e4   :  { %v19602_v0 = vpop.f32.mrf.mxu1  ;;  %22553 = vst [vmem:[#allocation27_spill] sm:$0xff] %v19667_v63  ;;  %16424 = vmatprep.subr.mxu0 %v19667_v63 }
 0x3e5   :  { %v16068_v14 = vpop.f32.mrf.mxu0 }
 0x3e6   :  { %v16100_v11 = vpop.f32.mrf.mxu1 }
 0x3e7   :  { %v4945_v5 = vadd.f32 %v16100_v11, %v16068_v14  ;;  %v19604_v40 = vpop.f32.mrf.mxu0 }
 0x3e8   :  { %v19606_v1 = vpop.f32.mrf.mxu1 }
 0x3e9   :  { %v16071_v49 = vpop.f32.mrf.mxu0 }
 0x3ea   :  { %v16103_v48 = vpop.f32.mrf.mxu1 }
 0x3eb   :  { %v4955_v41 = vadd.f32 %v16103_v48, %v16071_v49  ;;  %v19609_v35 = vpop.f32.mrf.mxu0 }
 0x3ec   :  { %v19611_v43 = vpop.f32.mrf.mxu1 }
 0x3ed   :  { %v16114_v44 = vpop.f32.mrf.mxu0 }
 0x3ee   :  { %v19614_v53 = vpop.f32.mrf.mxu1  ;;  %v19617_v34 = vadd.f32 %v16114_v44, %v19568_v19 }
 0x3ef   :  { %v19619_v13 = vpop.f32.mrf.mxu0 }
 0x3f0   :  { %v19621_v16 = vpop.f32.mrf.mxu1 }
 0x3f1   :  { %v16117_v47 = vpop.f32.mrf.mxu0 }
 0x3f2   :  { %v19623_v57 = vpop.f32.mrf.mxu1  ;;  %v19626_v58 = vadd.f32 %v16117_v47, %v19574_v12 }
 0x3f3   :  { %v19628_v50 = vpop.f32.mrf.mxu0 }
 0x3f4   :  { %v19630_v31 = vpop.f32.mrf.mxu1 }
 0x3f5   :  { %v16120_v2 = vpop.f32.mrf.mxu0 }
 0x3f6   :  { %v19632_v6 = vpop.f32.mrf.mxu1  ;;  %v19635_v7 = vadd.f32 %v16120_v2, %v19580_v20 }
 0x3f7   :  { %v19637_v15 = vpop.f32.mrf.mxu0 }
 0x3f8   :  { %v19639_v4 = vpop.f32.mrf.mxu1 }
 0x3f9   :  { %v16123_v55 = vpop.f32.mrf.mxu0 }
 0x3fa   :  { %v19641_v26 = vpop.f32.mrf.mxu1  ;;  %v19644_v19 = vadd.f32 %v16123_v55, %v19586_v45 }
 0x3fb   :  { %v19646_v52 = vpop.f32.mrf.mxu0 }
 0x3fc   :  { %v19648_v23 = vpop.f32.mrf.mxu1 }
 0x3fd   :  { %v16126_v12 = vpop.f32.mrf.mxu0 }
 0x3fe   :  { %v19650_v54 = vpop.f32.mrf.mxu1  ;;  %v19655_v20 = vadd.f32 %v16126_v12, %v19592_v42 }
 0x3ff   :  { %v19658_v56 = vpop.f32.mrf.mxu0 }
 0x400   :  { %v19660_v32 = vpop.f32.mrf.mxu1 }
 0x401   :  { %v16129_v45 = vpop.f32.mrf.mxu0 }
 0x402   :  { %v19662_v28 = vpop.f32.mrf.mxu1  ;;  %v19665_v30 = vadd.f32 %v16129_v45, %v19598_v21 }
 0x403   :  { %v19669_v38 = vpop.f32.mrf.mxu0 }
 0x404   :  { %v19671_v24 = vpop.f32.mrf.mxu1 }
 0x405   :  { %v16132_v42 = vpop.f32.mrf.mxu0 }
 0x406   :  { %v19674_v61 = vpop.f32.mrf.mxu1  ;;  %v19676_v10 = vadd.f32 %v16132_v42, %v4945_v5 }
 0x407   :  { %v19678_v14 = vpop.f32.mrf.mxu0 }
 0x408   :  { %v19680_v11 = vpop.f32.mrf.mxu1 }
 0x409   :  { %22554 = vst [vmem:[#allocation29_spill] sm:$0xff] %v19680_v11  ;;  %v16135_v29 = vpop.f32.mrf.mxu0 }
 0x40a   :  { %v19682_v21 = vpop.f32.mrf.mxu1  ;;  %v19684_v25 = vadd.f32 %v16135_v29, %v4955_v41 }
 0x40b   :  { %22555 = vst [vmem:[#allocation31_spill] sm:$0xff] %v19682_v21  ;;  %v19686_v51 = vpop.f32.mrf.mxu0 }
 0x40c   :  { %22556 = vst [vmem:[#allocation24_spill] sm:$0xff] %v19684_v25  ;;  %v19688_v36 = vpop.f32.mrf.mxu1 }
 0x40d   :  { %22557 = vst [vmem:[#allocation23_spill] sm:$0xff] %v19688_v36  ;;  %v16178_v49 = vpop.f32.mrf.mxu0 }
 0x40e   :  { %v19690_v48 = vpop.f32.mrf.mxu1 }
 0x40f   :  { %v5553_v37 = vpop.f32.mrf.mxu0 }
 0x410   :  { %v19692_v22 = vpop.f32.mrf.mxu1 }
 0x411   :  { %v19694_v5 = vpop.f32.mrf.mxu0 }
 0x412   :  { %v19696_v44 = vpop.f32.mrf.mxu1 }
 0x413   :  { %v19698_v47 = vpop.f32.mrf.mxu0 }
 0x414   :  { %v19700_v2 = vpop.f32.mrf.mxu1 }
 0x415   :  { %22558 = vst [vmem:[#allocation19_spill] sm:$0xff] %v19700_v2  ;;  %v19702_v41 = vpop.f32.mrf.mxu0 }
 0x416   :  { %v19704_v55 = vpop.f32.mrf.mxu1 }
 0x417   :  { %22559 = vst [vmem:[#allocation51_spill] sm:$0xff] %v19704_v55  ;;  %v19706_v12 = vpop.f32.mrf.mxu0 }
 0x418   :  { %22560 = vst [vmem:[#allocation40_spill] sm:$0xff] %v19706_v12  ;;  %v19708_v45 = vpop.f32.mrf.mxu1 }
 0x419   :  { %22561 = vst [vmem:[#allocation42_spill] sm:$0xff] %v19708_v45  ;;  %v19710_v42 = vpop.f32.mrf.mxu0 }
 0x41a   :  { %22562 = vst [vmem:[#allocation41_spill] sm:$0xff] %v19710_v42  ;;  %v19712_v29 = vpop.f32.mrf.mxu1 }
 0x41b   :  { %22563 = vst [vmem:[#allocation26_spill] sm:$0xff] %v19712_v29  ;;  %v19714_v63 = vpop.f32.mrf.mxu0 }
 0x41c   :  { %22564 = vst [vmem:[#allocation38_spill] sm:$0xff] %v19714_v63  ;;  %v19716_v9 = vpop.f32.mrf.mxu1 }
 0x41d   :  { %22565 = vst [vmem:[#allocation52_spill] sm:$0xff] %v19716_v9  ;;  %v19718_v36 = vpop.f32.mrf.mxu0 }
 0x41e   :  { %22566 = vst [vmem:[#allocation20_spill] sm:$0xff] %v19718_v36  ;;  %v19720_v21 = vpop.f32.mrf.mxu1 }
 0x41f   :  { %22567 = vst [vmem:[#allocation39_spill] sm:$0xff] %v19720_v21  ;;  %v19722_v25 = vpop.f32.mrf.mxu0 }
 0x420   :  { %22568 = vst [vmem:[#allocation28_spill] sm:$0xff] %v19722_v25  ;;  %v19724_v11 = vpop.f32.mrf.mxu1 }
 0x421   :  { %22569 = vst [vmem:[#allocation53_spill] sm:$0xff] %v19724_v11  ;;  %v19726_v55 = vpop.f32.mrf.mxu0 }
 0x422   :  { %22570 = vst [vmem:[#allocation54_spill] sm:$0xff] %v19726_v55  ;;  %v19728_v2 = vpop.f32.mrf.mxu1 }
 0x423   :  { %22571 = vst [vmem:[#allocation44_spill] sm:$0xff] %v19728_v2  ;;  %v19730_v45 = vpop.f32.mrf.mxu0 }
 0x424   :  { %22572 = vst [vmem:[#allocation46_spill] sm:$0xff] %v19730_v45  ;;  %v19732_v42 = vpop.f32.mrf.mxu1 }
 0x425   :  { %22573 = vst [vmem:[#allocation57_spill] sm:$0xff] %v19732_v42  ;;  %v19734_v29 = vpop.f32.mrf.mxu0 }
 0x426   :  { %22574 = vst [vmem:[#allocation55_spill] sm:$0xff] %v19734_v29  ;;  %v19736_v63 = vpop.f32.mrf.mxu1 }
 0x427   :  { %22575 = vst [vmem:[#allocation43_spill] sm:$0xff] %v19736_v63  ;;  %v19738_v9 = vpop.f32.mrf.mxu0 }
 0x428   :  { %22576 = vst [vmem:[#allocation32_spill] sm:$0xff] %v19738_v9  ;;  %v19740_v36 = vpop.f32.mrf.mxu1 }
 0x429   :  { %22577 = vst [vmem:[#allocation56_spill] sm:$0xff] %v19740_v36  ;;  %v19742_v21 = vpop.f32.mrf.mxu0 }
 0x42a   :  { %22578 = vst [vmem:[#allocation30_spill] sm:$0xff] %v19742_v21  ;;  %v19744_v25 = vpop.f32.mrf.mxu1 }
 0x42b   :  { %22579 = vst [vmem:[#allocation47_spill] sm:$0xff] %v19744_v25  ;;  %v19746_v11 = vpop.f32.mrf.mxu0 }
 0x42c   :  { %22580 = vst [vmem:[#allocation45_spill] sm:$0xff] %v19746_v11  ;;  %v19748_v55 = vpop.f32.mrf.mxu1 }
 0x42d   :  { %22581 = vst [vmem:[#allocation21_spill] sm:$0xff] %v19748_v55  ;;  %v16242_v2 = vpop.f32.mrf.mxu0 }
 0x42e   :  { %v19750_v45 = vpop.f32.mrf.mxu1 }
 0x42f   :  { %22582 = vst [vmem:[#allocation49_spill] sm:$0xff] %v19750_v45  ;;  %v6013_v42 = vpop.f32.mrf.mxu0  ;;  %v4880_v45 = vadd.f32 %v19572_v46, %v19570_v39  ;;  %v4910_v46 = vadd.f32 %v19590_v33, %v19588_v62 }
 0x430   :  { %v19752_v12 = vpop.f32.mrf.mxu1 }
 0x431   :  { %22583 = vst [vmem:[#allocation35_spill] sm:$0xff] %v19752_v12  ;;  %v19754_v29 = vpop.f32.mrf.mxu0  ;;  %v5178_v62 = vadd.f32 %v19646_v52, %v4910_v46 }
 0x432   :  { %22584 = vst [vmem:[#allocation33_spill] sm:$0xff] %v19754_v29  ;;  %v19758_v9 = vpop.f32.mrf.mxu1 }
 0x433   :  { %v19756_v63 = vpop.f32.mrf.mxu0  ;;  %22586 = vst [vmem:[#allocation48_spill] sm:$0xff] %v19758_v9 }
 0x434   :  { %22585 = vst [vmem:[#allocation50_spill] sm:$0xff] %v19756_v63  ;;  %v19764_v25 = vpop.f32.mrf.mxu1  ;;  %v5172_v63 = vadd.f32 %v19619_v13, %v4880_v45 }
 0x435   :  { %v19760_v36 = vpop.f32.mrf.mxu0  ;;  %22588 = vst [vmem:[#allocation34_spill] sm:$0xff] %v19764_v25  ;;  %v5403_v25 = vadd.f32 %v19614_v53, %v19617_v34 }
 0x436   :  { %v19772_v12 = vpop.f32.mrf.mxu1  ;;  %v5402_v13 = vadd.f32 %v19621_v16, %v5172_v63  ;;  %v4940_v16 = vadd.f32 %v19606_v1, %v19604_v40  ;;  %v5409_v1 = vadd.f32 %v19641_v26, %v19644_v19 }
 0x437   :  { %v19762_v21 = vpop.f32.mrf.mxu0 }
 0x438   :  { %22587 = vst [vmem:[#allocation36_spill] sm:$0xff] %v19762_v21  ;;  %v4890_v21 = vadd.f32 %v19578_v18, %v19576_v27  ;;  %v4920_v27 = vadd.f32 %v19596_v8, %v19594_v59  ;;  %v5632_v33 = vadd.f32 %v5553_v37, %v5402_v13  ;;  %v22595_v37 = vld [vmem:[#allocation38_spill] sm:$0xff]  ;;  %v22602_v13 = vld [vmem:[#allocation28_spill] sm:$0xff] }
 0x439   :  { %v19766_v11 = vpop.f32.mrf.mxu0 }
 0x43a   :  { %22589 = vst [vmem:[#allocation18_spill] sm:$0xff] %v19766_v11  ;;  %v19783_v11 = vpop.f32.mrf.mxu1  ;;  %v5174_v45 = vadd.f32 %v19628_v50, %v4890_v21  ;;  %v5180_v59 = vadd.f32 %v19658_v56, %v4920_v27  ;;  %v5862_v56 = vadd.f32 %v19692_v22, %v5632_v33  ;;  %v22596_v22 = vld [vmem:[#allocation49_spill] sm:$0xff] }
 0x43b   :  { %v19768_v55 = vpop.f32.mrf.mxu0 }
 0x43c   :  { %22590 = vst [vmem:[#allocation25_spill] sm:$0xff] %v19768_v55  ;;  %v4900_v55 = vadd.f32 %v19584_v3, %v19582_v60  ;;  %v4930_v60 = vadd.f32 %v19602_v0, %v19600_v17  ;;  %v5405_v3 = vadd.f32 %v19623_v57, %v19626_v58  ;;  %v19803_v34 = vpop.f32.mrf.mxu1  ;;  %v5404_v50 = vadd.f32 %v19630_v31, %v5174_v45 }
 0x43d   :  { %v19774_v29 = vpop.f32.mrf.mxu0  ;;  %v4950_v57 = vadd.f32 %v19611_v43, %v19609_v35  ;;  %v5407_v58 = vadd.f32 %v19632_v6, %v19635_v7  ;;  %v5408_v31 = vadd.f32 %v19648_v23, %v5178_v62  ;;  %v5411_v35 = vadd.f32 %v19650_v54, %v19655_v20  ;;  %v22592_v20 = vld [vmem:[#allocation40_spill] sm:$0xff]  ;;  %v22604_v62 = vld [vmem:[#allocation35_spill] sm:$0xff] }
 0x43e   :  { %v5176_v18 = vadd.f32 %v19637_v15, %v4900_v55  ;;  %v5182_v15 = vadd.f32 %v19669_v38, %v4930_v60  ;;  %v5635_v0 = vadd.f32 %v19694_v5, %v5405_v3  ;;  %v19826_v38 = vpop.f32.mrf.mxu1  ;;  %v5410_v43 = vadd.f32 %v19660_v32, %v5180_v59  ;;  %v22597_v5 = vld [vmem:[#allocation33_spill] sm:$0xff]  ;;  %v22603_v60 = vld [vmem:[#allocation23_spill] sm:$0xff] }
 0x43f   :  { %v19777_v9 = vpop.f32.mrf.mxu0  ;;  %v5413_v6 = vadd.f32 %v19662_v28, %v19665_v30  ;;  %v5184_v7 = vadd.f32 %v19678_v14, %v4940_v16  ;;  %v5186_v19 = vadd.f32 %v19686_v51, %v4950_v57  ;;  %v6092_v21 = vadd.f32 %v6013_v42, %v5862_v56  ;;  %v22594_v14 = vld [vmem:[#allocation19_spill] sm:$0xff]  ;;  %v22601_v42 = vld [vmem:[#allocation20_spill] sm:$0xff]  ;;  %v22605_v16 = vld [vmem:[#allocation50_spill] sm:$0xff] }
 0x440   :  { %22591 = vst [vmem:[#allocation22_spill] sm:$0xff] %v19777_v9  ;;  %v5633_v9 = vadd.f32 %v16178_v49, %v5403_v25  ;;  %v5406_v40 = vadd.f32 %v19639_v4, %v5176_v18  ;;  %v5412_v26 = vadd.f32 %v19671_v24, %v5182_v15  ;;  %v5865_v23 = vadd.f32 %v19696_v44, %v5635_v0  ;;  %v22593_v49 = vld [vmem:[#allocation41_spill] sm:$0xff]  ;;  %v22606_v15 = vld [vmem:[#allocation51_spill] sm:$0xff]  ;;  %v22607_v0 = vld [vmem:[#allocation42_spill] sm:$0xff] }
 0x441   :  { %v19787_v39 = vpop.f32.mrf.mxu0  ;;  %v5415_v25 = vadd.f32 %v19674_v61, %v19676_v10  ;;  %v5637_v54 = vadd.f32 %v19702_v41, %v5407_v58  ;;  %v5639_v28 = vadd.f32 %v22593_v49, %v5409_v1  ;;  %v5638_v24 = vadd.f32 %v22595_v37, %v5408_v31  ;;  %v22599_v10 = vld [vmem:[#allocation24_spill] sm:$0xff]  ;;  %v22600_v41 = vld [vmem:[#allocation31_spill] sm:$0xff]  ;;  %v19862_v18 = vld [vmem:[%s22362_s8] ss:$0 sm:$0xff] }
 0x442   :  { %v5863_v17 = vadd.f32 %v19690_v48, %v5633_v9  ;;  %v5634_v9 = vadd.f32 %v19698_v47, %v5404_v50  ;;  %v5636_v32 = vadd.f32 %v22592_v20, %v5406_v40  ;;  %v6095_v44 = vadd.f32 %v22597_v5, %v5865_v23  ;;  %v19850_v47 = vpop.f32.mrf.mxu1  ;;  %v22608_v58 = vld [vmem:[#allocation26_spill] sm:$0xff]  ;;  %v19876_v56 = vld [vmem:[%s22363_s9] ss:$0 sm:$0xff] }
 0x443   :  { %v19796_v53 = vpop.f32.mrf.mxu0  ;;  %v19855_v55 = vadd.f32 %v22600_v41, %v22599_v10  ;;  %v5641_v46 = vadd.f32 %v22601_v42, %v5411_v35  ;;  %v5640_v45 = vadd.f32 %v22602_v13, %v5410_v43  ;;  %v19865_v3 = vadd.f32 %v22603_v60, %v5186_v19  ;;  %v22609_v1 = vld [vmem:[#allocation54_spill] sm:$0xff]  ;;  %v22611_v43 = vld [vmem:[#allocation48_spill] sm:$0xff]  ;;  %v22618_v42 = vld [vmem:[#allocation55_spill] sm:$0xff] }
 0x444   :  { %v6093_v63 = vadd.f32 %v16242_v2, %v5863_v17  ;;  %v5864_v48 = vadd.f32 %v22594_v14, %v5634_v9  ;;  %v22598_v2 = vld [vmem:[#allocation29_spill] sm:$0xff]  ;;  %v6322_v33 = vadd.f32 %v22604_v62, %v6092_v21  ;;  %v5867_v17 = vadd.f32 %v22606_v15, %v5637_v54  ;;  %v19880_v19 = vpop.f32.mrf.mxu1  ;;  %v22612_v54 = vld [vmem:[#allocation39_spill] sm:$0xff]  ;;  %v22615_v37 = vld [vmem:[#allocation34_spill] sm:$0xff] }
 0x445   :  { %v19808_v8 = vpop.f32.mrf.mxu0  ;;  %v5414_v61 = vadd.f32 %v22598_v2, %v5184_v7  ;;  %v5866_v57 = vadd.f32 %v22607_v0, %v5636_v32  ;;  %v5869_v40 = vadd.f32 %v22608_v58, %v5639_v28  ;;  %v5643_v31 = vadd.f32 %v22609_v1, %v5413_v6  ;;  %v22613_v32 = vld [vmem:[#allocation53_spill] sm:$0xff]  ;;  %v22614_v28 = vld [vmem:[#allocation36_spill] sm:$0xff]  ;;  %v22617_v10 = vld [vmem:[#allocation46_spill] sm:$0xff] }
 0x446   :  { %v6323_v51 = vadd.f32 %v22596_v22, %v6093_v63  ;;  %v6094_v59 = vadd.f32 %v22605_v16, %v5864_v48  ;;  %v22610_v63 = vld [vmem:[#allocation52_spill] sm:$0xff]  ;;  %v6325_v7 = vadd.f32 %v22611_v43, %v6095_v44  ;;  %v5871_v20 = vadd.f32 %v22612_v54, %v5641_v46  ;;  %v22619_v13 = vld [vmem:[#allocation18_spill] sm:$0xff]  ;;  %v16289_v60 = vpop.f32.mrf.mxu1 }
 0x447   :  { %v19821_v52 = vpop.f32.mrf.mxu0  ;;  %v5868_v35 = vadd.f32 %v22610_v63, %v5638_v24  ;;  %v5870_v49 = vadd.f32 %v22613_v32, %v5640_v45  ;;  %v6097_v6 = vadd.f32 %v19760_v36, %v5867_v17  ;;  %v6096_v14 = vadd.f32 %v22614_v28, %v5866_v57  ;;  %v22616_v44 = vld [vmem:[#allocation44_spill] sm:$0xff]  ;;  %v22622_v63 = vld [vmem:[#allocation57_spill] sm:$0xff]  ;;  %v22623_v28 = vld [vmem:[#allocation43_spill] sm:$0xff] }
 0x448   :  { %v6324_v22 = vadd.f32 %v22615_v37, %v6094_v59  ;;  %v5873_v2 = vadd.f32 %v22616_v44, %v5643_v31  ;;  %v5642_v41 = vadd.f32 %v22617_v10, %v5412_v26  ;;  %v5645_v46 = vadd.f32 %v22618_v42, %v5415_v25  ;;  %v22621_v26 = vld [vmem:[#allocation25_spill] sm:$0xff] }
 0x449   :  { %v19834_v4 = vpop.f32.mrf.mxu0  ;;  %v6099_v45 = vadd.f32 %v22619_v13, %v5869_v40  ;;  %v6327_v17 = vadd.f32 %v19772_v12, %v6097_v6  ;;  %v6326_v0 = vadd.f32 %v19783_v11, %v6096_v14  ;;  %v6098_v57 = vadd.f32 %v22621_v26, %v5868_v35  ;;  %v4483_v25 = vld [vmem:[#allocation3] sm:$0xff]  ;;  %v6293_v11 = vpop.f32.mrf.mxu1 }
 0x44a   :  { %v5872_v43 = vadd.f32 %v22622_v63, %v5642_v41  ;;  %v5875_v14 = vadd.f32 %v22623_v28, %v5645_v46  ;;  %v22625_v41 = vld [vmem:[#allocation22_spill] sm:$0xff]  ;;  %v6103_v46 = vadd.f32 %v19787_v39, %v5873_v2 }
 0x44b   :  { %v19844_v30 = vpop.f32.mrf.mxu0  ;;  %v6100_v42 = vadd.f32 %v22625_v41, %v5870_v49  ;;  %v22627_v49 = vld [vmem:[#allocation45_spill] sm:$0xff] }
 0x44c   :  { %v6102_v39 = vadd.f32 %v19796_v53, %v5872_v43 }
 0x44d   :  { %v16306_v27 = vpop.f32.mrf.mxu0 }
 0x44e   :  { %v6553_v50 = vadd.f32 %v16306_v27, %v6323_v51  ;;  %v4484_v27 = vld [vmem:[#allocation3 + $0x8] sm:$0xff] }
 0x44f   :  { %v6473_v9 = vpop.f32.mrf.mxu0 }
 0x450   :  { %v6576_v23 = vmul.f32 %v19862_v18, %v6553_v50  ;;  %v6552_v21 = vadd.f32 %v6473_v9, %v6322_v33  ;;  %v22620_v50 = vld [vmem:[#allocation32_spill] sm:$0xff] }
 0x451   :  { %v16309_v48 = vpop.f32.mrf.mxu0  ;;  %v5644_v15 = vadd.f32 %v22620_v50, %v5414_v61  ;;  %v6101_v61 = vadd.f32 %v19774_v29, %v5871_v20  ;;  %v5646_v50 = vadd.f32 %v22627_v49, %v19865_v3 }
 0x452   :  { %v6599_v24 = vadd.f32 %v19876_v56, %v6576_v23  ;;  %v6575_v51 = vmul.f32 %v19862_v18, %v6552_v21  ;;  %v6555_v5 = vadd.f32 %v16309_v48, %v6325_v7  ;;  %v6329_v7 = vadd.f32 %v19803_v34, %v6099_v45  ;;  %v4486_v23 = vld [vmem:[#allocation3 + $0x18] sm:$0xff]  ;;  %v4485_v34 = vld [vmem:[#allocation3 + $0x10] sm:$0xff]  ;;  %v16292_v45 = vpop.f32.mrf.mxu1 }
 0x453   :  { %v6483_v36 = vpop.f32.mrf.mxu0  ;;  %v22624_v48 = vld [vmem:[#allocation56_spill] sm:$0xff]  ;;  %v6331_v10 = vadd.f32 %v19850_v47, %v6101_v61 }
 0x454   :  { %v6615_v62 = vadd.f32 %v6599_v24, %v4484_v27  ;;  %v6598_v33 = vadd.f32 %v19876_v56, %v6575_v51  ;;  %v6578_v16 = vmul.f32 %v19862_v18, %v6555_v5  ;;  %v6554_v59 = vadd.f32 %v6483_v36, %v6324_v22  ;;  %v4488_v36 = vld [vmem:[#allocation3 + $0x28] sm:$0xff] }
 0x455   :  { %v16312_v58 = vpop.f32.mrf.mxu0  ;;  %v5874_v37 = vadd.f32 %v22624_v48, %v5644_v15  ;;  %v6328_v22 = vadd.f32 %v19826_v38, %v6098_v57  ;;  %v4487_v15 = vld [vmem:[#allocation3 + $0x20] sm:$0xff] }
 0x456   :  { %v6631_v40 = vmax.f32 %v6615_v62, 0.0  ;;  %v6614_v1 = vadd.f32 %v6598_v33, %v4483_v25  ;;  %v6601_v31 = vadd.f32 %v19876_v56, %v6578_v16  ;;  %v6577_v9 = vmul.f32 %v19862_v18, %v6554_v59  ;;  %v22626_v59 = vld [vmem:[#allocation30_spill] sm:$0xff]  ;;  %v22629_v48 = vld [vmem:[#allocation21_spill] sm:$0xff] }
 0x457   :  { %v6557_v12 = vadd.f32 %v16312_v58, %v6327_v17  ;;  %v6493_v21 = vpop.f32.mrf.mxu0  ;;  %v5647_v47 = vadd.f32 %v22626_v59, %v19855_v55  ;;  %v6330_v58 = vadd.f32 %v19880_v19, %v6100_v42  ;;  %v6105_v55 = vadd.f32 %v19808_v8, %v5875_v14  ;;  %v4489_v8 = vld [vmem:[#allocation3 + $0x30] sm:$0xff] }
 0x458   :  { %6647 = vst.msk [vmem:[#allocation3 + $0x8] sm:$0xff] %vm145_vm0, %v6631_v40  ;;  %v6630_v35 = vmax.f32 %v6614_v1, 0.0  ;;  %v6617_v54 = vadd.f32 %v6601_v31, %v4486_v23  ;;  %v6600_v32 = vadd.f32 %v19876_v56, %v6577_v9  ;;  %v6556_v6 = vadd.f32 %v6493_v21, %v6326_v0  ;;  %v4490_v31 = vld [vmem:[#allocation3 + $0x38] sm:$0xff]  ;;  %v6303_v9 = vpop.f32.mrf.mxu1  ;;  %v22628_v14 = vld [vmem:[#allocation47_spill] sm:$0xff] }
 0x459   :  { %v6580_v29 = vmul.f32 %v19862_v18, %v6557_v12  ;;  %v16315_v20 = vpop.f32.mrf.mxu0  ;;  %v6333_v40 = vadd.f32 %v16289_v60, %v6103_v46  ;;  %v6332_v23 = vadd.f32 %v6293_v11, %v6102_v39  ;;  %v6104_v12 = vadd.f32 %v19821_v52, %v5874_v37 }
 0x45a   :  { %6646 = vst.msk [vmem:[#allocation3] sm:$0xff] %vm145_vm0, %v6630_v35  ;;  %v6633_v24 = vmax.f32 %v6617_v54, 0.0  ;;  %v6616_v51 = vadd.f32 %v6600_v32, %v4485_v34  ;;  %v6579_v5 = vmul.f32 %v19862_v18, %v6556_v6  ;;  %v6559_v44 = vadd.f32 %v16315_v20, %v6329_v7  ;;  %v16295_v35 = vpop.f32.mrf.mxu1  ;;  %v4492_v34 = vld [vmem:[#allocation3 + $0x48] sm:$0xff] }
 0x45b   :  { %v6603_v13 = vadd.f32 %v19876_v56, %v6580_v29  ;;  %v6503_v38 = vpop.f32.mrf.mxu0  ;;  %v5877_v11 = vadd.f32 %v22628_v14, %v5647_v47  ;;  %v5876_v52 = vadd.f32 %v22629_v48, %v5646_v50  ;;  %v6335_v37 = vadd.f32 %v16292_v45, %v6105_v55  ;;  %v4493_v50 = vld [vmem:[#allocation3 + $0x50] sm:$0xff] }
 0x45c   :  { %6649 = vst.msk [vmem:[#allocation3 + $0x18] sm:$0xff] %vm145_vm0, %v6633_v24  ;;  %v6632_v27 = vmax.f32 %v6616_v51, 0.0  ;;  %v6602_v62 = vadd.f32 %v19876_v56, %v6579_v5  ;;  %v6582_v33 = vmul.f32 %v19862_v18, %v6559_v44  ;;  %v6558_v16 = vadd.f32 %v6503_v38, %v6328_v22  ;;  %v6313_v45 = vpop.f32.mrf.mxu1 }
 0x45d   :  { %v6619_v2 = vadd.f32 %v6603_v13, %v4488_v36  ;;  %v16318_v17 = vpop.f32.mrf.mxu0  ;;  %v6107_v41 = vadd.f32 %v19834_v4, %v5877_v11  ;;  %v6106_v42 = vadd.f32 %v19844_v30, %v5876_v52  ;;  %v4491_v36 = vld [vmem:[#allocation3 + $0x40] sm:$0xff]  ;;  %v4494_v4 = vld [vmem:[#allocation3 + $0x58] sm:$0xff] }
 0x45e   :  { %6648 = vst.msk [vmem:[#allocation3 + $0x10] sm:$0xff] %vm145_vm0, %v6632_v27  ;;  %v6618_v0 = vadd.f32 %v6602_v62, %v4487_v15  ;;  %v6605_v26 = vadd.f32 %v19876_v56, %v6582_v33  ;;  %v6581_v57 = vmul.f32 %v19862_v18, %v6558_v16  ;;  %v6561_v25 = vadd.f32 %v16318_v17, %v6331_v10  ;;  %v7140_v17 = vld [vmem:[#allocation11 + $0x50] sm:$0xff] }
 0x45f   :  { %v6663_v1 = vld [vmem:[#allocation3 + $0x8] sm:$0xff]  ;;  %v6635_v3 = vmax.f32 %v6619_v2, 0.0  ;;  %v6513_v53 = vpop.f32.mrf.mxu0  ;;  %v6334_v10 = vadd.f32 %v6303_v9, %v6104_v12 }
 0x460   :  { %6679 = vst.msk [vmem:[#allocation2 + $0x21] sm:$0xff] %vm145_vm0, %v6663_v1  ;;  %v6634_v63 = vmax.f32 %v6618_v0, 0.0  ;;  %v6621_v43 = vadd.f32 %v6605_v26, %v4490_v31  ;;  %v6604_v7 = vadd.f32 %v19876_v56, %v6581_v57  ;;  %v6584_v61 = vmul.f32 %v19862_v18, %v6561_v25 }
 0x461   :  { %v6662_v19 = vld [vmem:[#allocation3] sm:$0xff]  ;;  %6651 = vst.msk [vmem:[#allocation3 + $0x28] sm:$0xff] %vm145_vm0, %v6635_v3  ;;  %v6560_v60 = vadd.f32 %v6513_v53, %v6330_v58  ;;  %v16321_v21 = vpop.f32.mrf.mxu0  ;;  %v6337_v0 = vadd.f32 %v16295_v35, %v6107_v41  ;;  %v6336_v26 = vadd.f32 %v6313_v45, %v6106_v42 }
 0x462   :  { %6678 = vst.msk [vmem:[#allocation2 + $0x11] sm:$0xff] %vm145_vm0, %v6662_v19  ;;  %6650 = vst.msk [vmem:[#allocation3 + $0x20] sm:$0xff] %vm145_vm0, %v6634_v63  ;;  %v6637_v54 = vmax.f32 %v6621_v43, 0.0  ;;  %v6620_v32 = vadd.f32 %v6604_v7, %v4489_v8  ;;  %v6607_v6 = vadd.f32 %v19876_v56, %v6584_v61  ;;  %v6563_v28 = vadd.f32 %v16321_v21, %v6333_v40  ;;  %v7370_v43 = vld [vmem:[#allocation11 + $0x70] sm:$0xff]  ;;  %v4496_v61 = vld [vmem:[#allocation3 + $0x68] sm:$0xff] }
 0x463   :  { %v6665_v22 = vld [vmem:[#allocation3 + $0x18] sm:$0xff]  ;;  %v6583_v29 = vmul.f32 %v19862_v18, %v6560_v60  ;;  %v6523_v20 = vpop.f32.mrf.mxu0  ;;  %v4495_v60 = vld [vmem:[#allocation3 + $0x60] sm:$0xff] }
 0x464   :  { %6681 = vst.msk [vmem:[#allocation2 + $0x41] sm:$0xff] %vm145_vm0, %v6665_v22  ;;  %6653 = vst.msk [vmem:[#allocation3 + $0x38] sm:$0xff] %vm145_vm0, %v6637_v54  ;;  %v6636_v24 = vmax.f32 %v6620_v32, 0.0  ;;  %v6623_v51 = vadd.f32 %v6607_v6, %v4492_v34  ;;  %v6586_v5 = vmul.f32 %v19862_v18, %v6563_v28  ;;  %v6562_v44 = vadd.f32 %v6523_v20, %v6332_v23  ;;  %v22630_v54 = vld [vmem:[#allocation37_spill] sm:$0xff]  ;;  %v7139_v32 = vld [vmem:[#allocation11 + $0x48] sm:$0xff] }
 0x465   :  { %v6664_v46 = vld [vmem:[#allocation3 + $0x10] sm:$0xff]  ;;  %v6606_v13 = vadd.f32 %v19876_v56, %v6583_v29  ;;  %v16324_v38 = vpop.f32.mrf.mxu0  ;;  %v7138_v41 = vld [vmem:[#allocation11 + $0x40] sm:$0xff] }
 0x466   :  { %6680 = vst.msk [vmem:[#allocation2 + $0x31] sm:$0xff] %vm145_vm0, %v6664_v46  ;;  %6652 = vst.msk [vmem:[#allocation3 + $0x30] sm:$0xff] %vm145_vm0, %v6636_v24  ;;  %v6639_v27 = vmax.f32 %v6623_v51, 0.0  ;;  %v6609_v62 = vadd.f32 %v19876_v56, %v6586_v5  ;;  %v6585_v33 = vmul.f32 %v19862_v18, %v6562_v44  ;;  %v6565_v16 = vadd.f32 %v16324_v38, %v6335_v37  ;;  %v22631_v6 = vld [vmem:[#allocation27_spill] sm:$0xff]  ;;  %v4498_v5 = vld [vmem:[#allocation3 + $0x78] sm:$0xff] }
 0x467   :  { %v6622_v59 = vadd.f32 %v6606_v13, %v4491_v36  ;;  %v6533_v47 = vpop.f32.mrf.mxu0  ;;  %v19966_v9 = vld [vmem:[#allocation2 + $0x21] sm:$0xff]  ;;  %v7369_v20 = vld [vmem:[#allocation11 + $0x68] sm:$0xff] }
 0x468   :  { %v6667_v30 = vld [vmem:[#allocation3 + $0x28] sm:$0xff]  ;;  %6655 = vst.msk [vmem:[#allocation3 + $0x48] sm:$0xff] %vm145_vm0, %v6639_v27  ;;  %v6625_v49 = vadd.f32 %v6609_v62, %v4494_v4  ;;  %v6608_v39 = vadd.f32 %v19876_v56, %v6585_v33  ;;  %v6588_v2 = vmul.f32 %v19862_v18, %v6565_v16  ;;  %v6564_v15 = vadd.f32 %v6533_v47, %v6334_v10  ;;  %v19968_v63 = vld [vmem:[#allocation2 + $0x20] sm:$0xff]  ;;  %v4497_v44 = vld [vmem:[#allocation3 + $0x70] sm:$0xff] }
 0x469   :  { %6683 = vst.msk [vmem:[#allocation2 + $0x61] sm:$0xff] %vm145_vm0, %v6667_v30  ;;  %v6666_v57 = vld [vmem:[#allocation3 + $0x20] sm:$0xff]  ;;  %v6638_v25 = vmax.f32 %v6622_v59, 0.0  ;;  %v16327_v58 = vpop.f32.mrf.mxu0  ;;  %v19955_v40 = vld [vmem:[#allocation2 + $0x11] sm:$0xff] }
 0x46a   :  { %v19957_v55 = vld [vmem:[#allocation2 + $0x10] sm:$0xff]  ;;  %6682 = vst.msk [vmem:[#allocation2 + $0x51] sm:$0xff] %vm145_vm0, %v6666_v57  ;;  %v6641_v1 = vmax.f32 %v6625_v49, 0.0  ;;  %v6624_v3 = vadd.f32 %v6608_v39, %v4493_v50  ;;  %v6611_v31 = vadd.f32 %v19876_v56, %v6588_v2  ;;  %v6587_v53 = vmul.f32 %v19862_v18, %v6564_v15  ;;  %16337 = vmatmul.mubr.msk.f32.vlgmr.msra.gmra.mxu1 %vm145_vm0, %v19955_v40  ;;  %v7368_v38 = vld [vmem:[#allocation11 + $0x60] sm:$0xff]  ;;  %v7601_v50 = vld [vmem:[#allocation11 + $0x98] sm:$0xff] }
 0x46b   :  { %16369 = vmatmul.mubr.msk.f32.vlgmr.msra.gmra.mxu0 %vm145_vm0, %v19957_v55  ;;  %v6669_v7 = vld [vmem:[#allocation3 + $0x38] sm:$0xff]  ;;  %6654 = vst.msk [vmem:[#allocation3 + $0x40] sm:$0xff] %vm145_vm0, %v6638_v25  ;;  %v6567_v23 = vadd.f32 %v16327_v58, %v6337_v0  ;;  %v6543_v12 = vpop.f32.mrf.mxu0  ;;  %16339 = vmatprep.mubr.msk.f32.mxu1 %vm145_vm0, %v19966_v9  ;;  %v19992_v34 = vld [vmem:[#allocation2 + $0x41] sm:$0xff] }
 0x46c   :  { %16371 = vmatprep.mubr.msk.f32.mxu0 %vm145_vm0, %v19968_v63  ;;  %6685 = vst.msk [vmem:[#allocation2 + $0x81] sm:$0xff] %vm145_vm0, %v6669_v7  ;;  %6657 = vst.msk [vmem:[#allocation3 + $0x58] sm:$0xff] %vm145_vm0, %v6641_v1  ;;  %v6640_v19 = vmax.f32 %v6624_v3, 0.0  ;;  %v6627_v8 = vadd.f32 %v6611_v31, %v4496_v61  ;;  %v6610_v21 = vadd.f32 %v19876_v56, %v6587_v53  ;;  %16393 = vmatpush3.msra.mxu1 %v22630_v54  ;;  %v19994_v29 = vld [vmem:[#allocation2 + $0x40] sm:$0xff]  ;;  %v7830_v54 = vld [vmem:[#allocation11 + $0xb0] sm:$0xff] }
 0x46d   :  { %v6566_v35 = vadd.f32 %v6543_v12, %v6336_v26  ;;  %16425 = vmatpush3.msra.mxu0 %v22631_v6  ;;  %v6668_v28 = vld [vmem:[#allocation3 + $0x30] sm:$0xff]  ;;  %v6590_v14 = vmul.f32 %v19862_v18, %v6567_v23  ;;  %16394 = vmatprep.subr.mxu1 %v7140_v17  ;;  %v6722_v59 = vld [vmem:[#allocation2 + $0xa1] sm:$0xff] }
 0x46e   :  { %v19981_v11 = vld [vmem:[#allocation2 + $0x31] sm:$0xff]  ;;  %16426 = vmatprep.subr.mxu0 %v7370_v43  ;;  %6684 = vst.msk [vmem:[#allocation2 + $0x71] sm:$0xff] %vm145_vm0, %v6668_v28  ;;  %6656 = vst.msk [vmem:[#allocation3 + $0x50] sm:$0xff] %vm145_vm0, %v6640_v19  ;;  %v6643_v52 = vmax.f32 %v6627_v8, 0.0  ;;  %v6626_v37 = vadd.f32 %v6610_v21, %v4495_v60  ;;  %16395 = vmatpush3.msra.mxu1 %v7140_v17  ;;  %v6702_v4 = vld [vmem:[#allocation2 + $0xa0] sm:$0xff] }
 0x46f   :  { %v19983_v48 = vld [vmem:[#allocation2 + $0x30] sm:$0xff]  ;;  %v6589_v22 = vmul.f32 %v19862_v18, %v6566_v35  ;;  %16340 = vmatmul.mubr.msk.f32.gmra.mxu1 %vm145_vm0, %v19981_v11  ;;  %v6671_v24 = vld [vmem:[#allocation3 + $0x48] sm:$0xff]  ;;  %v6613_v51 = vadd.f32 %v19876_v56, %v6590_v14  ;;  %16427 = vmatpush3.msra.mxu0 %v7370_v43  ;;  %v7831_v39 = vld [vmem:[#allocation11 + $0xb8] sm:$0xff] }
 0x470   :  { %16372 = vmatmul.mubr.msk.f32.gmra.mxu0 %vm145_vm0, %v19983_v48  ;;  %16342 = vmatprep.mubr.msk.f32.mxu1 %vm145_vm0, %v19992_v34  ;;  %6687 = vst.msk [vmem:[#allocation2 + $0xc1] sm:$0xff] %vm145_vm0, %v6671_v24  ;;  %6659 = vst.msk [vmem:[#allocation3 + $0x68] sm:$0xff] %vm145_vm0, %v6643_v52  ;;  %v6642_v18 = vmax.f32 %v6626_v37, 0.0  ;;  %v20015_v36 = vld [vmem:[#allocation2 + $0x60] sm:$0xff]  ;;  %v20099_v60 = vld [vmem:[#allocation2 + $0x12] sm:$0xff] }
 0x471   :  { %16374 = vmatprep.mubr.msk.f32.mxu0 %vm145_vm0, %v19994_v29  ;;  %v6612_v10 = vadd.f32 %v19876_v56, %v6589_v22  ;;  %v6629_v42 = vadd.f32 %v6613_v51, %v4498_v5  ;;  %v20004_v46 = vld [vmem:[#allocation2 + $0x51] sm:$0xff]  ;;  %16396 = vmatprep.subr.mxu1 %v7139_v32  ;;  %v20013_v56 = vld [vmem:[#allocation2 + $0x61] sm:$0xff] }
 0x472   :  { %v20006_v13 = vld [vmem:[#allocation2 + $0x50] sm:$0xff]  ;;  %16428 = vmatprep.subr.mxu0 %v7369_v20  ;;  %v6670_v45 = vld [vmem:[#allocation3 + $0x40] sm:$0xff]  ;;  %6658 = vst.msk [vmem:[#allocation3 + $0x60] sm:$0xff] %vm145_vm0, %v6642_v18  ;;  %16397 = vmatpush3.msra.mxu1 %v7139_v32 }
 0x473   :  { %v6628_v27 = vadd.f32 %v6612_v10, %v4497_v44  ;;  %16343 = vmatmul.mubr.msk.f32.gmra.mxu1 %vm145_vm0, %v20004_v46  ;;  %6686 = vst.msk [vmem:[#allocation2 + $0xb1] sm:$0xff] %vm145_vm0, %v6670_v45  ;;  %v6673_v62 = vld [vmem:[#allocation3 + $0x58] sm:$0xff]  ;;  %v6645_v33 = vmax.f32 %v6629_v42, 0.0  ;;  %16429 = vmatpush3.msra.mxu0 %v7369_v20  ;;  %v7121_v8 = vld [vmem:[#allocation2 + $0x2] sm:$0xff]  ;;  %v7599_v6 = vld [vmem:[#allocation11 + $0x88] sm:$0xff] }
 0x474   :  { %16375 = vmatmul.mubr.msk.f32.gmra.mxu0 %vm145_vm0, %v20006_v13  ;;  %16345 = vmatprep.mubr.msk.f32.mxu1 %vm145_vm0, %v20013_v56  ;;  %6689 = vst.msk [vmem:[#allocation2 + $0xe1] sm:$0xff] %vm145_vm0, %v6673_v62  ;;  %v20105_v21 = vld [vmem:[#allocation2 + $0x22] sm:$0xff]  ;;  %v7600_v35 = vld [vmem:[#allocation11 + $0x90] sm:$0xff]  ;;  %v7829_v28 = vld [vmem:[#allocation11 + $0xa8] sm:$0xff] }
 0x475   :  { %16377 = vmatprep.mubr.msk.f32.mxu0 %vm145_vm0, %v20015_v36  ;;  %v6644_v16 = vmax.f32 %v6628_v27, 0.0  ;;  %v6672_v47 = vld [vmem:[#allocation3 + $0x50] sm:$0xff]  ;;  %6661 = vst.msk [vmem:[#allocation3 + $0x78] sm:$0xff] %vm145_vm0, %v6645_v33  ;;  %16398 = vmatprep.subr.mxu1 %v7138_v41  ;;  %v20117_v32 = vld [vmem:[#allocation2 + $0x42] sm:$0xff]  ;;  %v8061_v18 = vld [vmem:[#allocation11 + $0xd8] sm:$0xff] }
 0x476   :  { %v20024_v30 = vld [vmem:[#allocation2 + $0x71] sm:$0xff]  ;;  %16430 = vmatprep.subr.mxu0 %v7368_v38  ;;  %6688 = vst.msk [vmem:[#allocation2 + $0xd1] sm:$0xff] %vm145_vm0, %v6672_v47  ;;  %16399 = vmatpush3.msra.mxu1 %v7138_v41  ;;  %v20129_v52 = vld [vmem:[#allocation2 + $0x62] sm:$0xff]  ;;  %v8291_v5 = vld [vmem:[#allocation11 + $0xf8] sm:$0xff] }
 0x477   :  { %v20026_v49 = vld [vmem:[#allocation2 + $0x70] sm:$0xff]  ;;  %6660 = vst.msk [vmem:[#allocation3 + $0x70] sm:$0xff] %vm145_vm0, %v6644_v16  ;;  %16346 = vmatmul.mubr.msk.f32.gmra.mxu1 %vm145_vm0, %v20024_v30  ;;  %v6675_v2 = vld [vmem:[#allocation3 + $0x68] sm:$0xff]  ;;  %16431 = vmatpush3.msra.mxu0 %v7368_v38  ;;  %v20048_v57 = vld [vmem:[#allocation2 + $0xc0] sm:$0xff] }
 0x478   :  { %16378 = vmatmul.mubr.msk.f32.gmra.mxu0 %vm145_vm0, %v20026_v49  ;;  %16348 = vmatprep.mubr.msk.f32.mxu1 %vm145_vm0, %v6722_v59  ;;  %6691 = vst.msk [vmem:[#allocation2 + $0x101] sm:$0xff] %vm145_vm0, %v6675_v2  ;;  %v20046_v26 = vld [vmem:[#allocation2 + $0xc1] sm:$0xff]  ;;  %v20123_v14 = vld [vmem:[#allocation2 + $0x52] sm:$0xff]  ;;  %v8289_v59 = vld [vmem:[#allocation11 + $0xe8] sm:$0xff] }
 0x479   :  { %16380 = vmatprep.mubr.msk.f32.mxu0 %vm145_vm0, %v6702_v4  ;;  %v6674_v15 = vld [vmem:[#allocation3 + $0x60] sm:$0xff]  ;;  %16456 = vmatprep.subr.mxu1 %v7601_v50  ;;  %v20135_v24 = vld [vmem:[#allocation2 + $0x72] sm:$0xff] }
 0x47a   :  { %16488 = vmatprep.subr.mxu0 %v7831_v39  ;;  %6690 = vst.msk [vmem:[#allocation2 + $0xf1] sm:$0xff] %vm145_vm0, %v6674_v15  ;;  %v20038_v17 = vld [vmem:[#allocation2 + $0xb1] sm:$0xff]  ;;  %v7598_v37 = vld [vmem:[#allocation11 + $0x80] sm:$0xff]  ;;  %v8521_v2 = vld [vmem:[#allocation11 + $0x118] sm:$0xff] }
 0x47b   :  { %v20040_v0 = vld [vmem:[#allocation2 + $0xb0] sm:$0xff]  ;;  %16349 = vmatmul.mubr.msk.f32.gmra.mxu1 %vm145_vm0, %v20038_v17  ;;  %v20064_v31 = vld [vmem:[#allocation2 + $0xe1] sm:$0xff] }
 0x47c   :  { %16381 = vmatmul.mubr.msk.f32.gmra.mxu0 %vm145_vm0, %v20040_v0  ;;  %v6677_v25 = vld [vmem:[#allocation3 + $0x78] sm:$0xff]  ;;  %16351 = vmatprep.mubr.msk.f32.mxu1 %vm145_vm0, %v20046_v26  ;;  %v20066_v53 = vld [vmem:[#allocation2 + $0xe0] sm:$0xff] }
 0x47d   :  { %16383 = vmatprep.mubr.msk.f32.mxu0 %vm145_vm0, %v20048_v57  ;;  %6693 = vst.msk [vmem:[#allocation2 + $0x121] sm:$0xff] %vm145_vm0, %v6677_v25  ;;  %v20055_v1 = vld [vmem:[#allocation2 + $0xd1] sm:$0xff]  ;;  %v7828_v22 = vld [vmem:[#allocation11 + $0xa0] sm:$0xff] }
 0x47e   :  { %v6676_v58 = vld [vmem:[#allocation3 + $0x70] sm:$0xff]  ;;  %v7129_v20 = vld [vmem:[#allocation2 + $0xa2] sm:$0xff] }
 0x47f   :  { %v20057_v3 = vld [vmem:[#allocation2 + $0xd0] sm:$0xff]  ;;  %6692 = vst.msk [vmem:[#allocation2 + $0x111] sm:$0xff] %vm145_vm0, %v6676_v58  ;;  %16352 = vmatmul.mubr.msk.f32.gmra.mxu1 %vm145_vm0, %v20055_v1  ;;  %v20080_v61 = vld [vmem:[#allocation2 + $0x101] sm:$0xff] }
 0x480   :  { %16384 = vmatmul.mubr.msk.f32.gmra.mxu0 %vm145_vm0, %v20057_v3  ;;  %16354 = vmatprep.mubr.msk.f32.mxu1 %vm145_vm0, %v20064_v31  ;;  %v20082_v23 = vld [vmem:[#allocation2 + $0x100] sm:$0xff]  ;;  %v7130_v44 = vld [vmem:[#allocation2 + $0xb2] sm:$0xff] }
 0x481   :  { %16386 = vmatprep.mubr.msk.f32.mxu0 %vm145_vm0, %v20066_v53  ;;  %v20072_v43 = vld [vmem:[#allocation2 + $0xf1] sm:$0xff]  ;;  %v20137_v51 = vld [vmem:[#allocation2 + $0x80] sm:$0xff] }
 0x482   :  { %v20074_v7 = vld [vmem:[#allocation2 + $0xf0] sm:$0xff]  ;;  %v20149_v10 = vld [vmem:[#allocation2 + $0xc2] sm:$0xff] }
 0x483   :  { %16355 = vmatmul.mubr.msk.f32.gmra.mxu1 %vm145_vm0, %v20072_v43  ;;  %v20155_v41 = vld [vmem:[#allocation2 + $0xd2] sm:$0xff]  ;;  %v20161_v42 = vld [vmem:[#allocation2 + $0xe2] sm:$0xff] }
 0x484   :  { %16387 = vmatmul.mubr.msk.f32.gmra.mxu0 %vm145_vm0, %v20074_v7  ;;  %16357 = vmatprep.mubr.msk.f32.mxu1 %vm145_vm0, %v20080_v61  ;;  %v20167_v38 = vld [vmem:[#allocation2 + $0xf2] sm:$0xff]  ;;  %v20173_v45 = vld [vmem:[#allocation2 + $0x102] sm:$0xff] }
 0x485   :  { %16389 = vmatprep.mubr.msk.f32.mxu0 %vm145_vm0, %v20082_v23  ;;  %v20181_v62 = vld [vmem:[#allocation2 + $0x120] sm:$0xff]  ;;  %v8060_v33 = vld [vmem:[#allocation11 + $0xd0] sm:$0xff] }
 0x486   :  { %v20088_v12 = vld [vmem:[#allocation2 + $0x111] sm:$0xff]  ;;  %v8058_v4 = vld [vmem:[#allocation11 + $0xc0] sm:$0xff] }
 0x487   :  { %v20090_v19 = vld [vmem:[#allocation2 + $0x110] sm:$0xff]  ;;  %16358 = vmatmul.mubr.msk.f32.gmra.mxu1 %vm145_vm0, %v20088_v12  ;;  %v8288_v47 = vld [vmem:[#allocation11 + $0xe0] sm:$0xff] }
 0x488   :  { %16390 = vmatmul.mubr.msk.f32.gmra.mxu0 %vm145_vm0, %v20090_v19  ;;  %16400 = vmatprep.mubr.msk.f32.mxu1 %vm145_vm0, %v7121_v8  ;;  %v20179_v27 = vld [vmem:[#allocation2 + $0x112] sm:$0xff]  ;;  %v7596_v15 = vld [vmem:[#allocation2 + $0x121] sm:$0xff] }
 0x489   :  { %16432 = vmatprep.mubr.msk.f32.mxu0 %vm145_vm0, %v19957_v55  ;;  %v20111_v55 = vld [vmem:[#allocation2 + $0x32] sm:$0xff] }
 0x48a   :  { %v8290_v16 = vld [vmem:[#allocation11 + $0xf0] sm:$0xff] }
 0x48b   :  { %16401 = vmatmul.mubr.msk.f32.vlgmr.msra.gmra.mxu1 %vm145_vm0, %v20099_v60 }
 0x48c   :  { %16433 = vmatmul.mubr.msk.f32.vlgmr.msra.gmra.mxu0 %vm145_vm0, %v19968_v63  ;;  %16403 = vmatprep.mubr.msk.f32.mxu1 %vm145_vm0, %v20105_v21 }
 0x48d   :  { %16435 = vmatprep.mubr.msk.f32.mxu0 %vm145_vm0, %v19983_v48  ;;  %16457 = vmatpush3.msra.mxu1 %v7601_v50  ;;  %v7588_v50 = vld [vmem:[#allocation2 + $0x81] sm:$0xff] }
 0x48e   :  { %16489 = vmatpush3.msra.mxu0 %v7831_v39  ;;  %16458 = vmatprep.subr.mxu1 %v7600_v35  ;;  %v20215_v39 = vld [vmem:[#allocation2 + $0x82] sm:$0xff] }
 0x48f   :  { %16490 = vmatprep.subr.mxu0 %v7830_v54  ;;  %16404 = vmatmul.mubr.msk.f32.gmra.mxu1 %vm145_vm0, %v20111_v55 }
 0x490   :  { %16436 = vmatmul.mubr.msk.f32.gmra.mxu0 %vm145_vm0, %v19994_v29  ;;  %16406 = vmatprep.mubr.msk.f32.mxu1 %vm145_vm0, %v20117_v32 }
 0x491   :  { %16438 = vmatprep.mubr.msk.f32.mxu0 %vm145_vm0, %v20006_v13  ;;  %16459 = vmatpush3.msra.mxu1 %v7600_v35 }
 0x492   :  { %16491 = vmatpush3.msra.mxu0 %v7830_v54  ;;  %16460 = vmatprep.subr.mxu1 %v7599_v6 }
 0x493   :  { %16492 = vmatprep.subr.mxu0 %v7829_v28  ;;  %16407 = vmatmul.mubr.msk.f32.gmra.mxu1 %vm145_vm0, %v20123_v14 }
 0x494   :  { %16439 = vmatmul.mubr.msk.f32.gmra.mxu0 %vm145_vm0, %v20015_v36  ;;  %16409 = vmatprep.mubr.msk.f32.mxu1 %vm145_vm0, %v20129_v52 }
 0x495   :  { %16441 = vmatprep.mubr.msk.f32.mxu0 %vm145_vm0, %v20026_v49  ;;  %16461 = vmatpush3.msra.mxu1 %v7599_v6 }
 0x496   :  { %16493 = vmatpush3.msra.mxu0 %v7829_v28  ;;  %16462 = vmatprep.subr.mxu1 %v7598_v37  ;;  %v8876_v28 = vld [vmem:[#allocation12 + $0x18] sm:$0xff] }
 0x497   :  { %16494 = vmatprep.subr.mxu0 %v7828_v22  ;;  %16410 = vmatmul.mubr.msk.f32.gmra.mxu1 %vm145_vm0, %v20135_v24 }
 0x498   :  { %16442 = vmatmul.mubr.msk.f32.gmra.mxu0 %vm145_vm0, %v20137_v51  ;;  %16412 = vmatprep.mubr.msk.f32.mxu1 %vm145_vm0, %v7129_v20 }
 0x499   :  { %16444 = vmatprep.mubr.msk.f32.mxu0 %vm145_vm0, %v20040_v0  ;;  %16463 = vmatpush3.msra.mxu1 %v7598_v37  ;;  %v8520_v0 = vld [vmem:[#allocation11 + $0x110] sm:$0xff] }
 0x49a   :  { %16495 = vmatpush3.msra.mxu0 %v7828_v22  ;;  %16520 = vmatprep.subr.mxu1 %v8061_v18  ;;  %v8875_v22 = vld [vmem:[#allocation12 + $0x10] sm:$0xff] }
 0x49b   :  { %16552 = vmatprep.subr.mxu0 %v8291_v5  ;;  %16413 = vmatmul.mubr.msk.f32.gmra.mxu1 %vm145_vm0, %v7130_v44 }
 0x49c   :  { %16445 = vmatmul.mubr.msk.f32.gmra.mxu0 %vm145_vm0, %v20048_v57  ;;  %16415 = vmatprep.mubr.msk.f32.mxu1 %vm145_vm0, %v20149_v10 }
 0x49d   :  { %16447 = vmatprep.mubr.msk.f32.mxu0 %vm145_vm0, %v20057_v3 }
 0x49f   :  { %16416 = vmatmul.mubr.msk.f32.gmra.mxu1 %vm145_vm0, %v20155_v41 }
 0x4a0   :  { %16448 = vmatmul.mubr.msk.f32.gmra.mxu0 %vm145_vm0, %v20066_v53  ;;  %16418 = vmatprep.mubr.msk.f32.mxu1 %vm145_vm0, %v20161_v42 }
 0x4a1   :  { %16450 = vmatprep.mubr.msk.f32.mxu0 %vm145_vm0, %v20074_v7 }
 0x4a3   :  { %16419 = vmatmul.mubr.msk.f32.gmra.mxu1 %vm145_vm0, %v20167_v38 }
 0x4a4   :  { %16451 = vmatmul.mubr.msk.f32.gmra.mxu0 %vm145_vm0, %v20082_v23  ;;  %16421 = vmatprep.mubr.msk.f32.mxu1 %vm145_vm0, %v20173_v45 }
 0x4a5   :  { %16453 = vmatprep.mubr.msk.f32.mxu0 %vm145_vm0, %v20090_v19 }
 0x4a7   :  { %16422 = vmatmul.mubr.msk.f32.gmra.mxu1 %vm145_vm0, %v20179_v27 }
 0x4a8   :  { %16454 = vmatmul.mubr.msk.f32.gmra.mxu0 %vm145_vm0, %v20181_v62  ;;  %16464 = vmatprep.mubr.msk.f32.mxu1 %vm145_vm0, %v19955_v40  ;;  %v8059_v40 = vld [vmem:[#allocation11 + $0xc8] sm:$0xff] }
 0x4a9   :  { %16496 = vmatprep.mubr.msk.f32.mxu0 %vm145_vm0, %v20099_v60 }
 0x4ab   :  { %16465 = vmatmul.mubr.msk.f32.vlgmr.msra.gmra.mxu1 %vm145_vm0, %v19966_v9 }
 0x4ac   :  { %16497 = vmatmul.mubr.msk.f32.vlgmr.msra.gmra.mxu0 %vm145_vm0, %v20105_v21  ;;  %16467 = vmatprep.mubr.msk.f32.mxu1 %vm145_vm0, %v19981_v11 }
 0x4ad   :  { %16499 = vmatprep.mubr.msk.f32.mxu0 %vm145_vm0, %v20111_v55  ;;  %16521 = vmatpush3.msra.mxu1 %v8061_v18  ;;  %v8895_v18 = vld [vmem:[#allocation12 + $0x28] sm:$0xff] }
 0x4ae   :  { %16553 = vmatpush3.msra.mxu0 %v8291_v5  ;;  %16522 = vmatprep.subr.mxu1 %v8060_v33  ;;  %v8874_v5 = vld [vmem:[#allocation12 + $0x8] sm:$0xff] }
 0x4af   :  { %16554 = vmatprep.subr.mxu0 %v8290_v16  ;;  %16468 = vmatmul.mubr.msk.f32.gmra.mxu1 %vm145_vm0, %v19992_v34 }
 0x4b0   :  { %16500 = vmatmul.mubr.msk.f32.gmra.mxu0 %vm145_vm0, %v20117_v32  ;;  %16470 = vmatprep.mubr.msk.f32.mxu1 %vm145_vm0, %v20004_v46 }
 0x4b1   :  { %16502 = vmatprep.mubr.msk.f32.mxu0 %vm145_vm0, %v20123_v14  ;;  %16523 = vmatpush3.msra.mxu1 %v8060_v33 }
 0x4b2   :  { %16555 = vmatpush3.msra.mxu0 %v8290_v16  ;;  %16524 = vmatprep.subr.mxu1 %v8059_v40 }
 0x4b3   :  { %16556 = vmatprep.subr.mxu0 %v8289_v59  ;;  %16471 = vmatmul.mubr.msk.f32.gmra.mxu1 %vm145_vm0, %v20013_v56 }
 0x4b4   :  { %16503 = vmatmul.mubr.msk.f32.gmra.mxu0 %vm145_vm0, %v20129_v52  ;;  %16473 = vmatprep.mubr.msk.f32.mxu1 %vm145_vm0, %v20024_v30 }
 0x4b5   :  { %16505 = vmatprep.mubr.msk.f32.mxu0 %vm145_vm0, %v20135_v24  ;;  %16525 = vmatpush3.msra.mxu1 %v8059_v40 }
 0x4b6   :  { %16557 = vmatpush3.msra.mxu0 %v8289_v59  ;;  %16526 = vmatprep.subr.mxu1 %v8058_v4 }
 0x4b7   :  { %16558 = vmatprep.subr.mxu0 %v8288_v47  ;;  %16474 = vmatmul.mubr.msk.f32.gmra.mxu1 %vm145_vm0, %v7588_v50 }
 0x4b8   :  { %16506 = vmatmul.mubr.msk.f32.gmra.mxu0 %vm145_vm0, %v20215_v39  ;;  %16476 = vmatprep.mubr.msk.f32.mxu1 %vm145_vm0, %v20038_v17  ;;  %v20247_v17 = vld [vmem:[#allocation2 + $0x122] sm:$0xff] }
 0x4b9   :  { %16508 = vmatprep.mubr.msk.f32.mxu0 %vm145_vm0, %v7130_v44  ;;  %16527 = vmatpush3.msra.mxu1 %v8058_v4 }
 0x4ba   :  { %16559 = vmatpush3.msra.mxu0 %v8288_v47  ;;  %16584 = vmatprep.subr.mxu1 %v8521_v2 }
 0x4bb   :  { %16477 = vmatmul.mubr.msk.f32.gmra.mxu1 %vm145_vm0, %v20046_v26 }
 0x4bc   :  { %16509 = vmatmul.mubr.msk.f32.gmra.mxu0 %vm145_vm0, %v20149_v10  ;;  %16479 = vmatprep.mubr.msk.f32.mxu1 %vm145_vm0, %v20055_v1 }
 0x4bd   :  { %16511 = vmatprep.mubr.msk.f32.mxu0 %vm145_vm0, %v20155_v41 }
 0x4bf   :  { %16480 = vmatmul.mubr.msk.f32.gmra.mxu1 %vm145_vm0, %v20064_v31 }
 0x4c0   :  { %16512 = vmatmul.mubr.msk.f32.gmra.mxu0 %vm145_vm0, %v20161_v42  ;;  %16482 = vmatprep.mubr.msk.f32.mxu1 %vm145_vm0, %v20072_v43 }
 0x4c1   :  { %16514 = vmatprep.mubr.msk.f32.mxu0 %vm145_vm0, %v20167_v38 }
 0x4c3   :  { %16483 = vmatmul.mubr.msk.f32.gmra.mxu1 %vm145_vm0, %v20080_v61 }
 0x4c4   :  { %16515 = vmatmul.mubr.msk.f32.gmra.mxu0 %vm145_vm0, %v20173_v45  ;;  %16485 = vmatprep.mubr.msk.f32.mxu1 %vm145_vm0, %v20088_v12 }
 0x4c5   :  { %16517 = vmatprep.mubr.msk.f32.mxu0 %vm145_vm0, %v20179_v27 }
 0x4c7   :  { %16486 = vmatmul.mubr.msk.f32.gmra.mxu1 %vm145_vm0, %v7596_v15 }
 0x4c8   :  { %16518 = vmatmul.mubr.msk.f32.gmra.mxu0 %vm145_vm0, %v20247_v17  ;;  %16528 = vmatprep.mubr.msk.f32.mxu1 %vm145_vm0, %v19968_v63  ;;  %v8518_v63 = vld [vmem:[#allocation11 + $0x100] sm:$0xff] }
 0x4c9   :  { %16560 = vmatprep.mubr.msk.f32.mxu0 %vm145_vm0, %v19966_v9  ;;  %v8519_v9 = vld [vmem:[#allocation11 + $0x108] sm:$0xff] }
 0x4cb   :  { %16529 = vmatmul.mubr.msk.f32.vlgmr.msra.gmra.mxu1 %vm145_vm0, %v19983_v48  ;;  %v8278_v48 = vld [vmem:[#allocation2 + $0x91] sm:$0xff] }
 0x4cc   :  { %16561 = vmatmul.mubr.msk.f32.vlgmr.msra.gmra.mxu0 %vm145_vm0, %v19981_v11  ;;  %16531 = vmatprep.mubr.msk.f32.mxu1 %vm145_vm0, %v19994_v29  ;;  %v8048_v11 = vld [vmem:[#allocation2 + $0x90] sm:$0xff] }
 0x4cd   :  { %16563 = vmatprep.mubr.msk.f32.mxu0 %vm145_vm0, %v19992_v34  ;;  %16585 = vmatpush3.msra.mxu1 %v8521_v2  ;;  %v8056_v34 = vld [vmem:[#allocation2 + $0x130] sm:$0xff] }
 0x4ce   :  { %16586 = vmatprep.subr.mxu1 %v8520_v0  ;;  %v8286_v29 = vld [vmem:[#allocation2 + $0x131] sm:$0xff] }
 0x4cf   :  { %16532 = vmatmul.mubr.msk.f32.gmra.mxu1 %vm145_vm0, %v20006_v13  ;;  %v8516_v13 = vld [vmem:[#allocation2 + $0x132] sm:$0xff] }
 0x4d0   :  { %16564 = vmatmul.mubr.msk.f32.gmra.mxu0 %vm145_vm0, %v20004_v46  ;;  %16534 = vmatprep.mubr.msk.f32.mxu1 %vm145_vm0, %v20015_v36  ;;  %v8508_v46 = vld [vmem:[#allocation2 + $0x92] sm:$0xff] }
 0x4d1   :  { %16566 = vmatprep.mubr.msk.f32.mxu0 %vm145_vm0, %v20013_v56  ;;  %16587 = vmatpush3.msra.mxu1 %v8520_v0  ;;  %v8897_v56 = vld [vmem:[#allocation12 + $0x38] sm:$0xff] }
 0x4d2   :  { %16588 = vmatprep.subr.mxu1 %v8519_v9  ;;  %16616 = vmatprep.subr.mxu0 %v8897_v56 }
 0x4d3   :  { %16535 = vmatmul.mubr.msk.f32.gmra.mxu1 %vm145_vm0, %v20026_v49  ;;  %16617 = vmatpush3.msra.mxu0 %v8897_v56 }
 0x4d4   :  { %16567 = vmatmul.mubr.msk.f32.gmra.mxu0 %vm145_vm0, %v20024_v30  ;;  %16537 = vmatprep.mubr.msk.f32.mxu1 %vm145_vm0, %v20137_v51 }
 0x4d5   :  { %16569 = vmatprep.mubr.msk.f32.mxu0 %vm145_vm0, %v7588_v50  ;;  %16589 = vmatpush3.msra.mxu1 %v8519_v9 }
 0x4d6   :  { %16590 = vmatprep.subr.mxu1 %v8518_v63 }
 0x4d7   :  { %16538 = vmatmul.mubr.msk.f32.gmra.mxu1 %vm145_vm0, %v8048_v11 }
 0x4d8   :  { %16570 = vmatmul.mubr.msk.f32.gmra.mxu0 %vm145_vm0, %v8278_v48  ;;  %16540 = vmatprep.mubr.msk.f32.mxu1 %vm145_vm0, %v20048_v57 }
 0x4d9   :  { %16572 = vmatprep.mubr.msk.f32.mxu0 %vm145_vm0, %v20046_v26  ;;  %16591 = vmatpush3.msra.mxu1 %v8518_v63 }
 0x4da   :  { %16648 = vmatprep.subr.mxu1 %v8876_v28 }
 0x4db   :  { %16541 = vmatmul.mubr.msk.f32.gmra.mxu1 %vm145_vm0, %v20057_v3 }
 0x4dc   :  { %16573 = vmatmul.mubr.msk.f32.gmra.mxu0 %vm145_vm0, %v20055_v1  ;;  %16543 = vmatprep.mubr.msk.f32.mxu1 %vm145_vm0, %v20066_v53 }
 0x4dd   :  { %16575 = vmatprep.mubr.msk.f32.mxu0 %vm145_vm0, %v20064_v31 }
 0x4df   :  { %16544 = vmatmul.mubr.msk.f32.gmra.mxu1 %vm145_vm0, %v20074_v7 }
 0x4e0   :  { %16576 = vmatmul.mubr.msk.f32.gmra.mxu0 %vm145_vm0, %v20072_v43  ;;  %16546 = vmatprep.mubr.msk.f32.mxu1 %vm145_vm0, %v20082_v23 }
 0x4e1   :  { %16578 = vmatprep.mubr.msk.f32.mxu0 %vm145_vm0, %v20080_v61 }
 0x4e3   :  { %16547 = vmatmul.mubr.msk.f32.gmra.mxu1 %vm145_vm0, %v20090_v19 }
 0x4e4   :  { %16579 = vmatmul.mubr.msk.f32.gmra.mxu0 %vm145_vm0, %v20088_v12  ;;  %16549 = vmatprep.mubr.msk.f32.mxu1 %vm145_vm0, %v20181_v62 }
 0x4e5   :  { %16581 = vmatprep.mubr.msk.f32.mxu0 %vm145_vm0, %v7596_v15 }
 0x4e7   :  { %16550 = vmatmul.mubr.msk.f32.gmra.mxu1 %vm145_vm0, %v8056_v34 }
 0x4e8   :  { %16582 = vmatmul.mubr.msk.f32.gmra.mxu0 %vm145_vm0, %v8286_v29  ;;  %16592 = vmatprep.mubr.msk.f32.mxu1 %vm145_vm0, %v20105_v21 }
 0x4eb   :  { %16593 = vmatmul.mubr.msk.f32.vlgmr.msra.gmra.mxu1 %vm145_vm0, %v20111_v55 }
 0x4ec   :  { %16595 = vmatprep.mubr.msk.f32.mxu1 %vm145_vm0, %v20117_v32  ;;  %16649 = vmatpush3.msra.mxu1 %v8876_v28 }
 0x4ed   :  { %16650 = vmatprep.subr.mxu1 %v8875_v22 }
 0x4ee   :  { %16651 = vmatpush3.msra.mxu1 %v8875_v22 }
 0x4ef   :  { %16596 = vmatmul.mubr.msk.f32.gmra.mxu1 %vm145_vm0, %v20123_v14  ;;  %v8896_v14 = vld [vmem:[#allocation12 + $0x30] sm:$0xff]  ;;  %16652 = vmatprep.subr.mxu1 %v8874_v5 }
 0x4f0   :  { %16598 = vmatprep.mubr.msk.f32.mxu1 %vm145_vm0, %v20129_v52  ;;  %16618 = vmatprep.subr.mxu0 %v8896_v14 }
 0x4f1   :  { %16619 = vmatpush3.msra.mxu0 %v8896_v14  ;;  %16653 = vmatpush3.msra.mxu1 %v8874_v5 }
 0x4f2   :  { %16620 = vmatprep.subr.mxu0 %v8895_v18 }
 0x4f3   :  { %16599 = vmatmul.mubr.msk.f32.gmra.mxu1 %vm145_vm0, %v20135_v24  ;;  %16621 = vmatpush3.msra.mxu0 %v8895_v18 }
 0x4f4   :  { %16601 = vmatprep.mubr.msk.f32.mxu1 %vm145_vm0, %v20215_v39 }
 0x4f7   :  { %16602 = vmatmul.mubr.msk.f32.gmra.mxu1 %vm145_vm0, %v8508_v46 }
 0x4f8   :  { %16604 = vmatprep.mubr.msk.f32.mxu1 %vm145_vm0, %v20149_v10 }
 0x4fb   :  { %16605 = vmatmul.mubr.msk.f32.gmra.mxu1 %vm145_vm0, %v20155_v41  ;;  %v8894_v41 = vld [vmem:[#allocation12 + $0x20] sm:$0xff] }
 0x4fc   :  { %16607 = vmatprep.mubr.msk.f32.mxu1 %vm145_vm0, %v20161_v42  ;;  %v8873_v42 = vld [vmem:[#allocation12] sm:$0xff]  ;;  %16622 = vmatprep.subr.mxu0 %v8894_v41 }
 0x4fd   :  { %16654 = vmatprep.subr.mxu1 %v8873_v42  ;;  %16623 = vmatpush3.msra.mxu0 %v8894_v41 }
 0x4fe   :  { %16655 = vmatpush3.msra.mxu1 %v8873_v42 }
 0x4ff   :  { %16608 = vmatmul.mubr.msk.f32.gmra.mxu1 %vm145_vm0, %v20167_v38 }
 0x500   :  { %16610 = vmatprep.mubr.msk.f32.mxu1 %vm145_vm0, %v20173_v45  ;;  %v8877_v45 = vld [vmem:[#allocation2 + $0x1] sm:$0xff] }
 0x501   :  { %16624 = vmatprep.mubr.msk.f32.mxu0 %vm145_vm0, %v8877_v45 }
 0x503   :  { %16611 = vmatmul.mubr.msk.f32.gmra.mxu1 %vm145_vm0, %v20179_v27  ;;  %v8857_v27 = vld [vmem:[#allocation2] sm:$0xff] }
 0x504   :  { %16613 = vmatprep.mubr.msk.f32.mxu1 %vm145_vm0, %v20247_v17 }
 0x507   :  { %16614 = vmatmul.mubr.msk.f32.gmra.mxu1 %vm145_vm0, %v8516_v13 }
 0x508   :  { %16656 = vmatprep.mubr.msk.f32.mxu1 %vm145_vm0, %v8857_v27 }
 0x52a   :  { %v16338_v36 = vpop.f32.mrf.mxu1 }
 0x52b   :  { %v16370_v30 = vpop.f32.mrf.mxu0 }
 0x52c   :  { %v20340_v49 = vadd.f32 %v16370_v30, %v16338_v36  ;;  %v20342_v26 = vpop.f32.mrf.mxu1  ;;  %v20413_v36 = vld [vmem:[#allocation12 + $0x58] sm:$0xff] }
 0x52d   :  { %v20344_v57 = vpop.f32.mrf.mxu0  ;;  %22632 = vst [vmem:[#allocation40_spill] sm:$0xff] %v20413_v36  ;;  %16680 = vmatprep.subr.mxu0 %v20413_v36 }
 0x52f   :  { %v16341_v25 = vpop.f32.mrf.mxu1 }
 0x530   :  { %v16373_v58 = vpop.f32.mrf.mxu0 }
 0x531   :  { %v20346_v1 = vadd.f32 %v16373_v58, %v16341_v25  ;;  %v20348_v3 = vpop.f32.mrf.mxu1 }
 0x532   :  { %v20350_v31 = vpop.f32.mrf.mxu0 }
 0x533   :  { %v16344_v53 = vpop.f32.mrf.mxu1 }
 0x534   :  { %v16376_v43 = vpop.f32.mrf.mxu0 }
 0x535   :  { %v20352_v7 = vadd.f32 %v16376_v43, %v16344_v53  ;;  %v20354_v61 = vpop.f32.mrf.mxu1 }
 0x536   :  { %v20356_v23 = vpop.f32.mrf.mxu0 }
 0x537   :  { %v16347_v12 = vpop.f32.mrf.mxu1 }
 0x538   :  { %v16379_v19 = vpop.f32.mrf.mxu0 }
 0x539   :  { %v20358_v8 = vadd.f32 %v16379_v19, %v16347_v12  ;;  %v20360_v60 = vpop.f32.mrf.mxu1 }
 0x53a   :  { %v20362_v21 = vpop.f32.mrf.mxu0 }
 0x53b   :  { %v16350_v35 = vpop.f32.mrf.mxu1 }
 0x53c   :  { %v16382_v54 = vpop.f32.mrf.mxu0 }
 0x53d   :  { %v20364_v55 = vadd.f32 %v16382_v54, %v16350_v35  ;;  %v20366_v32 = vpop.f32.mrf.mxu1  ;;  %v20434_v35 = vld [vmem:[#allocation12 + $0x78] sm:$0xff] }
 0x53e   :  { %v20368_v6 = vpop.f32.mrf.mxu0  ;;  %22633 = vst [vmem:[#allocation41_spill] sm:$0xff] %v20434_v35  ;;  %16712 = vmatprep.subr.mxu1 %v20434_v35 }
 0x53f   :  { %v16353_v52 = vpop.f32.mrf.mxu1 }
 0x540   :  { %v16385_v37 = vpop.f32.mrf.mxu0 }
 0x541   :  { %v20370_v20 = vadd.f32 %v16385_v37, %v16353_v52  ;;  %v20372_v24 = vpop.f32.mrf.mxu1 }
 0x542   :  { %v20374_v51 = vpop.f32.mrf.mxu0 }
 0x543   :  { %v16356_v44 = vpop.f32.mrf.mxu1 }
 0x544   :  { %v16388_v10 = vpop.f32.mrf.mxu0 }
 0x545   :  { %v7108_v38 = vadd.f32 %v16388_v10, %v16356_v44  ;;  %v20376_v62 = vpop.f32.mrf.mxu1 }
 0x546   :  { %v20378_v33 = vpop.f32.mrf.mxu0 }
 0x547   :  { %v16359_v16 = vpop.f32.mrf.mxu1 }
 0x548   :  { %v16391_v40 = vpop.f32.mrf.mxu0 }
 0x549   :  { %v7118_v59 = vadd.f32 %v16391_v40, %v16359_v16  ;;  %v20382_v4 = vpop.f32.mrf.mxu1 }
 0x54a   :  { %v20384_v47 = vpop.f32.mrf.mxu0 }
 0x54b   :  { %v16402_v50 = vpop.f32.mrf.mxu1 }
 0x54c   :  { %v20386_v39 = vpop.f32.mrf.mxu0  ;;  %v20389_v2 = vadd.f32 %v16402_v50, %v20340_v49 }
 0x54d   :  { %v20391_v15 = vpop.f32.mrf.mxu1 }
 0x54e   :  { %v20393_v17 = vpop.f32.mrf.mxu0 }
 0x54f   :  { %v16405_v0 = vpop.f32.mrf.mxu1 }
 0x550   :  { %v20395_v9 = vpop.f32.mrf.mxu0  ;;  %v20398_v63 = vadd.f32 %v16405_v0, %v20346_v1 }
 0x551   :  { %v20400_v11 = vpop.f32.mrf.mxu1 }
 0x552   :  { %v20402_v48 = vpop.f32.mrf.mxu0 }
 0x553   :  { %v16408_v34 = vpop.f32.mrf.mxu1 }
 0x554   :  { %v20404_v29 = vpop.f32.mrf.mxu0  ;;  %v20407_v46 = vadd.f32 %v16408_v34, %v20352_v7 }
 0x555   :  { %v20409_v13 = vpop.f32.mrf.mxu1 }
 0x556   :  { %v20411_v56 = vpop.f32.mrf.mxu0 }
 0x557   :  { %v16411_v30 = vpop.f32.mrf.mxu1 }
 0x558   :  { %v20415_v49 = vpop.f32.mrf.mxu0  ;;  %v20419_v25 = vadd.f32 %v16411_v30, %v20358_v8 }
 0x559   :  { %v20421_v58 = vpop.f32.mrf.mxu1 }
 0x55a   :  { %v20423_v1 = vpop.f32.mrf.mxu0 }
 0x55b   :  { %v16414_v53 = vpop.f32.mrf.mxu1 }
 0x55c   :  { %v20425_v43 = vpop.f32.mrf.mxu0  ;;  %v20428_v7 = vadd.f32 %v16414_v53, %v20364_v55 }
 0x55d   :  { %v20430_v12 = vpop.f32.mrf.mxu1 }
 0x55e   :  { %v20432_v19 = vpop.f32.mrf.mxu0 }
 0x55f   :  { %v16417_v8 = vpop.f32.mrf.mxu1 }
 0x560   :  { %v20437_v54 = vpop.f32.mrf.mxu0  ;;  %v20440_v28 = vadd.f32 %v16417_v8, %v20370_v20 }
 0x561   :  { %v20442_v14 = vpop.f32.mrf.mxu1 }
 0x562   :  { %v20444_v52 = vpop.f32.mrf.mxu0 }
 0x563   :  { %22634 = vst [vmem:[#allocation19_spill] sm:$0xff] %v20444_v52  ;;  %v16420_v55 = vpop.f32.mrf.mxu1 }
 0x564   :  { %v20446_v37 = vpop.f32.mrf.mxu0  ;;  %v20448_v22 = vadd.f32 %v16420_v55, %v7108_v38 }
 0x565   :  { %22635 = vst [vmem:[#allocation38_spill] sm:$0xff] %v20446_v37  ;;  %v20450_v18 = vpop.f32.mrf.mxu1 }
 0x566   :  { %22636 = vst [vmem:[#allocation49_spill] sm:$0xff] %v20448_v22  ;;  %v20452_v5 = vpop.f32.mrf.mxu0 }
 0x567   :  { %22637 = vst [vmem:[#allocation33_spill] sm:$0xff] %v20452_v5  ;;  %v16423_v44 = vpop.f32.mrf.mxu1 }
 0x568   :  { %v20454_v10 = vpop.f32.mrf.mxu0  ;;  %v20456_v41 = vadd.f32 %v16423_v44, %v7118_v59 }
 0x569   :  { %22638 = vst [vmem:[#allocation29_spill] sm:$0xff] %v20454_v10  ;;  %v20458_v20 = vpop.f32.mrf.mxu1 }
 0x56a   :  { %22639 = vst [vmem:[#allocation24_spill] sm:$0xff] %v20456_v41  ;;  %22640 = vst [vmem:[#allocation31_spill] sm:$0xff] %v20458_v20  ;;  %v20460_v42 = vpop.f32.mrf.mxu0 }
 0x56b   :  { %22641 = vst [vmem:[#allocation20_spill] sm:$0xff] %v20460_v42  ;;  %v16466_v45 = vpop.f32.mrf.mxu1 }
 0x56c   :  { %v20462_v27 = vpop.f32.mrf.mxu0 }
 0x56d   :  { %v7716_v16 = vpop.f32.mrf.mxu1 }
 0x56e   :  { %v20464_v40 = vpop.f32.mrf.mxu0 }
 0x56f   :  { %v20466_v38 = vpop.f32.mrf.mxu1 }
 0x570   :  { %v20468_v50 = vpop.f32.mrf.mxu0 }
 0x571   :  { %v20470_v0 = vpop.f32.mrf.mxu1 }
 0x572   :  { %v20472_v34 = vpop.f32.mrf.mxu0 }
 0x573   :  { %v20474_v59 = vpop.f32.mrf.mxu1 }
 0x574   :  { %v20476_v30 = vpop.f32.mrf.mxu0 }
 0x575   :  { %22642 = vst [vmem:[#allocation28_spill] sm:$0xff] %v20476_v30  ;;  %v20478_v53 = vpop.f32.mrf.mxu1 }
 0x576   :  { %v20480_v8 = vpop.f32.mrf.mxu0 }
 0x577   :  { %22643 = vst [vmem:[#allocation23_spill] sm:$0xff] %v20480_v8  ;;  %v20482_v55 = vpop.f32.mrf.mxu1 }
 0x578   :  { %22644 = vst [vmem:[#allocation35_spill] sm:$0xff] %v20482_v55  ;;  %v20484_v44 = vpop.f32.mrf.mxu0 }
 0x579   :  { %22645 = vst [vmem:[#allocation50_spill] sm:$0xff] %v20484_v44  ;;  %v20486_v35 = vpop.f32.mrf.mxu1 }
 0x57a   :  { %22646 = vst [vmem:[#allocation51_spill] sm:$0xff] %v20486_v35  ;;  %v20488_v36 = vpop.f32.mrf.mxu0 }
 0x57b   :  { %22647 = vst [vmem:[#allocation42_spill] sm:$0xff] %v20488_v36  ;;  %v20490_v42 = vpop.f32.mrf.mxu1 }
 0x57c   :  { %22648 = vst [vmem:[#allocation26_spill] sm:$0xff] %v20490_v42  ;;  %v20492_v10 = vpop.f32.mrf.mxu0 }
 0x57d   :  { %22649 = vst [vmem:[#allocation54_spill] sm:$0xff] %v20492_v10  ;;  %v20494_v41 = vpop.f32.mrf.mxu1 }
 0x57e   :  { %22650 = vst [vmem:[#allocation52_spill] sm:$0xff] %v20494_v41  ;;  %v20496_v5 = vpop.f32.mrf.mxu0 }
 0x57f   :  { %22651 = vst [vmem:[#allocation48_spill] sm:$0xff] %v20496_v5  ;;  %v20498_v37 = vpop.f32.mrf.mxu1 }
 0x580   :  { %22652 = vst [vmem:[#allocation39_spill] sm:$0xff] %v20498_v37  ;;  %v20500_v22 = vpop.f32.mrf.mxu0 }
 0x581   :  { %22653 = vst [vmem:[#allocation53_spill] sm:$0xff] %v20500_v22  ;;  %v20502_v8 = vpop.f32.mrf.mxu1 }
 0x582   :  { %22654 = vst [vmem:[#allocation36_spill] sm:$0xff] %v20502_v8  ;;  %v20504_v55 = vpop.f32.mrf.mxu0 }
 0x583   :  { %22655 = vst [vmem:[#allocation34_spill] sm:$0xff] %v20504_v55  ;;  %v20506_v44 = vpop.f32.mrf.mxu1 }
 0x584   :  { %22656 = vst [vmem:[#allocation44_spill] sm:$0xff] %v20506_v44  ;;  %v20508_v35 = vpop.f32.mrf.mxu0 }
 0x585   :  { %22657 = vst [vmem:[#allocation46_spill] sm:$0xff] %v20508_v35  ;;  %v20510_v36 = vpop.f32.mrf.mxu1 }
 0x586   :  { %22658 = vst [vmem:[#allocation55_spill] sm:$0xff] %v20510_v36  ;;  %v20512_v42 = vpop.f32.mrf.mxu0 }
 0x587   :  { %22659 = vst [vmem:[#allocation18_spill] sm:$0xff] %v20512_v42  ;;  %v20514_v10 = vpop.f32.mrf.mxu1 }
 0x588   :  { %22660 = vst [vmem:[#allocation32_spill] sm:$0xff] %v20514_v10  ;;  %v20516_v41 = vpop.f32.mrf.mxu0 }
 0x589   :  { %22661 = vst [vmem:[#allocation25_spill] sm:$0xff] %v20516_v41  ;;  %v20518_v5 = vpop.f32.mrf.mxu1 }
 0x58a   :  { %22662 = vst [vmem:[#allocation57_spill] sm:$0xff] %v20518_v5  ;;  %v20520_v37 = vpop.f32.mrf.mxu0 }
 0x58b   :  { %22663 = vst [vmem:[#allocation43_spill] sm:$0xff] %v20520_v37  ;;  %v16530_v22 = vpop.f32.mrf.mxu1  ;;  %v7043_v37 = vadd.f32 %v20344_v57, %v20342_v26 }
 0x58c   :  { %v16562_v8 = vpop.f32.mrf.mxu0 }
 0x58d   :  { %v8176_v30 = vpop.f32.mrf.mxu1 }
 0x58e   :  { %v20522_v55 = vpop.f32.mrf.mxu0 }
 0x58f   :  { %22664 = vst [vmem:[#allocation56_spill] sm:$0xff] %v20522_v55  ;;  %v16533_v44 = vpop.f32.mrf.mxu1 }
 0x590   :  { %v20526_v35 = vpop.f32.mrf.mxu0 }
 0x591   :  { %v20524_v20 = vpop.f32.mrf.mxu1  ;;  %22666 = vst [vmem:[#allocation30_spill] sm:$0xff] %v20526_v35 }
 0x592   :  { %22665 = vst [vmem:[#allocation22_spill] sm:$0xff] %v20524_v20  ;;  %v20532_v10 = vpop.f32.mrf.mxu0  ;;  %v7335_v20 = vadd.f32 %v20391_v15, %v7043_v37  ;;  %v7063_v15 = vadd.f32 %v20356_v23, %v20354_v61 }
 0x593   :  { %v20528_v36 = vpop.f32.mrf.mxu1  ;;  %22668 = vst [vmem:[#allocation47_spill] sm:$0xff] %v20532_v10  ;;  %v7566_v10 = vadd.f32 %v20386_v39, %v20389_v2 }
 0x594   :  { %v20540_v52 = vpop.f32.mrf.mxu0  ;;  %v7565_v26 = vadd.f32 %v20393_v17, %v7335_v20  ;;  %v7083_v17 = vadd.f32 %v20368_v6, %v20366_v32 }
 0x595   :  { %v20530_v42 = vpop.f32.mrf.mxu1  ;;  %22671 = vst [vmem:[#allocation27_spill] sm:$0xff] %v20540_v52  ;;  %v7796_v52 = vadd.f32 %v16466_v45, %v7566_v10  ;;  %v7574_v45 = vadd.f32 %v20425_v43, %v20428_v7  ;;  %v22673_v43 = vld [vmem:[#allocation31_spill] sm:$0xff] }
 0x596   :  { %22667 = vst [vmem:[#allocation45_spill] sm:$0xff] %v20530_v42  ;;  %v7053_v42 = vadd.f32 %v20350_v31, %v20348_v3  ;;  %v7073_v3 = vadd.f32 %v20362_v21, %v20360_v60  ;;  %v7568_v31 = vadd.f32 %v20395_v9, %v20398_v63  ;;  %v7795_v39 = vadd.f32 %v7716_v16, %v7565_v26 }
 0x597   :  { %v20534_v41 = vpop.f32.mrf.mxu1  ;;  %v8026_v20 = vadd.f32 %v20462_v27, %v7796_v52  ;;  %v7093_v21 = vadd.f32 %v20374_v51, %v20372_v24  ;;  %v7570_v9 = vadd.f32 %v20404_v29, %v20407_v46  ;;  %v7343_v32 = vadd.f32 %v20430_v12, %v7083_v17  ;;  %v22682_v17 = vld [vmem:[#allocation51_spill] sm:$0xff] }
 0x598   :  { %22669 = vst [vmem:[#allocation21_spill] sm:$0xff] %v20534_v41  ;;  %v20551_v41 = vpop.f32.mrf.mxu0  ;;  %v7337_v57 = vadd.f32 %v20400_v11, %v7053_v42  ;;  %v7339_v11 = vadd.f32 %v20409_v13, %v7063_v15  ;;  %v7341_v23 = vadd.f32 %v20421_v58, %v7073_v3  ;;  %v7798_v60 = vadd.f32 %v20466_v38, %v7568_v31  ;;  %v22680_v15 = vld [vmem:[#allocation33_spill] sm:$0xff]  ;;  %v22681_v31 = vld [vmem:[#allocation23_spill] sm:$0xff] }
 0x599   :  { %v20536_v5 = vpop.f32.mrf.mxu1  ;;  %v7103_v63 = vadd.f32 %v20378_v33, %v20376_v62  ;;  %v8256_v58 = vadd.f32 %v16530_v22, %v8026_v20  ;;  %v7113_v24 = vadd.f32 %v20384_v47, %v20382_v4  ;;  %v7345_v29 = vadd.f32 %v20442_v14, %v7093_v21  ;;  %v22684_v21 = vld [vmem:[#allocation29_spill] sm:$0xff] }
 0x59a   :  { %22670 = vst [vmem:[#allocation37_spill] sm:$0xff] %v20536_v5  ;;  %v20565_v2 = vpop.f32.mrf.mxu0  ;;  %v7567_v61 = vadd.f32 %v20402_v48, %v7337_v57  ;;  %v8025_v48 = vadd.f32 %v20464_v40, %v7795_v39  ;;  %v7569_v51 = vadd.f32 %v20411_v56, %v7339_v11  ;;  %v7800_v46 = vadd.f32 %v20474_v59, %v7570_v9  ;;  %v22672_v40 = vld [vmem:[#allocation19_spill] sm:$0xff] }
 0x59b   :  { %v20542_v55 = vpop.f32.mrf.mxu1  ;;  %v7572_v62 = vadd.f32 %v20415_v49, %v20419_v25  ;;  %v7571_v33 = vadd.f32 %v20423_v1, %v7341_v23  ;;  %v8028_v22 = vadd.f32 %v20468_v50, %v7798_v60  ;;  %v7573_v4 = vadd.f32 %v20432_v19, %v7343_v32  ;;  %v22674_v19 = vld [vmem:[#allocation28_spill] sm:$0xff]  ;;  %v20632_v23 = vld [vmem:[%s22366_s12] ss:$0 sm:$0xff]  ;;  %v22685_v32 = vld [vmem:[#allocation30_spill] sm:$0xff] }
 0x59c   :  { %v7797_v13 = vadd.f32 %v20470_v0, %v7567_v61  ;;  %v20587_v52 = vpop.f32.mrf.mxu0  ;;  %v8255_v42 = vadd.f32 %v8176_v30, %v8025_v48  ;;  %v7347_v47 = vadd.f32 %v20450_v18, %v7103_v63  ;;  %v7799_v56 = vadd.f32 %v20478_v53, %v7569_v51  ;;  %v22675_v18 = vld [vmem:[#allocation35_spill] sm:$0xff]  ;;  %v20619_v30 = vld [vmem:[%s22365_s11] ss:$0 sm:$0xff]  ;;  %v22678_v53 = vld [vmem:[#allocation56_spill] sm:$0xff] }
 0x59d   :  { %v20545_v35 = vpop.f32.mrf.mxu1  ;;  %v7576_v27 = vadd.f32 %v20437_v54, %v20440_v28  ;;  %v8486_v25 = vadd.f32 %v16562_v8, %v8256_v58  ;;  %v8258_v1 = vadd.f32 %v16533_v44, %v8028_v22  ;;  %v7575_v38 = vadd.f32 %v22672_v40, %v7345_v29  ;;  %v22676_v54 = vld [vmem:[#allocation49_spill] sm:$0xff]  ;;  %v22677_v28 = vld [vmem:[#allocation38_spill] sm:$0xff]  ;;  %v22683_v60 = vld [vmem:[#allocation24_spill] sm:$0xff] }
 0x59e   :  { %v8027_v49 = vadd.f32 %v20472_v34, %v7797_v13  ;;  %v20610_v16 = vpop.f32.mrf.mxu0  ;;  %v7349_v7 = vadd.f32 %v22673_v43, %v7113_v24  ;;  %v8030_v50 = vadd.f32 %v22674_v19, %v7800_v46  ;;  %v7802_v0 = vadd.f32 %v22675_v18, %v7572_v62  ;;  %v22679_v44 = vld [vmem:[#allocation22_spill] sm:$0xff]  ;;  %v22686_v24 = vld [vmem:[#allocation20_spill] sm:$0xff] }
 0x59f   :  { %v20553_v5 = vpop.f32.mrf.mxu1  ;;  %v7578_v34 = vadd.f32 %v22677_v28, %v22676_v54  ;;  %v8485_v8 = vadd.f32 %v22678_v53, %v8255_v42  ;;  %v7577_v3 = vadd.f32 %v22680_v15, %v7347_v47  ;;  %v8029_v39 = vadd.f32 %v22681_v31, %v7799_v56  ;;  %v22688_v46 = vld [vmem:[#allocation26_spill] sm:$0xff]  ;;  %v22690_v47 = vld [vmem:[#allocation47_spill] sm:$0xff]  ;;  %v22692_v19 = vld [vmem:[#allocation52_spill] sm:$0xff] }
 0x5a0   :  { %v8257_v26 = vadd.f32 %v22679_v44, %v8027_v49  ;;  %v7801_v11 = vadd.f32 %v22682_v17, %v7571_v33  ;;  %v8260_v61 = vadd.f32 %v20528_v36, %v8030_v50  ;;  %v20636_v9 = vadd.f32 %v22684_v21, %v22683_v60  ;;  %v20639_v48 = vpop.f32.mrf.mxu0  ;;  %v22687_v36 = vld [vmem:[#allocation50_spill] sm:$0xff]  ;;  %v22689_v33 = vld [vmem:[#allocation45_spill] sm:$0xff]  ;;  %v22696_v15 = vld [vmem:[#allocation39_spill] sm:$0xff] }
 0x5a1   :  { %v20559_v37 = vpop.f32.mrf.mxu1  ;;  %v8488_v63 = vadd.f32 %v22685_v32, %v8258_v1  ;;  %v20643_v51 = vadd.f32 %v22686_v24, %v7349_v7  ;;  %v8032_v29 = vadd.f32 %v22687_v36, %v7802_v0  ;;  %v7804_v62 = vadd.f32 %v22688_v46, %v7574_v45  ;;  %v22691_v40 = vld [vmem:[#allocation42_spill] sm:$0xff]  ;;  %v22693_v7 = vld [vmem:[#allocation27_spill] sm:$0xff]  ;;  %v22697_v17 = vld [vmem:[#allocation37_spill] sm:$0xff] }
 0x5a2   :  { %v8259_v22 = vadd.f32 %v22689_v33, %v8029_v39  ;;  %v8487_v56 = vadd.f32 %v22690_v47, %v8257_v26  ;;  %v8031_v43 = vadd.f32 %v22691_v40, %v7801_v11  ;;  %v7803_v50 = vadd.f32 %v22692_v19, %v7573_v4  ;;  %v16577_v45 = vpop.f32.mrf.mxu0  ;;  %v22695_v26 = vld [vmem:[#allocation54_spill] sm:$0xff]  ;;  %v22698_v32 = vld [vmem:[#allocation48_spill] sm:$0xff] }
 0x5a3   :  { %v20570_v10 = vpop.f32.mrf.mxu1  ;;  %v8490_v18 = vadd.f32 %v22693_v7, %v8260_v61  ;;  %v7806_v31 = vadd.f32 %v22696_v15, %v7576_v27  ;;  %v22701_v47 = vld [vmem:[#allocation44_spill] sm:$0xff] }
 0x5a4   :  { %v8489_v39 = vadd.f32 %v20551_v41, %v8259_v22  ;;  %v8261_v4 = vadd.f32 %v22697_v17, %v8031_v43  ;;  %v8456_v36 = vpop.f32.mrf.mxu0  ;;  %v22700_v22 = vld [vmem:[#allocation53_spill] sm:$0xff]  ;;  %v22702_v43 = vld [vmem:[#allocation34_spill] sm:$0xff] }
 0x5a5   :  { %v20581_v6 = vpop.f32.mrf.mxu1 }
 0x5a7   :  { %v20594_v12 = vpop.f32.mrf.mxu1 }
 0x5a9   :  { %v20605_v14 = vpop.f32.mrf.mxu1 }
 0x5ab   :  { %v16594_v59 = vpop.f32.mrf.mxu1 }
 0x5ac   :  { %v8716_v57 = vadd.f32 %v16594_v59, %v8486_v25  ;;  %v22694_v59 = vld [vmem:[#allocation21_spill] sm:$0xff] }
 0x5ad   :  { %v8636_v20 = vpop.f32.mrf.mxu1  ;;  %v8262_v0 = vadd.f32 %v22694_v59, %v8032_v29  ;;  %v16580_v59 = vpop.f32.mrf.mxu0 }
 0x5ae   :  { %v8739_v13 = vmul.f32 %v20619_v30, %v8716_v57  ;;  %v8715_v58 = vadd.f32 %v8636_v20, %v8485_v8  ;;  %v8034_v57 = vadd.f32 %v22695_v26, %v7804_v62 }
 0x5af   :  { %v16597_v42 = vpop.f32.mrf.mxu1  ;;  %v8492_v24 = vadd.f32 %v20565_v2, %v8262_v0 }
 0x5b0   :  { %v8762_v49 = vadd.f32 %v20632_v23, %v8739_v13  ;;  %v8738_v25 = vmul.f32 %v20619_v30, %v8715_v58  ;;  %v8718_v1 = vadd.f32 %v16597_v42, %v8488_v63  ;;  %v8033_v63 = vadd.f32 %v22698_v32, %v7803_v50  ;;  %v22699_v13 = vld [vmem:[#allocation36_spill] sm:$0xff]  ;;  %v22703_v50 = vld [vmem:[#allocation55_spill] sm:$0xff] }
 0x5b1   :  { %v8646_v54 = vpop.f32.mrf.mxu1  ;;  %v7805_v58 = vadd.f32 %v22699_v13, %v7575_v38  ;;  %v8264_v27 = vadd.f32 %v20542_v55, %v8034_v57  ;;  %v8036_v42 = vadd.f32 %v22700_v22, %v7806_v31  ;;  %v8491_v38 = vadd.f32 %v20587_v52, %v8261_v4  ;;  %v22706_v4 = vld [vmem:[#allocation18_spill] sm:$0xff] }
 0x5b2   :  { %v8778_v28 = vmax.f32 %v8762_v49, 0.0  ;;  %v8761_v53 = vadd.f32 %v20632_v23, %v8738_v25  ;;  %v8741_v8 = vmul.f32 %v20619_v30, %v8718_v1  ;;  %v8717_v44 = vadd.f32 %v8646_v54, %v8487_v56 }
 0x5b3   :  { %v16600_v11 = vpop.f32.mrf.mxu1  ;;  %v7808_v56 = vadd.f32 %v22701_v47, %v7578_v34  ;;  %v8263_v2 = vadd.f32 %v20545_v35, %v8033_v63  ;;  %v8035_v19 = vadd.f32 %v22702_v43, %v7805_v58  ;;  %v7807_v7 = vadd.f32 %v22703_v50, %v7577_v3 }
 0x5b4   :  { %8794 = vst.msk [vmem:[#allocation4 + $0x8] sm:$0xff] %vm145_vm0, %v8778_v28  ;;  %v8777_v61 = vmax.f32 %v8761_v53, 0.0  ;;  %v8764_v20 = vadd.f32 %v20632_v23, %v8741_v8  ;;  %v8740_v60 = vmul.f32 %v20619_v30, %v8717_v44  ;;  %v8720_v21 = vadd.f32 %v16600_v11, %v8490_v18  ;;  %v22704_v53 = vld [vmem:[#allocation46_spill] sm:$0xff]  ;;  %v22705_v44 = vld [vmem:[#allocation32_spill] sm:$0xff] }
 0x5b5   :  { %v8656_v41 = vpop.f32.mrf.mxu1  ;;  %v8494_v18 = vadd.f32 %v20610_v16, %v8264_v27  ;;  %v8266_v34 = vadd.f32 %v20553_v5, %v8036_v42  ;;  %v8038_v8 = vadd.f32 %v22704_v53, %v7808_v56  ;;  %v7810_v26 = vadd.f32 %v22705_v44, %v20636_v9  ;;  %v22707_v9 = vld [vmem:[#allocation57_spill] sm:$0xff]  ;;  %v22709_v42 = vld [vmem:[#allocation43_spill] sm:$0xff] }
 0x5b6   :  { %8793 = vst.msk [vmem:[#allocation4] sm:$0xff] %vm145_vm0, %v8777_v61  ;;  %v8780_v29 = vmax.f32 %v8764_v20, 0.0  ;;  %v8763_v46 = vadd.f32 %v20632_v23, %v8740_v60  ;;  %v8743_v62 = vmul.f32 %v20619_v30, %v8720_v21  ;;  %v8719_v33 = vadd.f32 %v8656_v41, %v8489_v39  ;;  %v8466_v21 = vpop.f32.mrf.mxu0 }
 0x5b7   :  { %v16603_v49 = vpop.f32.mrf.mxu1  ;;  %v8493_v3 = vadd.f32 %v20639_v48, %v8263_v2  ;;  %v8265_v16 = vadd.f32 %v20559_v37, %v8035_v19  ;;  %v8037_v11 = vadd.f32 %v22706_v4, %v7807_v7  ;;  %v7809_v61 = vadd.f32 %v22707_v9, %v20643_v51  ;;  %v9302_v9 = vld [vmem:[#allocation12 + $0x48] sm:$0xff] }
 0x5b8   :  { %8796 = vst.msk [vmem:[#allocation4 + $0x18] sm:$0xff] %vm145_vm0, %v8780_v29  ;;  %v8779_v55 = vmax.f32 %v8763_v46, 0.0  ;;  %v8766_v25 = vadd.f32 %v20632_v23, %v8743_v62  ;;  %v8742_v1 = vmul.f32 %v20619_v30, %v8719_v33  ;;  %v8722_v40 = vadd.f32 %v16603_v49, %v8492_v24  ;;  %v22708_v24 = vld [vmem:[#allocation25_spill] sm:$0xff]  ;;  %v16583_v29 = vpop.f32.mrf.mxu0 }
 0x5b9   :  { %v8666_v52 = vpop.f32.mrf.mxu1  ;;  %v8496_v48 = vadd.f32 %v16577_v45, %v8266_v34  ;;  %v8268_v37 = vadd.f32 %v20570_v10, %v8038_v8  ;;  %v8040_v27 = vadd.f32 %v22708_v24, %v7810_v26  ;;  %v8495_v41 = vadd.f32 %v8456_v36, %v8265_v16  ;;  %v9533_v16 = vld [vmem:[#allocation12 + $0x70] sm:$0xff] }
 0x5ba   :  { %8795 = vst.msk [vmem:[#allocation4 + $0x10] sm:$0xff] %vm145_vm0, %v8779_v55  ;;  %v8782_v35 = vmax.f32 %v8766_v25, 0.0  ;;  %v8765_v0 = vadd.f32 %v20632_v23, %v8742_v1  ;;  %v8745_v54 = vmul.f32 %v20619_v30, %v8722_v40  ;;  %v8721_v28 = vadd.f32 %v8666_v52, %v8491_v38  ;;  %v8476_v50 = vpop.f32.mrf.mxu0  ;;  %v9303_v52 = vld [vmem:[#allocation12 + $0x50] sm:$0xff] }
 0x5bb   :  { %v8826_v5 = vld [vmem:[#allocation4 + $0x8] sm:$0xff]  ;;  %v16606_v57 = vpop.f32.mrf.mxu1  ;;  %v8267_v51 = vadd.f32 %v20581_v6, %v8037_v11  ;;  %v8039_v47 = vadd.f32 %v22709_v42, %v7809_v61  ;;  %v8498_v56 = vadd.f32 %v16580_v59, %v8268_v37  ;;  %v8270_v36 = vadd.f32 %v20594_v12, %v8040_v27  ;;  %v22710_v11 = vld [vmem:[#allocation40_spill] sm:$0xff]  ;;  %v22711_v61 = vld [vmem:[#allocation41_spill] sm:$0xff] }
 0x5bc   :  { %8842 = vst.msk [vmem:[#allocation2 + $0x21] sm:$0xff] %vm145_vm0, %v8826_v5  ;;  %8798 = vst.msk [vmem:[#allocation4 + $0x28] sm:$0xff] %vm145_vm0, %v8782_v35  ;;  %v8781_v15 = vmax.f32 %v8765_v0, 0.0  ;;  %v8768_v31 = vadd.f32 %v20632_v23, %v8745_v54  ;;  %v8744_v39 = vmul.f32 %v20619_v30, %v8721_v28  ;;  %v8724_v17 = vadd.f32 %v16606_v57, %v8494_v18  ;;  %v9532_v27 = vld [vmem:[#allocation12 + $0x68] sm:$0xff] }
 0x5bd   :  { %v8825_v20 = vld [vmem:[#allocation4] sm:$0xff]  ;;  %v8676_v60 = vpop.f32.mrf.mxu1  ;;  %v8497_v1 = vadd.f32 %v8466_v21, %v8267_v51  ;;  %v8269_v40 = vadd.f32 %v20605_v14, %v8039_v47  ;;  %v8500_v59 = vadd.f32 %v16583_v29, %v8270_v36 }
 0x5be   :  { %8841 = vst.msk [vmem:[#allocation2 + $0x11] sm:$0xff] %vm145_vm0, %v8825_v20  ;;  %8797 = vst.msk [vmem:[#allocation4 + $0x20] sm:$0xff] %vm145_vm0, %v8781_v15  ;;  %v8784_v32 = vmax.f32 %v8768_v31, 0.0  ;;  %v8767_v63 = vadd.f32 %v20632_v23, %v8744_v39  ;;  %v8747_v13 = vmul.f32 %v20619_v30, %v8724_v17  ;;  %v8723_v58 = vadd.f32 %v8676_v60, %v8493_v3  ;;  %v9301_v29 = vld [vmem:[#allocation12 + $0x40] sm:$0xff] }
 0x5bf   :  { %v8828_v45 = vld [vmem:[#allocation4 + $0x18] sm:$0xff]  ;;  %v16609_v10 = vpop.f32.mrf.mxu1  ;;  %v8499_v5 = vadd.f32 %v8476_v50, %v8269_v40 }
 0x5c0   :  { %8844 = vst.msk [vmem:[#allocation2 + $0x41] sm:$0xff] %vm145_vm0, %v8828_v45  ;;  %8800 = vst.msk [vmem:[#allocation4 + $0x38] sm:$0xff] %vm145_vm0, %v8784_v32  ;;  %v8783_v46 = vmax.f32 %v8767_v63, 0.0  ;;  %v8770_v62 = vadd.f32 %v20632_v23, %v8747_v13  ;;  %v8746_v33 = vmul.f32 %v20619_v30, %v8723_v58  ;;  %v8726_v22 = vadd.f32 %v16609_v10, %v8496_v48 }
 0x5c1   :  { %v8827_v38 = vld [vmem:[#allocation4 + $0x10] sm:$0xff]  ;;  %v8686_v6 = vpop.f32.mrf.mxu1 }
 0x5c2   :  { %8843 = vst.msk [vmem:[#allocation2 + $0x31] sm:$0xff] %vm145_vm0, %v8827_v38  ;;  %8799 = vst.msk [vmem:[#allocation4 + $0x30] sm:$0xff] %vm145_vm0, %v8783_v46  ;;  %v8786_v2 = vmax.f32 %v8770_v62, 0.0  ;;  %v8769_v49 = vadd.f32 %v20632_v23, %v8746_v33  ;;  %v8749_v55 = vmul.f32 %v20619_v30, %v8726_v22  ;;  %v8725_v25 = vadd.f32 %v8686_v6, %v8495_v41  ;;  %v8885_v38 = vld [vmem:[#allocation2 + $0xa1] sm:$0xff] }
 0x5c3   :  { %v8830_v43 = vld [vmem:[#allocation4 + $0x28] sm:$0xff]  ;;  %v16612_v19 = vpop.f32.mrf.mxu1  ;;  %v20733_v3 = vld [vmem:[#allocation2 + $0x20] sm:$0xff] }
 0x5c4   :  { %8846 = vst.msk [vmem:[#allocation2 + $0x61] sm:$0xff] %vm145_vm0, %v8830_v43  ;;  %8802 = vst.msk [vmem:[#allocation4 + $0x48] sm:$0xff] %vm145_vm0, %v8786_v2  ;;  %v8785_v12 = vmax.f32 %v8769_v49, 0.0  ;;  %v8772_v7 = vadd.f32 %v20632_v23, %v8749_v55  ;;  %v8748_v18 = vmul.f32 %v20619_v30, %v8725_v25  ;;  %v8728_v34 = vadd.f32 %v16612_v19, %v8498_v56  ;;  %v20731_v26 = vld [vmem:[#allocation2 + $0x21] sm:$0xff] }
 0x5c5   :  { %v8829_v35 = vld [vmem:[#allocation4 + $0x20] sm:$0xff]  ;;  %v8696_v0 = vpop.f32.mrf.mxu1  ;;  %v20719_v54 = vld [vmem:[#allocation2 + $0x11] sm:$0xff] }
 0x5c6   :  { %v20721_v14 = vld [vmem:[#allocation2 + $0x10] sm:$0xff]  ;;  %8845 = vst.msk [vmem:[#allocation2 + $0x51] sm:$0xff] %vm145_vm0, %v8829_v35  ;;  %8801 = vst.msk [vmem:[#allocation4 + $0x40] sm:$0xff] %vm145_vm0, %v8785_v12  ;;  %v8788_v28 = vmax.f32 %v8772_v7, 0.0  ;;  %v8771_v53 = vadd.f32 %v20632_v23, %v8748_v18  ;;  %v8751_v8 = vmul.f32 %v20619_v30, %v8728_v34  ;;  %v8727_v44 = vadd.f32 %v8696_v0, %v8497_v1  ;;  %v9531_v56 = vld [vmem:[#allocation12 + $0x60] sm:$0xff] }
 0x5c7   :  { %16625 = vmatmul.mubr.msk.f32.vlgmr.msra.gmra.mxu0 %vm145_vm0, %v20719_v54  ;;  %16657 = vmatmul.mubr.msk.f32.vlgmr.msra.gmra.mxu1 %vm145_vm0, %v20721_v14  ;;  %v8832_v57 = vld [vmem:[#allocation4 + $0x38] sm:$0xff]  ;;  %v16615_v15 = vpop.f32.mrf.mxu1  ;;  %v20757_v58 = vld [vmem:[#allocation2 + $0x41] sm:$0xff] }
 0x5c8   :  { %16627 = vmatprep.mubr.msk.f32.mxu0 %vm145_vm0, %v20731_v26  ;;  %16659 = vmatprep.mubr.msk.f32.mxu1 %vm145_vm0, %v20733_v3  ;;  %8848 = vst.msk [vmem:[#allocation2 + $0x81] sm:$0xff] %vm145_vm0, %v8832_v57  ;;  %8804 = vst.msk [vmem:[#allocation4 + $0x58] sm:$0xff] %vm145_vm0, %v8788_v28  ;;  %v8787_v31 = vmax.f32 %v8771_v53, 0.0  ;;  %v8774_v39 = vadd.f32 %v20632_v23, %v8751_v8  ;;  %v8750_v17 = vmul.f32 %v20619_v30, %v8727_v44  ;;  %v20759_v24 = vld [vmem:[#allocation2 + $0x40] sm:$0xff] }
 0x5c9   :  { %v8730_v4 = vadd.f32 %v16615_v15, %v8500_v59  ;;  %16681 = vmatpush3.msra.mxu0 %v22710_v11  ;;  %16713 = vmatpush3.msra.mxu1 %v22711_v61  ;;  %v8831_v48 = vld [vmem:[#allocation4 + $0x30] sm:$0xff]  ;;  %v8706_v37 = vpop.f32.mrf.mxu1  ;;  %v8865_v6 = vld [vmem:[#allocation2 + $0xa0] sm:$0xff] }
 0x5ca   :  { %v20745_v20 = vld [vmem:[#allocation2 + $0x31] sm:$0xff]  ;;  %16682 = vmatprep.subr.mxu0 %v9303_v52  ;;  %16714 = vmatprep.subr.mxu1 %v9533_v16  ;;  %8847 = vst.msk [vmem:[#allocation2 + $0x71] sm:$0xff] %vm145_vm0, %v8831_v48  ;;  %8803 = vst.msk [vmem:[#allocation4 + $0x50] sm:$0xff] %vm145_vm0, %v8787_v31  ;;  %v8790_v21 = vmax.f32 %v8774_v39, 0.0  ;;  %v8773_v32 = vadd.f32 %v20632_v23, %v8750_v17  ;;  %v8729_v13 = vadd.f32 %v8706_v37, %v8499_v5  ;;  %v9764_v25 = vld [vmem:[#allocation12 + $0x98] sm:$0xff] }
 0x5cb   :  { %v20747_v60 = vld [vmem:[#allocation2 + $0x30] sm:$0xff]  ;;  %v8753_v63 = vmul.f32 %v20619_v30, %v8730_v4  ;;  %16628 = vmatmul.mubr.msk.f32.gmra.mxu0 %vm145_vm0, %v20745_v20  ;;  %v8834_v41 = vld [vmem:[#allocation4 + $0x48] sm:$0xff]  ;;  %16715 = vmatpush3.msra.mxu1 %v9533_v16  ;;  %v20782_v47 = vld [vmem:[#allocation2 + $0x60] sm:$0xff] }
 0x5cc   :  { %16660 = vmatmul.mubr.msk.f32.gmra.mxu1 %vm145_vm0, %v20747_v60  ;;  %16630 = vmatprep.mubr.msk.f32.mxu0 %vm145_vm0, %v20757_v58  ;;  %8850 = vst.msk [vmem:[#allocation2 + $0xc1] sm:$0xff] %vm145_vm0, %v8834_v41  ;;  %8806 = vst.msk [vmem:[#allocation4 + $0x68] sm:$0xff] %vm145_vm0, %v8790_v21  ;;  %v8789_v51 = vmax.f32 %v8773_v32, 0.0  ;;  %v8752_v10 = vmul.f32 %v20619_v30, %v8729_v13  ;;  %v20780_v30 = vld [vmem:[#allocation2 + $0x61] sm:$0xff]  ;;  %v20865_v15 = vld [vmem:[#allocation2 + $0x12] sm:$0xff] }
 0x5cd   :  { %16662 = vmatprep.mubr.msk.f32.mxu1 %vm145_vm0, %v20759_v24  ;;  %v8776_v45 = vadd.f32 %v20632_v23, %v8753_v63  ;;  %16683 = vmatpush3.msra.mxu0 %v9303_v52  ;;  %v8833_v46 = vld [vmem:[#allocation4 + $0x40] sm:$0xff]  ;;  %v20769_v62 = vld [vmem:[#allocation2 + $0x51] sm:$0xff] }
 0x5ce   :  { %v20771_v33 = vld [vmem:[#allocation2 + $0x50] sm:$0xff]  ;;  %16684 = vmatprep.subr.mxu0 %v9302_v9  ;;  %16716 = vmatprep.subr.mxu1 %v9532_v27  ;;  %8849 = vst.msk [vmem:[#allocation2 + $0xb1] sm:$0xff] %vm145_vm0, %v8833_v46  ;;  %8805 = vst.msk [vmem:[#allocation4 + $0x60] sm:$0xff] %vm145_vm0, %v8789_v51  ;;  %v8775_v42 = vadd.f32 %v20632_v23, %v8752_v10  ;;  %v9994_v1 = vld [vmem:[#allocation12 + $0xb8] sm:$0xff] }
 0x5cf   :  { %v8792_v22 = vmax.f32 %v8776_v45, 0.0  ;;  %16631 = vmatmul.mubr.msk.f32.gmra.mxu0 %vm145_vm0, %v20769_v62  ;;  %v8836_v36 = vld [vmem:[#allocation4 + $0x58] sm:$0xff]  ;;  %16717 = vmatpush3.msra.mxu1 %v9532_v27  ;;  %v9284_v16 = vld [vmem:[#allocation2 + $0x2] sm:$0xff]  ;;  %v9762_v11 = vld [vmem:[#allocation12 + $0x88] sm:$0xff] }
 0x5d0   :  { %16663 = vmatmul.mubr.msk.f32.gmra.mxu1 %vm145_vm0, %v20771_v33  ;;  %16633 = vmatprep.mubr.msk.f32.mxu0 %vm145_vm0, %v20780_v30  ;;  %8852 = vst.msk [vmem:[#allocation2 + $0xe1] sm:$0xff] %vm145_vm0, %v8836_v36  ;;  %v8791_v23 = vmax.f32 %v8775_v42, 0.0  ;;  %v20871_v31 = vld [vmem:[#allocation2 + $0x22] sm:$0xff]  ;;  %v9763_v39 = vld [vmem:[#allocation12 + $0x90] sm:$0xff]  ;;  %v10224_v27 = vld [vmem:[#allocation12 + $0xd8] sm:$0xff] }
 0x5d1   :  { %16665 = vmatprep.mubr.msk.f32.mxu1 %vm145_vm0, %v20782_v47  ;;  %8808 = vst.msk [vmem:[#allocation4 + $0x78] sm:$0xff] %vm145_vm0, %v8792_v22  ;;  %16685 = vmatpush3.msra.mxu0 %v9302_v9  ;;  %v8835_v2 = vld [vmem:[#allocation4 + $0x50] sm:$0xff]  ;;  %v20883_v4 = vld [vmem:[#allocation2 + $0x42] sm:$0xff]  ;;  %v10454_v41 = vld [vmem:[#allocation12 + $0xf8] sm:$0xff] }
 0x5d2   :  { %v20790_v49 = vld [vmem:[#allocation2 + $0x71] sm:$0xff]  ;;  %16686 = vmatprep.subr.mxu0 %v9301_v29  ;;  %16718 = vmatprep.subr.mxu1 %v9531_v56  ;;  %8851 = vst.msk [vmem:[#allocation2 + $0xd1] sm:$0xff] %vm145_vm0, %v8835_v2  ;;  %8807 = vst.msk [vmem:[#allocation4 + $0x70] sm:$0xff] %vm145_vm0, %v8791_v23  ;;  %v20895_v48 = vld [vmem:[#allocation2 + $0x62] sm:$0xff] }
 0x5d3   :  { %v20792_v55 = vld [vmem:[#allocation2 + $0x70] sm:$0xff]  ;;  %16634 = vmatmul.mubr.msk.f32.gmra.mxu0 %vm145_vm0, %v20790_v49  ;;  %v8838_v40 = vld [vmem:[#allocation4 + $0x68] sm:$0xff]  ;;  %16719 = vmatpush3.msra.mxu1 %v9531_v56  ;;  %v20814_v7 = vld [vmem:[#allocation2 + $0xc0] sm:$0xff] }
 0x5d4   :  { %16666 = vmatmul.mubr.msk.f32.gmra.mxu1 %vm145_vm0, %v20792_v55  ;;  %16636 = vmatprep.mubr.msk.f32.mxu0 %vm145_vm0, %v8885_v38  ;;  %8854 = vst.msk [vmem:[#allocation2 + $0x101] sm:$0xff] %vm145_vm0, %v8838_v40  ;;  %v20812_v12 = vld [vmem:[#allocation2 + $0xc1] sm:$0xff]  ;;  %v9993_v17 = vld [vmem:[#allocation12 + $0xb0] sm:$0xff]  ;;  %v9992_v9 = vld [vmem:[#allocation12 + $0xa8] sm:$0xff] }
 0x5d5   :  { %16668 = vmatprep.mubr.msk.f32.mxu1 %vm145_vm0, %v8865_v6  ;;  %16687 = vmatpush3.msra.mxu0 %v9301_v29  ;;  %v8837_v43 = vld [vmem:[#allocation4 + $0x60] sm:$0xff]  ;;  %v20803_v19 = vld [vmem:[#allocation2 + $0xb1] sm:$0xff] }
 0x5d6   :  { %v20805_v50 = vld [vmem:[#allocation2 + $0xb0] sm:$0xff]  ;;  %16744 = vmatprep.subr.mxu0 %v9764_v25  ;;  %16776 = vmatprep.subr.mxu1 %v9994_v1  ;;  %8853 = vst.msk [vmem:[#allocation2 + $0xf1] sm:$0xff] %vm145_vm0, %v8837_v43  ;;  %v9761_v37 = vld [vmem:[#allocation12 + $0x80] sm:$0xff]  ;;  %v10684_v40 = vld [vmem:[#allocation12 + $0x118] sm:$0xff] }
 0x5d7   :  { %16637 = vmatmul.mubr.msk.f32.gmra.mxu0 %vm145_vm0, %v20803_v19  ;;  %v20830_v35 = vld [vmem:[#allocation2 + $0xe1] sm:$0xff]  ;;  %v20889_v61 = vld [vmem:[#allocation2 + $0x52] sm:$0xff]  ;;  %v10452_v38 = vld [vmem:[#allocation12 + $0xe8] sm:$0xff] }
 0x5d8   :  { %16669 = vmatmul.mubr.msk.f32.gmra.mxu1 %vm145_vm0, %v20805_v50  ;;  %v8840_v18 = vld [vmem:[#allocation4 + $0x78] sm:$0xff]  ;;  %16639 = vmatprep.mubr.msk.f32.mxu0 %vm145_vm0, %v20812_v12  ;;  %v20832_v0 = vld [vmem:[#allocation2 + $0xe0] sm:$0xff] }
 0x5d9   :  { %16671 = vmatprep.mubr.msk.f32.mxu1 %vm145_vm0, %v20814_v7  ;;  %8856 = vst.msk [vmem:[#allocation2 + $0x121] sm:$0xff] %vm145_vm0, %v8840_v18  ;;  %v8839_v34 = vld [vmem:[#allocation4 + $0x70] sm:$0xff]  ;;  %v9991_v21 = vld [vmem:[#allocation12 + $0xa0] sm:$0xff] }
 0x5da   :  { %v20821_v52 = vld [vmem:[#allocation2 + $0xd1] sm:$0xff]  ;;  %8855 = vst.msk [vmem:[#allocation2 + $0x111] sm:$0xff] %vm145_vm0, %v8839_v34  ;;  %v9292_v32 = vld [vmem:[#allocation2 + $0xa2] sm:$0xff] }
 0x5db   :  { %v20823_v59 = vld [vmem:[#allocation2 + $0xd0] sm:$0xff]  ;;  %16640 = vmatmul.mubr.msk.f32.gmra.mxu0 %vm145_vm0, %v20821_v52  ;;  %v20846_v8 = vld [vmem:[#allocation2 + $0x101] sm:$0xff] }
 0x5dc   :  { %16672 = vmatmul.mubr.msk.f32.gmra.mxu1 %vm145_vm0, %v20823_v59  ;;  %16642 = vmatprep.mubr.msk.f32.mxu0 %vm145_vm0, %v20830_v35  ;;  %v20848_v44 = vld [vmem:[#allocation2 + $0x100] sm:$0xff]  ;;  %v20901_v63 = vld [vmem:[#allocation2 + $0x72] sm:$0xff] }
 0x5dd   :  { %16674 = vmatprep.mubr.msk.f32.mxu1 %vm145_vm0, %v20832_v0  ;;  %v20838_v28 = vld [vmem:[#allocation2 + $0xf1] sm:$0xff]  ;;  %v20903_v13 = vld [vmem:[#allocation2 + $0x80] sm:$0xff] }
 0x5de   :  { %v20840_v53 = vld [vmem:[#allocation2 + $0xf0] sm:$0xff]  ;;  %v20915_v45 = vld [vmem:[#allocation2 + $0xc2] sm:$0xff] }
 0x5df   :  { %16643 = vmatmul.mubr.msk.f32.gmra.mxu0 %vm145_vm0, %v20838_v28  ;;  %v9293_v51 = vld [vmem:[#allocation2 + $0xb2] sm:$0xff]  ;;  %v20927_v29 = vld [vmem:[#allocation2 + $0xe2] sm:$0xff] }
 0x5e0   :  { %16675 = vmatmul.mubr.msk.f32.gmra.mxu1 %vm145_vm0, %v20840_v53  ;;  %16645 = vmatprep.mubr.msk.f32.mxu0 %vm145_vm0, %v20846_v8  ;;  %v20921_v10 = vld [vmem:[#allocation2 + $0xd2] sm:$0xff]  ;;  %v20939_v22 = vld [vmem:[#allocation2 + $0x102] sm:$0xff] }
 0x5e1   :  { %16677 = vmatprep.mubr.msk.f32.mxu1 %vm145_vm0, %v20848_v44  ;;  %v20854_v5 = vld [vmem:[#allocation2 + $0x111] sm:$0xff]  ;;  %v20947_v56 = vld [vmem:[#allocation2 + $0x120] sm:$0xff] }
 0x5e2   :  { %v20856_v57 = vld [vmem:[#allocation2 + $0x110] sm:$0xff]  ;;  %v10221_v6 = vld [vmem:[#allocation12 + $0xc0] sm:$0xff] }
 0x5e3   :  { %16646 = vmatmul.mubr.msk.f32.gmra.mxu0 %vm145_vm0, %v20854_v5  ;;  %v20933_v46 = vld [vmem:[#allocation2 + $0xf2] sm:$0xff]  ;;  %v10451_v2 = vld [vmem:[#allocation12 + $0xe0] sm:$0xff] }
 0x5e4   :  { %16678 = vmatmul.mubr.msk.f32.gmra.mxu1 %vm145_vm0, %v20856_v57  ;;  %16688 = vmatprep.mubr.msk.f32.mxu0 %vm145_vm0, %v9284_v16  ;;  %v20945_v42 = vld [vmem:[#allocation2 + $0x112] sm:$0xff]  ;;  %v9759_v43 = vld [vmem:[#allocation2 + $0x121] sm:$0xff] }
 0x5e5   :  { %16720 = vmatprep.mubr.msk.f32.mxu1 %vm145_vm0, %v20721_v14  ;;  %v20877_v14 = vld [vmem:[#allocation2 + $0x32] sm:$0xff] }
 0x5e6   :  { %v10223_v36 = vld [vmem:[#allocation12 + $0xd0] sm:$0xff] }
 0x5e7   :  { %16689 = vmatmul.mubr.msk.f32.vlgmr.msra.gmra.mxu0 %vm145_vm0, %v20865_v15  ;;  %v10453_v23 = vld [vmem:[#allocation12 + $0xf0] sm:$0xff] }
 0x5e8   :  { %16721 = vmatmul.mubr.msk.f32.vlgmr.msra.gmra.mxu1 %vm145_vm0, %v20733_v3  ;;  %16691 = vmatprep.mubr.msk.f32.mxu0 %vm145_vm0, %v20871_v31 }
 0x5e9   :  { %16723 = vmatprep.mubr.msk.f32.mxu1 %vm145_vm0, %v20747_v60  ;;  %16745 = vmatpush3.msra.mxu0 %v9764_v25  ;;  %v9751_v25 = vld [vmem:[#allocation2 + $0x81] sm:$0xff] }
 0x5ea   :  { %16777 = vmatpush3.msra.mxu1 %v9994_v1  ;;  %16746 = vmatprep.subr.mxu0 %v9763_v39  ;;  %v20981_v1 = vld [vmem:[#allocation2 + $0x82] sm:$0xff] }
 0x5eb   :  { %16778 = vmatprep.subr.mxu1 %v9993_v17  ;;  %16692 = vmatmul.mubr.msk.f32.gmra.mxu0 %vm145_vm0, %v20877_v14 }
 0x5ec   :  { %16724 = vmatmul.mubr.msk.f32.gmra.mxu1 %vm145_vm0, %v20759_v24  ;;  %16694 = vmatprep.mubr.msk.f32.mxu0 %vm145_vm0, %v20883_v4 }
 0x5ed   :  { %16726 = vmatprep.mubr.msk.f32.mxu1 %vm145_vm0, %v20771_v33  ;;  %16747 = vmatpush3.msra.mxu0 %v9763_v39 }
 0x5ee   :  { %16779 = vmatpush3.msra.mxu1 %v9993_v17  ;;  %16748 = vmatprep.subr.mxu0 %v9762_v11 }
 0x5ef   :  { %16780 = vmatprep.subr.mxu1 %v9992_v9  ;;  %16695 = vmatmul.mubr.msk.f32.gmra.mxu0 %vm145_vm0, %v20889_v61 }
 0x5f0   :  { %16727 = vmatmul.mubr.msk.f32.gmra.mxu1 %vm145_vm0, %v20782_v47  ;;  %16697 = vmatprep.mubr.msk.f32.mxu0 %vm145_vm0, %v20895_v48 }
 0x5f1   :  { %16729 = vmatprep.mubr.msk.f32.mxu1 %vm145_vm0, %v20792_v55  ;;  %16749 = vmatpush3.msra.mxu0 %v9762_v11 }
 0x5f2   :  { %16781 = vmatpush3.msra.mxu1 %v9992_v9  ;;  %16750 = vmatprep.subr.mxu0 %v9761_v37 }
 0x5f3   :  { %16782 = vmatprep.subr.mxu1 %v9991_v21  ;;  %16698 = vmatmul.mubr.msk.f32.gmra.mxu0 %vm145_vm0, %v20901_v63 }
 0x5f4   :  { %16730 = vmatmul.mubr.msk.f32.gmra.mxu1 %vm145_vm0, %v20903_v13  ;;  %16700 = vmatprep.mubr.msk.f32.mxu0 %vm145_vm0, %v9292_v32 }
 0x5f5   :  { %16732 = vmatprep.mubr.msk.f32.mxu1 %vm145_vm0, %v20805_v50  ;;  %16751 = vmatpush3.msra.mxu0 %v9761_v37  ;;  %v10683_v50 = vld [vmem:[#allocation12 + $0x110] sm:$0xff] }
 0x5f6   :  { %16783 = vmatpush3.msra.mxu1 %v9991_v21  ;;  %16808 = vmatprep.subr.mxu0 %v10224_v27 }
 0x5f7   :  { %16840 = vmatprep.subr.mxu1 %v10454_v41  ;;  %16701 = vmatmul.mubr.msk.f32.gmra.mxu0 %vm145_vm0, %v9293_v51 }
 0x5f8   :  { %16733 = vmatmul.mubr.msk.f32.gmra.mxu1 %vm145_vm0, %v20814_v7  ;;  %16703 = vmatprep.mubr.msk.f32.mxu0 %vm145_vm0, %v20915_v45 }
 0x5f9   :  { %16735 = vmatprep.mubr.msk.f32.mxu1 %vm145_vm0, %v20823_v59 }
 0x5fb   :  { %16704 = vmatmul.mubr.msk.f32.gmra.mxu0 %vm145_vm0, %v20921_v10 }
 0x5fc   :  { %16736 = vmatmul.mubr.msk.f32.gmra.mxu1 %vm145_vm0, %v20832_v0  ;;  %16706 = vmatprep.mubr.msk.f32.mxu0 %vm145_vm0, %v20927_v29 }
 0x5fd   :  { %16738 = vmatprep.mubr.msk.f32.mxu1 %vm145_vm0, %v20840_v53 }
 0x5ff   :  { %16707 = vmatmul.mubr.msk.f32.gmra.mxu0 %vm145_vm0, %v20933_v46 }
 0x600   :  { %16739 = vmatmul.mubr.msk.f32.gmra.mxu1 %vm145_vm0, %v20848_v44  ;;  %16709 = vmatprep.mubr.msk.f32.mxu0 %vm145_vm0, %v20939_v22 }
 0x601   :  { %16741 = vmatprep.mubr.msk.f32.mxu1 %vm145_vm0, %v20856_v57 }
 0x603   :  { %16710 = vmatmul.mubr.msk.f32.gmra.mxu0 %vm145_vm0, %v20945_v42 }
 0x604   :  { %16742 = vmatmul.mubr.msk.f32.gmra.mxu1 %vm145_vm0, %v20947_v56  ;;  %16752 = vmatprep.mubr.msk.f32.mxu0 %vm145_vm0, %v20719_v54  ;;  %v10222_v54 = vld [vmem:[#allocation12 + $0xc8] sm:$0xff] }
 0x605   :  { %16784 = vmatprep.mubr.msk.f32.mxu1 %vm145_vm0, %v20865_v15 }
 0x607   :  { %16753 = vmatmul.mubr.msk.f32.vlgmr.msra.gmra.mxu0 %vm145_vm0, %v20731_v26 }
 0x608   :  { %16785 = vmatmul.mubr.msk.f32.vlgmr.msra.gmra.mxu1 %vm145_vm0, %v20871_v31  ;;  %16755 = vmatprep.mubr.msk.f32.mxu0 %vm145_vm0, %v20745_v20 }
 0x609   :  { %16787 = vmatprep.mubr.msk.f32.mxu1 %vm145_vm0, %v20877_v14  ;;  %16809 = vmatpush3.msra.mxu0 %v10224_v27 }
 0x60a   :  { %16841 = vmatpush3.msra.mxu1 %v10454_v41  ;;  %16810 = vmatprep.subr.mxu0 %v10223_v36 }
 0x60b   :  { %16842 = vmatprep.subr.mxu1 %v10453_v23  ;;  %16756 = vmatmul.mubr.msk.f32.gmra.mxu0 %vm145_vm0, %v20757_v58 }
 0x60c   :  { %16788 = vmatmul.mubr.msk.f32.gmra.mxu1 %vm145_vm0, %v20883_v4  ;;  %16758 = vmatprep.mubr.msk.f32.mxu0 %vm145_vm0, %v20769_v62 }
 0x60d   :  { %16790 = vmatprep.mubr.msk.f32.mxu1 %vm145_vm0, %v20889_v61  ;;  %16811 = vmatpush3.msra.mxu0 %v10223_v36 }
 0x60e   :  { %16843 = vmatpush3.msra.mxu1 %v10453_v23  ;;  %16812 = vmatprep.subr.mxu0 %v10222_v54  ;;  %v11040_v23 = vld [vmem:[#allocation2 + $0x1] sm:$0xff] }
 0x60f   :  { %16844 = vmatprep.subr.mxu1 %v10452_v38  ;;  %16759 = vmatmul.mubr.msk.f32.gmra.mxu0 %vm145_vm0, %v20780_v30 }
 0x610   :  { %16791 = vmatmul.mubr.msk.f32.gmra.mxu1 %vm145_vm0, %v20895_v48  ;;  %16761 = vmatprep.mubr.msk.f32.mxu0 %vm145_vm0, %v20790_v49 }
 0x611   :  { %16793 = vmatprep.mubr.msk.f32.mxu1 %vm145_vm0, %v20901_v63  ;;  %16813 = vmatpush3.msra.mxu0 %v10222_v54  ;;  %v11020_v54 = vld [vmem:[#allocation2] sm:$0xff] }
 0x612   :  { %16845 = vmatpush3.msra.mxu1 %v10452_v38  ;;  %16814 = vmatprep.subr.mxu0 %v10221_v6 }
 0x613   :  { %16846 = vmatprep.subr.mxu1 %v10451_v2  ;;  %16762 = vmatmul.mubr.msk.f32.gmra.mxu0 %vm145_vm0, %v9751_v25 }
 0x614   :  { %16794 = vmatmul.mubr.msk.f32.gmra.mxu1 %vm145_vm0, %v20981_v1  ;;  %16764 = vmatprep.mubr.msk.f32.mxu0 %vm145_vm0, %v20803_v19  ;;  %v21013_v19 = vld [vmem:[#allocation2 + $0x122] sm:$0xff] }
 0x615   :  { %16796 = vmatprep.mubr.msk.f32.mxu1 %vm145_vm0, %v9293_v51  ;;  %16815 = vmatpush3.msra.mxu0 %v10221_v6 }
 0x616   :  { %16847 = vmatpush3.msra.mxu1 %v10451_v2  ;;  %16872 = vmatprep.subr.mxu0 %v10684_v40 }
 0x617   :  { %16765 = vmatmul.mubr.msk.f32.gmra.mxu0 %vm145_vm0, %v20812_v12 }
 0x618   :  { %16797 = vmatmul.mubr.msk.f32.gmra.mxu1 %vm145_vm0, %v20915_v45  ;;  %16767 = vmatprep.mubr.msk.f32.mxu0 %vm145_vm0, %v20821_v52 }
 0x619   :  { %16799 = vmatprep.mubr.msk.f32.mxu1 %vm145_vm0, %v20921_v10 }
 0x61b   :  { %16768 = vmatmul.mubr.msk.f32.gmra.mxu0 %vm145_vm0, %v20830_v35 }
 0x61c   :  { %16800 = vmatmul.mubr.msk.f32.gmra.mxu1 %vm145_vm0, %v20927_v29  ;;  %16770 = vmatprep.mubr.msk.f32.mxu0 %vm145_vm0, %v20838_v28 }
 0x61d   :  { %16802 = vmatprep.mubr.msk.f32.mxu1 %vm145_vm0, %v20933_v46 }
 0x61f   :  { %16771 = vmatmul.mubr.msk.f32.gmra.mxu0 %vm145_vm0, %v20846_v8 }
 0x620   :  { %16803 = vmatmul.mubr.msk.f32.gmra.mxu1 %vm145_vm0, %v20939_v22  ;;  %16773 = vmatprep.mubr.msk.f32.mxu0 %vm145_vm0, %v20854_v5 }
 0x621   :  { %16805 = vmatprep.mubr.msk.f32.mxu1 %vm145_vm0, %v20945_v42 }
 0x623   :  { %16774 = vmatmul.mubr.msk.f32.gmra.mxu0 %vm145_vm0, %v9759_v43 }
 0x624   :  { %16806 = vmatmul.mubr.msk.f32.gmra.mxu1 %vm145_vm0, %v21013_v19  ;;  %16816 = vmatprep.mubr.msk.f32.mxu0 %vm145_vm0, %v20733_v3  ;;  %v10681_v3 = vld [vmem:[#allocation12 + $0x100] sm:$0xff] }
 0x625   :  { %16848 = vmatprep.mubr.msk.f32.mxu1 %vm145_vm0, %v20731_v26  ;;  %v10682_v26 = vld [vmem:[#allocation12 + $0x108] sm:$0xff] }
 0x627   :  { %16817 = vmatmul.mubr.msk.f32.vlgmr.msra.gmra.mxu0 %vm145_vm0, %v20747_v60  ;;  %v10441_v60 = vld [vmem:[#allocation2 + $0x91] sm:$0xff] }
 0x628   :  { %16849 = vmatmul.mubr.msk.f32.vlgmr.msra.gmra.mxu1 %vm145_vm0, %v20745_v20  ;;  %16819 = vmatprep.mubr.msk.f32.mxu0 %vm145_vm0, %v20759_v24  ;;  %v10211_v20 = vld [vmem:[#allocation2 + $0x90] sm:$0xff] }
 0x629   :  { %16851 = vmatprep.mubr.msk.f32.mxu1 %vm145_vm0, %v20757_v58  ;;  %16873 = vmatpush3.msra.mxu0 %v10684_v40  ;;  %v10219_v58 = vld [vmem:[#allocation2 + $0x130] sm:$0xff] }
 0x62a   :  { %16874 = vmatprep.subr.mxu0 %v10683_v50  ;;  %v10449_v24 = vld [vmem:[#allocation2 + $0x131] sm:$0xff] }
 0x62b   :  { %16820 = vmatmul.mubr.msk.f32.gmra.mxu0 %vm145_vm0, %v20771_v33  ;;  %v10679_v33 = vld [vmem:[#allocation2 + $0x132] sm:$0xff] }
 0x62c   :  { %16852 = vmatmul.mubr.msk.f32.gmra.mxu1 %vm145_vm0, %v20769_v62  ;;  %16822 = vmatprep.mubr.msk.f32.mxu0 %vm145_vm0, %v20782_v47  ;;  %v10671_v62 = vld [vmem:[#allocation2 + $0x92] sm:$0xff]  ;;  %v11039_v47 = vld [vmem:[#allocation14 + $0x18] sm:$0xff] }
 0x62d   :  { %16854 = vmatprep.mubr.msk.f32.mxu1 %vm145_vm0, %v20780_v30  ;;  %16875 = vmatpush3.msra.mxu0 %v10683_v50  ;;  %v11060_v30 = vld [vmem:[#allocation14 + $0x38] sm:$0xff] }
 0x62e   :  { %16876 = vmatprep.subr.mxu0 %v10682_v26  ;;  %16904 = vmatprep.subr.mxu1 %v11060_v30 }
 0x62f   :  { %16823 = vmatmul.mubr.msk.f32.gmra.mxu0 %vm145_vm0, %v20792_v55  ;;  %16905 = vmatpush3.msra.mxu1 %v11060_v30 }
 0x630   :  { %16855 = vmatmul.mubr.msk.f32.gmra.mxu1 %vm145_vm0, %v20790_v49  ;;  %16825 = vmatprep.mubr.msk.f32.mxu0 %vm145_vm0, %v20903_v13  ;;  %v11038_v13 = vld [vmem:[#allocation14 + $0x10] sm:$0xff] }
 0x631   :  { %16857 = vmatprep.mubr.msk.f32.mxu1 %vm145_vm0, %v9751_v25  ;;  %16877 = vmatpush3.msra.mxu0 %v10682_v26 }
 0x632   :  { %16878 = vmatprep.subr.mxu0 %v10681_v3 }
 0x633   :  { %16826 = vmatmul.mubr.msk.f32.gmra.mxu0 %vm145_vm0, %v10211_v20 }
 0x634   :  { %16858 = vmatmul.mubr.msk.f32.gmra.mxu1 %vm145_vm0, %v10441_v60  ;;  %16828 = vmatprep.mubr.msk.f32.mxu0 %vm145_vm0, %v20814_v7 }
 0x635   :  { %16860 = vmatprep.mubr.msk.f32.mxu1 %vm145_vm0, %v20812_v12  ;;  %16879 = vmatpush3.msra.mxu0 %v10681_v3 }
 0x636   :  { %16936 = vmatprep.subr.mxu0 %v11039_v47 }
 0x637   :  { %16829 = vmatmul.mubr.msk.f32.gmra.mxu0 %vm145_vm0, %v20823_v59 }
 0x638   :  { %16861 = vmatmul.mubr.msk.f32.gmra.mxu1 %vm145_vm0, %v20821_v52  ;;  %16831 = vmatprep.mubr.msk.f32.mxu0 %vm145_vm0, %v20832_v0 }
 0x639   :  { %16863 = vmatprep.mubr.msk.f32.mxu1 %vm145_vm0, %v20830_v35 }
 0x63b   :  { %16832 = vmatmul.mubr.msk.f32.gmra.mxu0 %vm145_vm0, %v20840_v53 }
 0x63c   :  { %16864 = vmatmul.mubr.msk.f32.gmra.mxu1 %vm145_vm0, %v20838_v28  ;;  %16834 = vmatprep.mubr.msk.f32.mxu0 %vm145_vm0, %v20848_v44 }
 0x63d   :  { %16866 = vmatprep.mubr.msk.f32.mxu1 %vm145_vm0, %v20846_v8 }
 0x63f   :  { %16835 = vmatmul.mubr.msk.f32.gmra.mxu0 %vm145_vm0, %v20856_v57 }
 0x640   :  { %16867 = vmatmul.mubr.msk.f32.gmra.mxu1 %vm145_vm0, %v20854_v5  ;;  %16837 = vmatprep.mubr.msk.f32.mxu0 %vm145_vm0, %v20947_v56 }
 0x641   :  { %16869 = vmatprep.mubr.msk.f32.mxu1 %vm145_vm0, %v9759_v43 }
 0x643   :  { %16838 = vmatmul.mubr.msk.f32.gmra.mxu0 %vm145_vm0, %v10219_v58 }
 0x644   :  { %16870 = vmatmul.mubr.msk.f32.gmra.mxu1 %vm145_vm0, %v10449_v24  ;;  %16880 = vmatprep.mubr.msk.f32.mxu0 %vm145_vm0, %v20871_v31 }
 0x645   :  { %16912 = vmatprep.mubr.msk.f32.mxu1 %vm145_vm0, %v11040_v23 }
 0x647   :  { %16881 = vmatmul.mubr.msk.f32.vlgmr.msra.gmra.mxu0 %vm145_vm0, %v20877_v14 }
 0x648   :  { %16883 = vmatprep.mubr.msk.f32.mxu0 %vm145_vm0, %v20883_v4  ;;  %16937 = vmatpush3.msra.mxu0 %v11039_v47 }
 0x649   :  { %16938 = vmatprep.subr.mxu0 %v11038_v13 }
 0x64a   :  { %16939 = vmatpush3.msra.mxu0 %v11038_v13 }
 0x64b   :  { %16884 = vmatmul.mubr.msk.f32.gmra.mxu0 %vm145_vm0, %v20889_v61 }
 0x64c   :  { %16886 = vmatprep.mubr.msk.f32.mxu0 %vm145_vm0, %v20895_v48 }
 0x64f   :  { %16887 = vmatmul.mubr.msk.f32.gmra.mxu0 %vm145_vm0, %v20901_v63  ;;  %v11059_v63 = vld [vmem:[#allocation14 + $0x30] sm:$0xff] }
 0x650   :  { %16889 = vmatprep.mubr.msk.f32.mxu0 %vm145_vm0, %v20981_v1  ;;  %16906 = vmatprep.subr.mxu1 %v11059_v63 }
 0x651   :  { %16907 = vmatpush3.msra.mxu1 %v11059_v63 }
 0x653   :  { %16890 = vmatmul.mubr.msk.f32.gmra.mxu0 %vm145_vm0, %v10671_v62 }
 0x654   :  { %16892 = vmatprep.mubr.msk.f32.mxu0 %vm145_vm0, %v20915_v45  ;;  %v11058_v45 = vld [vmem:[#allocation14 + $0x28] sm:$0xff] }
 0x655   :  { %16908 = vmatprep.subr.mxu1 %v11058_v45 }
 0x656   :  { %16909 = vmatpush3.msra.mxu1 %v11058_v45 }
 0x657   :  { %16893 = vmatmul.mubr.msk.f32.gmra.mxu0 %vm145_vm0, %v20921_v10  ;;  %v11037_v10 = vld [vmem:[#allocation14 + $0x8] sm:$0xff] }
 0x658   :  { %16895 = vmatprep.mubr.msk.f32.mxu0 %vm145_vm0, %v20927_v29  ;;  %16940 = vmatprep.subr.mxu0 %v11037_v10 }
 0x659   :  { %16941 = vmatpush3.msra.mxu0 %v11037_v10 }
 0x65b   :  { %16896 = vmatmul.mubr.msk.f32.gmra.mxu0 %vm145_vm0, %v20933_v46 }
 0x65c   :  { %16898 = vmatprep.mubr.msk.f32.mxu0 %vm145_vm0, %v20939_v22  ;;  %v11057_v22 = vld [vmem:[#allocation14 + $0x20] sm:$0xff] }
 0x65d   :  { %16910 = vmatprep.subr.mxu1 %v11057_v22 }
 0x65e   :  { %16911 = vmatpush3.msra.mxu1 %v11057_v22 }
 0x65f   :  { %16899 = vmatmul.mubr.msk.f32.gmra.mxu0 %vm145_vm0, %v20945_v42  ;;  %v11036_v42 = vld [vmem:[#allocation14] sm:$0xff] }
 0x660   :  { %16901 = vmatprep.mubr.msk.f32.mxu0 %vm145_vm0, %v21013_v19  ;;  %16942 = vmatprep.subr.mxu0 %v11036_v42 }
 0x661   :  { %16943 = vmatpush3.msra.mxu0 %v11036_v42 }
 0x663   :  { %16902 = vmatmul.mubr.msk.f32.gmra.mxu0 %vm145_vm0, %v10679_v33 }
 0x664   :  { %16944 = vmatprep.mubr.msk.f32.mxu0 %vm145_vm0, %v11020_v54 }
 0x687   :  { %v16626_v49 = vpop.f32.mrf.mxu0  ;;  %v16658_v55 = vpop.f32.mrf.mxu1 }
 0x688   :  { %v21106_v12 = vadd.f32 %v16658_v55, %v16626_v49 }
 0x689   :  { %v21108_v7 = vpop.f32.mrf.mxu0  ;;  %v21110_v18 = vpop.f32.mrf.mxu1 }
 0x68b   :  { %v16629_v34 = vpop.f32.mrf.mxu0 }
 0x68c   :  { %v16661_v52 = vpop.f32.mrf.mxu1 }
 0x68d   :  { %v9221_v59 = vadd.f32 %v16661_v52, %v16629_v34  ;;  %v21112_v35 = vpop.f32.mrf.mxu0 }
 0x68e   :  { %v21114_v0 = vpop.f32.mrf.mxu1 }
 0x68f   :  { %v16632_v28 = vpop.f32.mrf.mxu0 }
 0x690   :  { %v16664_v53 = vpop.f32.mrf.mxu1 }
 0x691   :  { %v9231_v8 = vadd.f32 %v16664_v53, %v16632_v28  ;;  %v21116_v44 = vpop.f32.mrf.mxu0  ;;  %v21181_v28 = vld [vmem:[#allocation14 + $0x58] sm:$0xff] }
 0x692   :  { %v21118_v16 = vpop.f32.mrf.mxu1  ;;  %22712 = vst [vmem:[#allocation19_spill] sm:$0xff] %v21181_v28  ;;  %16968 = vmatprep.subr.mxu1 %v21181_v28 }
 0x693   :  { %v16635_v5 = vpop.f32.mrf.mxu0 }
 0x694   :  { %v16667_v57 = vpop.f32.mrf.mxu1 }
 0x695   :  { %v9241_v15 = vadd.f32 %v16667_v57, %v16635_v5  ;;  %v21120_v31 = vpop.f32.mrf.mxu0 }
 0x696   :  { %v21122_v39 = vpop.f32.mrf.mxu1 }
 0x697   :  { %v16638_v17 = vpop.f32.mrf.mxu0 }
 0x698   :  { %v16670_v14 = vpop.f32.mrf.mxu1 }
 0x699   :  { %v21124_v4 = vadd.f32 %v16670_v14, %v16638_v17  ;;  %v21126_v11 = vpop.f32.mrf.mxu0 }
 0x69a   :  { %v21128_v9 = vpop.f32.mrf.mxu1 }
 0x69b   :  { %v16641_v61 = vpop.f32.mrf.mxu0 }
 0x69c   :  { %v16673_v48 = vpop.f32.mrf.mxu1 }
 0x69d   :  { %v21130_v37 = vadd.f32 %v16673_v48, %v16641_v61  ;;  %v21132_v21 = vpop.f32.mrf.mxu0 }
 0x69e   :  { %v21134_v32 = vpop.f32.mrf.mxu1 }
 0x69f   :  { %v16644_v27 = vpop.f32.mrf.mxu0 }
 0x6a0   :  { %v16676_v41 = vpop.f32.mrf.mxu1 }
 0x6a1   :  { %v9271_v51 = vadd.f32 %v16676_v41, %v16644_v27  ;;  %v21136_v29 = vpop.f32.mrf.mxu0 }
 0x6a2   :  { %v21138_v46 = vpop.f32.mrf.mxu1 }
 0x6a3   :  { %v16647_v56 = vpop.f32.mrf.mxu0 }
 0x6a4   :  { %v16679_v36 = vpop.f32.mrf.mxu1 }
 0x6a5   :  { %v9281_v38 = vadd.f32 %v16679_v36, %v16647_v56  ;;  %v21140_v6 = vpop.f32.mrf.mxu0 }
 0x6a6   :  { %v21142_v2 = vpop.f32.mrf.mxu1 }
 0x6a7   :  { %v16690_v25 = vpop.f32.mrf.mxu0 }
 0x6a8   :  { %v21146_v1 = vpop.f32.mrf.mxu1  ;;  %v21149_v40 = vadd.f32 %v16690_v25, %v21106_v12 }
 0x6a9   :  { %v21151_v43 = vpop.f32.mrf.mxu0 }
 0x6aa   :  { %v21153_v19 = vpop.f32.mrf.mxu1 }
 0x6ab   :  { %v16693_v50 = vpop.f32.mrf.mxu0 }
 0x6ac   :  { %v21155_v26 = vpop.f32.mrf.mxu1  ;;  %v21157_v3 = vadd.f32 %v16693_v50, %v9221_v59 }
 0x6ad   :  { %v21159_v20 = vpop.f32.mrf.mxu0 }
 0x6ae   :  { %v21161_v60 = vpop.f32.mrf.mxu1 }
 0x6af   :  { %v16696_v58 = vpop.f32.mrf.mxu0 }
 0x6b0   :  { %v21163_v24 = vpop.f32.mrf.mxu1  ;;  %v21165_v62 = vadd.f32 %v16696_v58, %v9231_v8  ;;  %v21187_v8 = vld [vmem:[#allocation14 + $0x78] sm:$0xff] }
 0x6b1   :  { %v21167_v33 = vpop.f32.mrf.mxu0  ;;  %22713 = vst [vmem:[#allocation31_spill] sm:$0xff] %v21187_v8  ;;  %17000 = vmatprep.subr.mxu0 %v21187_v8 }
 0x6b2   :  { %v21169_v30 = vpop.f32.mrf.mxu1 }
 0x6b3   :  { %v16699_v47 = vpop.f32.mrf.mxu0 }
 0x6b4   :  { %v21171_v49 = vpop.f32.mrf.mxu1  ;;  %v21173_v55 = vadd.f32 %v16699_v47, %v9241_v15 }
 0x6b5   :  { %v21175_v12 = vpop.f32.mrf.mxu0 }
 0x6b6   :  { %v21177_v34 = vpop.f32.mrf.mxu1 }
 0x6b7   :  { %v16702_v52 = vpop.f32.mrf.mxu0 }
 0x6b8   :  { %v21179_v59 = vpop.f32.mrf.mxu1  ;;  %v21184_v53 = vadd.f32 %v16702_v52, %v21124_v4 }
 0x6b9   :  { %v21189_v5 = vpop.f32.mrf.mxu0 }
 0x6ba   :  { %v21191_v57 = vpop.f32.mrf.mxu1 }
 0x6bb   :  { %v16705_v15 = vpop.f32.mrf.mxu0 }
 0x6bc   :  { %v21194_v17 = vpop.f32.mrf.mxu1  ;;  %v21197_v14 = vadd.f32 %v16705_v15, %v21130_v37 }
 0x6bd   :  { %v21199_v61 = vpop.f32.mrf.mxu0 }
 0x6be   :  { %v21201_v4 = vpop.f32.mrf.mxu1 }
 0x6bf   :  { %v16708_v48 = vpop.f32.mrf.mxu0 }
 0x6c0   :  { %v21203_v63 = vpop.f32.mrf.mxu1  ;;  %v21205_v13 = vadd.f32 %v16708_v48, %v9271_v51 }
 0x6c1   :  { %v21207_v27 = vpop.f32.mrf.mxu0 }
 0x6c2   :  { %v21209_v41 = vpop.f32.mrf.mxu1 }
 0x6c3   :  { %22714 = vst [vmem:[#allocation28_spill] sm:$0xff] %v21209_v41  ;;  %v16711_v45 = vpop.f32.mrf.mxu0 }
 0x6c4   :  { %v21211_v10 = vpop.f32.mrf.mxu1  ;;  %v21213_v22 = vadd.f32 %v16711_v45, %v9281_v38 }
 0x6c5   :  { %22715 = vst [vmem:[#allocation35_spill] sm:$0xff] %v21211_v10  ;;  %v21215_v37 = vpop.f32.mrf.mxu0 }
 0x6c6   :  { %22716 = vst [vmem:[#allocation49_spill] sm:$0xff] %v21213_v22  ;;  %v21217_v42 = vpop.f32.mrf.mxu1 }
 0x6c7   :  { %22717 = vst [vmem:[#allocation38_spill] sm:$0xff] %v21217_v42  ;;  %v16754_v56 = vpop.f32.mrf.mxu0 }
 0x6c8   :  { %v21219_v36 = vpop.f32.mrf.mxu1 }
 0x6c9   :  { %v9879_v23 = vpop.f32.mrf.mxu0 }
 0x6ca   :  { %v21221_v54 = vpop.f32.mrf.mxu1 }
 0x6cb   :  { %v21223_v51 = vpop.f32.mrf.mxu0 }
 0x6cc   :  { %v21225_v25 = vpop.f32.mrf.mxu1 }
 0x6cd   :  { %v21227_v50 = vpop.f32.mrf.mxu0 }
 0x6ce   :  { %v21229_v58 = vpop.f32.mrf.mxu1 }
 0x6cf   :  { %22718 = vst [vmem:[#allocation56_spill] sm:$0xff] %v21229_v58  ;;  %v21231_v38 = vpop.f32.mrf.mxu0 }
 0x6d0   :  { %v21233_v47 = vpop.f32.mrf.mxu1 }
 0x6d1   :  { %22719 = vst [vmem:[#allocation22_spill] sm:$0xff] %v21233_v47  ;;  %v21235_v52 = vpop.f32.mrf.mxu0 }
 0x6d2   :  { %22720 = vst [vmem:[#allocation33_spill] sm:$0xff] %v21235_v52  ;;  %v21237_v15 = vpop.f32.mrf.mxu1 }
 0x6d3   :  { %22721 = vst [vmem:[#allocation23_spill] sm:$0xff] %v21237_v15  ;;  %v21239_v48 = vpop.f32.mrf.mxu0 }
 0x6d4   :  { %22722 = vst [vmem:[#allocation51_spill] sm:$0xff] %v21239_v48  ;;  %v21241_v45 = vpop.f32.mrf.mxu1 }
 0x6d5   :  { %22723 = vst [vmem:[#allocation24_spill] sm:$0xff] %v21241_v45  ;;  %v21243_v8 = vpop.f32.mrf.mxu0 }
 0x6d6   :  { %22724 = vst [vmem:[#allocation29_spill] sm:$0xff] %v21243_v8  ;;  %v21245_v28 = vpop.f32.mrf.mxu1 }
 0x6d7   :  { %22725 = vst [vmem:[#allocation30_spill] sm:$0xff] %v21245_v28  ;;  %v21247_v42 = vpop.f32.mrf.mxu0 }
 0x6d8   :  { %22726 = vst [vmem:[#allocation20_spill] sm:$0xff] %v21247_v42  ;;  %v21249_v10 = vpop.f32.mrf.mxu1 }
 0x6d9   :  { %22727 = vst [vmem:[#allocation50_spill] sm:$0xff] %v21249_v10  ;;  %v21251_v22 = vpop.f32.mrf.mxu0 }
 0x6da   :  { %22728 = vst [vmem:[#allocation26_spill] sm:$0xff] %v21251_v22  ;;  %v21253_v41 = vpop.f32.mrf.mxu1 }
 0x6db   :  { %22729 = vst [vmem:[#allocation45_spill] sm:$0xff] %v21253_v41  ;;  %v21255_v47 = vpop.f32.mrf.mxu0 }
 0x6dc   :  { %22730 = vst [vmem:[#allocation47_spill] sm:$0xff] %v21255_v47  ;;  %v21257_v58 = vpop.f32.mrf.mxu1 }
 0x6dd   :  { %22731 = vst [vmem:[#allocation42_spill] sm:$0xff] %v21257_v58  ;;  %v21259_v15 = vpop.f32.mrf.mxu0 }
 0x6de   :  { %22732 = vst [vmem:[#allocation52_spill] sm:$0xff] %v21259_v15  ;;  %v21261_v48 = vpop.f32.mrf.mxu1 }
 0x6df   :  { %22733 = vst [vmem:[#allocation27_spill] sm:$0xff] %v21261_v48  ;;  %v21263_v45 = vpop.f32.mrf.mxu0 }
 0x6e0   :  { %22734 = vst [vmem:[#allocation21_spill] sm:$0xff] %v21263_v45  ;;  %v21265_v8 = vpop.f32.mrf.mxu1 }
 0x6e1   :  { %22735 = vst [vmem:[#allocation54_spill] sm:$0xff] %v21265_v8  ;;  %v21267_v28 = vpop.f32.mrf.mxu0 }
 0x6e2   :  { %22736 = vst [vmem:[#allocation39_spill] sm:$0xff] %v21267_v28  ;;  %v21269_v42 = vpop.f32.mrf.mxu1 }
 0x6e3   :  { %22737 = vst [vmem:[#allocation37_spill] sm:$0xff] %v21269_v42  ;;  %v21271_v10 = vpop.f32.mrf.mxu0 }
 0x6e4   :  { %22738 = vst [vmem:[#allocation48_spill] sm:$0xff] %v21271_v10  ;;  %v21273_v22 = vpop.f32.mrf.mxu1 }
 0x6e5   :  { %22739 = vst [vmem:[#allocation36_spill] sm:$0xff] %v21273_v22  ;;  %v21275_v41 = vpop.f32.mrf.mxu0 }
 0x6e6   :  { %22740 = vst [vmem:[#allocation53_spill] sm:$0xff] %v21275_v41  ;;  %v21277_v47 = vpop.f32.mrf.mxu1 }
 0x6e7   :  { %22741 = vst [vmem:[#allocation44_spill] sm:$0xff] %v21277_v47  ;;  %v16818_v58 = vpop.f32.mrf.mxu0 }
 0x6e8   :  { %v21279_v15 = vpop.f32.mrf.mxu1 }
 0x6e9   :  { %22742 = vst [vmem:[#allocation34_spill] sm:$0xff] %v21279_v15  ;;  %v10339_v48 = vpop.f32.mrf.mxu0  ;;  %v9206_v15 = vadd.f32 %v21110_v18, %v21108_v7  ;;  %v9236_v18 = vadd.f32 %v21122_v39, %v21120_v31 }
 0x6ea   :  { %v21281_v52 = vpop.f32.mrf.mxu1 }
 0x6eb   :  { %22743 = vst [vmem:[#allocation55_spill] sm:$0xff] %v21281_v52  ;;  %v21283_v45 = vpop.f32.mrf.mxu0  ;;  %v9504_v31 = vadd.f32 %v21175_v12, %v9236_v18 }
 0x6ec   :  { %22744 = vst [vmem:[#allocation46_spill] sm:$0xff] %v21283_v45  ;;  %v21287_v28 = vpop.f32.mrf.mxu1 }
 0x6ed   :  { %v21285_v8 = vpop.f32.mrf.mxu0  ;;  %22746 = vst [vmem:[#allocation18_spill] sm:$0xff] %v21287_v28 }
 0x6ee   :  { %22745 = vst [vmem:[#allocation32_spill] sm:$0xff] %v21285_v8  ;;  %v21293_v22 = vpop.f32.mrf.mxu1  ;;  %v9498_v8 = vadd.f32 %v21151_v43, %v9206_v15 }
 0x6ef   :  { %v21289_v42 = vpop.f32.mrf.mxu0  ;;  %22748 = vst [vmem:[#allocation25_spill] sm:$0xff] %v21293_v22  ;;  %v9729_v22 = vadd.f32 %v21146_v1, %v21149_v40 }
 0x6f0   :  { %v21301_v52 = vpop.f32.mrf.mxu1  ;;  %v9728_v43 = vadd.f32 %v21153_v19, %v9498_v8  ;;  %v9266_v19 = vadd.f32 %v21138_v46, %v21136_v29  ;;  %v9735_v46 = vadd.f32 %v21171_v49, %v21173_v55 }
 0x6f1   :  { %v21291_v10 = vpop.f32.mrf.mxu0 }
 0x6f2   :  { %22747 = vst [vmem:[#allocation57_spill] sm:$0xff] %v21291_v10  ;;  %v9216_v10 = vadd.f32 %v21114_v0, %v21112_v35  ;;  %v9246_v35 = vadd.f32 %v21128_v9, %v21126_v11  ;;  %v9958_v39 = vadd.f32 %v9879_v23, %v9728_v43  ;;  %v22755_v23 = vld [vmem:[#allocation29_spill] sm:$0xff]  ;;  %v22762_v43 = vld [vmem:[#allocation26_spill] sm:$0xff] }
 0x6f3   :  { %v21295_v41 = vpop.f32.mrf.mxu0 }
 0x6f4   :  { %22749 = vst [vmem:[#allocation43_spill] sm:$0xff] %v21295_v41  ;;  %v21312_v41 = vpop.f32.mrf.mxu1  ;;  %v9500_v15 = vadd.f32 %v21159_v20, %v9216_v10  ;;  %v9506_v11 = vadd.f32 %v21189_v5, %v9246_v35  ;;  %v10188_v8 = vadd.f32 %v21221_v54, %v9958_v39  ;;  %v22756_v54 = vld [vmem:[#allocation34_spill] sm:$0xff] }
 0x6f5   :  { %v21297_v47 = vpop.f32.mrf.mxu0 }
 0x6f6   :  { %22750 = vst [vmem:[#allocation40_spill] sm:$0xff] %v21297_v47  ;;  %v9226_v47 = vadd.f32 %v21118_v16, %v21116_v44  ;;  %v9256_v44 = vadd.f32 %v21134_v32, %v21132_v21  ;;  %v9731_v16 = vadd.f32 %v21155_v26, %v21157_v3  ;;  %v21332_v40 = vpop.f32.mrf.mxu1  ;;  %v9730_v20 = vadd.f32 %v21161_v60, %v9500_v15 }
 0x6f7   :  { %v21303_v45 = vpop.f32.mrf.mxu0  ;;  %v9276_v26 = vadd.f32 %v21142_v2, %v21140_v6  ;;  %v9733_v3 = vadd.f32 %v21163_v24, %v21165_v62  ;;  %v9734_v60 = vadd.f32 %v21177_v34, %v9504_v31  ;;  %v9737_v6 = vadd.f32 %v21179_v59, %v21184_v53  ;;  %v22752_v53 = vld [vmem:[#allocation33_spill] sm:$0xff]  ;;  %v22764_v31 = vld [vmem:[#allocation55_spill] sm:$0xff] }
 0x6f8   :  { %v9502_v0 = vadd.f32 %v21167_v33, %v9226_v47  ;;  %v9508_v33 = vadd.f32 %v21199_v61, %v9256_v44  ;;  %v9961_v32 = vadd.f32 %v21223_v51, %v9731_v16  ;;  %v21355_v61 = vpop.f32.mrf.mxu1  ;;  %v9736_v2 = vadd.f32 %v21191_v57, %v9506_v11  ;;  %v22757_v51 = vld [vmem:[#allocation46_spill] sm:$0xff] }
 0x6f9   :  { %v21306_v28 = vpop.f32.mrf.mxu0  ;;  %v9739_v24 = vadd.f32 %v21194_v17, %v21197_v14  ;;  %v9510_v62 = vadd.f32 %v21207_v27, %v9266_v19  ;;  %v9512_v55 = vadd.f32 %v21215_v37, %v9276_v26  ;;  %v10418_v10 = vadd.f32 %v10339_v48, %v10188_v8  ;;  %v22754_v27 = vld [vmem:[#allocation56_spill] sm:$0xff]  ;;  %v22763_v44 = vld [vmem:[#allocation38_spill] sm:$0xff]  ;;  %v21405_v8 = vld [vmem:[%s22369_s15] ss:$0 sm:$0xff] }
 0x6fa   :  { %22751 = vst [vmem:[#allocation41_spill] sm:$0xff] %v21306_v28  ;;  %v9959_v28 = vadd.f32 %v16754_v56, %v9729_v22  ;;  %v9732_v29 = vadd.f32 %v21169_v30, %v9502_v0  ;;  %v9738_v49 = vadd.f32 %v21201_v4, %v9508_v33  ;;  %v10191_v34 = vadd.f32 %v21225_v25, %v9961_v32  ;;  %v22753_v56 = vld [vmem:[#allocation51_spill] sm:$0xff]  ;;  %v22761_v48 = vld [vmem:[#allocation20_spill] sm:$0xff]  ;;  %v21391_v0 = vld [vmem:[%s22368_s14] ss:$0 sm:$0xff] }
 0x6fb   :  { %v21316_v7 = vpop.f32.mrf.mxu0  ;;  %v9741_v22 = vadd.f32 %v21203_v63, %v21205_v13  ;;  %v9963_v59 = vadd.f32 %v21231_v38, %v9733_v3  ;;  %v9965_v17 = vadd.f32 %v22753_v56, %v9735_v46  ;;  %v9964_v4 = vadd.f32 %v22755_v23, %v9734_v60  ;;  %v22759_v13 = vld [vmem:[#allocation49_spill] sm:$0xff]  ;;  %v22760_v38 = vld [vmem:[#allocation35_spill] sm:$0xff]  ;;  %v22765_v19 = vld [vmem:[#allocation32_spill] sm:$0xff] }
 0x6fc   :  { %v10189_v21 = vadd.f32 %v21219_v36, %v9959_v28  ;;  %v9960_v28 = vadd.f32 %v21227_v50, %v9730_v20  ;;  %v9962_v57 = vadd.f32 %v22752_v53, %v9732_v29  ;;  %v10421_v25 = vadd.f32 %v22757_v51, %v10191_v34  ;;  %v21379_v50 = vpop.f32.mrf.mxu1  ;;  %v22766_v33 = vld [vmem:[#allocation22_spill] sm:$0xff]  ;;  %v22767_v32 = vld [vmem:[#allocation23_spill] sm:$0xff]  ;;  %v22768_v3 = vld [vmem:[#allocation24_spill] sm:$0xff] }
 0x6fd   :  { %v21325_v1 = vpop.f32.mrf.mxu0  ;;  %v21384_v47 = vadd.f32 %v22760_v38, %v22759_v13  ;;  %v9967_v18 = vadd.f32 %v22761_v48, %v9737_v6  ;;  %v9966_v15 = vadd.f32 %v22762_v43, %v9736_v2  ;;  %v21394_v16 = vadd.f32 %v22763_v44, %v9512_v55  ;;  %v22769_v46 = vld [vmem:[#allocation47_spill] sm:$0xff]  ;;  %v22771_v2 = vld [vmem:[#allocation18_spill] sm:$0xff]  ;;  %v22775_v23 = vld [vmem:[#allocation25_spill] sm:$0xff] }
 0x6fe   :  { %v10419_v5 = vadd.f32 %v16818_v58, %v10189_v21  ;;  %v10190_v36 = vadd.f32 %v22754_v27, %v9960_v28  ;;  %v22758_v58 = vld [vmem:[#allocation28_spill] sm:$0xff]  ;;  %v10648_v39 = vadd.f32 %v22764_v31, %v10418_v10  ;;  %v10193_v21 = vadd.f32 %v22766_v33, %v9963_v59  ;;  %v21409_v55 = vpop.f32.mrf.mxu1  ;;  %v22772_v59 = vld [vmem:[#allocation50_spill] sm:$0xff]  ;;  %v22778_v48 = vld [vmem:[#allocation21_spill] sm:$0xff] }
 0x6ff   :  { %v21337_v9 = vpop.f32.mrf.mxu0  ;;  %v9740_v63 = vadd.f32 %v22758_v58, %v9510_v62  ;;  %v10192_v26 = vadd.f32 %v22767_v32, %v9962_v57  ;;  %v10195_v29 = vadd.f32 %v22768_v3, %v9965_v17  ;;  %v9969_v60 = vadd.f32 %v22769_v46, %v9739_v24  ;;  %v22773_v57 = vld [vmem:[#allocation45_spill] sm:$0xff]  ;;  %v22777_v13 = vld [vmem:[#allocation52_spill] sm:$0xff]  ;;  %v22779_v43 = vld [vmem:[#allocation43_spill] sm:$0xff] }
 0x700   :  { %v10649_v37 = vadd.f32 %v22756_v54, %v10419_v5  ;;  %v10420_v11 = vadd.f32 %v22765_v19, %v10190_v36  ;;  %v22770_v5 = vld [vmem:[#allocation30_spill] sm:$0xff]  ;;  %v10651_v62 = vadd.f32 %v22771_v2, %v10421_v25  ;;  %v10197_v53 = vadd.f32 %v22772_v59, %v9967_v18  ;;  %v22774_v17 = vld [vmem:[#allocation57_spill] sm:$0xff]  ;;  %v16865_v44 = vpop.f32.mrf.mxu1 }
 0x701   :  { %v21350_v12 = vpop.f32.mrf.mxu0  ;;  %v10194_v6 = vadd.f32 %v22770_v5, %v9964_v4  ;;  %v10196_v56 = vadd.f32 %v22773_v57, %v9966_v15  ;;  %v10423_v24 = vadd.f32 %v21289_v42, %v10193_v21  ;;  %v10422_v27 = vadd.f32 %v22774_v17, %v10192_v26  ;;  %v22776_v25 = vld [vmem:[#allocation42_spill] sm:$0xff]  ;;  %v22782_v5 = vld [vmem:[#allocation27_spill] sm:$0xff] }
 0x702   :  { %v10650_v54 = vadd.f32 %v22775_v23, %v10420_v11  ;;  %v10199_v58 = vadd.f32 %v22776_v25, %v9969_v60  ;;  %v9968_v38 = vadd.f32 %v22777_v13, %v9738_v49  ;;  %v9971_v18 = vadd.f32 %v22778_v48, %v9741_v22  ;;  %v22781_v49 = vld [vmem:[#allocation40_spill] sm:$0xff]  ;;  %v8809_v22 = vld [vmem:[#allocation3] sm:$0xff] }
 0x703   :  { %v21363_v30 = vpop.f32.mrf.mxu0  ;;  %v10425_v15 = vadd.f32 %v22779_v43, %v10195_v29  ;;  %v10653_v21 = vadd.f32 %v21301_v52, %v10423_v24  ;;  %v10652_v32 = vadd.f32 %v21312_v41, %v10422_v27  ;;  %v10424_v26 = vadd.f32 %v22781_v49, %v10194_v6  ;;  %v10619_v41 = vpop.f32.mrf.mxu1  ;;  %v22783_v17 = vld [vmem:[#allocation54_spill] sm:$0xff] }
 0x704   :  { %v10198_v2 = vadd.f32 %v22782_v5, %v9968_v38  ;;  %v10201_v27 = vadd.f32 %v22783_v17, %v9971_v18  ;;  %v22785_v38 = vld [vmem:[#allocation41_spill] sm:$0xff]  ;;  %v10429_v18 = vadd.f32 %v21316_v7, %v10199_v58 }
 0x705   :  { %v21373_v14 = vpop.f32.mrf.mxu0  ;;  %v10426_v48 = vadd.f32 %v22785_v38, %v10196_v56  ;;  %v22787_v56 = vld [vmem:[#allocation53_spill] sm:$0xff] }
 0x706   :  { %v10428_v7 = vadd.f32 %v21325_v1, %v10198_v2 }
 0x707   :  { %v16882_v35 = vpop.f32.mrf.mxu0 }
 0x708   :  { %v10879_v20 = vadd.f32 %v16882_v35, %v10649_v37  ;;  %v8810_v35 = vld [vmem:[#allocation3 + $0x8] sm:$0xff] }
 0x709   :  { %v10799_v28 = vpop.f32.mrf.mxu0 }
 0x70a   :  { %v10902_v34 = vmul.f32 %v21391_v0, %v10879_v20  ;;  %v10878_v10 = vadd.f32 %v10799_v28, %v10648_v39  ;;  %v22780_v20 = vld [vmem:[#allocation39_spill] sm:$0xff] }
 0x70b   :  { %v16885_v36 = vpop.f32.mrf.mxu0  ;;  %v9970_v33 = vadd.f32 %v22780_v20, %v9740_v63  ;;  %v10427_v63 = vadd.f32 %v21303_v45, %v10197_v53  ;;  %v9972_v20 = vadd.f32 %v22787_v56, %v21394_v16 }
 0x70c   :  { %v10925_v4 = vadd.f32 %v21405_v8, %v10902_v34  ;;  %v10901_v37 = vmul.f32 %v21391_v0, %v10878_v10  ;;  %v10881_v51 = vadd.f32 %v16885_v36, %v10651_v62  ;;  %v10655_v62 = vadd.f32 %v21332_v40, %v10425_v15  ;;  %v8812_v34 = vld [vmem:[#allocation3 + $0x18] sm:$0xff]  ;;  %v8811_v40 = vld [vmem:[#allocation3 + $0x10] sm:$0xff]  ;;  %v16868_v15 = vpop.f32.mrf.mxu1 }
 0x70d   :  { %v10809_v42 = vpop.f32.mrf.mxu0  ;;  %v22784_v36 = vld [vmem:[#allocation37_spill] sm:$0xff]  ;;  %v10657_v13 = vadd.f32 %v21379_v50, %v10427_v63 }
 0x70e   :  { %v10941_v31 = vadd.f32 %v10925_v4, %v8810_v35  ;;  %v10924_v39 = vadd.f32 %v21405_v8, %v10901_v37  ;;  %v10904_v19 = vmul.f32 %v21391_v0, %v10881_v51  ;;  %v10880_v11 = vadd.f32 %v10809_v42, %v10650_v54  ;;  %v8814_v42 = vld [vmem:[#allocation3 + $0x28] sm:$0xff] }
 0x70f   :  { %v16888_v3 = vpop.f32.mrf.mxu0  ;;  %v10200_v23 = vadd.f32 %v22784_v36, %v9970_v33  ;;  %v10654_v54 = vadd.f32 %v21355_v61, %v10424_v26  ;;  %v8813_v33 = vld [vmem:[#allocation3 + $0x20] sm:$0xff]  ;;  %v22789_v36 = vld [vmem:[#allocation44_spill] sm:$0xff] }
 0x710   :  { %v10957_v29 = vmax.f32 %v10941_v31, 0.0  ;;  %v10940_v46 = vadd.f32 %v10924_v39, %v8809_v22  ;;  %v10927_v60 = vadd.f32 %v21405_v8, %v10904_v19  ;;  %v10903_v28 = vmul.f32 %v21391_v0, %v10880_v11  ;;  %v22786_v11 = vld [vmem:[#allocation48_spill] sm:$0xff] }
 0x711   :  { %v10883_v52 = vadd.f32 %v16888_v3, %v10653_v21  ;;  %v10819_v10 = vpop.f32.mrf.mxu0  ;;  %v9973_v50 = vadd.f32 %v22786_v11, %v21384_v47  ;;  %v10656_v3 = vadd.f32 %v21409_v55, %v10426_v48  ;;  %v10431_v47 = vadd.f32 %v21337_v9, %v10201_v27  ;;  %v8815_v9 = vld [vmem:[#allocation3 + $0x30] sm:$0xff] }
 0x712   :  { %10973 = vst.msk [vmem:[#allocation3 + $0x8] sm:$0xff] %vm145_vm0, %v10957_v29  ;;  %v10956_v6 = vmax.f32 %v10940_v46, 0.0  ;;  %v10943_v59 = vadd.f32 %v10927_v60, %v8812_v34  ;;  %v10926_v57 = vadd.f32 %v21405_v8, %v10903_v28  ;;  %v10882_v24 = vadd.f32 %v10819_v10, %v10652_v32  ;;  %v8816_v60 = vld [vmem:[#allocation3 + $0x38] sm:$0xff]  ;;  %v10629_v28 = vpop.f32.mrf.mxu1 }
 0x713   :  { %v10906_v45 = vmul.f32 %v21391_v0, %v10883_v52  ;;  %v16891_v53 = vpop.f32.mrf.mxu0  ;;  %v10659_v29 = vadd.f32 %v16865_v44, %v10429_v18  ;;  %v10658_v34 = vadd.f32 %v10619_v41, %v10428_v7  ;;  %v10430_v52 = vadd.f32 %v21350_v12, %v10200_v23  ;;  %v22788_v27 = vld [vmem:[#allocation36_spill] sm:$0xff] }
 0x714   :  { %10972 = vst.msk [vmem:[#allocation3] sm:$0xff] %vm145_vm0, %v10956_v6  ;;  %v10959_v4 = vmax.f32 %v10943_v59, 0.0  ;;  %v10942_v37 = vadd.f32 %v10926_v57, %v8811_v40  ;;  %v10905_v51 = vmul.f32 %v21391_v0, %v10882_v24  ;;  %v10885_v25 = vadd.f32 %v16891_v53, %v10655_v62  ;;  %v16871_v6 = vpop.f32.mrf.mxu1  ;;  %v8818_v40 = vld [vmem:[#allocation3 + $0x48] sm:$0xff] }
 0x715   :  { %v10929_v43 = vadd.f32 %v21405_v8, %v10906_v45  ;;  %v10829_v61 = vpop.f32.mrf.mxu0  ;;  %v10203_v41 = vadd.f32 %v22788_v27, %v9973_v50  ;;  %v10202_v12 = vadd.f32 %v22789_v36, %v9972_v20  ;;  %v10661_v23 = vadd.f32 %v16868_v15, %v10431_v47  ;;  %v8819_v20 = vld [vmem:[#allocation3 + $0x50] sm:$0xff] }
 0x716   :  { %10975 = vst.msk [vmem:[#allocation3 + $0x18] sm:$0xff] %vm145_vm0, %v10959_v4  ;;  %v10958_v35 = vmax.f32 %v10942_v37, 0.0  ;;  %v10928_v31 = vadd.f32 %v21405_v8, %v10905_v51  ;;  %v10908_v39 = vmul.f32 %v21391_v0, %v10885_v25  ;;  %v10884_v19 = vadd.f32 %v10829_v61, %v10654_v54  ;;  %v10639_v15 = vpop.f32.mrf.mxu1 }
 0x717   :  { %v10945_v58 = vadd.f32 %v10929_v43, %v8814_v42  ;;  %v16894_v21 = vpop.f32.mrf.mxu0  ;;  %v10433_v38 = vadd.f32 %v21363_v30, %v10203_v41  ;;  %v10432_v48 = vadd.f32 %v21373_v14, %v10202_v12  ;;  %v8817_v42 = vld [vmem:[#allocation3 + $0x40] sm:$0xff]  ;;  %v8820_v14 = vld [vmem:[#allocation3 + $0x58] sm:$0xff] }
 0x718   :  { %10974 = vst.msk [vmem:[#allocation3 + $0x10] sm:$0xff] %vm145_vm0, %v10958_v35  ;;  %v10944_v32 = vadd.f32 %v10928_v31, %v8813_v33  ;;  %v10931_v49 = vadd.f32 %v21405_v8, %v10908_v39  ;;  %v10907_v26 = vmul.f32 %v21391_v0, %v10884_v19  ;;  %v10887_v22 = vadd.f32 %v16894_v21, %v10657_v13  ;;  %v11466_v21 = vld [vmem:[#allocation14 + $0x50] sm:$0xff] }
 0x719   :  { %v10989_v46 = vld [vmem:[#allocation3 + $0x8] sm:$0xff]  ;;  %v10961_v16 = vmax.f32 %v10945_v58, 0.0  ;;  %v10839_v1 = vpop.f32.mrf.mxu0  ;;  %v10660_v13 = vadd.f32 %v10629_v28, %v10430_v52 }
 0x71a   :  { %11005 = vst.msk [vmem:[#allocation2 + $0x21] sm:$0xff] %vm145_vm0, %v10989_v46  ;;  %v10960_v5 = vmax.f32 %v10944_v32, 0.0  ;;  %v10947_v2 = vadd.f32 %v10931_v49, %v8816_v60  ;;  %v10930_v62 = vadd.f32 %v21405_v8, %v10907_v26  ;;  %v10910_v63 = vmul.f32 %v21391_v0, %v10887_v22 }
 0x71b   :  { %v10988_v55 = vld [vmem:[#allocation3] sm:$0xff]  ;;  %10977 = vst.msk [vmem:[#allocation3 + $0x28] sm:$0xff] %vm145_vm0, %v10961_v16  ;;  %v10886_v44 = vadd.f32 %v10839_v1, %v10656_v3  ;;  %v16897_v10 = vpop.f32.mrf.mxu0  ;;  %v10663_v32 = vadd.f32 %v16871_v6, %v10433_v38  ;;  %v10662_v49 = vadd.f32 %v10639_v15, %v10432_v48 }
 0x71c   :  { %11004 = vst.msk [vmem:[#allocation2 + $0x11] sm:$0xff] %vm145_vm0, %v10988_v55  ;;  %10976 = vst.msk [vmem:[#allocation3 + $0x20] sm:$0xff] %vm145_vm0, %v10960_v5  ;;  %v10963_v59 = vmax.f32 %v10947_v2, 0.0  ;;  %v10946_v57 = vadd.f32 %v10930_v62, %v8815_v9  ;;  %v10933_v24 = vadd.f32 %v21405_v8, %v10910_v63  ;;  %v10889_v17 = vadd.f32 %v16897_v10, %v10659_v29  ;;  %v11696_v2 = vld [vmem:[#allocation14 + $0x70] sm:$0xff]  ;;  %v8822_v63 = vld [vmem:[#allocation3 + $0x68] sm:$0xff] }
 0x71d   :  { %v10991_v54 = vld [vmem:[#allocation3 + $0x18] sm:$0xff]  ;;  %v10909_v45 = vmul.f32 %v21391_v0, %v10886_v44  ;;  %v10849_v53 = vpop.f32.mrf.mxu0  ;;  %v8821_v44 = vld [vmem:[#allocation3 + $0x60] sm:$0xff] }
 0x71e   :  { %11007 = vst.msk [vmem:[#allocation2 + $0x41] sm:$0xff] %vm145_vm0, %v10991_v54  ;;  %10979 = vst.msk [vmem:[#allocation3 + $0x38] sm:$0xff] %vm145_vm0, %v10963_v59  ;;  %v10962_v4 = vmax.f32 %v10946_v57, 0.0  ;;  %v10949_v37 = vadd.f32 %v10933_v24, %v8818_v40  ;;  %v10912_v51 = vmul.f32 %v21391_v0, %v10889_v17  ;;  %v10888_v25 = vadd.f32 %v10849_v53, %v10658_v34  ;;  %v22790_v59 = vld [vmem:[#allocation19_spill] sm:$0xff]  ;;  %v11464_v38 = vld [vmem:[#allocation14 + $0x40] sm:$0xff] }
 0x71f   :  { %v21475_v18 = vld [vmem:[#allocation3 + $0x10] sm:$0xff]  ;;  %v10932_v43 = vadd.f32 %v21405_v8, %v10909_v45  ;;  %v16900_v61 = vpop.f32.mrf.mxu0  ;;  %v11694_v15 = vld [vmem:[#allocation14 + $0x60] sm:$0xff] }
 0x720   :  { %11006 = vst.msk [vmem:[#allocation2 + $0x31] sm:$0xff] %vm145_vm0, %v21475_v18  ;;  %10978 = vst.msk [vmem:[#allocation3 + $0x30] sm:$0xff] %vm145_vm0, %v10962_v4  ;;  %v10965_v35 = vmax.f32 %v10949_v37, 0.0  ;;  %v10935_v31 = vadd.f32 %v21405_v8, %v10912_v51  ;;  %v10911_v39 = vmul.f32 %v21391_v0, %v10888_v25  ;;  %v10891_v30 = vadd.f32 %v16900_v61, %v10661_v23  ;;  %v22791_v57 = vld [vmem:[#allocation31_spill] sm:$0xff]  ;;  %v8824_v51 = vld [vmem:[#allocation3 + $0x78] sm:$0xff] }
 0x721   :  { %v10948_v19 = vadd.f32 %v10932_v43, %v8817_v42  ;;  %v10859_v11 = vpop.f32.mrf.mxu0  ;;  %v21504_v28 = vld [vmem:[#allocation2 + $0x21] sm:$0xff]  ;;  %v11465_v24 = vld [vmem:[#allocation14 + $0x48] sm:$0xff] }
 0x722   :  { %v21483_v50 = vld [vmem:[#allocation3 + $0x28] sm:$0xff]  ;;  %10981 = vst.msk [vmem:[#allocation3 + $0x48] sm:$0xff] %vm145_vm0, %v10965_v35  ;;  %v10951_v56 = vadd.f32 %v10935_v31, %v8820_v14  ;;  %v10934_v7 = vadd.f32 %v21405_v8, %v10911_v39  ;;  %v10914_v58 = vmul.f32 %v21391_v0, %v10891_v30  ;;  %v10890_v33 = vadd.f32 %v10859_v11, %v10660_v13  ;;  %v21506_v5 = vld [vmem:[#allocation2 + $0x20] sm:$0xff]  ;;  %v8823_v25 = vld [vmem:[#allocation3 + $0x70] sm:$0xff] }
 0x723   :  { %11009 = vst.msk [vmem:[#allocation2 + $0x61] sm:$0xff] %vm145_vm0, %v21483_v50  ;;  %v21490_v26 = vld [vmem:[#allocation3 + $0x20] sm:$0xff]  ;;  %v10964_v22 = vmax.f32 %v10948_v19, 0.0  ;;  %v16903_v3 = vpop.f32.mrf.mxu0  ;;  %v21492_v29 = vld [vmem:[#allocation2 + $0x11] sm:$0xff] }
 0x724   :  { %v21494_v47 = vld [vmem:[#allocation2 + $0x10] sm:$0xff]  ;;  %11008 = vst.msk [vmem:[#allocation2 + $0x51] sm:$0xff] %vm145_vm0, %v21490_v26  ;;  %v10967_v46 = vmax.f32 %v10951_v56, 0.0  ;;  %v10950_v16 = vadd.f32 %v10934_v7, %v8819_v20  ;;  %v10937_v60 = vadd.f32 %v21405_v8, %v10914_v58  ;;  %v10913_v1 = vmul.f32 %v21391_v0, %v10890_v33  ;;  %16913 = vmatmul.mubr.msk.f32.vlgmr.msra.gmra.mxu1 %vm145_vm0, %v21492_v29  ;;  %v11048_v14 = vld [vmem:[#allocation2 + $0xa1] sm:$0xff] }
 0x725   :  { %16945 = vmatmul.mubr.msk.f32.vlgmr.msra.gmra.mxu0 %vm145_vm0, %v21494_v47  ;;  %v21508_v62 = vld [vmem:[#allocation3 + $0x38] sm:$0xff]  ;;  %10980 = vst.msk [vmem:[#allocation3 + $0x40] sm:$0xff] %vm145_vm0, %v10964_v22  ;;  %v10893_v34 = vadd.f32 %v16903_v3, %v10663_v32  ;;  %v10869_v52 = vpop.f32.mrf.mxu0  ;;  %16915 = vmatprep.mubr.msk.f32.mxu1 %vm145_vm0, %v21504_v28  ;;  %v21536_v40 = vld [vmem:[#allocation2 + $0x41] sm:$0xff]  ;;  %v11695_v53 = vld [vmem:[#allocation14 + $0x68] sm:$0xff] }
 0x726   :  { %16947 = vmatprep.mubr.msk.f32.mxu0 %vm145_vm0, %v21506_v5  ;;  %11011 = vst.msk [vmem:[#allocation2 + $0x81] sm:$0xff] %vm145_vm0, %v21508_v62  ;;  %10983 = vst.msk [vmem:[#allocation3 + $0x58] sm:$0xff] %vm145_vm0, %v10967_v46  ;;  %v10966_v55 = vmax.f32 %v10950_v16, 0.0  ;;  %v10953_v9 = vadd.f32 %v10937_v60, %v8822_v63  ;;  %v10936_v10 = vadd.f32 %v21405_v8, %v10913_v1  ;;  %16969 = vmatpush3.msra.mxu1 %v22790_v59  ;;  %v21538_v45 = vld [vmem:[#allocation2 + $0x40] sm:$0xff] }
 0x727   :  { %v10892_v6 = vadd.f32 %v10869_v52, %v10662_v49  ;;  %17001 = vmatpush3.msra.mxu0 %v22791_v57  ;;  %v21521_v17 = vld [vmem:[#allocation3 + $0x30] sm:$0xff]  ;;  %v10916_v27 = vmul.f32 %v21391_v0, %v10893_v34  ;;  %16970 = vmatprep.subr.mxu1 %v11466_v21  ;;  %v11028_v11 = vld [vmem:[#allocation2 + $0xa0] sm:$0xff] }
 0x728   :  { %v21524_v41 = vld [vmem:[#allocation2 + $0x31] sm:$0xff]  ;;  %17002 = vmatprep.subr.mxu0 %v11696_v2  ;;  %11010 = vst.msk [vmem:[#allocation2 + $0x71] sm:$0xff] %vm145_vm0, %v21521_v17  ;;  %10982 = vst.msk [vmem:[#allocation3 + $0x50] sm:$0xff] %vm145_vm0, %v10966_v55  ;;  %v10969_v12 = vmax.f32 %v10953_v9, 0.0  ;;  %v10952_v23 = vadd.f32 %v10936_v10, %v8821_v44  ;;  %16971 = vmatpush3.msra.mxu1 %v11466_v21  ;;  %v11927_v58 = vld [vmem:[#allocation14 + $0x98] sm:$0xff] }
 0x729   :  { %v21526_v36 = vld [vmem:[#allocation2 + $0x30] sm:$0xff]  ;;  %v10915_v54 = vmul.f32 %v21391_v0, %v10892_v6  ;;  %16916 = vmatmul.mubr.msk.f32.gmra.mxu1 %vm145_vm0, %v21524_v41  ;;  %v21540_v4 = vld [vmem:[#allocation3 + $0x48] sm:$0xff]  ;;  %v10939_v37 = vadd.f32 %v21405_v8, %v10916_v27  ;;  %17003 = vmatpush3.msra.mxu0 %v11696_v2  ;;  %v12157_v33 = vld [vmem:[#allocation14 + $0xb8] sm:$0xff] }
 0x72a   :  { %16948 = vmatmul.mubr.msk.f32.gmra.mxu0 %vm145_vm0, %v21526_v36  ;;  %16918 = vmatprep.mubr.msk.f32.mxu1 %vm145_vm0, %v21536_v40  ;;  %11013 = vst.msk [vmem:[#allocation2 + $0xc1] sm:$0xff] %vm145_vm0, %v21540_v4  ;;  %10985 = vst.msk [vmem:[#allocation3 + $0x68] sm:$0xff] %vm145_vm0, %v10969_v12  ;;  %v10968_v0 = vmax.f32 %v10952_v23, 0.0  ;;  %v21564_v31 = vld [vmem:[#allocation2 + $0x60] sm:$0xff]  ;;  %v21667_v57 = vld [vmem:[#allocation2 + $0x12] sm:$0xff] }
 0x72b   :  { %16950 = vmatprep.mubr.msk.f32.mxu0 %vm145_vm0, %v21538_v45  ;;  %v10938_v13 = vadd.f32 %v21405_v8, %v10915_v54  ;;  %v10955_v48 = vadd.f32 %v10939_v37, %v8824_v51  ;;  %v21551_v43 = vld [vmem:[#allocation2 + $0x51] sm:$0xff]  ;;  %16972 = vmatprep.subr.mxu1 %v11465_v24  ;;  %v21562_v8 = vld [vmem:[#allocation2 + $0x61] sm:$0xff] }
 0x72c   :  { %v21553_v61 = vld [vmem:[#allocation2 + $0x50] sm:$0xff]  ;;  %17004 = vmatprep.subr.mxu0 %v11695_v53  ;;  %v21555_v35 = vld [vmem:[#allocation3 + $0x40] sm:$0xff]  ;;  %10984 = vst.msk [vmem:[#allocation3 + $0x60] sm:$0xff] %vm145_vm0, %v10968_v0  ;;  %16973 = vmatpush3.msra.mxu1 %v11465_v24 }
 0x72d   :  { %v10954_v42 = vadd.f32 %v10938_v13, %v8823_v25  ;;  %16919 = vmatmul.mubr.msk.f32.gmra.mxu1 %vm145_vm0, %v21551_v43  ;;  %11012 = vst.msk [vmem:[#allocation2 + $0xb1] sm:$0xff] %vm145_vm0, %v21555_v35  ;;  %v21568_v39 = vld [vmem:[#allocation3 + $0x58] sm:$0xff]  ;;  %v10971_v30 = vmax.f32 %v10955_v48, 0.0  ;;  %17005 = vmatpush3.msra.mxu0 %v11695_v53  ;;  %v11447_v59 = vld [vmem:[#allocation2 + $0x2] sm:$0xff]  ;;  %v11925_v54 = vld [vmem:[#allocation14 + $0x88] sm:$0xff] }
 0x72e   :  { %16951 = vmatmul.mubr.msk.f32.gmra.mxu0 %vm145_vm0, %v21553_v61  ;;  %16921 = vmatprep.mubr.msk.f32.mxu1 %vm145_vm0, %v21562_v8  ;;  %11015 = vst.msk [vmem:[#allocation2 + $0xe1] sm:$0xff] %vm145_vm0, %v21568_v39  ;;  %v21673_v24 = vld [vmem:[#allocation2 + $0x22] sm:$0xff]  ;;  %v11926_v27 = vld [vmem:[#allocation14 + $0x90] sm:$0xff]  ;;  %v12155_v53 = vld [vmem:[#allocation14 + $0xa8] sm:$0xff] }
 0x72f   :  { %16953 = vmatprep.mubr.msk.f32.mxu0 %vm145_vm0, %v21564_v31  ;;  %v10970_v19 = vmax.f32 %v10954_v42, 0.0  ;;  %v21576_v56 = vld [vmem:[#allocation3 + $0x50] sm:$0xff]  ;;  %10987 = vst.msk [vmem:[#allocation3 + $0x78] sm:$0xff] %vm145_vm0, %v10971_v30  ;;  %16974 = vmatprep.subr.mxu1 %v11464_v38  ;;  %v21685_v23 = vld [vmem:[#allocation2 + $0x42] sm:$0xff]  ;;  %v12617_v42 = vld [vmem:[#allocation14 + $0xf8] sm:$0xff] }
 0x730   :  { %v21579_v20 = vld [vmem:[#allocation2 + $0x71] sm:$0xff]  ;;  %17006 = vmatprep.subr.mxu0 %v11694_v15  ;;  %11014 = vst.msk [vmem:[#allocation2 + $0xd1] sm:$0xff] %vm145_vm0, %v21576_v56  ;;  %16975 = vmatpush3.msra.mxu1 %v11464_v38  ;;  %v21697_v0 = vld [vmem:[#allocation2 + $0x62] sm:$0xff] }
 0x731   :  { %v21581_v7 = vld [vmem:[#allocation2 + $0x70] sm:$0xff]  ;;  %10986 = vst.msk [vmem:[#allocation3 + $0x70] sm:$0xff] %vm145_vm0, %v10970_v19  ;;  %16922 = vmatmul.mubr.msk.f32.gmra.mxu1 %vm145_vm0, %v21579_v20  ;;  %v21590_v21 = vld [vmem:[#allocation3 + $0x68] sm:$0xff]  ;;  %17007 = vmatpush3.msra.mxu0 %v11694_v15  ;;  %v21610_v46 = vld [vmem:[#allocation2 + $0xc0] sm:$0xff] }
 0x732   :  { %16954 = vmatmul.mubr.msk.f32.gmra.mxu0 %vm145_vm0, %v21581_v7  ;;  %16924 = vmatprep.mubr.msk.f32.mxu1 %vm145_vm0, %v11048_v14  ;;  %11017 = vst.msk [vmem:[#allocation2 + $0x101] sm:$0xff] %vm145_vm0, %v21590_v21  ;;  %v21608_v3 = vld [vmem:[#allocation2 + $0xc1] sm:$0xff]  ;;  %v12156_v12 = vld [vmem:[#allocation14 + $0xb0] sm:$0xff] }
 0x733   :  { %16956 = vmatprep.mubr.msk.f32.mxu0 %vm145_vm0, %v11028_v11  ;;  %v21596_v32 = vld [vmem:[#allocation3 + $0x60] sm:$0xff]  ;;  %17032 = vmatprep.subr.mxu1 %v11927_v58  ;;  %v21691_v37 = vld [vmem:[#allocation2 + $0x52] sm:$0xff] }
 0x734   :  { %17064 = vmatprep.subr.mxu0 %v12157_v33  ;;  %11016 = vst.msk [vmem:[#allocation2 + $0xf1] sm:$0xff] %vm145_vm0, %v21596_v32  ;;  %v21600_v49 = vld [vmem:[#allocation2 + $0xb1] sm:$0xff]  ;;  %v11924_v51 = vld [vmem:[#allocation14 + $0x80] sm:$0xff]  ;;  %v12387_v15 = vld [vmem:[#allocation14 + $0xd8] sm:$0xff] }
 0x735   :  { %v21602_v22 = vld [vmem:[#allocation2 + $0xb0] sm:$0xff]  ;;  %16925 = vmatmul.mubr.msk.f32.gmra.mxu1 %vm145_vm0, %v21600_v49  ;;  %v21632_v63 = vld [vmem:[#allocation2 + $0xe1] sm:$0xff] }
 0x736   :  { %16957 = vmatmul.mubr.msk.f32.gmra.mxu0 %vm145_vm0, %v21602_v22  ;;  %v21612_v16 = vld [vmem:[#allocation3 + $0x78] sm:$0xff]  ;;  %16927 = vmatprep.mubr.msk.f32.mxu1 %vm145_vm0, %v21608_v3  ;;  %v21634_v34 = vld [vmem:[#allocation2 + $0xe0] sm:$0xff] }
 0x737   :  { %16959 = vmatprep.mubr.msk.f32.mxu0 %vm145_vm0, %v21610_v46  ;;  %11019 = vst.msk [vmem:[#allocation2 + $0x121] sm:$0xff] %vm145_vm0, %v21612_v16  ;;  %v21622_v1 = vld [vmem:[#allocation2 + $0xd1] sm:$0xff]  ;;  %v12154_v25 = vld [vmem:[#allocation14 + $0xa0] sm:$0xff] }
 0x738   :  { %v21620_v60 = vld [vmem:[#allocation3 + $0x70] sm:$0xff]  ;;  %v11455_v13 = vld [vmem:[#allocation2 + $0xa2] sm:$0xff] }
 0x739   :  { %v21624_v2 = vld [vmem:[#allocation2 + $0xd0] sm:$0xff]  ;;  %11018 = vst.msk [vmem:[#allocation2 + $0x111] sm:$0xff] %vm145_vm0, %v21620_v60  ;;  %16928 = vmatmul.mubr.msk.f32.gmra.mxu1 %vm145_vm0, %v21622_v1  ;;  %v21648_v9 = vld [vmem:[#allocation2 + $0x101] sm:$0xff] }
 0x73a   :  { %16960 = vmatmul.mubr.msk.f32.gmra.mxu0 %vm145_vm0, %v21624_v2  ;;  %16930 = vmatprep.mubr.msk.f32.mxu1 %vm145_vm0, %v21632_v63  ;;  %v21650_v44 = vld [vmem:[#allocation2 + $0x100] sm:$0xff]  ;;  %v21703_v38 = vld [vmem:[#allocation2 + $0x72] sm:$0xff] }
 0x73b   :  { %16962 = vmatprep.mubr.msk.f32.mxu0 %vm145_vm0, %v21634_v34  ;;  %v21640_v52 = vld [vmem:[#allocation2 + $0xf1] sm:$0xff]  ;;  %v21705_v48 = vld [vmem:[#allocation2 + $0x80] sm:$0xff] }
 0x73c   :  { %v21642_v55 = vld [vmem:[#allocation2 + $0xf0] sm:$0xff]  ;;  %v21720_v19 = vld [vmem:[#allocation2 + $0xc2] sm:$0xff] }
 0x73d   :  { %16931 = vmatmul.mubr.msk.f32.gmra.mxu1 %vm145_vm0, %v21640_v52  ;;  %v21714_v30 = vld [vmem:[#allocation2 + $0xb2] sm:$0xff]  ;;  %v21732_v11 = vld [vmem:[#allocation2 + $0xe2] sm:$0xff] }
 0x73e   :  { %16963 = vmatmul.mubr.msk.f32.gmra.mxu0 %vm145_vm0, %v21642_v55  ;;  %16933 = vmatprep.mubr.msk.f32.mxu1 %vm145_vm0, %v21648_v9  ;;  %v21726_v14 = vld [vmem:[#allocation2 + $0xd2] sm:$0xff] }
 0x73f   :  { %16965 = vmatprep.mubr.msk.f32.mxu0 %vm145_vm0, %v21650_v44 }
 0x740   :  { %v21656_v10 = vld [vmem:[#allocation2 + $0x111] sm:$0xff] }
 0x741   :  { %v21658_v6 = vld [vmem:[#allocation2 + $0x110] sm:$0xff]  ;;  %16934 = vmatmul.mubr.msk.f32.gmra.mxu1 %vm145_vm0, %v21656_v10 }
 0x742   :  { %16966 = vmatmul.mubr.msk.f32.gmra.mxu0 %vm145_vm0, %v21658_v6  ;;  %16976 = vmatprep.mubr.msk.f32.mxu1 %vm145_vm0, %v11447_v59  ;;  %v21752_v59 = vld [vmem:[#allocation2 + $0x120] sm:$0xff] }
 0x743   :  { %17008 = vmatprep.mubr.msk.f32.mxu0 %vm145_vm0, %v21494_v47  ;;  %v21679_v47 = vld [vmem:[#allocation2 + $0x32] sm:$0xff] }
 0x745   :  { %16977 = vmatmul.mubr.msk.f32.vlgmr.msra.gmra.mxu1 %vm145_vm0, %v21667_v57 }
 0x746   :  { %17009 = vmatmul.mubr.msk.f32.vlgmr.msra.gmra.mxu0 %vm145_vm0, %v21506_v5  ;;  %16979 = vmatprep.mubr.msk.f32.mxu1 %vm145_vm0, %v21673_v24 }
 0x747   :  { %17011 = vmatprep.mubr.msk.f32.mxu0 %vm145_vm0, %v21526_v36  ;;  %17033 = vmatpush3.msra.mxu1 %v11927_v58  ;;  %v21738_v58 = vld [vmem:[#allocation2 + $0xf2] sm:$0xff] }
 0x748   :  { %17065 = vmatpush3.msra.mxu0 %v12157_v33  ;;  %17034 = vmatprep.subr.mxu1 %v11926_v27  ;;  %v21744_v33 = vld [vmem:[#allocation2 + $0x102] sm:$0xff] }
 0x749   :  { %17066 = vmatprep.subr.mxu0 %v12156_v12  ;;  %16980 = vmatmul.mubr.msk.f32.gmra.mxu1 %vm145_vm0, %v21679_v47 }
 0x74a   :  { %17012 = vmatmul.mubr.msk.f32.gmra.mxu0 %vm145_vm0, %v21538_v45  ;;  %16982 = vmatprep.mubr.msk.f32.mxu1 %vm145_vm0, %v21685_v23 }
 0x74b   :  { %17014 = vmatprep.mubr.msk.f32.mxu0 %vm145_vm0, %v21553_v61  ;;  %17035 = vmatpush3.msra.mxu1 %v11926_v27  ;;  %v12386_v27 = vld [vmem:[#allocation14 + $0xd0] sm:$0xff] }
 0x74c   :  { %17067 = vmatpush3.msra.mxu0 %v12156_v12  ;;  %17036 = vmatprep.subr.mxu1 %v11925_v54  ;;  %v12616_v12 = vld [vmem:[#allocation14 + $0xf0] sm:$0xff] }
 0x74d   :  { %17068 = vmatprep.subr.mxu0 %v12155_v53  ;;  %16983 = vmatmul.mubr.msk.f32.gmra.mxu1 %vm145_vm0, %v21691_v37 }
 0x74e   :  { %17015 = vmatmul.mubr.msk.f32.gmra.mxu0 %vm145_vm0, %v21564_v31  ;;  %16985 = vmatprep.mubr.msk.f32.mxu1 %vm145_vm0, %v21697_v0 }
 0x74f   :  { %17017 = vmatprep.mubr.msk.f32.mxu0 %vm145_vm0, %v21581_v7  ;;  %17037 = vmatpush3.msra.mxu1 %v11925_v54  ;;  %v12384_v54 = vld [vmem:[#allocation14 + $0xc0] sm:$0xff] }
 0x750   :  { %17069 = vmatpush3.msra.mxu0 %v12155_v53  ;;  %17038 = vmatprep.subr.mxu1 %v11924_v51  ;;  %v12614_v53 = vld [vmem:[#allocation14 + $0xe0] sm:$0xff] }
 0x751   :  { %17070 = vmatprep.subr.mxu0 %v12154_v25  ;;  %16986 = vmatmul.mubr.msk.f32.gmra.mxu1 %vm145_vm0, %v21703_v38 }
 0x752   :  { %17018 = vmatmul.mubr.msk.f32.gmra.mxu0 %vm145_vm0, %v21705_v48  ;;  %16988 = vmatprep.mubr.msk.f32.mxu1 %vm145_vm0, %v11455_v13  ;;  %v12847_v13 = vld [vmem:[#allocation14 + $0x118] sm:$0xff] }
 0x753   :  { %17020 = vmatprep.mubr.msk.f32.mxu0 %vm145_vm0, %v21602_v22  ;;  %17039 = vmatpush3.msra.mxu1 %v11924_v51  ;;  %v21750_v22 = vld [vmem:[#allocation2 + $0x112] sm:$0xff]  ;;  %v11914_v51 = vld [vmem:[#allocation2 + $0x81] sm:$0xff] }
 0x754   :  { %17071 = vmatpush3.msra.mxu0 %v12154_v25  ;;  %17096 = vmatprep.subr.mxu1 %v12387_v15  ;;  %v21786_v25 = vld [vmem:[#allocation2 + $0x82] sm:$0xff] }
 0x755   :  { %17128 = vmatprep.subr.mxu0 %v12617_v42  ;;  %16989 = vmatmul.mubr.msk.f32.gmra.mxu1 %vm145_vm0, %v21714_v30 }
 0x756   :  { %17021 = vmatmul.mubr.msk.f32.gmra.mxu0 %vm145_vm0, %v21610_v46  ;;  %16991 = vmatprep.mubr.msk.f32.mxu1 %vm145_vm0, %v21720_v19 }
 0x757   :  { %17023 = vmatprep.mubr.msk.f32.mxu0 %vm145_vm0, %v21624_v2 }
 0x759   :  { %16992 = vmatmul.mubr.msk.f32.gmra.mxu1 %vm145_vm0, %v21726_v14 }
 0x75a   :  { %17024 = vmatmul.mubr.msk.f32.gmra.mxu0 %vm145_vm0, %v21634_v34  ;;  %16994 = vmatprep.mubr.msk.f32.mxu1 %vm145_vm0, %v21732_v11 }
 0x75b   :  { %17026 = vmatprep.mubr.msk.f32.mxu0 %vm145_vm0, %v21642_v55 }
 0x75d   :  { %16995 = vmatmul.mubr.msk.f32.gmra.mxu1 %vm145_vm0, %v21738_v58 }
 0x75e   :  { %17027 = vmatmul.mubr.msk.f32.gmra.mxu0 %vm145_vm0, %v21650_v44  ;;  %16997 = vmatprep.mubr.msk.f32.mxu1 %vm145_vm0, %v21744_v33 }
 0x75f   :  { %17029 = vmatprep.mubr.msk.f32.mxu0 %vm145_vm0, %v21658_v6 }
 0x761   :  { %16998 = vmatmul.mubr.msk.f32.gmra.mxu1 %vm145_vm0, %v21750_v22 }
 0x762   :  { %17030 = vmatmul.mubr.msk.f32.gmra.mxu0 %vm145_vm0, %v21752_v59  ;;  %17040 = vmatprep.mubr.msk.f32.mxu1 %vm145_vm0, %v21492_v29  ;;  %v12385_v29 = vld [vmem:[#allocation14 + $0xc8] sm:$0xff] }
 0x763   :  { %17072 = vmatprep.mubr.msk.f32.mxu0 %vm145_vm0, %v21667_v57  ;;  %v12615_v57 = vld [vmem:[#allocation14 + $0xe8] sm:$0xff] }
 0x765   :  { %17041 = vmatmul.mubr.msk.f32.vlgmr.msra.gmra.mxu1 %vm145_vm0, %v21504_v28 }
 0x766   :  { %17073 = vmatmul.mubr.msk.f32.vlgmr.msra.gmra.mxu0 %vm145_vm0, %v21673_v24  ;;  %17043 = vmatprep.mubr.msk.f32.mxu1 %vm145_vm0, %v21524_v41 }
 0x767   :  { %17075 = vmatprep.mubr.msk.f32.mxu0 %vm145_vm0, %v21679_v47  ;;  %17097 = vmatpush3.msra.mxu1 %v12387_v15  ;;  %v13154_v15 = vld [vmem:[%s22373_s19 + $0x18] sm:$0xff] }
 0x768   :  { %17129 = vmatpush3.msra.mxu0 %v12617_v42  ;;  %17098 = vmatprep.subr.mxu1 %v12386_v27  ;;  %v21822_v42 = vld [vmem:[#allocation2 + $0x122] sm:$0xff] }
 0x769   :  { %17130 = vmatprep.subr.mxu0 %v12616_v12  ;;  %17044 = vmatmul.mubr.msk.f32.gmra.mxu1 %vm145_vm0, %v21536_v40 }
 0x76a   :  { %17076 = vmatmul.mubr.msk.f32.gmra.mxu0 %vm145_vm0, %v21685_v23  ;;  %17046 = vmatprep.mubr.msk.f32.mxu1 %vm145_vm0, %v21551_v43 }
 0x76b   :  { %17078 = vmatprep.mubr.msk.f32.mxu0 %vm145_vm0, %v21691_v37  ;;  %17099 = vmatpush3.msra.mxu1 %v12386_v27  ;;  %v13153_v27 = vld [vmem:[%s22373_s19 + $0x10] sm:$0xff] }
 0x76c   :  { %17131 = vmatpush3.msra.mxu0 %v12616_v12  ;;  %17100 = vmatprep.subr.mxu1 %v12385_v29 }
 0x76d   :  { %17132 = vmatprep.subr.mxu0 %v12615_v57  ;;  %17047 = vmatmul.mubr.msk.f32.gmra.mxu1 %vm145_vm0, %v21562_v8 }
 0x76e   :  { %17079 = vmatmul.mubr.msk.f32.gmra.mxu0 %vm145_vm0, %v21697_v0  ;;  %17049 = vmatprep.mubr.msk.f32.mxu1 %vm145_vm0, %v21579_v20 }
 0x76f   :  { %17081 = vmatprep.mubr.msk.f32.mxu0 %vm145_vm0, %v21703_v38  ;;  %17101 = vmatpush3.msra.mxu1 %v12385_v29 }
 0x770   :  { %17133 = vmatpush3.msra.mxu0 %v12615_v57  ;;  %17102 = vmatprep.subr.mxu1 %v12384_v54 }
 0x771   :  { %17134 = vmatprep.subr.mxu0 %v12614_v53  ;;  %17050 = vmatmul.mubr.msk.f32.gmra.mxu1 %vm145_vm0, %v11914_v51 }
 0x772   :  { %17082 = vmatmul.mubr.msk.f32.gmra.mxu0 %vm145_vm0, %v21786_v25  ;;  %17052 = vmatprep.mubr.msk.f32.mxu1 %vm145_vm0, %v21600_v49  ;;  %v11922_v49 = vld [vmem:[#allocation2 + $0x121] sm:$0xff] }
 0x773   :  { %17084 = vmatprep.mubr.msk.f32.mxu0 %vm145_vm0, %v21714_v30  ;;  %17103 = vmatpush3.msra.mxu1 %v12384_v54  ;;  %v12846_v30 = vld [vmem:[#allocation14 + $0x110] sm:$0xff] }
 0x774   :  { %17135 = vmatpush3.msra.mxu0 %v12614_v53  ;;  %17160 = vmatprep.subr.mxu1 %v12847_v13 }
 0x775   :  { %17192 = vmatprep.subr.mxu0 %v13154_v15  ;;  %17053 = vmatmul.mubr.msk.f32.gmra.mxu1 %vm145_vm0, %v21608_v3 }
 0x776   :  { %17085 = vmatmul.mubr.msk.f32.gmra.mxu0 %vm145_vm0, %v21720_v19  ;;  %17055 = vmatprep.mubr.msk.f32.mxu1 %vm145_vm0, %v21622_v1 }
 0x777   :  { %17087 = vmatprep.mubr.msk.f32.mxu0 %vm145_vm0, %v21726_v14 }
 0x779   :  { %17056 = vmatmul.mubr.msk.f32.gmra.mxu1 %vm145_vm0, %v21632_v63 }
 0x77a   :  { %17088 = vmatmul.mubr.msk.f32.gmra.mxu0 %vm145_vm0, %v21732_v11  ;;  %17058 = vmatprep.mubr.msk.f32.mxu1 %vm145_vm0, %v21640_v52 }
 0x77b   :  { %17090 = vmatprep.mubr.msk.f32.mxu0 %vm145_vm0, %v21738_v58 }
 0x77d   :  { %17059 = vmatmul.mubr.msk.f32.gmra.mxu1 %vm145_vm0, %v21648_v9 }
 0x77e   :  { %17091 = vmatmul.mubr.msk.f32.gmra.mxu0 %vm145_vm0, %v21744_v33  ;;  %17061 = vmatprep.mubr.msk.f32.mxu1 %vm145_vm0, %v21656_v10 }
 0x77f   :  { %17093 = vmatprep.mubr.msk.f32.mxu0 %vm145_vm0, %v21750_v22 }
 0x781   :  { %17062 = vmatmul.mubr.msk.f32.gmra.mxu1 %vm145_vm0, %v11922_v49 }
 0x782   :  { %17094 = vmatmul.mubr.msk.f32.gmra.mxu0 %vm145_vm0, %v21822_v42  ;;  %17104 = vmatprep.mubr.msk.f32.mxu1 %vm145_vm0, %v21506_v5  ;;  %v13152_v5 = vld [vmem:[%s22373_s19 + $0x8] sm:$0xff] }
 0x783   :  { %17136 = vmatprep.mubr.msk.f32.mxu0 %vm145_vm0, %v21504_v28  ;;  %v12845_v28 = vld [vmem:[#allocation14 + $0x108] sm:$0xff] }
 0x785   :  { %17105 = vmatmul.mubr.msk.f32.vlgmr.msra.gmra.mxu1 %vm145_vm0, %v21526_v36  ;;  %v13151_v36 = vld [vmem:[%s22373_s19] sm:$0xff] }
 0x786   :  { %17137 = vmatmul.mubr.msk.f32.vlgmr.msra.gmra.mxu0 %vm145_vm0, %v21524_v41  ;;  %17107 = vmatprep.mubr.msk.f32.mxu1 %vm145_vm0, %v21538_v45  ;;  %v12844_v41 = vld [vmem:[#allocation14 + $0x100] sm:$0xff]  ;;  %v12604_v45 = vld [vmem:[#allocation2 + $0x91] sm:$0xff] }
 0x787   :  { %17139 = vmatprep.mubr.msk.f32.mxu0 %vm145_vm0, %v21536_v40  ;;  %17161 = vmatpush3.msra.mxu1 %v12847_v13  ;;  %v12374_v40 = vld [vmem:[#allocation2 + $0x90] sm:$0xff] }
 0x788   :  { %17193 = vmatpush3.msra.mxu0 %v13154_v15  ;;  %17162 = vmatprep.subr.mxu1 %v12846_v30 }
 0x789   :  { %17194 = vmatprep.subr.mxu0 %v13153_v27  ;;  %17108 = vmatmul.mubr.msk.f32.gmra.mxu1 %vm145_vm0, %v21553_v61  ;;  %v12612_v61 = vld [vmem:[#allocation2 + $0x131] sm:$0xff] }
 0x78a   :  { %17140 = vmatmul.mubr.msk.f32.gmra.mxu0 %vm145_vm0, %v21551_v43  ;;  %17110 = vmatprep.mubr.msk.f32.mxu1 %vm145_vm0, %v21564_v31  ;;  %v12382_v43 = vld [vmem:[#allocation2 + $0x130] sm:$0xff]  ;;  %v13136_v31 = vld [vmem:[#allocation3 + $0x8] sm:$0xff] }
 0x78b   :  { %17142 = vmatprep.mubr.msk.f32.mxu0 %vm145_vm0, %v21562_v8  ;;  %17163 = vmatpush3.msra.mxu1 %v12846_v30  ;;  %v13135_v8 = vld [vmem:[#allocation3] sm:$0xff] }
 0x78c   :  { %17195 = vmatpush3.msra.mxu0 %v13153_v27  ;;  %17164 = vmatprep.subr.mxu1 %v12845_v28 }
 0x78d   :  { %17196 = vmatprep.subr.mxu0 %v13152_v5  ;;  %17111 = vmatmul.mubr.msk.f32.gmra.mxu1 %vm145_vm0, %v21581_v7 }
 0x78e   :  { %17143 = vmatmul.mubr.msk.f32.gmra.mxu0 %vm145_vm0, %v21579_v20  ;;  %17113 = vmatprep.mubr.msk.f32.mxu1 %vm145_vm0, %v21705_v48  ;;  %v13138_v20 = vld [vmem:[#allocation3 + $0x18] sm:$0xff] }
 0x78f   :  { %17145 = vmatprep.mubr.msk.f32.mxu0 %vm145_vm0, %v11914_v51  ;;  %17165 = vmatpush3.msra.mxu1 %v12845_v28 }
 0x790   :  { %17197 = vmatpush3.msra.mxu0 %v13152_v5  ;;  %17166 = vmatprep.subr.mxu1 %v12844_v41 }
 0x791   :  { %17198 = vmatprep.subr.mxu0 %v13151_v36  ;;  %17114 = vmatmul.mubr.msk.f32.gmra.mxu1 %vm145_vm0, %v12374_v40 }
 0x792   :  { %17146 = vmatmul.mubr.msk.f32.gmra.mxu0 %vm145_vm0, %v12604_v45  ;;  %17116 = vmatprep.mubr.msk.f32.mxu1 %vm145_vm0, %v21610_v46 }
 0x793   :  { %17148 = vmatprep.mubr.msk.f32.mxu0 %vm145_vm0, %v21608_v3  ;;  %17167 = vmatpush3.msra.mxu1 %v12844_v41 }
 0x794   :  { %17199 = vmatpush3.msra.mxu0 %v13151_v36 }
 0x795   :  { %17117 = vmatmul.mubr.msk.f32.gmra.mxu1 %vm145_vm0, %v21624_v2 }
 0x796   :  { %17149 = vmatmul.mubr.msk.f32.gmra.mxu0 %vm145_vm0, %v21622_v1  ;;  %17119 = vmatprep.mubr.msk.f32.mxu1 %vm145_vm0, %v21634_v34 }
 0x797   :  { %17151 = vmatprep.mubr.msk.f32.mxu0 %vm145_vm0, %v21632_v63 }
 0x799   :  { %17120 = vmatmul.mubr.msk.f32.gmra.mxu1 %vm145_vm0, %v21642_v55 }
 0x79a   :  { %17152 = vmatmul.mubr.msk.f32.gmra.mxu0 %vm145_vm0, %v21640_v52  ;;  %17122 = vmatprep.mubr.msk.f32.mxu1 %vm145_vm0, %v21650_v44 }
 0x79b   :  { %17154 = vmatprep.mubr.msk.f32.mxu0 %vm145_vm0, %v21648_v9 }
 0x79d   :  { %17123 = vmatmul.mubr.msk.f32.gmra.mxu1 %vm145_vm0, %v21658_v6 }
 0x79e   :  { %17155 = vmatmul.mubr.msk.f32.gmra.mxu0 %vm145_vm0, %v21656_v10  ;;  %17125 = vmatprep.mubr.msk.f32.mxu1 %vm145_vm0, %v21752_v59 }
 0x79f   :  { %17157 = vmatprep.mubr.msk.f32.mxu0 %vm145_vm0, %v11922_v49 }
 0x7a1   :  { %17126 = vmatmul.mubr.msk.f32.gmra.mxu1 %vm145_vm0, %v12382_v43 }
 0x7a2   :  { %17158 = vmatmul.mubr.msk.f32.gmra.mxu0 %vm145_vm0, %v12612_v61  ;;  %17168 = vmatprep.mubr.msk.f32.mxu1 %vm145_vm0, %v21673_v24 }
 0x7a3   :  { %17200 = vmatprep.mubr.msk.f32.mxu0 %vm145_vm0, %v13135_v8 }
 0x7a5   :  { %17169 = vmatmul.mubr.msk.f32.vlgmr.msra.gmra.mxu1 %vm145_vm0, %v21679_v47 }
 0x7a6   :  { %17201 = vmatmul.mubr.msk.f32.vlgmr.msra.gmra.mxu0 %vm145_vm0, %v13136_v31  ;;  %17171 = vmatprep.mubr.msk.f32.mxu1 %vm145_vm0, %v21685_v23 }
 0x7a7   :  { %17203 = vmatprep.mubr.msk.f32.mxu0 %vm145_vm0, %v21475_v18  ;;  %v12834_v18 = vld [vmem:[#allocation2 + $0x92] sm:$0xff] }
 0x7a9   :  { %17172 = vmatmul.mubr.msk.f32.gmra.mxu1 %vm145_vm0, %v21691_v37 }
 0x7aa   :  { %17204 = vmatmul.mubr.msk.f32.gmra.mxu0 %vm145_vm0, %v13138_v20  ;;  %17174 = vmatprep.mubr.msk.f32.mxu1 %vm145_vm0, %v21697_v0 }
 0x7ab   :  { %17206 = vmatprep.mubr.msk.f32.mxu0 %vm145_vm0, %v21490_v26 }
 0x7ad   :  { %17175 = vmatmul.mubr.msk.f32.gmra.mxu1 %vm145_vm0, %v21703_v38 }
 0x7ae   :  { %17207 = vmatmul.mubr.msk.f32.gmra.mxu0 %vm145_vm0, %v21483_v50  ;;  %17177 = vmatprep.mubr.msk.f32.mxu1 %vm145_vm0, %v21786_v25  ;;  %v12842_v50 = vld [vmem:[#allocation2 + $0x132] sm:$0xff] }
 0x7af   :  { %17209 = vmatprep.mubr.msk.f32.mxu0 %vm145_vm0, %v21521_v17 }
 0x7b1   :  { %17178 = vmatmul.mubr.msk.f32.gmra.mxu1 %vm145_vm0, %v12834_v18 }
 0x7b2   :  { %17210 = vmatmul.mubr.msk.f32.gmra.mxu0 %vm145_vm0, %v21508_v62  ;;  %17180 = vmatprep.mubr.msk.f32.mxu1 %vm145_vm0, %v21720_v19 }
 0x7b3   :  { %17212 = vmatprep.mubr.msk.f32.mxu0 %vm145_vm0, %v21555_v35 }
 0x7b5   :  { %17181 = vmatmul.mubr.msk.f32.gmra.mxu1 %vm145_vm0, %v21726_v14 }
 0x7b6   :  { %17213 = vmatmul.mubr.msk.f32.gmra.mxu0 %vm145_vm0, %v21540_v4  ;;  %17183 = vmatprep.mubr.msk.f32.mxu1 %vm145_vm0, %v21732_v11 }
 0x7b7   :  { %17215 = vmatprep.mubr.msk.f32.mxu0 %vm145_vm0, %v21576_v56 }
 0x7b9   :  { %17184 = vmatmul.mubr.msk.f32.gmra.mxu1 %vm145_vm0, %v21738_v58 }
 0x7ba   :  { %17216 = vmatmul.mubr.msk.f32.gmra.mxu0 %vm145_vm0, %v21568_v39  ;;  %17186 = vmatprep.mubr.msk.f32.mxu1 %vm145_vm0, %v21744_v33 }
 0x7bb   :  { %17218 = vmatprep.mubr.msk.f32.mxu0 %vm145_vm0, %v21596_v32 }
 0x7bd   :  { %17187 = vmatmul.mubr.msk.f32.gmra.mxu1 %vm145_vm0, %v21750_v22 }
 0x7be   :  { %17219 = vmatmul.mubr.msk.f32.gmra.mxu0 %vm145_vm0, %v21590_v21  ;;  %17189 = vmatprep.mubr.msk.f32.mxu1 %vm145_vm0, %v21822_v42 }
 0x7bf   :  { %17221 = vmatprep.mubr.msk.f32.mxu0 %vm145_vm0, %v21620_v60 }
 0x7c1   :  { %17190 = vmatmul.mubr.msk.f32.gmra.mxu1 %vm145_vm0, %v12842_v50 }
 0x7c2   :  { %17222 = vmatmul.mubr.msk.f32.gmra.mxu0 %vm145_vm0, %v21612_v16 }
 0x7e4   :  { %v16914_v26 = vpop.f32.mrf.mxu1 }
 0x7e5   :  { %v16946_v62 = vpop.f32.mrf.mxu0 }
 0x7e6   :  { %v11374_v17 = vadd.f32 %v16946_v62, %v16914_v26  ;;  %v11175_v4 = vpop.f32.mrf.mxu1 }
 0x7e7   :  { %v11368_v35 = vpop.f32.mrf.mxu0 }
 0x7e8   :  { %v11369_v39 = vadd.f32 %v11368_v35, %v11175_v4 }
 0x7e9   :  { %v16917_v56 = vpop.f32.mrf.mxu1 }
 0x7ea   :  { %v16949_v7 = vpop.f32.mrf.mxu0 }
 0x7eb   :  { %v11384_v21 = vadd.f32 %v16949_v7, %v16917_v56  ;;  %v11185_v32 = vpop.f32.mrf.mxu1 }
 0x7ec   :  { %v11378_v3 = vpop.f32.mrf.mxu0 }
 0x7ed   :  { %v11379_v46 = vadd.f32 %v11378_v3, %v11185_v32  ;;  %v16920_v1 = vpop.f32.mrf.mxu1 }
 0x7ee   :  { %v16952_v60 = vpop.f32.mrf.mxu0 }
 0x7ef   :  { %v11394_v2 = vadd.f32 %v16952_v60, %v16920_v1  ;;  %v11195_v63 = vpop.f32.mrf.mxu1 }
 0x7f0   :  { %v11388_v34 = vpop.f32.mrf.mxu0 }
 0x7f1   :  { %v11389_v52 = vadd.f32 %v11388_v34, %v11195_v63  ;;  %v16923_v55 = vpop.f32.mrf.mxu1 }
 0x7f2   :  { %v16955_v16 = vpop.f32.mrf.mxu0 }
 0x7f3   :  { %v11404_v9 = vadd.f32 %v16955_v16, %v16923_v55  ;;  %v11205_v44 = vpop.f32.mrf.mxu1 }
 0x7f4   :  { %v11398_v10 = vpop.f32.mrf.mxu0 }
 0x7f5   :  { %v11399_v6 = vadd.f32 %v11398_v10, %v11205_v44  ;;  %v16926_v24 = vpop.f32.mrf.mxu1 }
 0x7f6   :  { %v16958_v47 = vpop.f32.mrf.mxu0 }
 0x7f7   :  { %v11414_v23 = vadd.f32 %v16958_v47, %v16926_v24  ;;  %v11215_v37 = vpop.f32.mrf.mxu1 }
 0x7f8   :  { %v11408_v0 = vpop.f32.mrf.mxu0 }
 0x7f9   :  { %v11409_v38 = vadd.f32 %v11408_v0, %v11215_v37  ;;  %v16929_v48 = vpop.f32.mrf.mxu1 }
 0x7fa   :  { %v16961_v19 = vpop.f32.mrf.mxu0 }
 0x7fb   :  { %v11424_v14 = vadd.f32 %v16961_v19, %v16929_v48  ;;  %v11225_v11 = vpop.f32.mrf.mxu1 }
 0x7fc   :  { %v11418_v58 = vpop.f32.mrf.mxu0 }
 0x7fd   :  { %v11419_v33 = vadd.f32 %v11418_v58, %v11225_v11  ;;  %v16932_v22 = vpop.f32.mrf.mxu1 }
 0x7fe   :  { %v16964_v59 = vpop.f32.mrf.mxu0 }
 0x7ff   :  { %v11434_v12 = vadd.f32 %v16964_v59, %v16932_v22  ;;  %v11235_v29 = vpop.f32.mrf.mxu1 }
 0x800   :  { %v11428_v57 = vpop.f32.mrf.mxu0 }
 0x801   :  { %v11429_v54 = vadd.f32 %v11428_v57, %v11235_v29  ;;  %v16935_v53 = vpop.f32.mrf.mxu1 }
 0x802   :  { %v16967_v51 = vpop.f32.mrf.mxu0 }
 0x803   :  { %v11444_v25 = vadd.f32 %v16967_v51, %v16935_v53  ;;  %v11245_v13 = vpop.f32.mrf.mxu1 }
 0x804   :  { %v11438_v15 = vpop.f32.mrf.mxu0 }
 0x805   :  { %v21953_v49 = vadd.f32 %v11438_v15, %v11245_v13  ;;  %v16978_v42 = vpop.f32.mrf.mxu1 }
 0x806   :  { %v17010_v30 = vpop.f32.mrf.mxu0  ;;  %v11662_v27 = vadd.f32 %v16978_v42, %v11374_v17 }
 0x807   :  { %v11582_v28 = vpop.f32.mrf.mxu1 }
 0x808   :  { %v11812_v5 = vpop.f32.mrf.mxu0  ;;  %v21955_v41 = vadd.f32 %v17010_v30, %v11662_v27  ;;  %v11661_v36 = vadd.f32 %v11582_v28, %v11369_v39 }
 0x809   :  { %v16981_v40 = vpop.f32.mrf.mxu1 }
 0x80a   :  { %v17013_v45 = vpop.f32.mrf.mxu0  ;;  %v21957_v43 = vadd.f32 %v11812_v5, %v11661_v36  ;;  %v11664_v61 = vadd.f32 %v16981_v40, %v11384_v21 }
 0x80b   :  { %v11592_v8 = vpop.f32.mrf.mxu1 }
 0x80c   :  { %v11822_v31 = vpop.f32.mrf.mxu0  ;;  %v21959_v20 = vadd.f32 %v17013_v45, %v11664_v61  ;;  %v11663_v18 = vadd.f32 %v11592_v8, %v11379_v46 }
 0x80d   :  { %v16984_v50 = vpop.f32.mrf.mxu1 }
 0x80e   :  { %v17016_v26 = vpop.f32.mrf.mxu0  ;;  %v21961_v62 = vadd.f32 %v11822_v31, %v11663_v18  ;;  %v11666_v17 = vadd.f32 %v16984_v50, %v11394_v2 }
 0x80f   :  { %v11602_v4 = vpop.f32.mrf.mxu1 }
 0x810   :  { %v11832_v35 = vpop.f32.mrf.mxu0  ;;  %v21963_v56 = vadd.f32 %v17016_v26, %v11666_v17  ;;  %v11665_v39 = vadd.f32 %v11602_v4, %v11389_v52 }
 0x811   :  { %v16987_v7 = vpop.f32.mrf.mxu1 }
 0x812   :  { %v17019_v32 = vpop.f32.mrf.mxu0  ;;  %v21965_v3 = vadd.f32 %v11832_v35, %v11665_v39  ;;  %v11668_v21 = vadd.f32 %v16987_v7, %v11404_v9 }
 0x813   :  { %v11612_v1 = vpop.f32.mrf.mxu1 }
 0x814   :  { %v11842_v60 = vpop.f32.mrf.mxu0  ;;  %v21967_v63 = vadd.f32 %v17019_v32, %v11668_v21  ;;  %v11667_v46 = vadd.f32 %v11612_v1, %v11399_v6 }
 0x815   :  { %v16990_v34 = vpop.f32.mrf.mxu1 }
 0x816   :  { %v17022_v55 = vpop.f32.mrf.mxu0  ;;  %v21969_v16 = vadd.f32 %v11842_v60, %v11667_v46  ;;  %v11670_v2 = vadd.f32 %v16990_v34, %v11414_v23 }
 0x817   :  { %v11622_v44 = vpop.f32.mrf.mxu1 }
 0x818   :  { %v11852_v10 = vpop.f32.mrf.mxu0  ;;  %v21971_v24 = vadd.f32 %v17022_v55, %v11670_v2  ;;  %v11669_v52 = vadd.f32 %v11622_v44, %v11409_v38 }
 0x819   :  { %v16993_v47 = vpop.f32.mrf.mxu1 }
 0x81a   :  { %v17025_v37 = vpop.f32.mrf.mxu0  ;;  %v21973_v0 = vadd.f32 %v11852_v10, %v11669_v52  ;;  %v11672_v9 = vadd.f32 %v16993_v47, %v11424_v14 }
 0x81b   :  { %v11632_v48 = vpop.f32.mrf.mxu1 }
 0x81c   :  { %v11862_v19 = vpop.f32.mrf.mxu0  ;;  %v21975_v11 = vadd.f32 %v17025_v37, %v11672_v9  ;;  %v11671_v6 = vadd.f32 %v11632_v48, %v11419_v33 }
 0x81d   :  { %v16996_v58 = vpop.f32.mrf.mxu1 }
 0x81e   :  { %v17028_v22 = vpop.f32.mrf.mxu0  ;;  %v21977_v59 = vadd.f32 %v11862_v19, %v11671_v6  ;;  %v11674_v23 = vadd.f32 %v16996_v58, %v11434_v12 }
 0x81f   :  { %v11642_v29 = vpop.f32.mrf.mxu1 }
 0x820   :  { %v11872_v57 = vpop.f32.mrf.mxu0  ;;  %v21979_v53 = vadd.f32 %v17028_v22, %v11674_v23  ;;  %v11673_v38 = vadd.f32 %v11642_v29, %v11429_v54 }
 0x821   :  { %v16999_v51 = vpop.f32.mrf.mxu1 }
 0x822   :  { %v17031_v13 = vpop.f32.mrf.mxu0  ;;  %v21981_v15 = vadd.f32 %v11872_v57, %v11673_v38  ;;  %v11676_v14 = vadd.f32 %v16999_v51, %v11444_v25 }
 0x823   :  { %v11652_v42 = vpop.f32.mrf.mxu1 }
 0x824   :  { %v11882_v30 = vpop.f32.mrf.mxu0  ;;  %v21983_v27 = vadd.f32 %v17031_v13, %v11676_v14  ;;  %v11675_v33 = vadd.f32 %v11652_v42, %v21953_v49 }
 0x825   :  { %v17042_v28 = vpop.f32.mrf.mxu1 }
 0x826   :  { %v21986_v5 = vpop.f32.mrf.mxu0  ;;  %v21988_v12 = vadd.f32 %v11882_v30, %v11675_v33 }
 0x827   :  { %v12042_v36 = vpop.f32.mrf.mxu1 }
 0x828   :  { %v21990_v40 = vpop.f32.mrf.mxu0 }
 0x829   :  { %v17045_v54 = vpop.f32.mrf.mxu1 }
 0x82a   :  { %v21992_v45 = vpop.f32.mrf.mxu0 }
 0x82b   :  { %v12052_v61 = vpop.f32.mrf.mxu1 }
 0x82c   :  { %v21994_v8 = vpop.f32.mrf.mxu0 }
 0x82d   :  { %v17048_v25 = vpop.f32.mrf.mxu1 }
 0x82e   :  { %v21996_v31 = vpop.f32.mrf.mxu0 }
 0x82f   :  { %v12062_v18 = vpop.f32.mrf.mxu1 }
 0x830   :  { %v21998_v50 = vpop.f32.mrf.mxu0 }
 0x831   :  { %v17051_v49 = vpop.f32.mrf.mxu1 }
 0x832   :  { %v22000_v26 = vpop.f32.mrf.mxu0 }
 0x833   :  { %v12072_v17 = vpop.f32.mrf.mxu1 }
 0x834   :  { %v22002_v4 = vpop.f32.mrf.mxu0 }
 0x835   :  { %v17054_v35 = vpop.f32.mrf.mxu1 }
 0x836   :  { %v22004_v39 = vpop.f32.mrf.mxu0 }
 0x837   :  { %v12082_v7 = vpop.f32.mrf.mxu1 }
 0x838   :  { %v22006_v32 = vpop.f32.mrf.mxu0 }
 0x839   :  { %v17057_v21 = vpop.f32.mrf.mxu1 }
 0x83a   :  { %v22008_v1 = vpop.f32.mrf.mxu0 }
 0x83b   :  { %v12092_v60 = vpop.f32.mrf.mxu1 }
 0x83c   :  { %v22010_v46 = vpop.f32.mrf.mxu0 }
 0x83d   :  { %v17060_v34 = vpop.f32.mrf.mxu1 }
 0x83e   :  { %v22012_v55 = vpop.f32.mrf.mxu0 }
 0x83f   :  { %22792 = vst [vmem:[#allocation33_spill] sm:$0xff] %v22012_v55  ;;  %v12102_v2 = vpop.f32.mrf.mxu1 }
 0x840   :  { %v22014_v44 = vpop.f32.mrf.mxu0 }
 0x841   :  { %22793 = vst [vmem:[#allocation51_spill] sm:$0xff] %v22014_v44  ;;  %v17063_v10 = vpop.f32.mrf.mxu1  ;;  %v12123_v44 = vadd.f32 %v12052_v61, %v21961_v62 }
 0x842   :  { %v22016_v52 = vpop.f32.mrf.mxu0 }
 0x843   :  { %22794 = vst [vmem:[#allocation56_spill] sm:$0xff] %v22016_v52  ;;  %v12112_v47 = vpop.f32.mrf.mxu1 }
 0x844   :  { %v22018_v37 = vpop.f32.mrf.mxu0 }
 0x845   :  { %22795 = vst [vmem:[#allocation29_spill] sm:$0xff] %v22018_v37  ;;  %v17106_v9 = vpop.f32.mrf.mxu1 }
 0x846   :  { %v22020_v48 = vpop.f32.mrf.mxu0 }
 0x847   :  { %22796 = vst [vmem:[#allocation34_spill] sm:$0xff] %v22020_v48  ;;  %v12502_v19 = vpop.f32.mrf.mxu1 }
 0x848   :  { %v22022_v6 = vpop.f32.mrf.mxu0 }
 0x849   :  { %22797 = vst [vmem:[#allocation46_spill] sm:$0xff] %v22022_v6  ;;  %v17109_v58 = vpop.f32.mrf.mxu1 }
 0x84a   :  { %v22024_v22 = vpop.f32.mrf.mxu0 }
 0x84b   :  { %22798 = vst [vmem:[#allocation28_spill] sm:$0xff] %v22024_v22  ;;  %v12512_v23 = vpop.f32.mrf.mxu1 }
 0x84c   :  { %v22026_v29 = vpop.f32.mrf.mxu0 }
 0x84d   :  { %22799 = vst [vmem:[#allocation49_spill] sm:$0xff] %v22026_v29  ;;  %v17112_v57 = vpop.f32.mrf.mxu1 }
 0x84e   :  { %v22028_v38 = vpop.f32.mrf.mxu0 }
 0x84f   :  { %22800 = vst [vmem:[#allocation35_spill] sm:$0xff] %v22028_v38  ;;  %v12522_v51 = vpop.f32.mrf.mxu1  ;;  %v12122_v38 = vadd.f32 %v17042_v28, %v21955_v41  ;;  %v12130_v41 = vadd.f32 %v17054_v35, %v21971_v24  ;;  %v12131_v24 = vadd.f32 %v12092_v60, %v21977_v59 }
 0x850   :  { %v22030_v13 = vpop.f32.mrf.mxu0 }
 0x851   :  { %22801 = vst [vmem:[#allocation20_spill] sm:$0xff] %v22030_v13  ;;  %v17115_v14 = vpop.f32.mrf.mxu1  ;;  %v12121_v13 = vadd.f32 %v12042_v36, %v21957_v43  ;;  %v12132_v36 = vadd.f32 %v17057_v21, %v21975_v11  ;;  %v22808_v21 = vld [vmem:[#allocation33_spill] sm:$0xff] }
 0x852   :  { %v22032_v42 = vpop.f32.mrf.mxu0 }
 0x853   :  { %22802 = vst [vmem:[#allocation26_spill] sm:$0xff] %v22032_v42  ;;  %v12532_v30 = vpop.f32.mrf.mxu1  ;;  %v12124_v42 = vadd.f32 %v17045_v54, %v21959_v20  ;;  %v12352_v20 = vadd.f32 %v21986_v5, %v12122_v38  ;;  %v12351_v62 = vadd.f32 %v21990_v40, %v12121_v13  ;;  %v12134_v5 = vadd.f32 %v17060_v34, %v21979_v53 }
 0x854   :  { %v22034_v33 = vpop.f32.mrf.mxu0  ;;  %v12133_v40 = vadd.f32 %v12102_v2, %v21981_v15  ;;  %v12362_v15 = vadd.f32 %v22008_v1, %v12132_v36  ;;  %v22810_v1 = vld [vmem:[#allocation56_spill] sm:$0xff]  ;;  %v22811_v2 = vld [vmem:[#allocation34_spill] sm:$0xff] }
 0x855   :  { %22803 = vst [vmem:[#allocation38_spill] sm:$0xff] %v22034_v33  ;;  %v17118_v37 = vpop.f32.mrf.mxu1  ;;  %v12126_v33 = vadd.f32 %v17048_v25, %v21963_v56  ;;  %v12129_v56 = vadd.f32 %v12082_v7, %v21973_v0  ;;  %v12136_v0 = vadd.f32 %v17063_v10, %v21983_v27  ;;  %v12582_v25 = vadd.f32 %v17106_v9, %v12352_v20  ;;  %v22094_v7 = vld [vmem:[#allocation5] ss:$0 sm:$0xff] }
 0x856   :  { %v22036_v6 = vpop.f32.mrf.mxu0  ;;  %v12135_v27 = vadd.f32 %v12112_v47, %v21988_v12  ;;  %v22097_v60 = vadd.f32 %v22808_v21, %v12134_v5 }
 0x857   :  { %22804 = vst [vmem:[#allocation55_spill] sm:$0xff] %v22036_v6  ;;  %v22038_v48 = vpop.f32.mrf.mxu1  ;;  %v12359_v53 = vadd.f32 %v22006_v32, %v12129_v56  ;;  %v22809_v32 = vld [vmem:[#allocation51_spill] sm:$0xff]  ;;  %v22103_v12 = vadd.f32 %v22810_v1, %v12136_v0 }
 0x858   :  { %v22040_v22 = vpop.f32.mrf.mxu0  ;;  %v22100_v34 = vadd.f32 %v22809_v32, %v12133_v40  ;;  %v22817_v5 = vld [vmem:[#allocation20_spill] sm:$0xff] }
 0x859   :  { %22805 = vst [vmem:[#allocation32_spill] sm:$0xff] %v22040_v22  ;;  %v22042_v29 = vpop.f32.mrf.mxu1  ;;  %v12125_v22 = vadd.f32 %v12062_v18, %v21965_v3  ;;  %v12354_v3 = vadd.f32 %v21992_v45, %v12124_v42  ;;  %v12589_v20 = vadd.f32 %v22038_v48, %v12359_v53 }
 0x85a   :  { %22806 = vst [vmem:[#allocation22_spill] sm:$0xff] %v22042_v29  ;;  %v22044_v52 = vpop.f32.mrf.mxu0  ;;  %v12128_v29 = vadd.f32 %v17051_v49, %v21967_v63  ;;  %v12353_v63 = vadd.f32 %v21994_v8, %v12123_v44  ;;  %v12581_v49 = vadd.f32 %v12502_v19, %v12351_v62  ;;  %v22109_v19 = vld [vmem:[%s22371_s17] ss:$0 sm:$0xff]  ;;  %v22818_v0 = vld [vmem:[#allocation26_spill] sm:$0xff] }
 0x85b   :  { %22807 = vst [vmem:[#allocation23_spill] sm:$0xff] %v22044_v52  ;;  %v22051_v55 = vpop.f32.mrf.mxu1  ;;  %v12127_v52 = vadd.f32 %v12072_v17, %v21969_v16  ;;  %v12356_v16 = vadd.f32 %v21996_v31, %v12126_v33  ;;  %v12355_v11 = vadd.f32 %v21998_v50, %v12125_v22  ;;  %v12360_v31 = vadd.f32 %v22004_v39, %v12130_v41  ;;  %v22111_v22 = vld [vmem:[#allocation6] ss:$0 sm:$0xff]  ;;  %v22816_v33 = vld [vmem:[#allocation35_spill] sm:$0xff]  ;;  %v22125_v62 = vld [vmem:[%s22372_s18] ss:$0 sm:$0xff] }
 0x85c   :  { %v22053_v6 = vpop.f32.mrf.mxu0  ;;  %v12358_v45 = vadd.f32 %v22000_v26, %v12128_v29  ;;  %v12361_v50 = vadd.f32 %v22010_v46, %v12131_v24  ;;  %v12584_v17 = vadd.f32 %v17109_v58, %v12354_v3  ;;  %v12583_v26 = vadd.f32 %v12512_v23, %v12353_v63  ;;  %v22812_v23 = vld [vmem:[#allocation29_spill] sm:$0xff] }
 0x85d   :  { %v22059_v28 = vpop.f32.mrf.mxu1  ;;  %v12357_v8 = vadd.f32 %v22002_v4, %v12127_v52  ;;  %v12586_v35 = vadd.f32 %v17112_v57, %v12356_v16  ;;  %v12812_v46 = vadd.f32 %v22811_v2, %v12582_v25  ;;  %v12585_v44 = vadd.f32 %v12522_v51, %v12355_v11  ;;  %v22813_v57 = vld [vmem:[#allocation46_spill] sm:$0xff] }
 0x85e   :  { %v22061_v43 = vpop.f32.mrf.mxu0  ;;  %v12588_v10 = vadd.f32 %v17115_v14, %v12358_v45  ;;  %v12590_v47 = vadd.f32 %v17118_v37, %v12360_v31  ;;  %v22114_v29 = vadd.f32 %v22812_v23, %v12135_v27  ;;  %v12811_v38 = vadd.f32 %v22813_v57, %v12581_v49  ;;  %v22814_v14 = vld [vmem:[#allocation28_spill] sm:$0xff]  ;;  %v22815_v37 = vld [vmem:[#allocation49_spill] sm:$0xff]  ;;  %v22819_v11 = vld [vmem:[#allocation38_spill] sm:$0xff] }
 0x85f   :  { %v22071_v54 = vpop.f32.mrf.mxu1  ;;  %v12587_v52 = vadd.f32 %v12532_v30, %v12357_v8  ;;  %v12814_v42 = vadd.f32 %v22814_v14, %v12584_v17  ;;  %v12813_v30 = vadd.f32 %v22815_v37, %v12583_v26  ;;  %v12816_v41 = vadd.f32 %v22816_v33, %v12586_v35  ;;  %v22820_v45 = vld [vmem:[#allocation55_spill] sm:$0xff] }
 0x860   :  { %v22073_v61 = vpop.f32.mrf.mxu0  ;;  %v12815_v40 = vadd.f32 %v22817_v5, %v12585_v44  ;;  %v12818_v25 = vadd.f32 %v22818_v0, %v12588_v10  ;;  %v22136_v8 = vadd.f32 %v22820_v45, %v12590_v47  ;;  %v22821_v35 = vld [vmem:[#allocation32_spill] sm:$0xff]  ;;  %v12591_v23 = vadd.f32 %v22051_v55, %v12361_v50 }
 0x861   :  { %v22082_v59 = vpop.f32.mrf.mxu1  ;;  %v22133_v48 = vadd.f32 %v22819_v11, %v12587_v52  ;;  %v22142_v21 = vadd.f32 %v22821_v35, %v12589_v20  ;;  %v22822_v32 = vld [vmem:[#allocation22_spill] sm:$0xff] }
 0x862   :  { %v22084_v18 = vpop.f32.mrf.mxu0  ;;  %v12592_v1 = vadd.f32 %v22822_v32, %v12362_v15  ;;  %v22823_v37 = vld [vmem:[#allocation23_spill] sm:$0xff]  ;;  %v22178_v5 = vadd.f32 %v22053_v6, %v12591_v23  ;;  %v12594_v6 = vadd.f32 %v22059_v28, %v22097_v60 }
 0x863   :  { %v22090_v4 = vpop.f32.mrf.mxu1 }
 0x864   :  { %v22092_v39 = vpop.f32.mrf.mxu0 }
 0x865   :  { %v17170_v9 = vpop.f32.mrf.mxu1 }
 0x866   :  { %v17202_v58 = vpop.f32.mrf.mxu0  ;;  %v13042_v13 = vadd.f32 %v17170_v9, %v12812_v46 }
 0x867   :  { %v13356_v51 = vmul.f32 %v17202_v58, %v22094_v7  ;;  %v12962_v56 = vpop.f32.mrf.mxu1 }
 0x868   :  { %v13269_v36 = vpop.f32.mrf.mxu0  ;;  %v13065_v3 = vmul.f32 %v22109_v19, %v13042_v13  ;;  %v13041_v16 = vadd.f32 %v12962_v56, %v12811_v38 }
 0x869   :  { %v13379_v63 = vadd.f32 %v22111_v22, %v13356_v51  ;;  %v13355_v24 = vmul.f32 %v22094_v7, %v13269_v36  ;;  %v17173_v31 = vpop.f32.mrf.mxu1 }
 0x86a   :  { %v17205_v53 = vpop.f32.mrf.mxu0  ;;  %v13088_v27 = vadd.f32 %v22125_v62, %v13065_v3  ;;  %v13064_v17 = vmul.f32 %v22109_v19, %v13041_v16  ;;  %v13044_v2 = vadd.f32 %v17173_v31, %v12814_v42 }
 0x86b   :  { %v13395_v49 = vmax.f32 %v13379_v63, 0.0  ;;  %v13378_v26 = vadd.f32 %v22111_v22, %v13355_v24  ;;  %v13358_v46 = vmul.f32 %v17205_v53, %v22094_v7  ;;  %v12972_v44 = vpop.f32.mrf.mxu1 }
 0x86c   :  { %v13279_v10 = vpop.f32.mrf.mxu0  ;;  %v13104_v52 = vmax.f32 %v13088_v27, 0.0  ;;  %v13087_v47 = vadd.f32 %v22125_v62, %v13064_v17  ;;  %v13043_v58 = vadd.f32 %v12972_v44, %v12813_v30  ;;  %v13067_v57 = vmul.f32 %v22109_v19, %v13044_v2 }
 0x86d   :  { %13412 = vst.msk [vmem:[%s22376_s23 + $0x8] sm:$0xff] %vm13410_vm2, %v13395_v49  ;;  %v13394_v9 = vmax.f32 %v13378_v26, 0.0  ;;  %v13381_v15 = vadd.f32 %v22111_v22, %v13358_v46  ;;  %v13357_v38 = vmul.f32 %v22094_v7, %v13279_v10  ;;  %v17176_v13 = vpop.f32.mrf.mxu1  ;;  %v22166_v30 = vadd.f32 %v22823_v37, %v12592_v1 }
 0x86e   :  { %v17208_v51 = vpop.f32.mrf.mxu0  ;;  %13120 = vst.msk [vmem:[%s22375_s22 + $0x8] sm:$0xff] %vm145_vm0, %v13104_v52  ;;  %v13103_v14 = vmax.f32 %v13087_v47, 0.0  ;;  %v13066_v55 = vmul.f32 %v22109_v19, %v13043_v58  ;;  %v13046_v50 = vadd.f32 %v17176_v13, %v12816_v41  ;;  %v13090_v33 = vadd.f32 %v22125_v62, %v13067_v57 }
 0x86f   :  { %13411 = vst.msk [vmem:[%s22376_s23] sm:$0xff] %vm13410_vm2, %v13394_v9  ;;  %v13360_v42 = vmul.f32 %v17208_v51, %v22094_v7  ;;  %v13397_v20 = vmax.f32 %v13381_v15, 0.0  ;;  %v13380_v56 = vadd.f32 %v22111_v22, %v13357_v38  ;;  %v12982_v36 = vpop.f32.mrf.mxu1  ;;  %v12593_v44 = vadd.f32 %v22071_v54, %v22100_v34 }
 0x870   :  { %v13289_v3 = vpop.f32.mrf.mxu0  ;;  %13119 = vst.msk [vmem:[%s22375_s22] sm:$0xff] %vm145_vm0, %v13103_v14  ;;  %v13089_v63 = vadd.f32 %v22125_v62, %v13066_v55  ;;  %v13069_v41 = vmul.f32 %v22109_v19, %v13046_v50  ;;  %v13045_v24 = vadd.f32 %v12982_v36, %v12815_v40  ;;  %v13106_v0 = vmax.f32 %v13090_v33, 0.0 }
 0x871   :  { %v13383_v16 = vadd.f32 %v22111_v22, %v13360_v42  ;;  %13414 = vst.msk [vmem:[%s22376_s23 + $0x18] sm:$0xff] %vm13410_vm2, %v13397_v20  ;;  %v13396_v11 = vmax.f32 %v13380_v56, 0.0  ;;  %v13359_v45 = vmul.f32 %v22094_v7, %v13289_v3  ;;  %v17179_v31 = vpop.f32.mrf.mxu1  ;;  %v12824_v54 = vadd.f32 %v22061_v43, %v12594_v6 }
 0x872   :  { %v17211_v53 = vpop.f32.mrf.mxu0  ;;  %v13105_v27 = vmax.f32 %v13089_v63, 0.0  ;;  %v13092_v49 = vadd.f32 %v22125_v62, %v13069_v41  ;;  %v13068_v40 = vmul.f32 %v22109_v19, %v13045_v24  ;;  %13122 = vst.msk [vmem:[%s22375_s22 + $0x18] sm:$0xff] %vm145_vm0, %v13106_v0  ;;  %v13048_v35 = vadd.f32 %v17179_v31, %v12818_v25 }
 0x873   :  { %v13399_v17 = vmax.f32 %v13383_v16, 0.0  ;;  %13413 = vst.msk [vmem:[%s22376_s23 + $0x10] sm:$0xff] %vm13410_vm2, %v13396_v11  ;;  %v13382_v26 = vadd.f32 %v22111_v22, %v13359_v45  ;;  %v13362_v32 = vmul.f32 %v17211_v53, %v22094_v7  ;;  %v12992_v1 = vpop.f32.mrf.mxu1  ;;  %v12823_v42 = vadd.f32 %v22073_v61, %v12593_v44 }
 0x874   :  { %v13299_v2 = vpop.f32.mrf.mxu0  ;;  %13121 = vst.msk [vmem:[%s22375_s22 + $0x10] sm:$0xff] %vm145_vm0, %v13105_v27  ;;  %v13108_v28 = vmax.f32 %v13092_v49, 0.0  ;;  %v13091_v60 = vadd.f32 %v22125_v62, %v13068_v40  ;;  %v13047_v46 = vadd.f32 %v12992_v1, %v22133_v48  ;;  %v13071_v52 = vmul.f32 %v22109_v19, %v13048_v35 }
 0x875   :  { %13416 = vst.msk [vmem:[%s22376_s23 + $0x28] sm:$0xff] %vm13410_vm2, %v13399_v17  ;;  %v13361_v25 = vmul.f32 %v22094_v7, %v13299_v2  ;;  %v13398_v10 = vmax.f32 %v13382_v26, 0.0  ;;  %v13385_v47 = vadd.f32 %v22111_v22, %v13362_v32  ;;  %v17182_v9 = vpop.f32.mrf.mxu1  ;;  %v12596_v41 = vadd.f32 %v22082_v59, %v22103_v12 }
 0x876   :  { %v17214_v58 = vpop.f32.mrf.mxu0  ;;  %13124 = vst.msk [vmem:[%s22375_s22 + $0x28] sm:$0xff] %vm145_vm0, %v13108_v28  ;;  %v13107_v23 = vmax.f32 %v13091_v60, 0.0  ;;  %v13070_v48 = vmul.f32 %v22109_v19, %v13047_v46  ;;  %v13050_v15 = vadd.f32 %v17182_v9, %v22136_v8  ;;  %v13094_v34 = vadd.f32 %v22125_v62, %v13071_v52 }
 0x877   :  { %v13384_v57 = vadd.f32 %v22111_v22, %v13361_v25  ;;  %13415 = vst.msk [vmem:[%s22376_s23 + $0x20] sm:$0xff] %vm13410_vm2, %v13398_v10  ;;  %v13401_v38 = vmax.f32 %v13385_v47, 0.0  ;;  %v13364_v13 = vmul.f32 %v17214_v58, %v22094_v7  ;;  %v13002_v51 = vpop.f32.mrf.mxu1  ;;  %v12595_v53 = vadd.f32 %v22090_v4, %v22114_v29 }
 0x878   :  { %v13309_v14 = vpop.f32.mrf.mxu0  ;;  %13123 = vst.msk [vmem:[%s22375_s22 + $0x20] sm:$0xff] %vm145_vm0, %v13107_v23  ;;  %v13093_v8 = vadd.f32 %v22125_v62, %v13070_v48  ;;  %v13073_v55 = vmul.f32 %v22109_v19, %v13050_v15  ;;  %v13049_v50 = vadd.f32 %v13002_v51, %v22142_v21  ;;  %v13110_v37 = vmax.f32 %v13094_v34, 0.0 }
 0x879   :  { %v13400_v43 = vmax.f32 %v13384_v57, 0.0  ;;  %13418 = vst.msk [vmem:[%s22376_s23 + $0x38] sm:$0xff] %vm13410_vm2, %v13401_v38  ;;  %v13387_v33 = vadd.f32 %v22111_v22, %v13364_v13  ;;  %v13363_v20 = vmul.f32 %v22094_v7, %v13309_v14  ;;  %v17185_v56 = vpop.f32.mrf.mxu1  ;;  %v12826_v35 = vadd.f32 %v22084_v18, %v12596_v41 }
 0x87a   :  { %v17217_v36 = vpop.f32.mrf.mxu0  ;;  %v13109_v3 = vmax.f32 %v13093_v8, 0.0  ;;  %v13096_v61 = vadd.f32 %v22125_v62, %v13073_v55  ;;  %v13072_v21 = vmul.f32 %v22109_v19, %v13049_v50  ;;  %v13052_v63 = vadd.f32 %v17185_v56, %v22166_v30  ;;  %13126 = vst.msk [vmem:[%s22375_s22 + $0x38] sm:$0xff] %vm145_vm0, %v13110_v37 }
 0x87b   :  { %13417 = vst.msk [vmem:[%s22376_s23 + $0x30] sm:$0xff] %vm13410_vm2, %v13400_v43  ;;  %v13403_v16 = vmax.f32 %v13387_v33, 0.0  ;;  %v13386_v24 = vadd.f32 %v22111_v22, %v13363_v20  ;;  %v13366_v0 = vmul.f32 %v17217_v36, %v22094_v7  ;;  %v13012_v11 = vpop.f32.mrf.mxu1  ;;  %v12825_v10 = vadd.f32 %v22092_v39, %v12595_v53 }
 0x87c   :  { %v13319_v45 = vpop.f32.mrf.mxu0  ;;  %13125 = vst.msk [vmem:[%s22375_s22 + $0x30] sm:$0xff] %vm145_vm0, %v13109_v3  ;;  %v13112_v30 = vmax.f32 %v13096_v61, 0.0  ;;  %v13095_v59 = vadd.f32 %v22125_v62, %v13072_v21  ;;  %v13075_v12 = vmul.f32 %v22109_v19, %v13052_v63  ;;  %v13051_v31 = vadd.f32 %v13012_v11, %v22178_v5 }
 0x87d   :  { %13420 = vst.msk [vmem:[%s22376_s23 + $0x48] sm:$0xff] %vm13410_vm2, %v13403_v16  ;;  %v13402_v27 = vmax.f32 %v13386_v24, 0.0  ;;  %v13389_v49 = vadd.f32 %v22111_v22, %v13366_v0  ;;  %v13365_v17 = vmul.f32 %v22094_v7, %v13319_v45  ;;  %v17188_v40 = vpop.f32.mrf.mxu1 }
 0x87e   :  { %v17220_v6 = vpop.f32.mrf.mxu0  ;;  %13128 = vst.msk [vmem:[%s22375_s22 + $0x48] sm:$0xff] %vm145_vm0, %v13112_v30  ;;  %v13111_v5 = vmax.f32 %v13095_v59, 0.0  ;;  %v13098_v4 = vadd.f32 %v22125_v62, %v13075_v12  ;;  %v13074_v29 = vmul.f32 %v22109_v19, %v13051_v31  ;;  %v13054_v26 = vadd.f32 %v17188_v40, %v12824_v54 }
 0x87f   :  { %13419 = vst.msk [vmem:[%s22376_s23 + $0x40] sm:$0xff] %vm13410_vm2, %v13402_v27  ;;  %v13405_v32 = vmax.f32 %v13389_v49, 0.0  ;;  %v13388_v1 = vadd.f32 %v22111_v22, %v13365_v17  ;;  %v13368_v2 = vmul.f32 %v17220_v6, %v22094_v7  ;;  %v13022_v28 = vpop.f32.mrf.mxu1 }
 0x880   :  { %v13329_v60 = vpop.f32.mrf.mxu0  ;;  %13127 = vst.msk [vmem:[%s22375_s22 + $0x40] sm:$0xff] %vm145_vm0, %v13111_v5  ;;  %v13114_v46 = vmax.f32 %v13098_v4, 0.0  ;;  %v13097_v18 = vadd.f32 %v22125_v62, %v13074_v29  ;;  %v13077_v25 = vmul.f32 %v22109_v19, %v13054_v26  ;;  %v13053_v44 = vadd.f32 %v13022_v28, %v12823_v42 }
 0x881   :  { %13422 = vst.msk [vmem:[%s22376_s23 + $0x58] sm:$0xff] %vm13410_vm2, %v13405_v32  ;;  %v13404_v52 = vmax.f32 %v13388_v1, 0.0  ;;  %v13391_v47 = vadd.f32 %v22111_v22, %v13368_v2  ;;  %v13367_v9 = vmul.f32 %v22094_v7, %v13329_v60  ;;  %v17191_v58 = vpop.f32.mrf.mxu1 }
 0x882   :  { %v17223_v23 = vpop.f32.mrf.mxu0  ;;  %13130 = vst.msk [vmem:[%s22375_s22 + $0x58] sm:$0xff] %vm145_vm0, %v13114_v46  ;;  %v13113_v48 = vmax.f32 %v13097_v18, 0.0  ;;  %v13100_v39 = vadd.f32 %v22125_v62, %v13077_v25  ;;  %v13076_v57 = vmul.f32 %v22109_v19, %v13053_v44  ;;  %v13056_v15 = vadd.f32 %v17191_v58, %v12826_v35 }
 0x883   :  { %13421 = vst.msk [vmem:[%s22376_s23 + $0x50] sm:$0xff] %vm13410_vm2, %v13404_v52  ;;  %v13407_v54 = vmax.f32 %v13391_v47, 0.0  ;;  %v13390_v34 = vadd.f32 %v22111_v22, %v13367_v9  ;;  %v13370_v38 = vmul.f32 %v17223_v23, %v22094_v7  ;;  %v13032_v13 = vpop.f32.mrf.mxu1 }
 0x884   :  { %v13339_v51 = vpop.f32.mrf.mxu0  ;;  %13129 = vst.msk [vmem:[%s22375_s22 + $0x50] sm:$0xff] %vm145_vm0, %v13113_v48  ;;  %v13116_v14 = vmax.f32 %v13100_v39, 0.0  ;;  %v13099_v8 = vadd.f32 %v22125_v62, %v13076_v57  ;;  %v13079_v43 = vmul.f32 %v22109_v19, %v13056_v15  ;;  %v13055_v55 = vadd.f32 %v13032_v13, %v12825_v10 }
 0x885   :  { %13424 = vst.msk [vmem:[%s22376_s23 + $0x68] sm:$0xff] %vm13410_vm2, %v13407_v54  ;;  %v13406_v50 = vmax.f32 %v13390_v34, 0.0  ;;  %v13393_v42 = vadd.f32 %v22111_v22, %v13370_v38  ;;  %v13369_v37 = vmul.f32 %v22094_v7, %v13339_v51 }
 0x886   :  { %13132 = vst.msk [vmem:[%s22375_s22 + $0x68] sm:$0xff] %vm145_vm0, %v13116_v14  ;;  %v13115_v33 = vmax.f32 %v13099_v8, 0.0  ;;  %v13102_v20 = vadd.f32 %v22125_v62, %v13079_v43  ;;  %v13078_v56 = vmul.f32 %v22109_v19, %v13055_v55 }
 0x887   :  { %13423 = vst.msk [vmem:[%s22376_s23 + $0x60] sm:$0xff] %vm13410_vm2, %v13406_v50  ;;  %v13409_v36 = vmax.f32 %v13393_v42, 0.0  ;;  %v13392_v3 = vadd.f32 %v22111_v22, %v13369_v37 }
 0x888   :  { %13131 = vst.msk [vmem:[%s22375_s22 + $0x60] sm:$0xff] %vm145_vm0, %v13115_v33  ;;  %v13118_v7 = vmax.f32 %v13102_v20, 0.0  ;;  %v13101_v61 = vadd.f32 %v22125_v62, %v13078_v56 }
 0x889   :  { %13426 = vst.msk [vmem:[%s22376_s23 + $0x78] sm:$0xff] %vm13410_vm2, %v13409_v36  ;;  %v13408_v19 = vmax.f32 %v13392_v3, 0.0 }
 0x88a   :  { %13134 = vst.msk [vmem:[%s22375_s22 + $0x78] sm:$0xff] %vm145_vm0, %v13118_v7  ;;  %v13117_v22 = vmax.f32 %v13101_v61, 0.0 }
 0x88b   :  { %13425 = vst.msk [vmem:[%s22376_s23 + $0x70] sm:$0xff] %vm13410_vm2, %v13408_v19 }
 0x88c   :  { %13133 = vst.msk [vmem:[%s22375_s22 + $0x70] sm:$0xff] %vm145_vm0, %v13117_v22 }
 0x88d   :  { %13435 = vsyncpa [#allocation8], 1 }
 0x88e   :  { %13436 = vsyncpa [#allocation10], 1 }
 0x88f   :  { %13437 = vsyncpa [#allocation13], 1 }

</bundles_post_ra>
